<compile_context>
chip_gen: v7x
topology: tpu7x:2x2x1
jax: 0.10.0
libtpu: 0.0.40
codegen_flags: <defaults>
</compile_context>

<pallas_src>
import math

import jax
import jax.numpy as jnp
from jax import lax
from jax.experimental import pallas as pl
from jax.experimental.pallas import tpu as pltpu


# ----------------------------------------------------------------------------
# Fused Pallas kernel
# ----------------------------------------------------------------------------

def _conv3x3_relu(pad_ref, Hc, Wc, Cin, w_ref, b_ref, col_ref):
    """3x3 'SAME' conv + ReLU via in-kernel im2col and one K=9*Cin MXU matmul.

    pad_ref: (Hc+2, Wc+2, Cin) zero-padded activation (VMEM scratch ref)
    w_ref:   (9*Cin, Cout) packed weights, row index = (ky*3+kx)*Cin + ci
    b_ref:   (1, Cout)
    col_ref: (>=Hc*Wc, >=9*Cin) f32 VMEM scratch (im2col slab)
    returns: (Hc*Wc, Cout) f32 value
    """
    HW = Hc * Wc
    xp = pad_ref[...]                                   # load padded act once
    for k in range(9):                                  # static unroll, 9 copies
        ky, kx = k // 3, k % 3
        col_ref[0:HW, k * Cin:(k + 1) * Cin] = (
            xp[ky:ky + Hc, kx:kx + Wc, :].reshape(HW, Cin))
    y = jnp.dot(col_ref[0:HW, 0:9 * Cin], w_ref[...],
                preferred_element_type=jnp.float32)
    return jnp.maximum(y + b_ref[...], 0.0)


def unet_fused_kernel(xcol_ref, w1, b1, w2, b2, w3, b3, w4, b4, wt, bt,
                      o_ref, a_pad, p_pad, col):
    # xcol_ref: (1, H*W, 27)     first-layer im2col (Cin=3), built in wrapper
    # w1: (27, C)   b1: (1, C)
    # w2..w4: (9*C, C)  b2..b4: (1, C)
    # wt: (C, 4*Co)  bt: (1, 4*Co)
    # o_ref: (1, Ho*Wo, 4*Co)    lane-packed ConvTranspose output
    # a_pad: VMEM (H+2, W+2, C); p_pad: VMEM (Ho+2, Wo+2, C); col: VMEM (H*W, 9*C)
    H = a_pad.shape[0] - 2
    W = a_pad.shape[1] - 2
    Ho, Wo = H // 2, W // 2
    C = w1.shape[1]
    HW = H * W

    # Scratch persists across grid steps: zero the padded borders exactly once.
    # Only interiors are (over)written below, so the zero halo stays valid.
    @pl.when(pl.program_id(0) == 0)
    def _init():
        a_pad[...] = jnp.zeros_like(a_pad)
        p_pad[...] = jnp.zeros_like(p_pad)

    # ---- encoder: conv1 + ReLU (K=27 matmul) -------------------------------
    y1 = jnp.dot(xcol_ref[0], w1[...], preferred_element_type=jnp.float32)
    y1 = jnp.maximum(y1 + b1[...], 0.0)                    # (HW, C)
    a_pad[1:H + 1, 1:W + 1, :] = y1.reshape(H, W, C)

    # ---- encoder: conv2 + ReLU + fused 2x2 maxpool --------------------------
    y2 = _conv3x3_relu(a_pad, H, W, C, w2, b2, col)        # (HW, C)
    m = y2.reshape(HW // 2, 2, C)                          # keep C on lanes
    m = jnp.maximum(m[:, 0, :], m[:, 1, :])                # horizontal pairs
    m = m.reshape(Ho, 2, Wo, C)
    m = jnp.maximum(m[:, 0], m[:, 1])                      # vertical pairs -> (Ho,Wo,C)
    p_pad[1:Ho + 1, 1:Wo + 1, :] = m

    # ---- decoder: conv3 + ReLU ----------------------------------------------
    y3 = _conv3x3_relu(p_pad, Ho, Wo, C, w3, b3, col)      # (Ho*Wo, C)
    p_pad[1:Ho + 1, 1:Wo + 1, :] = y3.reshape(Ho, Wo, C)   # border stays zero

    # ---- decoder: conv4 + ReLU ----------------------------------------------
    y4 = _conv3x3_relu(p_pad, Ho, Wo, C, w4, b4, col)      # (Ho*Wo, C)

    # ---- decoder: ConvTranspose2d(k=2, s=2) as one (C, 4*Co) matmul ---------
    yd = jnp.dot(y4, wt[...], preferred_element_type=jnp.float32) + bt[...]
    o_ref[0] = yd.astype(o_ref.dtype)                      # (Ho*Wo, 4*Co)


# ----------------------------------------------------------------------------
# Wrapper: weight packing, first-layer im2col, final interleave (plain-JAX glue)
# ----------------------------------------------------------------------------

def _pack_conv_w(w_pt):
    # PyTorch Conv2d weight (Cout, Cin, 3, 3) -> (9*Cin, Cout); row = k*Cin + ci
    Cout, Cin = w_pt.shape[0], w_pt.shape[1]
    return jnp.transpose(w_pt, (2, 3, 1, 0)).reshape(9 * Cin, Cout)


def _pack_deconv_w(w_pt):
    # PyTorch ConvTranspose2d weight (Cin, Cout, 2, 2) -> (Cin, 4*Cout)
    # column index = (dy*2 + dx)*Cout + co
    Cin, Cout = w_pt.shape[0], w_pt.shape[1]
    return jnp.transpose(w_pt, (0, 2, 3, 1)).reshape(Cin, 4 * Cout)


@jax.jit
def unet_forward(x_nchw, p):
    N, Cin0, H, W = x_nchw.shape
    C = p["enc_w1"].shape[0]                     # 64
    Co = p["dec_tw"].shape[1]                    # 3
    Ho, Wo = H // 2, W // 2

    # NCHW -> NHWC, pad, build first-layer im2col (Cin=3 -> lane width 27)
    x = jnp.transpose(x_nchw, (0, 2, 3, 1))
    xp = jnp.pad(x, ((0, 0), (1, 1), (1, 1), (0, 0)))
    cols = [xp[:, ky:ky + H, kx:kx + W, :] for ky in range(3) for kx in range(3)]
    xcol = jnp.concatenate(cols, axis=-1).reshape(N, H * W, 9 * Cin0)

    w1 = _pack_conv_w(p["enc_w1"]); b1 = p["enc_b1"].reshape(1, C)
    w2 = _pack_conv_w(p["enc_w2"]); b2 = p["enc_b2"].reshape(1, C)
    w3 = _pack_conv_w(p["dec_w1"]); b3 = p["dec_b1"].reshape(1, C)
    w4 = _pack_conv_w(p["dec_w2"]); b4 = p["dec_b2"].reshape(1, C)
    wt = _pack_deconv_w(p["dec_tw"])
    bt = jnp.tile(p["dec_tb"], 4).reshape(1, 4 * Co)

    out = pl.pallas_call(
        unet_fused_kernel,
        out_shape=jax.ShapeDtypeStruct((N, Ho * Wo, 4 * Co), x.dtype),
        grid=(N,),
        in_specs=[
            pl.BlockSpec((1, H * W, 9 * Cin0), lambda n: (n, 0, 0)),
            pl.BlockSpec((9 * Cin0, C), lambda n: (0, 0)),
            pl.BlockSpec((1, C), lambda n: (0, 0)),
            pl.BlockSpec((9 * C, C), lambda n: (0, 0)),
            pl.BlockSpec((1, C), lambda n: (0, 0)),
            pl.BlockSpec((9 * C, C), lambda n: (0, 0)),
            pl.BlockSpec((1, C), lambda n: (0, 0)),
            pl.BlockSpec((9 * C, C), lambda n: (0, 0)),
            pl.BlockSpec((1, C), lambda n: (0, 0)),
            pl.BlockSpec((C, 4 * Co), lambda n: (0, 0)),
            pl.BlockSpec((1, 4 * Co), lambda n: (0, 0)),
        ],
        out_specs=pl.BlockSpec((1, Ho * Wo, 4 * Co), lambda n: (n, 0, 0)),
        scratch_shapes=[
            pltpu.VMEM((H + 2, W + 2, C), jnp.float32),      # padded conv1 out
            pltpu.VMEM((Ho + 2, Wo + 2, C), jnp.float32),    # padded pooled / conv3 out
            pltpu.VMEM((H * W, 9 * C), jnp.float32),         # im2col slab
        ],
        compiler_params=pltpu.CompilerParams(
            dimension_semantics=("parallel",)),              # megacore on v7x
    )(xcol, w1, b1, w2, b2, w3, b3, w4, b4, wt, bt)

    # interleave (dy, dx) back onto the spatial grid, then NHWC -> NCHW
    out = out.reshape(N, Ho, Wo, 2, 2, Co).transpose(0, 1, 3, 2, 4, 5)
    out = out.reshape(N, 2 * Ho, 2 * Wo, Co)
    return jnp.transpose(out, (0, 3, 1, 2))


# ----------------------------------------------------------------------------
# Deterministic parameter init (PyTorch-shaped, uniform(-1/sqrt(fan_in), ...))
# ----------------------------------------------------------------------------

def init_params(key):
    def u(k, shape, fan_in):
        bound = 1.0 / math.sqrt(fan_in)
        return jax.random.uniform(k, shape, jnp.float32, -bound, bound)

    ks = jax.random.split(key, 12)
    return {
        # encoder: Conv2d(3,64,3,p=1), Conv2d(64,64,3,p=1)
        "enc_w1": u(ks[0], (64, 3, 3, 3), 3 * 9),
        "enc_b1": u(ks[1], (64,), 3 * 9),
        "enc_w2": u(ks[2], (64, 64, 3, 3), 64 * 9),
        "enc_b2": u(ks[3], (64,), 64 * 9),
        # decoder: Conv2d(64,64,3,p=1), Conv2d(64,64,3,p=1), ConvTranspose2d(64,3,2,s=2)
        "dec_w1": u(ks[4], (64, 64, 3, 3), 64 * 9),
        "dec_b1": u(ks[5], (64,), 64 * 9),
        "dec_w2": u(ks[6], (64, 64, 3, 3), 64 * 9),
        "dec_b2": u(ks[7], (64,), 64 * 9),
        "dec_tw": u(ks[8], (64, 3, 2, 2), 64 * 4),
        "dec_tb": u(ks[9], (3,), 64 * 4),
    }


# ----------------------------------------------------------------------------
# Pure-JAX reference (independent construction) for a correctness check
# ----------------------------------------------------------------------------

def ref_forward(x_nchw, p):
    def conv_relu(x, w_pt, b):
        w_hwio = jnp.transpose(w_pt, (2, 3, 1, 0))
        y = lax.conv_general_dilated(x, w_hwio, (1, 1), "SAME",
                                     dimension_numbers=("NHWC", "HWIO", "NHWC"))
        return jnp.maximum(y + b, 0.0)

    def maxpool(x):
        return lax.reduce_window(x, -jnp.inf, lax.max,
                                 (1, 2, 2, 1), (1, 2, 2, 1), "VALID")

    def deconv(x, w_pt, b):
        N, Hi, Wi, Cin = x.shape
        Cout = w_pt.shape[1]
        out = jnp.zeros((N, 2 * Hi, 2 * Wi, Cout), x.dtype)
        for dy in range(2):
            for dx in range(2):
                y = jnp.einsum("nhwc,co->nhwo", x, w_pt[:, :, dy, dx]) + b
                out = out.at[:, dy::2, dx::2, :].set(y)
        return out

    x = jnp.transpose(x_nchw, (0, 2, 3, 1))
    x = conv_relu(x, p["enc_w1"], p["enc_b1"])
    x = conv_relu(x, p["enc_w2"], p["enc_b2"])
    x = maxpool(x)
    x = conv_relu(x, p["dec_w1"], p["dec_b1"])
    x = conv_relu(x, p["dec_w2"], p["dec_b2"])
    x = deconv(x, p["dec_tw"], p["dec_tb"])
    return jnp.transpose(x, (0, 3, 1, 2))


# ----------------------------------------------------------------------------

if __name__ == "__main__":
    key = jax.random.PRNGKey(0)
    k_x, k_p = jax.random.split(key)
    x = jax.random.normal(k_x, (2, 3, 16, 16), jnp.float32)   # NCHW, like PyTorch
    params = init_params(k_p)

    out = jax.block_until_ready(unet_forward(x, params))
    assert out.shape == (2, 3, 16, 16), out.shape

    ref = jax.block_until_ready(ref_forward(x, params))
    assert jnp.allclose(out, ref, atol=1e-3, rtol=1e-3), float(jnp.max(jnp.abs(out - ref)))

    print("KERNEL_OK")
</pallas_src>

<mosaic_0001>
module attributes {stable_mosaic.version = 11 : i64} {
  func.func @unet_fused_kernel(%arg0: i32, %arg1: memref<1x256x27xf32, #tpu.memory_space<vmem>>, %arg2: memref<27x64xf32, #tpu.memory_space<vmem>>, %arg3: memref<1x64xf32, #tpu.memory_space<vmem>>, %arg4: memref<576x64xf32, #tpu.memory_space<vmem>>, %arg5: memref<1x64xf32, #tpu.memory_space<vmem>>, %arg6: memref<576x64xf32, #tpu.memory_space<vmem>>, %arg7: memref<1x64xf32, #tpu.memory_space<vmem>>, %arg8: memref<576x64xf32, #tpu.memory_space<vmem>>, %arg9: memref<1x64xf32, #tpu.memory_space<vmem>>, %arg10: memref<64x12xf32, #tpu.memory_space<vmem>>, %arg11: memref<1x12xf32, #tpu.memory_space<vmem>>, %arg12: memref<1x64x12xf32, #tpu.memory_space<vmem>>, %arg13: memref<18x18x64xf32, #tpu.memory_space<vmem>>, %arg14: memref<10x10x64xf32, #tpu.memory_space<vmem>>, %arg15: memref<256x576xf32, #tpu.memory_space<vmem>>) attributes {dimension_semantics = [#tpu.dimension_semantics<parallel>], iteration_bounds = array<i64: 2>, scalar_prefetch = 0 : i64, scratch_operands = 3 : i64, tpu.core_type = #tpu.core_type<tc>, window_params = [{transform_indices = @transform_0, window_bounds = array<i64: 1, 256, 27>}, {pipeline_mode = #tpu.pipeline_mode<synchronous>, transform_indices = @transform_1, window_bounds = array<i64: 27, 64>}, {pipeline_mode = #tpu.pipeline_mode<synchronous>, transform_indices = @transform_2, window_bounds = array<i64: 1, 64>}, {pipeline_mode = #tpu.pipeline_mode<synchronous>, transform_indices = @transform_3, window_bounds = array<i64: 576, 64>}, {pipeline_mode = #tpu.pipeline_mode<synchronous>, transform_indices = @transform_4, window_bounds = array<i64: 1, 64>}, {pipeline_mode = #tpu.pipeline_mode<synchronous>, transform_indices = @transform_5, window_bounds = array<i64: 576, 64>}, {pipeline_mode = #tpu.pipeline_mode<synchronous>, transform_indices = @transform_6, window_bounds = array<i64: 1, 64>}, {pipeline_mode = #tpu.pipeline_mode<synchronous>, transform_indices = @transform_7, window_bounds = array<i64: 576, 64>}, {pipeline_mode = #tpu.pipeline_mode<synchronous>, transform_indices = @transform_8, window_bounds = array<i64: 1, 64>}, {pipeline_mode = #tpu.pipeline_mode<synchronous>, transform_indices = @transform_9, window_bounds = array<i64: 64, 12>}, {pipeline_mode = #tpu.pipeline_mode<synchronous>, transform_indices = @transform_10, window_bounds = array<i64: 1, 12>}, {transform_indices = @transform_11, window_bounds = array<i64: 1, 64, 12>}]} {
    %c0_i32 = arith.constant 0 : i32
    %0 = arith.cmpi eq, %arg0, %c0_i32 : i32
    %1 = arith.extui %0 : i1 to i32
    %c0_i32_0 = arith.constant 0 : i32
    %2 = arith.cmpi ne, %1, %c0_i32_0 : i32
    scf.if %2 {
      %cst_103 = arith.constant 0.000000e+00 : f32
      %145 = vector.broadcast %cst_103 : f32 to vector<18x18x64xf32>
      %c0_104 = arith.constant 0 : index
      %c0_105 = arith.constant 0 : index
      %c0_106 = arith.constant 0 : index
      %146 = vector.load %arg13[%c0_104, %c0_105, %c0_106] : memref<18x18x64xf32, #tpu.memory_space<vmem>>, vector<18x18x64xf32>
      tpu.vector_store %arg13[%c0_104, %c0_105, %c0_106], %145 {strides = array<i32>} : memref<18x18x64xf32, #tpu.memory_space<vmem>>, vector<18x18x64xf32>,
      %cst_107 = arith.constant 0.000000e+00 : f32
      %147 = vector.broadcast %cst_107 : f32 to vector<10x10x64xf32>
      %c0_108 = arith.constant 0 : index
      %c0_109 = arith.constant 0 : index
      %c0_110 = arith.constant 0 : index
      %148 = vector.load %arg14[%c0_108, %c0_109, %c0_110] : memref<10x10x64xf32, #tpu.memory_space<vmem>>, vector<10x10x64xf32>
      tpu.vector_store %arg14[%c0_108, %c0_109, %c0_110], %147 {strides = array<i32>} : memref<10x10x64xf32, #tpu.memory_space<vmem>>, vector<10x10x64xf32>,
    } else {
    }
    %c0 = arith.constant 0 : index
    %c0_1 = arith.constant 0 : index
    %c0_2 = arith.constant 0 : index
    %3 = vector.load %arg1[%c0, %c0_1, %c0_2] : memref<1x256x27xf32, #tpu.memory_space<vmem>>, vector<1x256x27xf32>
    %4 = vector.shape_cast %3 : vector<1x256x27xf32> to vector<256x27xf32>
    %c0_3 = arith.constant 0 : index
    %c0_4 = arith.constant 0 : index
    %5 = vector.load %arg2[%c0_3, %c0_4] : memref<27x64xf32, #tpu.memory_space<vmem>>, vector<27x64xf32>
    %cst = arith.constant dense<0.000000e+00> : vector<256x64xf32>
    %6 = tpu.matmul %4, %5, %cst {dimension_numbers = #tpu.dot_dimension_numbers<[1], [0], [0], [1], [0, 0, 1, 1], [], []>} : vector<256x27xf32>, vector<27x64xf32>, vector<256x64xf32> -> vector<256x64xf32>
    %c0_5 = arith.constant 0 : index
    %c0_6 = arith.constant 0 : index
    %7 = vector.load %arg3[%c0_5, %c0_6] : memref<1x64xf32, #tpu.memory_space<vmem>>, vector<1x64xf32>
    %8 = vector.broadcast %7 : vector<1x64xf32> to vector<256x64xf32>
    %9 = arith.addf %6, %8 : vector<256x64xf32>
    %cst_7 = arith.constant 0.000000e+00 : f32
    %10 = vector.broadcast %cst_7 : f32 to vector<256x64xf32>
    %11 = arith.maximumf %9, %10 : vector<256x64xf32>
    %12 = vector.shape_cast %11 : vector<256x64xf32> to vector<16x16x64xf32>
    %c1 = arith.constant 1 : index
    %c1_8 = arith.constant 1 : index
    %c0_9 = arith.constant 0 : index
    %13 = vector.load %arg13[%c1, %c1_8, %c0_9] : memref<18x18x64xf32, #tpu.memory_space<vmem>>, vector<16x16x64xf32>
    tpu.vector_store %arg13[%c1, %c1_8, %c0_9], %12 {strides = array<i32>} : memref<18x18x64xf32, #tpu.memory_space<vmem>>, vector<16x16x64xf32>,
    %c0_10 = arith.constant 0 : index
    %c0_11 = arith.constant 0 : index
    %c0_12 = arith.constant 0 : index
    %14 = vector.load %arg13[%c0_10, %c0_11, %c0_12] : memref<18x18x64xf32, #tpu.memory_space<vmem>>, vector<18x18x64xf32>
    %15 = vector.extract_strided_slice %14 {offsets = [0, 0, 0], sizes = [16, 16, 64], strides = [1, 1, 1]} : vector<18x18x64xf32> to vector<16x16x64xf32>
    %16 = vector.shape_cast %15 : vector<16x16x64xf32> to vector<256x64xf32>
    %c0_13 = arith.constant 0 : index
    %c0_14 = arith.constant 0 : index
    %17 = vector.load %arg15[%c0_13, %c0_14] : memref<256x576xf32, #tpu.memory_space<vmem>>, vector<256x64xf32>
    tpu.vector_store %arg15[%c0_13, %c0_14], %16 {strides = array<i32>} : memref<256x576xf32, #tpu.memory_space<vmem>>, vector<256x64xf32>,
    %18 = vector.extract_strided_slice %14 {offsets = [0, 1, 0], sizes = [16, 16, 64], strides = [1, 1, 1]} : vector<18x18x64xf32> to vector<16x16x64xf32>
    %19 = vector.shape_cast %18 : vector<16x16x64xf32> to vector<256x64xf32>
    %c0_15 = arith.constant 0 : index
    %c64 = arith.constant 64 : index
    %20 = vector.load %arg15[%c0_15, %c64] : memref<256x576xf32, #tpu.memory_space<vmem>>, vector<256x64xf32>
    tpu.vector_store %arg15[%c0_15, %c64], %19 {strides = array<i32>} : memref<256x576xf32, #tpu.memory_space<vmem>>, vector<256x64xf32>,
    %21 = vector.extract_strided_slice %14 {offsets = [0, 2, 0], sizes = [16, 16, 64], strides = [1, 1, 1]} : vector<18x18x64xf32> to vector<16x16x64xf32>
    %22 = vector.shape_cast %21 : vector<16x16x64xf32> to vector<256x64xf32>
    %c0_16 = arith.constant 0 : index
    %c128 = arith.constant 128 : index
    %23 = vector.load %arg15[%c0_16, %c128] : memref<256x576xf32, #tpu.memory_space<vmem>>, vector<256x64xf32>
    tpu.vector_store %arg15[%c0_16, %c128], %22 {strides = array<i32>} : memref<256x576xf32, #tpu.memory_space<vmem>>, vector<256x64xf32>,
    %24 = vector.extract_strided_slice %14 {offsets = [1, 0, 0], sizes = [16, 16, 64], strides = [1, 1, 1]} : vector<18x18x64xf32> to vector<16x16x64xf32>
    %25 = vector.shape_cast %24 : vector<16x16x64xf32> to vector<256x64xf32>
    %c0_17 = arith.constant 0 : index
    %c192 = arith.constant 192 : index
    %26 = vector.load %arg15[%c0_17, %c192] : memref<256x576xf32, #tpu.memory_space<vmem>>, vector<256x64xf32>
    tpu.vector_store %arg15[%c0_17, %c192], %25 {strides = array<i32>} : memref<256x576xf32, #tpu.memory_space<vmem>>, vector<256x64xf32>,
    %27 = vector.extract_strided_slice %14 {offsets = [1, 1, 0], sizes = [16, 16, 64], strides = [1, 1, 1]} : vector<18x18x64xf32> to vector<16x16x64xf32>
    %28 = vector.shape_cast %27 : vector<16x16x64xf32> to vector<256x64xf32>
    %c0_18 = arith.constant 0 : index
    %c256 = arith.constant 256 : index
    %29 = vector.load %arg15[%c0_18, %c256] : memref<256x576xf32, #tpu.memory_space<vmem>>, vector<256x64xf32>
    tpu.vector_store %arg15[%c0_18, %c256], %28 {strides = array<i32>} : memref<256x576xf32, #tpu.memory_space<vmem>>, vector<256x64xf32>,
    %30 = vector.extract_strided_slice %14 {offsets = [1, 2, 0], sizes = [16, 16, 64], strides = [1, 1, 1]} : vector<18x18x64xf32> to vector<16x16x64xf32>
    %31 = vector.shape_cast %30 : vector<16x16x64xf32> to vector<256x64xf32>
    %c0_19 = arith.constant 0 : index
    %c320 = arith.constant 320 : index
    %32 = vector.load %arg15[%c0_19, %c320] : memref<256x576xf32, #tpu.memory_space<vmem>>, vector<256x64xf32>
    tpu.vector_store %arg15[%c0_19, %c320], %31 {strides = array<i32>} : memref<256x576xf32, #tpu.memory_space<vmem>>, vector<256x64xf32>,
    %33 = vector.extract_strided_slice %14 {offsets = [2, 0, 0], sizes = [16, 16, 64], strides = [1, 1, 1]} : vector<18x18x64xf32> to vector<16x16x64xf32>
    %34 = vector.shape_cast %33 : vector<16x16x64xf32> to vector<256x64xf32>
    %c0_20 = arith.constant 0 : index
    %c384 = arith.constant 384 : index
    %35 = vector.load %arg15[%c0_20, %c384] : memref<256x576xf32, #tpu.memory_space<vmem>>, vector<256x64xf32>
    tpu.vector_store %arg15[%c0_20, %c384], %34 {strides = array<i32>} : memref<256x576xf32, #tpu.memory_space<vmem>>, vector<256x64xf32>,
    %36 = vector.extract_strided_slice %14 {offsets = [2, 1, 0], sizes = [16, 16, 64], strides = [1, 1, 1]} : vector<18x18x64xf32> to vector<16x16x64xf32>
    %37 = vector.shape_cast %36 : vector<16x16x64xf32> to vector<256x64xf32>
    %c0_21 = arith.constant 0 : index
    %c448 = arith.constant 448 : index
    %38 = vector.load %arg15[%c0_21, %c448] : memref<256x576xf32, #tpu.memory_space<vmem>>, vector<256x64xf32>
    tpu.vector_store %arg15[%c0_21, %c448], %37 {strides = array<i32>} : memref<256x576xf32, #tpu.memory_space<vmem>>, vector<256x64xf32>,
    %39 = vector.extract_strided_slice %14 {offsets = [2, 2, 0], sizes = [16, 16, 64], strides = [1, 1, 1]} : vector<18x18x64xf32> to vector<16x16x64xf32>
    %40 = vector.shape_cast %39 : vector<16x16x64xf32> to vector<256x64xf32>
    %c0_22 = arith.constant 0 : index
    %c512 = arith.constant 512 : index
    %41 = vector.load %arg15[%c0_22, %c512] : memref<256x576xf32, #tpu.memory_space<vmem>>, vector<256x64xf32>
    tpu.vector_store %arg15[%c0_22, %c512], %40 {strides = array<i32>} : memref<256x576xf32, #tpu.memory_space<vmem>>, vector<256x64xf32>,
    %c0_23 = arith.constant 0 : index
    %c0_24 = arith.constant 0 : index
    %42 = vector.load %arg15[%c0_23, %c0_24] : memref<256x576xf32, #tpu.memory_space<vmem>>, vector<256x576xf32>
    %c0_25 = arith.constant 0 : index
    %c0_26 = arith.constant 0 : index
    %43 = vector.load %arg4[%c0_25, %c0_26] : memref<576x64xf32, #tpu.memory_space<vmem>>, vector<576x64xf32>
    %cst_27 = arith.constant dense<0.000000e+00> : vector<256x64xf32>
    %44 = tpu.matmul %42, %43, %cst_27 {dimension_numbers = #tpu.dot_dimension_numbers<[1], [0], [0], [1], [0, 0, 1, 1], [], []>} : vector<256x576xf32>, vector<576x64xf32>, vector<256x64xf32> -> vector<256x64xf32>
    %c0_28 = arith.constant 0 : index
    %c0_29 = arith.constant 0 : index
    %45 = vector.load %arg5[%c0_28, %c0_29] : memref<1x64xf32, #tpu.memory_space<vmem>>, vector<1x64xf32>
    %46 = vector.broadcast %45 : vector<1x64xf32> to vector<256x64xf32>
    %47 = arith.addf %44, %46 : vector<256x64xf32>
    %cst_30 = arith.constant 0.000000e+00 : f32
    %48 = vector.broadcast %cst_30 : f32 to vector<256x64xf32>
    %49 = arith.maximumf %47, %48 : vector<256x64xf32>
    %50 = vector.shape_cast %49 : vector<256x64xf32> to vector<128x2x64xf32>
    %51 = vector.extract_strided_slice %50 {offsets = [0, 0, 0], sizes = [128, 1, 64], strides = [1, 1, 1]} : vector<128x2x64xf32> to vector<128x1x64xf32>
    %52 = vector.shape_cast %51 : vector<128x1x64xf32> to vector<128x64xf32>
    %53 = vector.extract_strided_slice %50 {offsets = [0, 1, 0], sizes = [128, 1, 64], strides = [1, 1, 1]} : vector<128x2x64xf32> to vector<128x1x64xf32>
    %54 = vector.shape_cast %53 : vector<128x1x64xf32> to vector<128x64xf32>
    %55 = arith.maximumf %52, %54 : vector<128x64xf32>
    %56 = vector.shape_cast %55 : vector<128x64xf32> to vector<8x2x8x64xf32>
    %57 = vector.extract_strided_slice %56 {offsets = [0, 0, 0, 0], sizes = [8, 1, 8, 64], strides = [1, 1, 1, 1]} : vector<8x2x8x64xf32> to vector<8x1x8x64xf32>
    %58 = vector.shape_cast %57 : vector<8x1x8x64xf32> to vector<8x8x64xf32>
    %59 = vector.extract_strided_slice %56 {offsets = [0, 1, 0, 0], sizes = [8, 1, 8, 64], strides = [1, 1, 1, 1]} : vector<8x2x8x64xf32> to vector<8x1x8x64xf32>
    %60 = vector.shape_cast %59 : vector<8x1x8x64xf32> to vector<8x8x64xf32>
    %61 = arith.maximumf %58, %60 : vector<8x8x64xf32>
    %c1_31 = arith.constant 1 : index
    %c1_32 = arith.constant 1 : index
    %c0_33 = arith.constant 0 : index
    %62 = vector.load %arg14[%c1_31, %c1_32, %c0_33] : memref<10x10x64xf32, #tpu.memory_space<vmem>>, vector<8x8x64xf32>
    tpu.vector_store %arg14[%c1_31, %c1_32, %c0_33], %61 {strides = array<i32>} : memref<10x10x64xf32, #tpu.memory_space<vmem>>, vector<8x8x64xf32>,
    %c0_34 = arith.constant 0 : index
    %c0_35 = arith.constant 0 : index
    %c0_36 = arith.constant 0 : index
    %63 = vector.load %arg14[%c0_34, %c0_35, %c0_36] : memref<10x10x64xf32, #tpu.memory_space<vmem>>, vector<10x10x64xf32>
    %64 = vector.extract_strided_slice %63 {offsets = [0, 0, 0], sizes = [8, 8, 64], strides = [1, 1, 1]} : vector<10x10x64xf32> to vector<8x8x64xf32>
    %65 = vector.shape_cast %64 : vector<8x8x64xf32> to vector<64x64xf32>
    %c0_37 = arith.constant 0 : index
    %c0_38 = arith.constant 0 : index
    %66 = vector.load %arg15[%c0_37, %c0_38] : memref<256x576xf32, #tpu.memory_space<vmem>>, vector<64x64xf32>
    tpu.vector_store %arg15[%c0_37, %c0_38], %65 {strides = array<i32>} : memref<256x576xf32, #tpu.memory_space<vmem>>, vector<64x64xf32>,
    %67 = vector.extract_strided_slice %63 {offsets = [0, 1, 0], sizes = [8, 8, 64], strides = [1, 1, 1]} : vector<10x10x64xf32> to vector<8x8x64xf32>
    %68 = vector.shape_cast %67 : vector<8x8x64xf32> to vector<64x64xf32>
    %c0_39 = arith.constant 0 : index
    %c64_40 = arith.constant 64 : index
    %69 = vector.load %arg15[%c0_39, %c64_40] : memref<256x576xf32, #tpu.memory_space<vmem>>, vector<64x64xf32>
    tpu.vector_store %arg15[%c0_39, %c64_40], %68 {strides = array<i32>} : memref<256x576xf32, #tpu.memory_space<vmem>>, vector<64x64xf32>,
    %70 = vector.extract_strided_slice %63 {offsets = [0, 2, 0], sizes = [8, 8, 64], strides = [1, 1, 1]} : vector<10x10x64xf32> to vector<8x8x64xf32>
    %71 = vector.shape_cast %70 : vector<8x8x64xf32> to vector<64x64xf32>
    %c0_41 = arith.constant 0 : index
    %c128_42 = arith.constant 128 : index
    %72 = vector.load %arg15[%c0_41, %c128_42] : memref<256x576xf32, #tpu.memory_space<vmem>>, vector<64x64xf32>
    tpu.vector_store %arg15[%c0_41, %c128_42], %71 {strides = array<i32>} : memref<256x576xf32, #tpu.memory_space<vmem>>, vector<64x64xf32>,
    %73 = vector.extract_strided_slice %63 {offsets = [1, 0, 0], sizes = [8, 8, 64], strides = [1, 1, 1]} : vector<10x10x64xf32> to vector<8x8x64xf32>
    %74 = vector.shape_cast %73 : vector<8x8x64xf32> to vector<64x64xf32>
    %c0_43 = arith.constant 0 : index
    %c192_44 = arith.constant 192 : index
    %75 = vector.load %arg15[%c0_43, %c192_44] : memref<256x576xf32, #tpu.memory_space<vmem>>, vector<64x64xf32>
    tpu.vector_store %arg15[%c0_43, %c192_44], %74 {strides = array<i32>} : memref<256x576xf32, #tpu.memory_space<vmem>>, vector<64x64xf32>,
    %76 = vector.extract_strided_slice %63 {offsets = [1, 1, 0], sizes = [8, 8, 64], strides = [1, 1, 1]} : vector<10x10x64xf32> to vector<8x8x64xf32>
    %77 = vector.shape_cast %76 : vector<8x8x64xf32> to vector<64x64xf32>
    %c0_45 = arith.constant 0 : index
    %c256_46 = arith.constant 256 : index
    %78 = vector.load %arg15[%c0_45, %c256_46] : memref<256x576xf32, #tpu.memory_space<vmem>>, vector<64x64xf32>
    tpu.vector_store %arg15[%c0_45, %c256_46], %77 {strides = array<i32>} : memref<256x576xf32, #tpu.memory_space<vmem>>, vector<64x64xf32>,
    %79 = vector.extract_strided_slice %63 {offsets = [1, 2, 0], sizes = [8, 8, 64], strides = [1, 1, 1]} : vector<10x10x64xf32> to vector<8x8x64xf32>
    %80 = vector.shape_cast %79 : vector<8x8x64xf32> to vector<64x64xf32>
    %c0_47 = arith.constant 0 : index
    %c320_48 = arith.constant 320 : index
    %81 = vector.load %arg15[%c0_47, %c320_48] : memref<256x576xf32, #tpu.memory_space<vmem>>, vector<64x64xf32>
    tpu.vector_store %arg15[%c0_47, %c320_48], %80 {strides = array<i32>} : memref<256x576xf32, #tpu.memory_space<vmem>>, vector<64x64xf32>,
    %82 = vector.extract_strided_slice %63 {offsets = [2, 0, 0], sizes = [8, 8, 64], strides = [1, 1, 1]} : vector<10x10x64xf32> to vector<8x8x64xf32>
    %83 = vector.shape_cast %82 : vector<8x8x64xf32> to vector<64x64xf32>
    %c0_49 = arith.constant 0 : index
    %c384_50 = arith.constant 384 : index
    %84 = vector.load %arg15[%c0_49, %c384_50] : memref<256x576xf32, #tpu.memory_space<vmem>>, vector<64x64xf32>
    tpu.vector_store %arg15[%c0_49, %c384_50], %83 {strides = array<i32>} : memref<256x576xf32, #tpu.memory_space<vmem>>, vector<64x64xf32>,
    %85 = vector.extract_strided_slice %63 {offsets = [2, 1, 0], sizes = [8, 8, 64], strides = [1, 1, 1]} : vector<10x10x64xf32> to vector<8x8x64xf32>
    %86 = vector.shape_cast %85 : vector<8x8x64xf32> to vector<64x64xf32>
    %c0_51 = arith.constant 0 : index
    %c448_52 = arith.constant 448 : index
    %87 = vector.load %arg15[%c0_51, %c448_52] : memref<256x576xf32, #tpu.memory_space<vmem>>, vector<64x64xf32>
    tpu.vector_store %arg15[%c0_51, %c448_52], %86 {strides = array<i32>} : memref<256x576xf32, #tpu.memory_space<vmem>>, vector<64x64xf32>,
    %88 = vector.extract_strided_slice %63 {offsets = [2, 2, 0], sizes = [8, 8, 64], strides = [1, 1, 1]} : vector<10x10x64xf32> to vector<8x8x64xf32>
    %89 = vector.shape_cast %88 : vector<8x8x64xf32> to vector<64x64xf32>
    %c0_53 = arith.constant 0 : index
    %c512_54 = arith.constant 512 : index
    %90 = vector.load %arg15[%c0_53, %c512_54] : memref<256x576xf32, #tpu.memory_space<vmem>>, vector<64x64xf32>
    tpu.vector_store %arg15[%c0_53, %c512_54], %89 {strides = array<i32>} : memref<256x576xf32, #tpu.memory_space<vmem>>, vector<64x64xf32>,
    %c0_55 = arith.constant 0 : index
    %c0_56 = arith.constant 0 : index
    %91 = vector.load %arg15[%c0_55, %c0_56] : memref<256x576xf32, #tpu.memory_space<vmem>>, vector<64x576xf32>
    %c0_57 = arith.constant 0 : index
    %c0_58 = arith.constant 0 : index
    %92 = vector.load %arg6[%c0_57, %c0_58] : memref<576x64xf32, #tpu.memory_space<vmem>>, vector<576x64xf32>
    %cst_59 = arith.constant dense<0.000000e+00> : vector<64x64xf32>
    %93 = tpu.matmul %91, %92, %cst_59 {dimension_numbers = #tpu.dot_dimension_numbers<[1], [0], [0], [1], [0, 0, 1, 1], [], []>} : vector<64x576xf32>, vector<576x64xf32>, vector<64x64xf32> -> vector<64x64xf32>
    %c0_60 = arith.constant 0 : index
    %c0_61 = arith.constant 0 : index
    %94 = vector.load %arg7[%c0_60, %c0_61] : memref<1x64xf32, #tpu.memory_space<vmem>>, vector<1x64xf32>
    %95 = vector.broadcast %94 : vector<1x64xf32> to vector<64x64xf32>
    %96 = arith.addf %93, %95 : vector<64x64xf32>
    %cst_62 = arith.constant 0.000000e+00 : f32
    %97 = vector.broadcast %cst_62 : f32 to vector<64x64xf32>
    %98 = arith.maximumf %96, %97 : vector<64x64xf32>
    %99 = vector.shape_cast %98 : vector<64x64xf32> to vector<8x8x64xf32>
    %c1_63 = arith.constant 1 : index
    %c1_64 = arith.constant 1 : index
    %c0_65 = arith.constant 0 : index
    %100 = vector.load %arg14[%c1_63, %c1_64, %c0_65] : memref<10x10x64xf32, #tpu.memory_space<vmem>>, vector<8x8x64xf32>
    tpu.vector_store %arg14[%c1_63, %c1_64, %c0_65], %99 {strides = array<i32>} : memref<10x10x64xf32, #tpu.memory_space<vmem>>, vector<8x8x64xf32>,
    %c0_66 = arith.constant 0 : index
    %c0_67 = arith.constant 0 : index
    %c0_68 = arith.constant 0 : index
    %101 = vector.load %arg14[%c0_66, %c0_67, %c0_68] : memref<10x10x64xf32, #tpu.memory_space<vmem>>, vector<10x10x64xf32>
    %102 = vector.extract_strided_slice %101 {offsets = [0, 0, 0], sizes = [8, 8, 64], strides = [1, 1, 1]} : vector<10x10x64xf32> to vector<8x8x64xf32>
    %103 = vector.shape_cast %102 : vector<8x8x64xf32> to vector<64x64xf32>
    %c0_69 = arith.constant 0 : index
    %c0_70 = arith.constant 0 : index
    %104 = vector.load %arg15[%c0_69, %c0_70] : memref<256x576xf32, #tpu.memory_space<vmem>>, vector<64x64xf32>
    tpu.vector_store %arg15[%c0_69, %c0_70], %103 {strides = array<i32>} : memref<256x576xf32, #tpu.memory_space<vmem>>, vector<64x64xf32>,
    %105 = vector.extract_strided_slice %101 {offsets = [0, 1, 0], sizes = [8, 8, 64], strides = [1, 1, 1]} : vector<10x10x64xf32> to vector<8x8x64xf32>
    %106 = vector.shape_cast %105 : vector<8x8x64xf32> to vector<64x64xf32>
    %c0_71 = arith.constant 0 : index
    %c64_72 = arith.constant 64 : index
    %107 = vector.load %arg15[%c0_71, %c64_72] : memref<256x576xf32, #tpu.memory_space<vmem>>, vector<64x64xf32>
    tpu.vector_store %arg15[%c0_71, %c64_72], %106 {strides = array<i32>} : memref<256x576xf32, #tpu.memory_space<vmem>>, vector<64x64xf32>,
    %108 = vector.extract_strided_slice %101 {offsets = [0, 2, 0], sizes = [8, 8, 64], strides = [1, 1, 1]} : vector<10x10x64xf32> to vector<8x8x64xf32>
    %109 = vector.shape_cast %108 : vector<8x8x64xf32> to vector<64x64xf32>
    %c0_73 = arith.constant 0 : index
    %c128_74 = arith.constant 128 : index
    %110 = vector.load %arg15[%c0_73, %c128_74] : memref<256x576xf32, #tpu.memory_space<vmem>>, vector<64x64xf32>
    tpu.vector_store %arg15[%c0_73, %c128_74], %109 {strides = array<i32>} : memref<256x576xf32, #tpu.memory_space<vmem>>, vector<64x64xf32>,
    %111 = vector.extract_strided_slice %101 {offsets = [1, 0, 0], sizes = [8, 8, 64], strides = [1, 1, 1]} : vector<10x10x64xf32> to vector<8x8x64xf32>
    %112 = vector.shape_cast %111 : vector<8x8x64xf32> to vector<64x64xf32>
    %c0_75 = arith.constant 0 : index
    %c192_76 = arith.constant 192 : index
    %113 = vector.load %arg15[%c0_75, %c192_76] : memref<256x576xf32, #tpu.memory_space<vmem>>, vector<64x64xf32>
    tpu.vector_store %arg15[%c0_75, %c192_76], %112 {strides = array<i32>} : memref<256x576xf32, #tpu.memory_space<vmem>>, vector<64x64xf32>,
    %114 = vector.extract_strided_slice %101 {offsets = [1, 1, 0], sizes = [8, 8, 64], strides = [1, 1, 1]} : vector<10x10x64xf32> to vector<8x8x64xf32>
    %115 = vector.shape_cast %114 : vector<8x8x64xf32> to vector<64x64xf32>
    %c0_77 = arith.constant 0 : index
    %c256_78 = arith.constant 256 : index
    %116 = vector.load %arg15[%c0_77, %c256_78] : memref<256x576xf32, #tpu.memory_space<vmem>>, vector<64x64xf32>
    tpu.vector_store %arg15[%c0_77, %c256_78], %115 {strides = array<i32>} : memref<256x576xf32, #tpu.memory_space<vmem>>, vector<64x64xf32>,
    %117 = vector.extract_strided_slice %101 {offsets = [1, 2, 0], sizes = [8, 8, 64], strides = [1, 1, 1]} : vector<10x10x64xf32> to vector<8x8x64xf32>
    %118 = vector.shape_cast %117 : vector<8x8x64xf32> to vector<64x64xf32>
    %c0_79 = arith.constant 0 : index
    %c320_80 = arith.constant 320 : index
    %119 = vector.load %arg15[%c0_79, %c320_80] : memref<256x576xf32, #tpu.memory_space<vmem>>, vector<64x64xf32>
    tpu.vector_store %arg15[%c0_79, %c320_80], %118 {strides = array<i32>} : memref<256x576xf32, #tpu.memory_space<vmem>>, vector<64x64xf32>,
    %120 = vector.extract_strided_slice %101 {offsets = [2, 0, 0], sizes = [8, 8, 64], strides = [1, 1, 1]} : vector<10x10x64xf32> to vector<8x8x64xf32>
    %121 = vector.shape_cast %120 : vector<8x8x64xf32> to vector<64x64xf32>
    %c0_81 = arith.constant 0 : index
    %c384_82 = arith.constant 384 : index
    %122 = vector.load %arg15[%c0_81, %c384_82] : memref<256x576xf32, #tpu.memory_space<vmem>>, vector<64x64xf32>
    tpu.vector_store %arg15[%c0_81, %c384_82], %121 {strides = array<i32>} : memref<256x576xf32, #tpu.memory_space<vmem>>, vector<64x64xf32>,
    %123 = vector.extract_strided_slice %101 {offsets = [2, 1, 0], sizes = [8, 8, 64], strides = [1, 1, 1]} : vector<10x10x64xf32> to vector<8x8x64xf32>
    %124 = vector.shape_cast %123 : vector<8x8x64xf32> to vector<64x64xf32>
    %c0_83 = arith.constant 0 : index
    %c448_84 = arith.constant 448 : index
    %125 = vector.load %arg15[%c0_83, %c448_84] : memref<256x576xf32, #tpu.memory_space<vmem>>, vector<64x64xf32>
    tpu.vector_store %arg15[%c0_83, %c448_84], %124 {strides = array<i32>} : memref<256x576xf32, #tpu.memory_space<vmem>>, vector<64x64xf32>,
    %126 = vector.extract_strided_slice %101 {offsets = [2, 2, 0], sizes = [8, 8, 64], strides = [1, 1, 1]} : vector<10x10x64xf32> to vector<8x8x64xf32>
    %127 = vector.shape_cast %126 : vector<8x8x64xf32> to vector<64x64xf32>
    %c0_85 = arith.constant 0 : index
    %c512_86 = arith.constant 512 : index
    %128 = vector.load %arg15[%c0_85, %c512_86] : memref<256x576xf32, #tpu.memory_space<vmem>>, vector<64x64xf32>
    tpu.vector_store %arg15[%c0_85, %c512_86], %127 {strides = array<i32>} : memref<256x576xf32, #tpu.memory_space<vmem>>, vector<64x64xf32>,
    %c0_87 = arith.constant 0 : index
    %c0_88 = arith.constant 0 : index
    %129 = vector.load %arg15[%c0_87, %c0_88] : memref<256x576xf32, #tpu.memory_space<vmem>>, vector<64x576xf32>
    %c0_89 = arith.constant 0 : index
    %c0_90 = arith.constant 0 : index
    %130 = vector.load %arg8[%c0_89, %c0_90] : memref<576x64xf32, #tpu.memory_space<vmem>>, vector<576x64xf32>
    %cst_91 = arith.constant dense<0.000000e+00> : vector<64x64xf32>
    %131 = tpu.matmul %129, %130, %cst_91 {dimension_numbers = #tpu.dot_dimension_numbers<[1], [0], [0], [1], [0, 0, 1, 1], [], []>} : vector<64x576xf32>, vector<576x64xf32>, vector<64x64xf32> -> vector<64x64xf32>
    %c0_92 = arith.constant 0 : index
    %c0_93 = arith.constant 0 : index
    %132 = vector.load %arg9[%c0_92, %c0_93] : memref<1x64xf32, #tpu.memory_space<vmem>>, vector<1x64xf32>
    %133 = vector.broadcast %132 : vector<1x64xf32> to vector<64x64xf32>
    %134 = arith.addf %131, %133 : vector<64x64xf32>
    %cst_94 = arith.constant 0.000000e+00 : f32
    %135 = vector.broadcast %cst_94 : f32 to vector<64x64xf32>
    %136 = arith.maximumf %134, %135 : vector<64x64xf32>
    %c0_95 = arith.constant 0 : index
    %c0_96 = arith.constant 0 : index
    %137 = vector.load %arg10[%c0_95, %c0_96] : memref<64x12xf32, #tpu.memory_space<vmem>>, vector<64x12xf32>
    %cst_97 = arith.constant dense<0.000000e+00> : vector<64x12xf32>
    %138 = tpu.matmul %136, %137, %cst_97 {dimension_numbers = #tpu.dot_dimension_numbers<[1], [0], [0], [1], [0, 0, 1, 1], [], []>} : vector<64x64xf32>, vector<64x12xf32>, vector<64x12xf32> -> vector<64x12xf32>
    %c0_98 = arith.constant 0 : index
    %c0_99 = arith.constant 0 : index
    %139 = vector.load %arg11[%c0_98, %c0_99] : memref<1x12xf32, #tpu.memory_space<vmem>>, vector<1x12xf32>
    %140 = vector.broadcast %139 : vector<1x12xf32> to vector<64x12xf32>
    %141 = arith.addf %138, %140 : vector<64x12xf32>
    %c0_100 = arith.constant 0 : index
    %c0_101 = arith.constant 0 : index
    %c0_102 = arith.constant 0 : index
    %142 = vector.load %arg12[%c0_100, %c0_101, %c0_102] : memref<1x64x12xf32, #tpu.memory_space<vmem>>, vector<1x64x12xf32>
    %143 = vector.shape_cast %142 : vector<1x64x12xf32> to vector<64x12xf32>
    %144 = vector.shape_cast %141 : vector<64x12xf32> to vector<1x64x12xf32>
    tpu.vector_store %arg12[%c0_100, %c0_101, %c0_102], %144 {strides = array<i32>} : memref<1x64x12xf32, #tpu.memory_space<vmem>>, vector<1x64x12xf32>,
    return
  }
  func.func @transform_0(%arg0: i32) -> (i32, i32, i32) {
    %c0_i32 = arith.constant 0 : i32
    %c0_i32_0 = arith.constant 0 : i32
    %c0_i32_1 = arith.constant 0 : i32
    return %arg0, %c0_i32, %c0_i32_0 : i32, i32, i32
  }
  func.func @transform_1(%arg0: i32) -> (i32, i32) {
    %c0_i32 = arith.constant 0 : i32
    %c0_i32_0 = arith.constant 0 : i32
    %c0_i32_1 = arith.constant 0 : i32
    return %c0_i32, %c0_i32_0 : i32, i32
  }
  func.func @transform_2(%arg0: i32) -> (i32, i32) {
    %c0_i32 = arith.constant 0 : i32
    %c0_i32_0 = arith.constant 0 : i32
    %c0_i32_1 = arith.constant 0 : i32
    return %c0_i32, %c0_i32_0 : i32, i32
  }
  func.func @transform_3(%arg0: i32) -> (i32, i32) {
    %c0_i32 = arith.constant 0 : i32
    %c0_i32_0 = arith.constant 0 : i32
    %c0_i32_1 = arith.constant 0 : i32
    return %c0_i32, %c0_i32_0 : i32, i32
  }
  func.func @transform_4(%arg0: i32) -> (i32, i32) {
    %c0_i32 = arith.constant 0 : i32
    %c0_i32_0 = arith.constant 0 : i32
    %c0_i32_1 = arith.constant 0 : i32
    return %c0_i32, %c0_i32_0 : i32, i32
  }
  func.func @transform_5(%arg0: i32) -> (i32, i32) {
    %c0_i32 = arith.constant 0 : i32
    %c0_i32_0 = arith.constant 0 : i32
    %c0_i32_1 = arith.constant 0 : i32
    return %c0_i32, %c0_i32_0 : i32, i32
  }
  func.func @transform_6(%arg0: i32) -> (i32, i32) {
    %c0_i32 = arith.constant 0 : i32
    %c0_i32_0 = arith.constant 0 : i32
    %c0_i32_1 = arith.constant 0 : i32
    return %c0_i32, %c0_i32_0 : i32, i32
  }
  func.func @transform_7(%arg0: i32) -> (i32, i32) {
    %c0_i32 = arith.constant 0 : i32
    %c0_i32_0 = arith.constant 0 : i32
    %c0_i32_1 = arith.constant 0 : i32
    return %c0_i32, %c0_i32_0 : i32, i32
  }
  func.func @transform_8(%arg0: i32) -> (i32, i32) {
    %c0_i32 = arith.constant 0 : i32
    %c0_i32_0 = arith.constant 0 : i32
    %c0_i32_1 = arith.constant 0 : i32
    return %c0_i32, %c0_i32_0 : i32, i32
  }
  func.func @transform_9(%arg0: i32) -> (i32, i32) {
    %c0_i32 = arith.constant 0 : i32
    %c0_i32_0 = arith.constant 0 : i32
    %c0_i32_1 = arith.constant 0 : i32
    return %c0_i32, %c0_i32_0 : i32, i32
  }
  func.func @transform_10(%arg0: i32) -> (i32, i32) {
    %c0_i32 = arith.constant 0 : i32
    %c0_i32_0 = arith.constant 0 : i32
    %c0_i32_1 = arith.constant 0 : i32
    return %c0_i32, %c0_i32_0 : i32, i32
  }
  func.func @transform_11(%arg0: i32) -> (i32, i32, i32) {
    %c0_i32 = arith.constant 0 : i32
    %c0_i32_0 = arith.constant 0 : i32
    %c0_i32_1 = arith.constant 0 : i32
    return %arg0, %c0_i32, %c0_i32_0 : i32, i32, i32
  }
}

</mosaic_0001>

<bundles_post_ra>
// kernel: tile.8
= control target key start
LH: loop header
LB: loop body
LE: loop exit
PB: predicated region body
PF: predicated region fallthrough
CT: control target
= control target key end

     0   :  { %s22_s0 = inlined_call_operand.vmem [shape: f32[3], index: 0, kind: input, shape index: {}]   ;;  %s23_s1 = inlined_call_operand.vmem [shape: f32[4,3], index: 1, kind: output, shape index: {}]  }
   0x1   :  { %v4_v0 = vld [vmem:[%s22_s0] ss:$0 sm:$0xff] }
   0x2   :  { %5 = vst [vmem:[%s23_s1] sm:$0xf] %v4_v0 }

// kernel: tile.9
= control target key start
LH: loop header
LB: loop body
LE: loop exit
PB: predicated region body
PF: predicated region fallthrough
CT: control target
= control target key end

     0   :  { %vm7_vm0 = vcmask 23552   ;;  %s37_s8 = smov 3   ;;  %s38_s9 = smov 6   ;;  %vm13_vm1 = vcmask 97352   ;;  %vm19_vm2 = vcmask 72752   ;;  %vm25_vm3 = vcmask 48152   ;;  %s55_s0 = inlined_call_operand.vmem [shape: f32[4,3], index: 0, kind: input, shape index: {}]   ;;  %s56_s1 = inlined_call_operand.vmem [shape: f32[1,12], index: 1, kind: output, shape index: {}]  }
   0x1   :  { %v4_v0 = vld [vmem:[%s55_s0] sm:$0xf]  ;;  %s36_s0 = smov 9  }
   0x2   :  { %5 = vst [vmem:[#allocation1] sm:$0xf] %v4_v0 }
   0x9   :  { %v10_v1 = vld [vmem:[#allocation1 + $0x3] sm:$0x1]   ;;  %v22_v2 = vld [vmem:[#allocation1 + $0x1] sm:$0x1]   ;;  %v6_v3 = vld [vmem:[#allocation1] sm:$0x1]  }
   0xa   :  { %11 = vrot.lane.b32.xlu0 %v10_v1, %s36_s0  ;;  %23 = vrot.lane.b32.xlu1 %v22_v2, %s37_s8  ;;  %v16_v4 = vld [vmem:[#allocation1 + $0x2] sm:$0x1]   ;;  %8 = vst.msk [vmem:[#allocation0] sm:$0x1] %vm7_vm0, %v6_v3  }
   0xe   :  { %17 = vrot.lane.b32.xlu0 %v16_v4, %s38_s9 }
  0x7c   :  { %v12_v5 = vpop.permute.xlu0 %11   ;;  %v24_v6 = vpop.permute.xlu1 %23  }
  0x7d   :  { %14 = vst.msk [vmem:[#allocation0] sm:$0x1] %vm13_vm1, %v12_v5  }
  0x80   :  { %v18_v7 = vpop.permute.xlu0 %17  }
  0x81   :  { %20 = vst.msk [vmem:[#allocation0] sm:$0x1] %vm19_vm2, %v18_v7  }
  0x82   :  { %26 = vst.msk [vmem:[#allocation0] sm:$0x1] %vm25_vm3, %v24_v6  }
  0x89   :  { %v30_v8 = vld [vmem:[#allocation0] sm:$0x1] }
  0x8a   :  { %32 = vst [vmem:[%s56_s1] sm:$0x1] %v30_v8 }

// kernel: unet_forward.1
= control target key start
LH: loop header
LB: loop body
LE: loop exit
PB: predicated region body
PF: predicated region fallthrough
CT: control target
= control target key end

     0   :  { %s7535_s17 = smov 0   ;;  %s10497_s0 = inlined_call_operand.vmem [shape: f32[2,256,27], index: 0, kind: input, shape index: {}]   ;;  %s10498_s1 = inlined_call_operand.vmem [shape: f32[27,64], index: 1, kind: input, shape index: {}]   ;;  %s10499_s2 = inlined_call_operand.vmem [shape: f32[1,64], index: 2, kind: input, shape index: {}]   ;;  %s10500_s3 = inlined_call_operand.vmem [shape: f32[576,64], index: 3, kind: input, shape index: {}]   ;;  %s10501_s4 = inlined_call_operand.vmem [shape: f32[1,64], index: 4, kind: input, shape index: {}]   ;;  %s10502_s5 = inlined_call_operand.vmem [shape: f32[576,64], index: 5, kind: input, shape index: {}]   ;;  %s10503_s6 = inlined_call_operand.vmem [shape: f32[1,64], index: 6, kind: input, shape index: {}]   ;;  %s10504_s7 = inlined_call_operand.vmem [shape: f32[576,64], index: 7, kind: input, shape index: {}]   ;;  %s10505_s8 = inlined_call_operand.vmem [shape: f32[1,64], index: 8, kind: input, shape index: {}]   ;;  %s10506_s9 = inlined_call_operand.vmem [shape: f32[64,12], index: 9, kind: input, shape index: {}]   ;;  %s10507_s10 = inlined_call_operand.vmem [shape: f32[1,12], index: 10, kind: input, shape index: {}]   ;;  %s10508_s11 = inlined_call_operand.vmem [shape: f32[2,64,12], index: 11, kind: output, shape index: {}]  }
   0x1 LB: > { %s6255_s18 = sadd.s32 4294967295, %s7468_s17   ;;  %p6259_p0 = scmp.ge.s32.totalorder %s7468_s17, 1  ;;  %s7468_s17 = sphi %s7535_s17, %s21_s17  }
   0x2   : > { %p337_p1 = scmp.lt.s32.totalorder %s7468_s17, 3 }
   0x4   : > { %p338_p2 = pnand %p6259_p0, %p337_p1 }
   0x6   : > { %341 = sbr.rel (%p338_p2) target bundleno = 1979 (0x7bb), region = 64 }
   0xd   : > { %p377_p3 = scmp.lt.s32.totalorder %s6255_s18, 1  ;;  %p6264_p4 = scmp.ne.s32.totalorder %s6255_s18, 0 }
   0xe   : > { %vm391_vm0 = vcmask (!%p6264_p4), 523264   ;;  %vm394_vm1 = vcmask (!%p6264_p4), 517120   ;;  %v7470_v0 = vmov (!%p6264_p4), 0.0  }
   0xf   : > { %s378_s19 = scalar_select %p377_p3, %s6255_s18, 1 }
  0x10   : > { %390 = sbr.rel (%p6264_p4) target bundleno = 53 (0x35), region = 68  ;;  %392 = vst.msk [vmem:[#allocation2] sm:$0xff] (!%p6264_p4), %vm391_vm0, %v7470_v0  ;;  %393 = vst.msk [vmem:[#allocation2 + $0x8] sm:$0xff] (!%p6264_p4), %vm391_vm0, %v7470_v0 }
  0x11   : > { %s6489_s20 = sshll.u32 %s378_s19, 8  ;;  %s6490_s21 = sshll.u32 %s378_s19, 6  ;;  %396 = vst.msk [vmem:[#allocation2 + $0x18] sm:$0xff] (!%p6264_p4), %vm391_vm0, %v7470_v0  ;;  %397 = vst.msk [vmem:[#allocation2 + $0x20] sm:$0xff] (!%p6264_p4), %vm391_vm0, %v7470_v0 }
  0x12   : > { %s7546_s24 = scalar_lea.vmem %s10497_s0, %s6489_s20  ;;  %s7551_s27 = scalar_lea.vmem %s10508_s11, %s6490_s21  ;;  %399 = vst.msk [vmem:[#allocation2 + $0x30] sm:$0xff] (!%p6264_p4), %vm391_vm0, %v7470_v0  ;;  %400 = vst.msk [vmem:[#allocation2 + $0x38] sm:$0xff] (!%p6264_p4), %vm391_vm0, %v7470_v0 }
  0x13   : > { %402 = vst.msk [vmem:[#allocation2 + $0x48] sm:$0xff] (!%p6264_p4), %vm391_vm0, %v7470_v0  ;;  %403 = vst.msk [vmem:[#allocation2 + $0x50] sm:$0xff] (!%p6264_p4), %vm391_vm0, %v7470_v0 }
  0x14   : > { %405 = vst.msk [vmem:[#allocation2 + $0x60] sm:$0xff] (!%p6264_p4), %vm391_vm0, %v7470_v0  ;;  %406 = vst.msk [vmem:[#allocation2 + $0x68] sm:$0xff] (!%p6264_p4), %vm391_vm0, %v7470_v0 }
  0x15   : > { %408 = vst.msk [vmem:[#allocation2 + $0x78] sm:$0xff] (!%p6264_p4), %vm391_vm0, %v7470_v0  ;;  %409 = vst.msk [vmem:[#allocation2 + $0x80] sm:$0xff] (!%p6264_p4), %vm391_vm0, %v7470_v0 }
  0x16   : > { %411 = vst.msk [vmem:[#allocation2 + $0x90] sm:$0xff] (!%p6264_p4), %vm391_vm0, %v7470_v0  ;;  %412 = vst.msk [vmem:[#allocation2 + $0x98] sm:$0xff] (!%p6264_p4), %vm391_vm0, %v7470_v0 }
  0x17   : > { %414 = vst.msk [vmem:[#allocation2 + $0xa8] sm:$0xff] %vm391_vm0, %v7470_v0  ;;  %415 = vst.msk [vmem:[#allocation2 + $0xb0] sm:$0xff] %vm391_vm0, %v7470_v0 }
  0x18   : > { %417 = vst.msk [vmem:[#allocation2 + $0xc0] sm:$0xff] %vm391_vm0, %v7470_v0  ;;  %418 = vst.msk [vmem:[#allocation2 + $0xc8] sm:$0xff] %vm391_vm0, %v7470_v0 }
  0x19   : > { %420 = vst.msk [vmem:[#allocation2 + $0xd8] sm:$0xff] %vm391_vm0, %v7470_v0  ;;  %421 = vst.msk [vmem:[#allocation2 + $0xe0] sm:$0xff] %vm391_vm0, %v7470_v0 }
  0x1a   : > { %423 = vst.msk [vmem:[#allocation2 + $0xf0] sm:$0xff] %vm391_vm0, %v7470_v0  ;;  %424 = vst.msk [vmem:[#allocation2 + $0xf8] sm:$0xff] %vm391_vm0, %v7470_v0 }
  0x1b   : > { %426 = vst.msk [vmem:[#allocation2 + $0x108] sm:$0xff] %vm391_vm0, %v7470_v0  ;;  %427 = vst.msk [vmem:[#allocation2 + $0x110] sm:$0xff] %vm391_vm0, %v7470_v0 }
  0x1c   : > { %429 = vst.msk [vmem:[#allocation2 + $0x120] sm:$0xff] %vm391_vm0, %v7470_v0  ;;  %430 = vst.msk [vmem:[#allocation2 + $0x128] sm:$0xff] %vm391_vm0, %v7470_v0 }
  0x1d   : > { %432 = vst.msk [vmem:[#allocation2 + $0x138] sm:$0xff] %vm391_vm0, %v7470_v0  ;;  %433 = vst.msk [vmem:[#allocation2 + $0x140] sm:$0xff] %vm391_vm0, %v7470_v0 }
  0x1e   : > { %435 = vst.msk [vmem:[#allocation2 + $0x150] sm:$0xff] %vm391_vm0, %v7470_v0  ;;  %436 = vst.msk [vmem:[#allocation2 + $0x158] sm:$0xff] %vm391_vm0, %v7470_v0 }
  0x1f   : > { %438 = vst.msk [vmem:[#allocation2 + $0x168] sm:$0xff] %vm391_vm0, %v7470_v0  ;;  %439 = vst.msk [vmem:[#allocation2 + $0x170] sm:$0xff] %vm391_vm0, %v7470_v0 }
  0x20   : > { %441 = vst.msk [vmem:[#allocation2 + $0x180] sm:$0xff] %vm391_vm0, %v7470_v0  ;;  %442 = vst.msk [vmem:[#allocation2 + $0x188] sm:$0xff] %vm391_vm0, %v7470_v0 }
  0x21   : > { %444 = vst.msk [vmem:[#allocation2 + $0x198] sm:$0xff] %vm391_vm0, %v7470_v0  ;;  %445 = vst.msk [vmem:[#allocation2 + $0x1a0] sm:$0xff] %vm391_vm0, %v7470_v0 }
  0x22   : > { %447 = vst.msk [vmem:[#allocation3] sm:$0xff] %vm391_vm0, %v7470_v0  ;;  %449 = vst.msk [vmem:[#allocation3 + $0x10] sm:$0xff] %vm391_vm0, %v7470_v0 }
  0x23   : > { %451 = vst.msk [vmem:[#allocation3 + $0x20] sm:$0xff] %vm391_vm0, %v7470_v0  ;;  %453 = vst.msk [vmem:[#allocation3 + $0x30] sm:$0xff] %vm391_vm0, %v7470_v0 }
  0x24   : > { %455 = vst.msk [vmem:[#allocation3 + $0x40] sm:$0xff] %vm391_vm0, %v7470_v0  ;;  %457 = vst.msk [vmem:[#allocation3 + $0x50] sm:$0xff] %vm391_vm0, %v7470_v0 }
  0x25   : > { %459 = vst.msk [vmem:[#allocation3 + $0x60] sm:$0xff] %vm391_vm0, %v7470_v0  ;;  %461 = vst.msk [vmem:[#allocation3 + $0x70] sm:$0xff] %vm391_vm0, %v7470_v0 }
  0x26   : > { %463 = vst.msk [vmem:[#allocation3 + $0x80] sm:$0xff] %vm391_vm0, %v7470_v0  ;;  %465 = vst.msk [vmem:[#allocation3 + $0x90] sm:$0xff] %vm391_vm0, %v7470_v0 }
  0x27   : > { %395 = vst.msk [vmem:[#allocation2 + $0x10] sm:$0x3] %vm394_vm1, %v7470_v0  ;;  %398 = vst.msk [vmem:[#allocation2 + $0x28] sm:$0x3] %vm394_vm1, %v7470_v0 }
  0x28   : > { %401 = vst.msk [vmem:[#allocation2 + $0x40] sm:$0x3] %vm394_vm1, %v7470_v0  ;;  %404 = vst.msk [vmem:[#allocation2 + $0x58] sm:$0x3] %vm394_vm1, %v7470_v0 }
  0x29   : > { %407 = vst.msk [vmem:[#allocation2 + $0x70] sm:$0x3] %vm394_vm1, %v7470_v0  ;;  %410 = vst.msk [vmem:[#allocation2 + $0x88] sm:$0x3] %vm394_vm1, %v7470_v0 }
  0x2a   : > { %413 = vst.msk [vmem:[#allocation2 + $0xa0] sm:$0x3] %vm394_vm1, %v7470_v0  ;;  %416 = vst.msk [vmem:[#allocation2 + $0xb8] sm:$0x3] %vm394_vm1, %v7470_v0 }
  0x2b   : > { %419 = vst.msk [vmem:[#allocation2 + $0xd0] sm:$0x3] %vm394_vm1, %v7470_v0  ;;  %422 = vst.msk [vmem:[#allocation2 + $0xe8] sm:$0x3] %vm394_vm1, %v7470_v0 }
  0x2c   : > { %425 = vst.msk [vmem:[#allocation2 + $0x100] sm:$0x3] %vm394_vm1, %v7470_v0  ;;  %428 = vst.msk [vmem:[#allocation2 + $0x118] sm:$0x3] %vm394_vm1, %v7470_v0 }
  0x2d   : > { %431 = vst.msk [vmem:[#allocation2 + $0x130] sm:$0x3] %vm394_vm1, %v7470_v0  ;;  %434 = vst.msk [vmem:[#allocation2 + $0x148] sm:$0x3] %vm394_vm1, %v7470_v0 }
  0x2e   : > { %437 = vst.msk [vmem:[#allocation2 + $0x160] sm:$0x3] %vm394_vm1, %v7470_v0  ;;  %440 = vst.msk [vmem:[#allocation2 + $0x178] sm:$0x3] %vm394_vm1, %v7470_v0 }
  0x2f   : > { %443 = vst.msk [vmem:[#allocation2 + $0x190] sm:$0x3] %vm394_vm1, %v7470_v0  ;;  %446 = vst.msk [vmem:[#allocation2 + $0x1a8] sm:$0x3] %vm394_vm1, %v7470_v0 }
  0x30   : > { %448 = vst.msk [vmem:[#allocation3 + $0x8] sm:$0x3] %vm394_vm1, %v7470_v0  ;;  %450 = vst.msk [vmem:[#allocation3 + $0x18] sm:$0x3] %vm394_vm1, %v7470_v0 }
  0x31   : > { %452 = vst.msk [vmem:[#allocation3 + $0x28] sm:$0x3] %vm394_vm1, %v7470_v0  ;;  %454 = vst.msk [vmem:[#allocation3 + $0x38] sm:$0x3] %vm394_vm1, %v7470_v0 }
  0x32   : > { %456 = vst.msk [vmem:[#allocation3 + $0x48] sm:$0x3] %vm394_vm1, %v7470_v0  ;;  %458 = vst.msk [vmem:[#allocation3 + $0x58] sm:$0x3] %vm394_vm1, %v7470_v0 }
  0x33   : > { %460 = vst.msk [vmem:[#allocation3 + $0x68] sm:$0x3] %vm394_vm1, %v7470_v0  ;;  %462 = vst.msk [vmem:[#allocation3 + $0x78] sm:$0x3] %vm394_vm1, %v7470_v0 }
  0x34   : > { %464 = vst.msk [vmem:[#allocation3 + $0x88] sm:$0x3] %vm394_vm1, %v7470_v0  ;;  %466 = vst.msk [vmem:[#allocation3 + $0x98] sm:$0x3] %vm394_vm1, %v7470_v0 }
  0x35 PF: > { %v499_v1 = vld [vmem:[%s10498_s1] sm:$0xff]  ;;  %v500_v2 = vld [vmem:[%s10498_s1 + $0x8] sm:$0xff]  ;;  %v501_v3 = vld [vmem:[%s10498_s1 + $0x10] sm:$0xff]  ;;  %vm607_vm2 = vcmask 1042432   ;;  %vm510_vm3 = vcmask 220160   ;;  %vm7471_vm4 = vmmov 1  }
  0x36   : > { %v7043_v4 = vpack.c.bf16 %v500_v2, %v499_v1  ;;  %v502_v5 = vld [vmem:[%s10498_s1 + $0x18] sm:$0x7]  ;;  %v467_v6 = vld [vmem:[%s7546_s24] sm:$0xff]  ;;  %vm7048_vm5 = vmpackc.low %vm607_vm2, %vm7471_vm4  ;;  %vm869_vm6 = vcmask 523264   ;;  %v10509_v55 = vmov 0.0|0.0   ;;  %vm1246_vm7 = vcmask 1045504  }
  0x37   : > { %v7047_v7 = vpack.c.bf16 %v502_v5, %v501_v3  ;;  %6847 = vmatprep.mubr.msk.f32.mxu0 %vm510_vm3, %v467_v6  ;;  %v468_v8 = vld [vmem:[%s7546_s24 + $0x8] sm:$0xff]  ;;  %v469_v9 = vld [vmem:[%s7546_s24 + $0x10] sm:$0xff]  ;;  %v470_v10 = vld [vmem:[%s7546_s24 + $0x18] sm:$0xff]  ;;  %7053 = vmatprep.subr.bf16.mxu1 %v10509_v55  ;;  %vm1036_vm8 = vcmask 1046528   ;;  %s7473_s14 = smov 64   ;;  %vm1213_vm9 = vcmask 1048064  }
  0x38   : > { %7044 = vmatprep.subr.bf16.mxu0 %v7043_v4  ;;  %v471_v11 = vld [vmem:[%s7546_s24 + $0x20] sm:$0xff]  ;;  %v472_v12 = vld [vmem:[%s7546_s24 + $0x28] sm:$0xff]  ;;  %v473_v13 = vld [vmem:[%s7546_s24 + $0x30] sm:$0xff]  ;;  %vm4491_vm10 = vcmask 1041409   ;;  %vm4493_vm11 = vcmask 1042434   ;;  %vm4495_vm12 = vcmask 1043459  }
  0x39   : > { %7046 = vmatpush3.bf16.msra.mxu0 %v7043_v4  ;;  %v474_v14 = vld [vmem:[%s7546_s24 + $0x38] sm:$0xff]  ;;  %v475_v15 = vld [vmem:[%s7546_s24 + $0x40] sm:$0xff]  ;;  %v476_v16 = vld [vmem:[%s7546_s24 + $0x48] sm:$0xff]  ;;  %vm4497_vm13 = vcmask 1044484   ;;  %vm4499_vm14 = vcmask 1045509   ;;  %vm4501_vm15 = vcmask 1046534  }
  0x3a   : > { %7049 = vmatprep.subr.msk.bf16.mxu0 %vm7048_vm5, %v7047_v7  ;;  %v477_v17 = vld [vmem:[%s7546_s24 + $0x50] sm:$0xff]  ;;  %v478_v18 = vld [vmem:[%s7546_s24 + $0x58] sm:$0xff]  ;;  %v479_v19 = vld [vmem:[%s7546_s24 + $0x60] sm:$0xff]  ;;  %vm4503_vm0 = vcmask 1047559   ;;  %vm6191_vm1 = vcmask 97280  }
  0x3b   : > { %v480_v20 = vld [vmem:[%s7546_s24 + $0x68] sm:$0xff]  ;;  %v481_v21 = vld [vmem:[%s7546_s24 + $0x70] sm:$0xff]  ;;  %v482_v22 = vld [vmem:[%s7546_s24 + $0x78] sm:$0xff] }
  0x3c   : > { %v483_v23 = vld [vmem:[%s7546_s24 + $0x80] sm:$0xff]  ;;  %v484_v24 = vld [vmem:[%s7546_s24 + $0x88] sm:$0xff]  ;;  %v485_v25 = vld [vmem:[%s7546_s24 + $0x90] sm:$0xff] }
  0x3d   : > { %7052 = vmatpush3.bf16.msk.msra.mxu0 %vm7048_vm5, %v7047_v7  ;;  %v486_v26 = vld [vmem:[%s7546_s24 + $0x98] sm:$0xff]  ;;  %v487_v27 = vld [vmem:[%s7546_s24 + $0xa0] sm:$0xff]  ;;  %v488_v28 = vld [vmem:[%s7546_s24 + $0xa8] sm:$0xff] }
  0x3e   : > { %v489_v29 = vld [vmem:[%s7546_s24 + $0xb0] sm:$0xff]  ;;  %v490_v30 = vld [vmem:[%s7546_s24 + $0xb8] sm:$0xff]  ;;  %v491_v31 = vld [vmem:[%s7546_s24 + $0xc0] sm:$0xff] }
  0x3f   : > { %v492_v32 = vld [vmem:[%s7546_s24 + $0xc8] sm:$0xff]  ;;  %v493_v33 = vld [vmem:[%s7546_s24 + $0xd0] sm:$0xff]  ;;  %v494_v34 = vld [vmem:[%s7546_s24 + $0xd8] sm:$0xff] }
  0x40   : > { %6848 = vmatmul.mubr.msk.f32.vlgmr.msra.gmra.mrb[0].mxu0 %vm510_vm3, %v468_v8  ;;  %v495_v35 = vld [vmem:[%s7546_s24 + $0xe0] sm:$0xff]  ;;  %v496_v36 = vld [vmem:[%s7546_s24 + $0xe8] sm:$0xff]  ;;  %v497_v37 = vld [vmem:[%s7546_s24 + $0xf0] sm:$0xff] }
  0x41   : > { %6850 = vmatprep.mubr.msk.f32.mxu0 %vm510_vm3, %v469_v9  ;;  %v498_v38 = vld [vmem:[%s7546_s24 + $0xf8] sm:$0xff]  ;;  %v2073_v39 = vld [vmem:[%s10500_s3 + $0x200] sm:$0xff]  ;;  %v2074_v40 = vld [vmem:[%s10500_s3 + $0x208] sm:$0xff] }
  0x42   : > { %v7783_v41 = vld [vmem:[#allocation2 + $0x8] sm:$0xff]  ;;  %v7785_v42 = vpack.c.bf16 %v2074_v40, %v2073_v39  ;;  %v7789_v43 = vld [vmem:[#allocation2] sm:$0xff]  ;;  %v2075_v44 = vld [vmem:[%s10500_s3 + $0x210] sm:$0xff] }
  0x43   : > { %957 = vst.msk [vmem:[#allocation4 + $0x28] sm:$0xff] %vm869_vm6, %v7783_v41  ;;  %956 = vst.msk [vmem:[#allocation4] sm:$0xff] %vm869_vm6, %v7789_v43  ;;  %v2076_v45 = vld [vmem:[%s10500_s3 + $0x218] sm:$0xff]  ;;  %v2077_v47 = vld [vmem:[%s10500_s3 + $0x220] sm:$0xff] }
  0x44   : > { %6851 = vmatmul.mubr.msk.f32.gmra.mrb[2].mxu0 %vm510_vm3, %v470_v10  ;;  %10531 = vst [vmem:[#allocation5_spill] sm:$0xff] %v7785_v42  ;;  %7150 = vmatprep.subr.bf16.mxu0 %v7785_v42  ;;  %v7801_v46 = vpack.c.bf16 %v2076_v45, %v2075_v44  ;;  %v2078_v48 = vld [vmem:[%s10500_s3 + $0x228] sm:$0xff]  ;;  %v2079_v50 = vld [vmem:[%s10500_s3 + $0x230] sm:$0xff]  ;;  %v2080_v51 = vld [vmem:[%s10500_s3 + $0x238] sm:$0xff] }
  0x45   : > { %6853 = vmatprep.mubr.msk.f32.mxu0 %vm510_vm3, %v471_v11  ;;  %7152 = vmatpush3.bf16.msra.mxu0 %v7785_v42  ;;  %v7811_v49 = vpack.c.bf16 %v2078_v48, %v2077_v47  ;;  %v7821_v52 = vpack.c.bf16 %v2080_v51, %v2079_v50  ;;  %v2009_v53 = vld [vmem:[%s10500_s3] sm:$0xff]  ;;  %v2010_v54 = vld [vmem:[%s10500_s3 + $0x8] sm:$0xff]  ;;  %v2011_v57 = vld [vmem:[%s10500_s3 + $0x10] sm:$0xff] }
  0x46   : > { %10532 = vst [vmem:[#allocation6_spill] sm:$0xff] %v7801_v46  ;;  %7154 = vmatprep.subr.bf16.mxu0 %v7801_v46  ;;  %v7054_v56 = vpack.c.bf16 %v2010_v54, %v2009_v53  ;;  %v2012_v58 = vld [vmem:[%s10500_s3 + $0x18] sm:$0xff]  ;;  %v2013_v60 = vld [vmem:[%s10500_s3 + $0x20] sm:$0xff]  ;;  %v2014_v61 = vld [vmem:[%s10500_s3 + $0x28] sm:$0xff] }
  0x47   : > { %10533 = vst [vmem:[#allocation7_spill] sm:$0xff] %v7811_v49  ;;  %10534 = vst [vmem:[#allocation8_spill] sm:$0xff] %v7821_v52  ;;  %v7057_v59 = vpack.c.bf16 %v2012_v58, %v2011_v57  ;;  %v7060_v62 = vpack.c.bf16 %v2014_v61, %v2013_v60  ;;  %v2015_v63 = vld [vmem:[%s10500_s3 + $0x30] sm:$0xff]  ;;  %v2016_v0 = vld [vmem:[%s10500_s3 + $0x38] sm:$0xff] }
  0x48   : > { %6854 = vmatmul.mubr.msk.f32.gmra.mrb[4].mxu0 %vm510_vm3, %v472_v12  ;;  %7055 = vmatpush1.bf16.msra.mxu1 %v7054_v56  ;;  %v7063_v1 = vpack.c.bf16 %v2016_v0, %v2015_v63  ;;  %v2017_v2 = vld [vmem:[%s10500_s3 + $0x40] sm:$0xff]  ;;  %v2018_v3 = vld [vmem:[%s10500_s3 + $0x48] sm:$0xff]  ;;  %v2019_v5 = vld [vmem:[%s10500_s3 + $0x50] sm:$0xff] }
  0x49   : > { %6856 = vmatprep.mubr.msk.f32.mxu0 %vm510_vm3, %v473_v13  ;;  %7156 = vmatpush3.bf16.msra.mxu0 %v7801_v46  ;;  %v7066_v4 = vpack.c.bf16 %v2018_v3, %v2017_v2  ;;  %v2020_v6 = vld [vmem:[%s10500_s3 + $0x58] sm:$0xff]  ;;  %v2021_v8 = vld [vmem:[%s10500_s3 + $0x60] sm:$0xff]  ;;  %v2022_v9 = vld [vmem:[%s10500_s3 + $0x68] sm:$0xff] }
  0x4a   : > { %7158 = vmatprep.subr.bf16.mxu0 %v7811_v49  ;;  %7056 = vmatprep.subr.bf16.mxu1 %v10509_v55  ;;  %v7069_v7 = vpack.c.bf16 %v2020_v6, %v2019_v5  ;;  %v7072_v10 = vpack.c.bf16 %v2022_v9, %v2021_v8  ;;  %v2023_v11 = vld [vmem:[%s10500_s3 + $0x70] sm:$0xff]  ;;  %v2024_v12 = vld [vmem:[%s10500_s3 + $0x78] sm:$0xff]  ;;  %v2037_v48 = vld [vmem:[%s10500_s3 + $0xe0] sm:$0xff]  ;;  %v1038_v5 = vrot.slane %v7783_v41, 1 }
  0x4b   : > { %v7075_v13 = vpack.c.bf16 %v2024_v12, %v2023_v11  ;;  %v2038_v50 = vld [vmem:[%s10500_s3 + $0xe8] sm:$0xff]  ;;  %v2039_v60 = vld [vmem:[%s10500_s3 + $0xf0] sm:$0xff]  ;;  %v2040_v61 = vld [vmem:[%s10500_s3 + $0xf8] sm:$0xff] }
  0x4c   : > { %6857 = vmatmul.mubr.msk.f32.gmra.mrb[6].mxu0 %vm510_vm3, %v474_v14  ;;  %7058 = vmatpush1.bf16.msra.mxu1 %v7057_v59  ;;  %v2025_v14 = vld [vmem:[%s10500_s3 + $0x80] sm:$0xff]  ;;  %v7096_v54 = vpack.c.bf16 %v2038_v50, %v2037_v48  ;;  %v7099_v0 = vpack.c.bf16 %v2040_v61, %v2039_v60 }
  0x4d   : > { %6859 = vmatprep.mubr.msk.f32.mxu0 %vm510_vm3, %v475_v15  ;;  %7160 = vmatpush3.bf16.msra.mxu0 %v7811_v49  ;;  %v2026_v15 = vld [vmem:[%s10500_s3 + $0x88] sm:$0xff] }
  0x4e   : > { %7162 = vmatprep.subr.bf16.mxu0 %v7821_v52  ;;  %7059 = vmatprep.subr.bf16.mxu1 %v10509_v55 }
  0x50   : > { %6860 = vmatmul.mubr.msk.f32.gmra.mrb[8].mxu0 %vm510_vm3, %v476_v16  ;;  %7061 = vmatpush1.bf16.msra.mxu1 %v7060_v62  ;;  %v7078_v16 = vpack.c.bf16 %v2026_v15, %v2025_v14 }
  0x51   : > { %6862 = vmatprep.mubr.msk.f32.mxu0 %vm510_vm3, %v477_v17  ;;  %7164 = vmatpush3.bf16.msra.mxu0 %v7821_v52  ;;  %v2027_v17 = vld [vmem:[%s10500_s3 + $0x90] sm:$0xff] }
  0x52   : > { %7062 = vmatprep.subr.bf16.mxu1 %v10509_v55 }
  0x54   : > { %6863 = vmatmul.mubr.msk.f32.gmra.mrb[10].mxu0 %vm510_vm3, %v478_v18  ;;  %7064 = vmatpush1.bf16.msra.mxu1 %v7063_v1  ;;  %v2028_v18 = vld [vmem:[%s10500_s3 + $0x98] sm:$0xff] }
  0x55   : > { %6865 = vmatprep.mubr.msk.f32.mxu0 %vm510_vm3, %v479_v19  ;;  %7065 = vmatprep.subr.bf16.mxu1 %v10509_v55  ;;  %v7081_v19 = vpack.c.bf16 %v2028_v18, %v2027_v17 }
  0x58   : > { %6866 = vmatmul.mubr.msk.f32.gmra.mrb[12].mxu0 %vm510_vm3, %v480_v20  ;;  %7067 = vmatpush1.bf16.msra.mxu1 %v7066_v4  ;;  %v2029_v20 = vld [vmem:[%s10500_s3 + $0xa0] sm:$0xff] }
  0x59   : > { %6868 = vmatprep.mubr.msk.f32.mxu0 %vm510_vm3, %v481_v21  ;;  %7068 = vmatprep.subr.bf16.mxu1 %v10509_v55  ;;  %v2030_v21 = vld [vmem:[%s10500_s3 + $0xa8] sm:$0xff] }
  0x5c   : > { %6869 = vmatmul.mubr.msk.f32.gmra.mrb[14].mxu0 %vm510_vm3, %v482_v22  ;;  %7070 = vmatpush1.bf16.msra.mxu1 %v7069_v7  ;;  %v7084_v22 = vpack.c.bf16 %v2030_v21, %v2029_v20  ;;  %v1037_v7 = vrot.slane %v7789_v43, 1 }
  0x5d   : > { %6871 = vmatprep.mubr.msk.f32.mxu0 %vm510_vm3, %v483_v23  ;;  %7071 = vmatprep.subr.bf16.mxu1 %v10509_v55  ;;  %v2031_v23 = vld [vmem:[%s10500_s3 + $0xb0] sm:$0xff] }
  0x5e   : > { %v1039_v20 = vsel %vm1036_vm8, %v1037_v7, %v1038_v5 }
  0x60   : > { %6872 = vmatmul.mubr.msk.f32.gmra.mrb[16].mxu0 %vm510_vm3, %v484_v24  ;;  %7073 = vmatpush1.bf16.msra.mxu1 %v7072_v10  ;;  %v2032_v24 = vld [vmem:[%s10500_s3 + $0xb8] sm:$0xff] }
  0x61   : > { %6874 = vmatprep.mubr.msk.f32.mxu0 %vm510_vm3, %v485_v25  ;;  %7074 = vmatprep.subr.bf16.mxu1 %v10509_v55  ;;  %v7087_v25 = vpack.c.bf16 %v2032_v24, %v2031_v23 }
  0x64   : > { %6875 = vmatmul.mubr.msk.f32.gmra.mrb[18].mxu0 %vm510_vm3, %v486_v26  ;;  %7076 = vmatpush1.bf16.msra.mxu1 %v7075_v13  ;;  %v7909_v26 = vld [vmem:[#allocation2 + $0x10] sm:$0x3] }
  0x65   : > { %6877 = vmatprep.mubr.msk.f32.mxu0 %vm510_vm3, %v487_v27  ;;  %7077 = vmatprep.subr.bf16.mxu1 %v10509_v55  ;;  %v2033_v27 = vld [vmem:[%s10500_s3 + $0xc0] sm:$0xff]  ;;  %v1040_v6 = vrot.slane %v7909_v26, 1 }
  0x68   : > { %6878 = vmatmul.mubr.msk.f32.gmra.mrb[20].mxu0 %vm510_vm3, %v488_v28  ;;  %7079 = vmatpush1.bf16.msra.mxu1 %v7078_v16  ;;  %v2034_v28 = vld [vmem:[%s10500_s3 + $0xc8] sm:$0xff] }
  0x69   : > { %6880 = vmatprep.mubr.msk.f32.mxu0 %vm510_vm3, %v489_v29  ;;  %7080 = vmatprep.subr.bf16.mxu1 %v10509_v55  ;;  %v1250_v29 = vrot.slane %v7909_v26, 2 }
  0x6c   : > { %6881 = vmatmul.mubr.msk.f32.gmra.mrb[22].mxu0 %vm510_vm3, %v490_v30  ;;  %7082 = vmatpush1.bf16.msra.mxu1 %v7081_v19  ;;  %v7090_v30 = vpack.c.bf16 %v2034_v28, %v2033_v27  ;;  %v1041_v19 = vsel %vm1036_vm8, %v1038_v5, %v1040_v6 }
  0x6d   : > { %6883 = vmatprep.mubr.msk.f32.mxu0 %vm510_vm3, %v491_v31  ;;  %7083 = vmatprep.subr.bf16.mxu1 %v10509_v55  ;;  %v1248_v31 = vrot.slane %v7783_v41, 2 }
  0x70   : > { %6884 = vmatmul.mubr.msk.f32.gmra.mrb[24].mxu0 %vm510_vm3, %v492_v32  ;;  %7085 = vmatpush1.bf16.msra.mxu1 %v7084_v22  ;;  %v1247_v32 = vrot.slane %v7789_v43, 2 }
  0x71   : > { %6886 = vmatprep.mubr.msk.f32.mxu0 %vm510_vm3, %v493_v33  ;;  %7086 = vmatprep.subr.bf16.mxu1 %v10509_v55  ;;  %v7924_v33 = vld [vmem:[%s10499_s2] ss:$0 sm:$0xff] }
  0x74   : > { %6887 = vmatmul.mubr.msk.f32.gmra.mrb[26].mxu0 %vm510_vm3, %v494_v34  ;;  %7088 = vmatpush1.bf16.msra.mxu1 %v7087_v25  ;;  %v1251_v34 = vsel %vm1246_vm7, %v1248_v31, %v1250_v29 }
  0x75   : > { %6889 = vmatprep.mubr.msk.f32.mxu0 %vm510_vm3, %v495_v35  ;;  %7089 = vmatprep.subr.bf16.mxu1 %v10509_v55  ;;  %v1249_v35 = vsel %vm1246_vm7, %v1247_v32, %v1248_v31  ;;  %1360 = vst.msk [vmem:[#allocation4 + $0x30] sm:$0xff] %vm869_vm6, %v1251_v34 }
  0x76   : > { %1359 = vst.msk [vmem:[#allocation4 + $0x8] sm:$0xff] %vm869_vm6, %v1249_v35 }
  0x78   : > { %6890 = vmatmul.mubr.msk.f32.gmra.mrb[28].mxu0 %vm510_vm3, %v496_v36  ;;  %7091 = vmatpush1.bf16.msra.mxu1 %v7090_v30  ;;  %v2035_v36 = vld [vmem:[%s10500_s3 + $0xd0] sm:$0xff] }
  0x79   : > { %6892 = vmatprep.mubr.msk.f32.mxu0 %vm510_vm3, %v497_v37  ;;  %7092 = vmatprep.subr.bf16.mxu1 %v10509_v55  ;;  %v2036_v37 = vld [vmem:[%s10500_s3 + $0xd8] sm:$0xff] }
  0x7a   : > { %v7093_v39 = vpack.c.bf16 %v2036_v37, %v2035_v36 }
  0x7c   : > { %6893 = vmatmul.mubr.msk.f32.gmra.mrb[30].mxu0 %vm510_vm3, %v498_v38  ;;  %7094 = vmatpush1.bf16.msra.mxu1 %v7093_v39 }
  0x7d   : > { %7095 = vmatprep.subr.bf16.mxu1 %v10509_v55 }
  0x80   : > { %7097 = vmatpush1.bf16.msra.mxu1 %v7096_v54 }
  0x81   : > { %7098 = vmatprep.subr.bf16.mxu1 %v10509_v55 }
  0x84   : > { %7100 = vmatpush1.bf16.msra.mxu1 %v7099_v0 }
  0x85   : > { %7101 = vmatprep.subr.bf16.mxu1 %v10509_v55 }
 0x113   : > { %v6849_v38 = vpop.f32.mrb[0].mxu0 }
 0x114   : > { %v683_v40 = vadd.f32 %v6849_v38, %v7924_v33  ;;  %v677_v44 = vpop.f32.mrb[1].mxu0 }
 0x115   : > { %v678_v45 = vadd.f32 %v7924_v33, %v677_v44 }
 0x116   : > { %v837_v47 = vmax.f32 %v683_v40, 0.0 }
 0x117   : > { %v836_v51 = vmax.f32 %v678_v45, 0.0  ;;  %v6852_v53 = vpop.f32.mrb[2].mxu0 }
 0x118   : > { %871 = vst.msk [vmem:[#allocation2 + $0x21] sm:$0xff] %vm869_vm6, %v837_v47  ;;  %v693_v56 = vadd.f32 %v6852_v53, %v7924_v33  ;;  %v687_v57 = vpop.f32.mrb[3].mxu0 }
 0x119   : > { %870 = vst.msk [vmem:[#allocation2 + $0x19] sm:$0xff] %vm869_vm6, %v836_v51  ;;  %v688_v58 = vadd.f32 %v7924_v33, %v687_v57 }
 0x11a   : > { %v839_v59 = vmax.f32 %v693_v56, 0.0 }
 0x11b   : > { %v838_v62 = vmax.f32 %v688_v58, 0.0  ;;  %v6855_v63 = vpop.f32.mrb[4].mxu0 }
 0x11c   : > { %873 = vst.msk [vmem:[#allocation2 + $0x39] sm:$0xff] %vm869_vm6, %v839_v59  ;;  %v703_v1 = vadd.f32 %v6855_v63, %v7924_v33  ;;  %v697_v2 = vpop.f32.mrb[5].mxu0 }
 0x11d   : > { %872 = vst.msk [vmem:[#allocation2 + $0x31] sm:$0xff] %vm869_vm6, %v838_v62  ;;  %v698_v3 = vadd.f32 %v7924_v33, %v697_v2 }
 0x11e   : > { %v841_v4 = vmax.f32 %v703_v1, 0.0 }
 0x11f   : > { %v840_v8 = vmax.f32 %v698_v3, 0.0  ;;  %v6858_v9 = vpop.f32.mrb[6].mxu0  ;;  %v907_v10 = vld [vmem:[#allocation2 + $0x28] sm:$0x3] }
 0x120   : > { %v906_v11 = vld [vmem:[#allocation2 + $0x20] sm:$0xff]  ;;  %v905_v12 = vld [vmem:[#allocation2 + $0x18] sm:$0xff]  ;;  %875 = vst.msk [vmem:[#allocation2 + $0x51] sm:$0xff] %vm869_vm6, %v841_v4  ;;  %v713_v13 = vadd.f32 %v6858_v9, %v7924_v33  ;;  %v707_v14 = vpop.f32.mrb[7].mxu0  ;;  %v1045_v15 = vrot.slane %v907_v10, 1  ;;  %v1255_v16 = vrot.slane %v907_v10, 2 }
 0x121   : > { %1395 = vrot.lane.b32.xlu1 %v906_v11, %s7473_s14  ;;  %v1253_v41 = vrot.slane %v906_v11, 2  ;;  %959 = vst.msk [vmem:[#allocation4 + $0x78] sm:$0xff] %vm869_vm6, %v906_v11  ;;  %1393 = vrot.lane.b32.xlu0 %v905_v12, %s7473_s14  ;;  %v1252_v43 = vrot.slane %v905_v12, 2  ;;  %958 = vst.msk [vmem:[#allocation4 + $0x50] sm:$0xff] %vm869_vm6, %v905_v12  ;;  %v1042_v17 = vrot.slane %v905_v12, 1  ;;  %v1043_v18 = vrot.slane %v906_v11, 1 }
 0x122   : > { %874 = vst.msk [vmem:[#allocation2 + $0x49] sm:$0xff] %vm869_vm6, %v840_v8  ;;  %v843_v21 = vmax.f32 %v713_v13, 0.0  ;;  %v708_v22 = vadd.f32 %v7924_v33, %v707_v14 }
 0x123   : > { %v1044_v23 = vsel %vm1036_vm8, %v1042_v17, %v1043_v18  ;;  %v910_v24 = vld [vmem:[#allocation2 + $0x40] sm:$0x3]  ;;  %v7977_v25 = vsel %vm1036_vm8, %v1043_v18, %v1045_v15  ;;  %v6861_v26 = vpop.f32.mrb[8].mxu0  ;;  %v7980_v27 = vsel %vm1246_vm7, %v1252_v43, %v1253_v41  ;;  %v7983_v28 = vsel %vm1246_vm7, %v1253_v41, %v1255_v16 }
 0x124   : > { %v908_v29 = vld [vmem:[#allocation2 + $0x30] sm:$0xff]  ;;  %1559 = vst.msk [vmem:[#allocation4 + $0x10] sm:$0xff] %vm869_vm6, %v1044_v23  ;;  %877 = vst.msk [vmem:[#allocation2 + $0x69] sm:$0xff] %vm869_vm6, %v843_v21  ;;  %v842_v30 = vmax.f32 %v708_v22, 0.0  ;;  %v7987_v31 = vld [vmem:[#allocation2 + $0x38] sm:$0xff]  ;;  %v1260_v32 = vrot.slane %v910_v24, 2  ;;  %v723_v34 = vadd.f32 %v6861_v26, %v7924_v33 }
 0x125   : > { %1560 = vst.msk [vmem:[#allocation4 + $0x38] sm:$0xff] %vm869_vm6, %v7977_v25  ;;  %v717_v35 = vpop.f32.mrb[9].mxu0  ;;  %v1050_v36 = vrot.slane %v910_v24, 1  ;;  %1361 = vst.msk [vmem:[#allocation4 + $0x58] sm:$0xff] %vm869_vm6, %v7980_v27  ;;  %1119 = vrot.lane.b32.xlu1 %v1041_v19, %s7473_s14  ;;  %1117 = vrot.lane.b32.xlu0 %v1039_v20, %s7473_s14  ;;  %v1257_v37 = vrot.slane %v908_v29, 2  ;;  %v1258_v38 = vrot.slane %v7987_v31, 2 }
 0x126   : > { %1362 = vst.msk [vmem:[#allocation4 + $0x80] sm:$0xff] %vm869_vm6, %v7983_v28  ;;  %960 = vst.msk [vmem:[#allocation4 + $0xa0] sm:$0xff] %vm869_vm6, %v908_v29  ;;  %v1047_v39 = vrot.slane %v908_v29, 1  ;;  %v1048_v40 = vrot.slane %v7987_v31, 1  ;;  %v845_v44 = vmax.f32 %v723_v34, 0.0  ;;  %v718_v45 = vadd.f32 %v7924_v33, %v717_v35  ;;  %v8080_v16 = vld [vmem:[#allocation3 + $0x90] sm:$0xff] }
 0x127   : > { %1724 = vst.msk [vmem:[#allocation4 + $0x18] sm:$0xff] %vm869_vm6, %v908_v29  ;;  %961 = vst.msk [vmem:[#allocation4 + $0xc8] sm:$0xff] %vm869_vm6, %v7987_v31  ;;  %v8009_v47 = vsel %vm1246_vm7, %v1257_v37, %v1258_v38  ;;  %v8012_v48 = vsel %vm1246_vm7, %v1258_v38, %v1260_v32  ;;  %v913_v51 = vld [vmem:[#allocation2 + $0x58] sm:$0x3]  ;;  %v6864_v54 = vpop.f32.mrb[10].mxu0  ;;  %v4826_v18 = vrot.slane %v8080_v16, 2 }
 0x128   : > { %1725 = vst.msk [vmem:[#allocation4 + $0x40] sm:$0xff] %vm869_vm6, %v7987_v31  ;;  %876 = vst.msk [vmem:[#allocation2 + $0x61] sm:$0xff] %vm869_vm6, %v842_v30  ;;  %v8015_v50 = vsel %vm1036_vm8, %v1047_v39, %v1048_v40  ;;  %v8018_v53 = vsel %vm1036_vm8, %v1048_v40, %v1050_v36  ;;  %v844_v57 = vmax.f32 %v718_v45, 0.0  ;;  %v1265_v59 = vrot.slane %v913_v51, 2  ;;  %v727_v61 = vpop.f32.mrb[11].mxu0 }
 0x129   : > { %1817 = vst.msk [vmem:[#allocation4 + $0x20] sm:$0xff] %vm869_vm6, %v8009_v47  ;;  %1818 = vst.msk [vmem:[#allocation4 + $0x48] sm:$0xff] %vm869_vm6, %v8012_v48  ;;  %v8028_v56 = vld [vmem:[#allocation2 + $0x48] sm:$0xff]  ;;  %v8033_v58 = vld [vmem:[#allocation2 + $0x50] sm:$0xff]  ;;  %v733_v60 = vadd.f32 %v6864_v54, %v7924_v33  ;;  %v1055_v62 = vrot.slane %v913_v51, 1  ;;  %1397 = vrot.lane.b32.xlu0 %v908_v29, %s7473_s14  ;;  %1121 = vrot.lane.b32.xlu1 %v1044_v23, %s7473_s14  ;;  %v728_v4 = vadd.f32 %v7924_v33, %v727_v61 }
 0x12a   : > { %1363 = vst.msk [vmem:[#allocation4 + $0xa8] sm:$0xff] %vm869_vm6, %v8009_v47  ;;  %1364 = vst.msk [vmem:[#allocation4 + $0xd0] sm:$0xff] %vm869_vm6, %v8012_v48  ;;  %v1262_v63 = vrot.slane %v8028_v56, 2  ;;  %v1263_v0 = vrot.slane %v8033_v58, 2  ;;  %v1052_v1 = vrot.slane %v8028_v56, 1  ;;  %v1053_v2 = vrot.slane %v8033_v58, 1 }
 0x12b   : > { %1561 = vst.msk [vmem:[#allocation4 + $0x60] sm:$0xff] %vm869_vm6, %v8015_v50  ;;  %879 = vst.msk [vmem:[#allocation2 + $0x81] sm:$0xff] %vm869_vm6, %v845_v44  ;;  %v847_v3 = vmax.f32 %v733_v60, 0.0  ;;  %v916_v8 = vld [vmem:[#allocation2 + $0x70] sm:$0x3]  ;;  %v6867_v10 = vpop.f32.mrb[12].mxu0 }
 0x12c   : > { %1562 = vst.msk [vmem:[#allocation4 + $0x88] sm:$0xff] %vm869_vm6, %v8018_v53  ;;  %962 = vst.msk [vmem:[#allocation4 + $0xf0] sm:$0xff] %vm869_vm6, %v8028_v56  ;;  %v8055_v5 = vsel %vm1246_vm7, %v1262_v63, %v1263_v0  ;;  %v8058_v6 = vsel %vm1246_vm7, %v1263_v0, %v1265_v59  ;;  %v8061_v7 = vsel %vm1036_vm8, %v1052_v1, %v1053_v2  ;;  %v846_v11 = vmax.f32 %v728_v4, 0.0  ;;  %v737_v14 = vpop.f32.mrb[13].mxu0  ;;  %v8105_v23 = vld [vmem:[#allocation3 + $0x98] sm:$0x3] }
 0x12d   : > { %1726 = vst.msk [vmem:[#allocation4 + $0x68] sm:$0xff] %vm869_vm6, %v8028_v56  ;;  %963 = vst.msk [vmem:[#allocation4 + $0x118] sm:$0xff] %vm869_vm6, %v8033_v58  ;;  %v8064_v9 = vsel %vm1036_vm8, %v1053_v2, %v1055_v62  ;;  %v1270_v12 = vrot.slane %v916_v8, 2  ;;  %v743_v13 = vadd.f32 %v6867_v10, %v7924_v33  ;;  %v1060_v15 = vrot.slane %v916_v8, 1  ;;  %1399 = vrot.lane.b32.xlu0 %v7987_v31, %s7473_s14 }
 0x12e   : > { %1727 = vst.msk [vmem:[#allocation4 + $0x90] sm:$0xff] %vm869_vm6, %v8033_v58  ;;  %878 = vst.msk [vmem:[#allocation2 + $0x79] sm:$0xff] %vm869_vm6, %v844_v57  ;;  %1123 = vrot.lane.b32.xlu1 %v7977_v25, %s7473_s14  ;;  %v738_v17 = vadd.f32 %v7924_v33, %v737_v14  ;;  %v4827_v31 = vrot.slane %v8105_v23, 2 }
 0x12f   : > { %1819 = vst.msk [vmem:[#allocation4 + $0x70] sm:$0xff] %vm869_vm6, %v8055_v5  ;;  %1820 = vst.msk [vmem:[#allocation4 + $0x98] sm:$0xff] %vm869_vm6, %v8058_v6  ;;  %v8086_v41 = vld [vmem:[#allocation2 + $0x60] sm:$0xff]  ;;  %v8088_v43 = vld [vmem:[#allocation2 + $0x68] sm:$0xff]  ;;  %v849_v26 = vmax.f32 %v743_v13, 0.0  ;;  %v6870_v30 = vpop.f32.mrb[14].mxu0 }
 0x130   : > { %1365 = vst.msk [vmem:[#allocation4 + $0xf8] sm:$0xff] %vm869_vm6, %v8055_v5  ;;  %1366 = vst.msk [vmem:[#allocation4 + $0x120] sm:$0xff] %vm869_vm6, %v8058_v6  ;;  %v1267_v19 = vrot.slane %v8086_v41, 2  ;;  %v1268_v20 = vrot.slane %v8088_v43, 2  ;;  %v1057_v21 = vrot.slane %v8086_v41, 1  ;;  %v1058_v22 = vrot.slane %v8088_v43, 1 }
 0x131   : > { %1563 = vst.msk [vmem:[#allocation4 + $0xb0] sm:$0xff] %vm869_vm6, %v8061_v7  ;;  %881 = vst.msk [vmem:[#allocation2 + $0x99] sm:$0xff] %vm869_vm6, %v847_v3  ;;  %v1853_v24 = vld [vmem:[#allocation4 + $0x20] sm:$0xff]  ;;  %v1858_v25 = vld [vmem:[#allocation4 + $0x48] sm:$0xff]  ;;  %v848_v29 = vmax.f32 %v738_v17, 0.0  ;;  %v747_v37 = vpop.f32.mrb[15].mxu0  ;;  %1401 = vrot.lane.b32.xlu0 %v8028_v56, %s7473_s14  ;;  %v753_v44 = vadd.f32 %v6870_v30, %v7924_v33 }
 0x132   : > { %1564 = vst.msk [vmem:[#allocation4 + $0xd8] sm:$0xff] %vm869_vm6, %v8064_v9  ;;  %10535 = vst [vmem:[#allocation9_spill] sm:$0xff] %v8080_v16  ;;  %6911 = vmatprep.mubr.msk.f32.mxu0 %vm869_vm6, %v1853_v24  ;;  %v8110_v32 = vsel %vm1246_vm7, %v1267_v19, %v1268_v20  ;;  %v8113_v34 = vsel %vm1246_vm7, %v1268_v20, %v1270_v12  ;;  %v8116_v35 = vsel %vm1036_vm8, %v1057_v21, %v1058_v22  ;;  %v919_v38 = vld [vmem:[#allocation2 + $0x88] sm:$0x3] }
 0x133   : > { %964 = vst.msk [vmem:[#allocation4 + $0x140] sm:$0xff] %vm869_vm6, %v8086_v41  ;;  %1728 = vst.msk [vmem:[#allocation4 + $0xb8] sm:$0xff] %vm869_vm6, %v8086_v41  ;;  %v8119_v36 = vsel %vm1036_vm8, %v1058_v22, %v1060_v15  ;;  %1125 = vrot.lane.b32.xlu1 %v8015_v50, %s7473_s14  ;;  %v748_v45 = vadd.f32 %v7924_v33, %v747_v37  ;;  %v1275_v50 = vrot.slane %v919_v38, 2  ;;  %v1065_v51 = vrot.slane %v919_v38, 1  ;;  %v6873_v8 = vpop.f32.mrb[16].mxu0 }
 0x134   : > { %880 = vst.msk [vmem:[#allocation2 + $0x91] sm:$0xff] %vm869_vm6, %v846_v11  ;;  %965 = vst.msk [vmem:[#allocation4 + $0x168] sm:$0xff] %vm869_vm6, %v8088_v43  ;;  %6912 = vmatmul.mubr.msk.f32.vlgmr.msra.gmra.mrb[32].mxu0 %vm869_vm6, %v1858_v25  ;;  %v851_v62 = vmax.f32 %v753_v44, 0.0  ;;  %v763_v11 = vadd.f32 %v6873_v8, %v7924_v33  ;;  %v757_v12 = vpop.f32.mrb[17].mxu0  ;;  %v4828_v20 = vsel %vm1246_vm7, %v4826_v18, %v4827_v31 }
 0x135   : > { %1729 = vst.msk [vmem:[#allocation4 + $0xe0] sm:$0xff] %vm869_vm6, %v8088_v43  ;;  %1821 = vst.msk [vmem:[#allocation4 + $0xc0] sm:$0xff] %vm869_vm6, %v8110_v32  ;;  %v8133_v39 = vld [vmem:[#allocation2 + $0x78] sm:$0xff]  ;;  %v8139_v40 = vld [vmem:[#allocation2 + $0x80] sm:$0xff]  ;;  %v850_v63 = vmax.f32 %v748_v45, 0.0  ;;  %1403 = vrot.lane.b32.xlu0 %v8033_v58, %s7473_s14  ;;  %v758_v22 = vadd.f32 %v7924_v33, %v757_v12 }
 0x136   : > { %1822 = vst.msk [vmem:[#allocation4 + $0xe8] sm:$0xff] %vm869_vm6, %v8113_v34  ;;  %1367 = vst.msk [vmem:[#allocation4 + $0x148] sm:$0xff] %vm869_vm6, %v8110_v32  ;;  %v1272_v54 = vrot.slane %v8133_v39, 2  ;;  %v1273_v56 = vrot.slane %v8139_v40, 2  ;;  %v1062_v57 = vrot.slane %v8133_v39, 1  ;;  %v1063_v59 = vrot.slane %v8139_v40, 1 }
 0x137   : > { %1368 = vst.msk [vmem:[#allocation4 + $0x170] sm:$0xff] %vm869_vm6, %v8113_v34  ;;  %1565 = vst.msk [vmem:[#allocation4 + $0x100] sm:$0xff] %vm869_vm6, %v8116_v35  ;;  %v1863_v60 = vld [vmem:[#allocation4 + $0x70] sm:$0xff]  ;;  %v1868_v61 = vld [vmem:[#allocation4 + $0x98] sm:$0xff]  ;;  %1127 = vrot.lane.b32.xlu1 %v8018_v53, %s7473_s14  ;;  %v853_v21 = vmax.f32 %v763_v11, 0.0  ;;  %v6876_v24 = vpop.f32.mrb[18].mxu0 }
 0x138   : > { %883 = vst.msk [vmem:[#allocation2 + $0xb1] sm:$0xff] %vm869_vm6, %v849_v26  ;;  %882 = vst.msk [vmem:[#allocation2 + $0xa9] sm:$0xff] %vm869_vm6, %v848_v29  ;;  %v922_v0 = vld [vmem:[#allocation2 + $0xa0] sm:$0x3]  ;;  %6914 = vmatprep.mubr.msk.f32.mxu0 %vm869_vm6, %v1863_v60  ;;  %v8160_v1 = vsel %vm1246_vm7, %v1272_v54, %v1273_v56  ;;  %v8163_v2 = vsel %vm1036_vm8, %v1062_v57, %v1063_v59  ;;  %v8166_v3 = vsel %vm1246_vm7, %v1273_v56, %v1275_v50  ;;  %v767_v18 = vpop.f32.mrb[19].mxu0 }
 0x139   : > { %1566 = vst.msk [vmem:[#allocation4 + $0x128] sm:$0xff] %vm869_vm6, %v8119_v36  ;;  %966 = vst.msk [vmem:[#allocation4 + $0x190] sm:$0xff] %vm869_vm6, %v8133_v39  ;;  %v1280_v4 = vrot.slane %v922_v0, 2  ;;  %v8189_v58 = vsel %vm1036_vm8, %v1063_v59, %v1065_v51  ;;  %v1070_v13 = vrot.slane %v922_v0, 1  ;;  %6915 = vmatmul.mubr.msk.f32.gmra.mrb[34].mxu0 %vm869_vm6, %v1868_v61  ;;  %1405 = vrot.lane.b32.xlu0 %v8086_v41, %s7473_s14 }
 0x13a   : > { %1730 = vst.msk [vmem:[#allocation4 + $0x108] sm:$0xff] %vm869_vm6, %v8133_v39  ;;  %967 = vst.msk [vmem:[#allocation4 + $0x1b8] sm:$0xff] %vm869_vm6, %v8139_v40  ;;  %v773_v50 = vadd.f32 %v6876_v24, %v7924_v33  ;;  %v768_v57 = vadd.f32 %v7924_v33, %v767_v18 }
 0x13b   : > { %1731 = vst.msk [vmem:[#allocation4 + $0x130] sm:$0xff] %vm869_vm6, %v8139_v40  ;;  %1823 = vst.msk [vmem:[#allocation4 + $0x110] sm:$0xff] %vm869_vm6, %v8160_v1  ;;  %v8176_v10 = vld [vmem:[#allocation2 + $0x90] sm:$0xff]  ;;  %v8186_v53 = vld [vmem:[#allocation2 + $0x98] sm:$0xff]  ;;  %1129 = vrot.lane.b32.xlu1 %v8061_v7, %s7473_s14  ;;  %v852_v7 = vmax.f32 %v758_v22, 0.0  ;;  %v6879_v61 = vpop.f32.mrb[20].mxu0 }
 0x13c   : > { %1369 = vst.msk [vmem:[#allocation4 + $0x198] sm:$0xff] %vm869_vm6, %v8160_v1  ;;  %1567 = vst.msk [vmem:[#allocation4 + $0x150] sm:$0xff] %vm869_vm6, %v8163_v2  ;;  %v1277_v14 = vrot.slane %v8176_v10, 2  ;;  %v1278_v15 = vrot.slane %v8186_v53, 2  ;;  %v1067_v17 = vrot.slane %v8176_v10, 1  ;;  %v1068_v19 = vrot.slane %v8186_v53, 1 }
 0x13d   : > { %885 = vst.msk [vmem:[#allocation2 + $0xc9] sm:$0xff] %vm869_vm6, %v851_v62  ;;  %884 = vst.msk [vmem:[#allocation2 + $0xc1] sm:$0xff] %vm869_vm6, %v850_v63  ;;  %v1873_v25 = vld [vmem:[#allocation4 + $0xc0] sm:$0xff]  ;;  %v1878_v26 = vld [vmem:[#allocation4 + $0xe8] sm:$0xff]  ;;  %v855_v59 = vmax.f32 %v773_v50, 0.0  ;;  %v854_v12 = vmax.f32 %v768_v57, 0.0  ;;  %1407 = vrot.lane.b32.xlu0 %v8088_v43, %s7473_s14 }
 0x13e   : > { %1824 = vst.msk [vmem:[#allocation4 + $0x138] sm:$0xff] %vm869_vm6, %v8166_v3  ;;  %1370 = vst.msk [vmem:[#allocation4 + $0x1c0] sm:$0xff] %vm869_vm6, %v8166_v3  ;;  %v8214_v29 = vsel %vm1246_vm7, %v1277_v14, %v1278_v15  ;;  %v8217_v30 = vsel %vm1246_vm7, %v1278_v15, %v1280_v4  ;;  %v8222_v23 = vsel %vm1036_vm8, %v1067_v17, %v1068_v19  ;;  %6917 = vmatprep.mubr.msk.f32.mxu0 %vm869_vm6, %v1873_v25 }
 0x13f   : > { %968 = vst.msk [vmem:[#allocation4 + $0x1e0] sm:$0xff] %vm869_vm6, %v8176_v10  ;;  %1732 = vst.msk [vmem:[#allocation4 + $0x158] sm:$0xff] %vm869_vm6, %v8176_v10  ;;  %v8219_v37 = vld [vmem:[#allocation2 + $0xa8] sm:$0xff]  ;;  %v8225_v38 = vsel %vm1036_vm8, %v1068_v19, %v1070_v13  ;;  %v8247_v41 = vld [vmem:[#allocation2 + $0xb0] sm:$0xff]  ;;  %6918 = vmatmul.mubr.msk.f32.gmra.mrb[36].mxu0 %vm869_vm6, %v1878_v26  ;;  %v777_v13 = vpop.f32.mrb[21].mxu0  ;;  %1131 = vrot.lane.b32.xlu1 %v8064_v9, %s7473_s14  ;;  %v783_v19 = vadd.f32 %v6879_v61, %v7924_v33 }
 0x140   : > { %969 = vst.msk [vmem:[#allocation4 + $0x208] sm:$0xff] %vm869_vm6, %v8186_v53  ;;  %1733 = vst.msk [vmem:[#allocation4 + $0x180] sm:$0xff] %vm869_vm6, %v8186_v53  ;;  %v1282_v31 = vrot.slane %v8219_v37, 2  ;;  %v925_v44 = vld [vmem:[#allocation2 + $0xb8] sm:$0x3]  ;;  %v1072_v45 = vrot.slane %v8219_v37, 1  ;;  %v778_v24 = vadd.f32 %v7924_v33, %v777_v13 }
 0x141   : > { %1568 = vst.msk [vmem:[#allocation4 + $0x178] sm:$0xff] %vm869_vm6, %v8189_v58  ;;  %1825 = vst.msk [vmem:[#allocation4 + $0x160] sm:$0xff] %vm869_vm6, %v8214_v29  ;;  %v1283_v51 = vrot.slane %v8247_v41, 2  ;;  %v1285_v54 = vrot.slane %v925_v44, 2  ;;  %v1073_v56 = vrot.slane %v8247_v41, 1  ;;  %v1075_v60 = vrot.slane %v925_v44, 1  ;;  %1409 = vrot.lane.b32.xlu0 %v8133_v39, %s7473_s14 }
 0x142   : > { %1826 = vst.msk [vmem:[#allocation4 + $0x188] sm:$0xff] %vm869_vm6, %v8217_v30  ;;  %1371 = vst.msk [vmem:[#allocation4 + $0x1e8] sm:$0xff] %vm869_vm6, %v8214_v29  ;;  %v1883_v62 = vld [vmem:[#allocation4 + $0x110] sm:$0xff]  ;;  %v857_v25 = vmax.f32 %v783_v19, 0.0  ;;  %v6882_v18 = vpop.f32.mrb[22].mxu0 }
 0x143   : > { %1372 = vst.msk [vmem:[#allocation4 + $0x210] sm:$0xff] %vm869_vm6, %v8217_v30  ;;  %970 = vst.msk [vmem:[#allocation4 + $0x230] sm:$0xff] %vm869_vm6, %v8219_v37  ;;  %v8264_v0 = vsel %vm1246_vm7, %v1282_v31, %v1283_v51  ;;  %v8267_v4 = vsel %vm1246_vm7, %v1283_v51, %v1285_v54  ;;  %v8272_v11 = vsel %vm1036_vm8, %v1072_v45, %v1073_v56  ;;  %6920 = vmatprep.mubr.msk.f32.mxu0 %vm869_vm6, %v1883_v62 }
 0x144   : > { %1734 = vst.msk [vmem:[#allocation4 + $0x1a8] sm:$0xff] %vm869_vm6, %v8219_v37  ;;  %1569 = vst.msk [vmem:[#allocation4 + $0x1a0] sm:$0xff] %vm869_vm6, %v8222_v23  ;;  %v8269_v8 = vld [vmem:[#allocation2 + $0xc0] sm:$0xff]  ;;  %v8295_v9 = vld [vmem:[#allocation2 + $0xc8] sm:$0xff]  ;;  %v8298_v15 = vsel %vm1036_vm8, %v1073_v56, %v1075_v60  ;;  %v856_v51 = vmax.f32 %v778_v24, 0.0  ;;  %v787_v56 = vpop.f32.mrb[23].mxu0  ;;  %1133 = vrot.lane.b32.xlu1 %v8116_v35, %s7473_s14  ;;  %v793_v57 = vadd.f32 %v6882_v18, %v7924_v33 }
 0x145   : > { %887 = vst.msk [vmem:[#allocation2 + $0xe1] sm:$0xff] %vm869_vm6, %v853_v21  ;;  %1570 = vst.msk [vmem:[#allocation4 + $0x1c8] sm:$0xff] %vm869_vm6, %v8225_v38  ;;  %v1888_v63 = vld [vmem:[#allocation4 + $0x138] sm:$0xff]  ;;  %v1287_v14 = vrot.slane %v8269_v8, 2  ;;  %v928_v43 = vld [vmem:[#allocation2 + $0xd0] sm:$0x3]  ;;  %1411 = vrot.lane.b32.xlu0 %v8139_v40, %s7473_s14 }
 0x146   : > { %971 = vst.msk [vmem:[#allocation4 + $0x258] sm:$0xff] %vm869_vm6, %v8247_v41  ;;  %1735 = vst.msk [vmem:[#allocation4 + $0x1d0] sm:$0xff] %vm869_vm6, %v8247_v41  ;;  %v1077_v17 = vrot.slane %v8269_v8, 1  ;;  %v1290_v21 = vrot.slane %v928_v43, 2  ;;  %v1078_v22 = vrot.slane %v8295_v9, 1  ;;  %6921 = vmatmul.mubr.msk.f32.gmra.mrb[38].mxu0 %vm869_vm6, %v1888_v63  ;;  %v1080_v26 = vrot.slane %v928_v43, 1 }
 0x147   : > { %886 = vst.msk [vmem:[#allocation2 + $0xd9] sm:$0xff] %vm869_vm6, %v852_v7  ;;  %4838 = vst.msk [vmem:[#allocation4 + $0x138] sm:$0xff] %vm869_vm6, %v4828_v20  ;;  %v1288_v20 = vrot.slane %v8295_v9, 2  ;;  %v6885_v43 = vpop.f32.mrb[24].mxu0 }
 0x148   : > { %1827 = vst.msk [vmem:[#allocation4 + $0x1b0] sm:$0xff] %vm869_vm6, %v8264_v0  ;;  %1828 = vst.msk [vmem:[#allocation4 + $0x1d8] sm:$0xff] %vm869_vm6, %v8267_v4  ;;  %v1893_v31 = vld [vmem:[#allocation4 + $0x160] sm:$0xff]  ;;  %v8321_v50 = vsel %vm1036_vm8, %v1077_v17, %v1078_v22  ;;  %v8339_v35 = vsel %vm1036_vm8, %v1078_v22, %v1080_v26  ;;  %v803_v24 = vadd.f32 %v6885_v43, %v7924_v33  ;;  %1135 = vrot.lane.b32.xlu1 %v8119_v36, %s7473_s14 }
 0x149   : > { %1373 = vst.msk [vmem:[#allocation4 + $0x238] sm:$0xff] %vm869_vm6, %v8264_v0  ;;  %1374 = vst.msk [vmem:[#allocation4 + $0x260] sm:$0xff] %vm869_vm6, %v8267_v4  ;;  %v1898_v7 = vld [vmem:[#allocation4 + $0x188] sm:$0xff]  ;;  %v8315_v44 = vsel %vm1246_vm7, %v1287_v14, %v1288_v20  ;;  %v8318_v45 = vsel %vm1246_vm7, %v1288_v20, %v1290_v21  ;;  %6923 = vmatprep.mubr.msk.f32.mxu0 %vm869_vm6, %v1893_v31  ;;  %v859_v20 = vmax.f32 %v793_v57, 0.0  ;;  %1413 = vrot.lane.b32.xlu0 %v8176_v10, %s7473_s14 }
 0x14a   : > { %972 = vst.msk [vmem:[#allocation4 + $0x280] sm:$0xff] %vm869_vm6, %v8269_v8  ;;  %1736 = vst.msk [vmem:[#allocation4 + $0x1f8] sm:$0xff] %vm869_vm6, %v8269_v8  ;;  %6924 = vmatmul.mubr.msk.f32.gmra.mrb[40].mxu0 %vm869_vm6, %v1898_v7 }
 0x14b   : > { %1571 = vst.msk [vmem:[#allocation4 + $0x1f0] sm:$0xff] %vm869_vm6, %v8272_v11  ;;  %889 = vst.msk [vmem:[#allocation2 + $0xf9] sm:$0xff] %vm869_vm6, %v855_v59  ;;  %v788_v59 = vadd.f32 %v7924_v33, %v787_v56 }
 0x14c   : > { %888 = vst.msk [vmem:[#allocation2 + $0xf1] sm:$0xff] %vm869_vm6, %v854_v12  ;;  %973 = vst.msk [vmem:[#allocation4 + $0x2a8] sm:$0xff] %vm869_vm6, %v8295_v9  ;;  %v931_v54 = vld [vmem:[#allocation2 + $0xe8] sm:$0x3]  ;;  %1137 = vrot.lane.b32.xlu1 %v8163_v2, %s7473_s14 }
 0x14d   : > { %1737 = vst.msk [vmem:[#allocation4 + $0x220] sm:$0xff] %vm869_vm6, %v8295_v9  ;;  %1572 = vst.msk [vmem:[#allocation4 + $0x218] sm:$0xff] %vm869_vm6, %v8298_v15  ;;  %v1295_v39 = vrot.slane %v931_v54, 2  ;;  %v1085_v62 = vrot.slane %v931_v54, 1  ;;  %v858_v21 = vmax.f32 %v788_v59, 0.0  ;;  %v797_v54 = vpop.f32.mrb[25].mxu0  ;;  %1415 = vrot.lane.b32.xlu0 %v8186_v53, %s7473_s14 }
 0x14e   : > { %1829 = vst.msk [vmem:[#allocation4 + $0x200] sm:$0xff] %vm869_vm6, %v8315_v44  ;;  %1830 = vst.msk [vmem:[#allocation4 + $0x228] sm:$0xff] %vm869_vm6, %v8318_v45  ;;  %v8344_v60 = vld [vmem:[#allocation2 + $0xd8] sm:$0xff]  ;;  %v8347_v61 = vld [vmem:[#allocation2 + $0xe0] sm:$0xff]  ;;  %v861_v59 = vmax.f32 %v803_v24, 0.0 }
 0x14f   : > { %1375 = vst.msk [vmem:[#allocation4 + $0x288] sm:$0xff] %vm869_vm6, %v8315_v44  ;;  %1376 = vst.msk [vmem:[#allocation4 + $0x2b0] sm:$0xff] %vm869_vm6, %v8318_v45  ;;  %v1292_v63 = vrot.slane %v8344_v60, 2  ;;  %v1293_v12 = vrot.slane %v8347_v61, 2  ;;  %v1082_v13 = vrot.slane %v8344_v60, 1  ;;  %v1083_v14 = vrot.slane %v8347_v61, 1 }
 0x150   : > { %1573 = vst.msk [vmem:[#allocation4 + $0x240] sm:$0xff] %vm869_vm6, %v8321_v50  ;;  %891 = vst.msk [vmem:[#allocation2 + $0x111] sm:$0xff] %vm869_vm6, %v857_v25  ;;  %v1903_v17 = vld [vmem:[#allocation4 + $0x1b0] sm:$0xff]  ;;  %v1908_v19 = vld [vmem:[#allocation4 + $0x1d8] sm:$0xff]  ;;  %1139 = vrot.lane.b32.xlu1 %v8189_v58, %s7473_s14 }
 0x151   : > { %890 = vst.msk [vmem:[#allocation2 + $0x109] sm:$0xff] %vm869_vm6, %v856_v51  ;;  %1574 = vst.msk [vmem:[#allocation4 + $0x268] sm:$0xff] %vm869_vm6, %v8339_v35  ;;  %v8370_v25 = vsel %vm1246_vm7, %v1292_v63, %v1293_v12  ;;  %v8373_v26 = vsel %vm1246_vm7, %v1293_v12, %v1295_v39  ;;  %v8378_v31 = vsel %vm1036_vm8, %v1082_v13, %v1083_v14  ;;  %6926 = vmatprep.mubr.msk.f32.mxu0 %vm869_vm6, %v1903_v17  ;;  %v6888_v13 = vpop.f32.mrb[26].mxu0 }
 0x152   : > { %974 = vst.msk [vmem:[#allocation4 + $0x2d0] sm:$0xff] %vm869_vm6, %v8344_v60  ;;  %1738 = vst.msk [vmem:[#allocation4 + $0x248] sm:$0xff] %vm869_vm6, %v8344_v60  ;;  %v934_v22 = vld [vmem:[#allocation2 + $0x100] sm:$0x3]  ;;  %v8406_v56 = vsel %vm1036_vm8, %v1083_v14, %v1085_v62  ;;  %6927 = vmatmul.mubr.msk.f32.gmra.mrb[42].mxu0 %vm869_vm6, %v1908_v19  ;;  %v798_v63 = vadd.f32 %v7924_v33, %v797_v54  ;;  %v813_v19 = vadd.f32 %v6888_v13, %v7924_v33 }
 0x153   : > { %975 = vst.msk [vmem:[#allocation4 + $0x2f8] sm:$0xff] %vm869_vm6, %v8347_v61  ;;  %1739 = vst.msk [vmem:[#allocation4 + $0x270] sm:$0xff] %vm869_vm6, %v8347_v61  ;;  %v8375_v18 = vld [vmem:[#allocation2 + $0xf0] sm:$0xff]  ;;  %v8380_v7 = vld [vmem:[#allocation2 + $0xf8] sm:$0xff]  ;;  %v1300_v51 = vrot.slane %v934_v22, 2  ;;  %v1090_v12 = vrot.slane %v934_v22, 1  ;;  %1417 = vrot.lane.b32.xlu0 %v8219_v37, %s7473_s14 }
 0x154   : > { %1831 = vst.msk [vmem:[#allocation4 + $0x250] sm:$0xff] %vm869_vm6, %v8370_v25  ;;  %1832 = vst.msk [vmem:[#allocation4 + $0x278] sm:$0xff] %vm869_vm6, %v8373_v26  ;;  %v1297_v36 = vrot.slane %v8375_v18, 2  ;;  %v1298_v40 = vrot.slane %v8380_v7, 2  ;;  %v1087_v39 = vrot.slane %v8375_v18, 1  ;;  %v1088_v57 = vrot.slane %v8380_v7, 1  ;;  %1141 = vrot.lane.b32.xlu1 %v8222_v23, %s7473_s14 }
 0x155   : > { %1377 = vst.msk [vmem:[#allocation4 + $0x2d8] sm:$0xff] %vm869_vm6, %v8370_v25  ;;  %1378 = vst.msk [vmem:[#allocation4 + $0x300] sm:$0xff] %vm869_vm6, %v8373_v26  ;;  %v1913_v43 = vld [vmem:[#allocation4 + $0x200] sm:$0xff]  ;;  %v1918_v17 = vld [vmem:[#allocation4 + $0x228] sm:$0xff]  ;;  %v860_v2 = vmax.f32 %v798_v63, 0.0 }
 0x156   : > { %976 = vst.msk [vmem:[#allocation4 + $0x320] sm:$0xff] %vm869_vm6, %v8375_v18  ;;  %1740 = vst.msk [vmem:[#allocation4 + $0x298] sm:$0xff] %vm869_vm6, %v8375_v18  ;;  %v8418_v62 = vsel %vm1246_vm7, %v1298_v40, %v1300_v51  ;;  %v8436_v24 = vsel %vm1036_vm8, %v1087_v39, %v1088_v57  ;;  %v8442_v54 = vsel %vm1036_vm8, %v1088_v57, %v1090_v12  ;;  %6929 = vmatprep.mubr.msk.f32.mxu0 %vm869_vm6, %v1913_v43 }
 0x157   : > { %1575 = vst.msk [vmem:[#allocation4 + $0x290] sm:$0xff] %vm869_vm6, %v8378_v31  ;;  %893 = vst.msk [vmem:[#allocation2 + $0x129] sm:$0xff] %vm869_vm6, %v859_v20  ;;  %v8415_v20 = vsel %vm1246_vm7, %v1297_v36, %v1298_v40  ;;  %v937_v14 = vld [vmem:[#allocation2 + $0x118] sm:$0x3]  ;;  %6930 = vmatmul.mubr.msk.f32.gmra.mrb[44].mxu0 %vm869_vm6, %v1918_v17  ;;  %1419 = vrot.lane.b32.xlu0 %v8247_v41, %s7473_s14 }
 0x158   : > { %892 = vst.msk [vmem:[#allocation2 + $0x121] sm:$0xff] %vm869_vm6, %v858_v21  ;;  %977 = vst.msk [vmem:[#allocation4 + $0x348] sm:$0xff] %vm869_vm6, %v8380_v7  ;;  %v807_v21 = vpop.f32.mrb[27].mxu0  ;;  %v8433_v22 = vld [vmem:[#allocation2 + $0x108] sm:$0xff]  ;;  %v8439_v10 = vld [vmem:[#allocation2 + $0x110] sm:$0xff]  ;;  %v1305_v51 = vrot.slane %v937_v14, 2  ;;  %1143 = vrot.lane.b32.xlu1 %v8225_v38, %s7473_s14 }
 0x159   : > { %1741 = vst.msk [vmem:[#allocation4 + $0x2c0] sm:$0xff] %vm869_vm6, %v8380_v7  ;;  %1576 = vst.msk [vmem:[#allocation4 + $0x2b8] sm:$0xff] %vm869_vm6, %v8406_v56  ;;  %v1302_v36 = vrot.slane %v8433_v22, 2  ;;  %v1303_v40 = vrot.slane %v8439_v10, 2  ;;  %v1092_v39 = vrot.slane %v8433_v22, 1  ;;  %v1093_v57 = vrot.slane %v8439_v10, 1 }
 0x15a   : > { %1833 = vst.msk [vmem:[#allocation4 + $0x2a0] sm:$0xff] %vm869_vm6, %v8415_v20  ;;  %1834 = vst.msk [vmem:[#allocation4 + $0x2c8] sm:$0xff] %vm869_vm6, %v8418_v62  ;;  %v808_v63 = vadd.f32 %v7924_v33, %v807_v21  ;;  %v1095_v12 = vrot.slane %v937_v14, 1  ;;  %v6891_v13 = vpop.f32.mrb[28].mxu0 }
 0x15b   : > { %1379 = vst.msk [vmem:[#allocation4 + $0x328] sm:$0xff] %vm869_vm6, %v8415_v20  ;;  %1380 = vst.msk [vmem:[#allocation4 + $0x350] sm:$0xff] %vm869_vm6, %v8418_v62  ;;  %v8465_v43 = vsel %vm1246_vm7, %v1302_v36, %v1303_v40  ;;  %v8468_v55 = vsel %vm1246_vm7, %v1303_v40, %v1305_v51  ;;  %v8471_v52 = vsel %vm1036_vm8, %v1092_v39, %v1093_v57  ;;  %v817_v46 = vpop.f32.mrb[29].mxu0  ;;  %v1923_v17 = vld [vmem:[#allocation4 + $0x250] sm:$0xff]  ;;  %v1928_v14 = vld [vmem:[#allocation4 + $0x278] sm:$0xff]  ;;  %1421 = vrot.lane.b32.xlu0 %v8269_v8, %s7473_s14 }
 0x15c   : > { %895 = vst.msk [vmem:[#allocation2 + $0x141] sm:$0xff] %vm869_vm6, %v861_v59  ;;  %978 = vst.msk [vmem:[#allocation4 + $0x370] sm:$0xff] %vm869_vm6, %v8433_v22  ;;  %v863_v59 = vmax.f32 %v813_v19, 0.0  ;;  %v823_v49 = vadd.f32 %v6891_v13, %v7924_v33  ;;  %v862_v53 = vmax.f32 %v808_v63, 0.0  ;;  %v8492_v58 = vsel %vm1036_vm8, %v1093_v57, %v1095_v12  ;;  %6932 = vmatprep.mubr.msk.f32.mxu0 %vm869_vm6, %v1923_v17  ;;  %v6894_v12 = vpop.f32.mrb[30].mxu0 }
 0x15d   : > { %1742 = vst.msk [vmem:[#allocation4 + $0x2e8] sm:$0xff] %vm869_vm6, %v8433_v22  ;;  %1577 = vst.msk [vmem:[#allocation4 + $0x2e0] sm:$0xff] %vm869_vm6, %v8436_v24  ;;  %v818_v21 = vadd.f32 %v7924_v33, %v817_v46  ;;  %6933 = vmatmul.mubr.msk.f32.gmra.mrb[46].mxu0 %vm869_vm6, %v1928_v14  ;;  %v827_v42 = vpop.f32.mrb[31].mxu0  ;;  %1145 = vrot.lane.b32.xlu1 %v8272_v11, %s7473_s14 }
 0x15e   : > { %979 = vst.msk [vmem:[#allocation4 + $0x398] sm:$0xff] %vm869_vm6, %v8439_v10  ;;  %1743 = vst.msk [vmem:[#allocation4 + $0x310] sm:$0xff] %vm869_vm6, %v8439_v10  ;;  %v940_v36 = vld [vmem:[#allocation2 + $0x130] sm:$0x3]  ;;  %v865_v39 = vmax.f32 %v823_v49, 0.0 }
 0x15f   : > { %1578 = vst.msk [vmem:[#allocation4 + $0x308] sm:$0xff] %vm869_vm6, %v8442_v54  ;;  %894 = vst.msk [vmem:[#allocation2 + $0x139] sm:$0xff] %vm869_vm6, %v860_v2  ;;  %v8486_v19 = vld [vmem:[#allocation2 + $0x120] sm:$0xff]  ;;  %v8501_v51 = vld [vmem:[#allocation2 + $0x128] sm:$0xff]  ;;  %v1310_v57 = vrot.slane %v940_v36, 2  ;;  %v864_v63 = vmax.f32 %v818_v21, 0.0  ;;  %1423 = vrot.lane.b32.xlu0 %v8295_v9, %s7473_s14 }
 0x160   : > { %10536 = vst [vmem:[#allocation10_spill] sm:$0xff] %v8465_v43  ;;  %10537 = vst [vmem:[#allocation11_spill] sm:$0xff] %v8468_v55  ;;  %v1307_v2 = vrot.slane %v8486_v19, 2  ;;  %v1097_v40 = vrot.slane %v8486_v19, 1  ;;  %v1308_v46 = vrot.slane %v8501_v51, 2  ;;  %v1100_v14 = vrot.slane %v940_v36, 1 }
 0x161   : > { %1835 = vst.msk [vmem:[#allocation4 + $0x2f0] sm:$0xff] %vm869_vm6, %v8465_v43  ;;  %1836 = vst.msk [vmem:[#allocation4 + $0x318] sm:$0xff] %vm869_vm6, %v8468_v55  ;;  %v1933_v13 = vld [vmem:[#allocation4 + $0x2a0] sm:$0xff]  ;;  %v1938_v17 = vld [vmem:[#allocation4 + $0x2c8] sm:$0xff]  ;;  %1147 = vrot.lane.b32.xlu1 %v8298_v15, %s7473_s14 }
 0x162   : > { %1381 = vst.msk [vmem:[#allocation4 + $0x378] sm:$0xff] %vm869_vm6, %v8465_v43  ;;  %1382 = vst.msk [vmem:[#allocation4 + $0x3a0] sm:$0xff] %vm869_vm6, %v8468_v55  ;;  %v8521_v55 = vsel %vm1246_vm7, %v1307_v2, %v1308_v46  ;;  %v8524_v21 = vsel %vm1246_vm7, %v1308_v46, %v1310_v57  ;;  %6935 = vmatprep.mubr.msk.f32.mxu0 %vm869_vm6, %v1933_v13 }
 0x163   : > { %1579 = vst.msk [vmem:[#allocation4 + $0x330] sm:$0xff] %vm869_vm6, %v8471_v52  ;;  %897 = vst.msk [vmem:[#allocation2 + $0x159] sm:$0xff] %vm869_vm6, %v863_v59  ;;  %v1098_v59 = vrot.slane %v8501_v51, 1  ;;  %v943_v49 = vld [vmem:[#allocation2 + $0x148] sm:$0x3]  ;;  %6936 = vmatmul.mubr.msk.f32.gmra.mrb[48].mxu0 %vm869_vm6, %v1938_v17  ;;  %1425 = vrot.lane.b32.xlu0 %v8344_v60, %s7473_s14 }
 0x164   : > { %980 = vst.msk [vmem:[#allocation4 + $0x3c0] sm:$0xff] %vm869_vm6, %v8486_v19  ;;  %1744 = vst.msk [vmem:[#allocation4 + $0x338] sm:$0xff] %vm869_vm6, %v8486_v19  ;;  %v1315_v36 = vrot.slane %v943_v49, 2  ;;  %v1105_v46 = vrot.slane %v943_v49, 1 }
 0x165   : > { %1580 = vst.msk [vmem:[#allocation4 + $0x358] sm:$0xff] %vm869_vm6, %v8492_v58  ;;  %896 = vst.msk [vmem:[#allocation2 + $0x151] sm:$0xff] %vm869_vm6, %v862_v53  ;;  %v833_v53 = vadd.f32 %v6894_v12, %v7924_v33  ;;  %v8527_v43 = vsel %vm1036_vm8, %v1097_v40, %v1098_v59  ;;  %v8546_v2 = vsel %vm1036_vm8, %v1098_v59, %v1100_v14  ;;  %1149 = vrot.lane.b32.xlu1 %v8321_v50, %s7473_s14 }
 0x166   : > { %981 = vst.msk [vmem:[#allocation4 + $0x3e8] sm:$0xff] %vm869_vm6, %v8501_v51  ;;  %1745 = vst.msk [vmem:[#allocation4 + $0x360] sm:$0xff] %vm869_vm6, %v8501_v51  ;;  %v8539_v37 = vld [vmem:[#allocation2 + $0x138] sm:$0xff]  ;;  %v8543_v23 = vld [vmem:[#allocation2 + $0x140] sm:$0xff] }
 0x167   : > { %899 = vst.msk [vmem:[#allocation2 + $0x171] sm:$0xff] %vm869_vm6, %v865_v39  ;;  %10538 = vst [vmem:[#allocation12_spill] sm:$0xff] %v8521_v55  ;;  %v867_v40 = vmax.f32 %v833_v53, 0.0  ;;  %v828_v39 = vadd.f32 %v7924_v33, %v827_v42  ;;  %v1312_v57 = vrot.slane %v8539_v37, 2  ;;  %v1102_v42 = vrot.slane %v8539_v37, 1  ;;  %1427 = vrot.lane.b32.xlu0 %v8347_v61, %s7473_s14 }
 0x168   : > { %10539 = vst [vmem:[#allocation13_spill] sm:$0xff] %v8524_v21  ;;  %898 = vst.msk [vmem:[#allocation2 + $0x169] sm:$0xff] %vm869_vm6, %v864_v63  ;;  %v1313_v63 = vrot.slane %v8543_v23, 2  ;;  %v1103_v33 = vrot.slane %v8543_v23, 1  ;;  %v1943_v59 = vld [vmem:[#allocation4 + $0x2f0] sm:$0xff]  ;;  %v1948_v12 = vld [vmem:[#allocation4 + $0x318] sm:$0xff] }
 0x169   : > { %1837 = vst.msk [vmem:[#allocation4 + $0x340] sm:$0xff] %vm869_vm6, %v8521_v55  ;;  %1838 = vst.msk [vmem:[#allocation4 + $0x368] sm:$0xff] %vm869_vm6, %v8524_v21  ;;  %v866_v13 = vmax.f32 %v828_v39, 0.0  ;;  %6938 = vmatprep.mubr.msk.f32.mxu0 %vm869_vm6, %v1943_v59  ;;  %1151 = vrot.lane.b32.xlu1 %v8339_v35, %s7473_s14 }
 0x16a   : > { %1383 = vst.msk [vmem:[#allocation4 + $0x3c8] sm:$0xff] %vm869_vm6, %v8521_v55  ;;  %1384 = vst.msk [vmem:[#allocation4 + $0x3f0] sm:$0xff] %vm869_vm6, %v8524_v21  ;;  %v946_v17 = vld [vmem:[#allocation2 + $0x160] sm:$0x3]  ;;  %v8570_v49 = vsel %vm1246_vm7, %v1312_v57, %v1313_v63  ;;  %v8573_v14 = vsel %vm1246_vm7, %v1313_v63, %v1315_v36  ;;  %v8576_v53 = vsel %vm1036_vm8, %v1102_v42, %v1103_v33  ;;  %6939 = vmatmul.mubr.msk.f32.gmra.mrb[50].mxu0 %vm869_vm6, %v1948_v12 }
 0x16b   : > { %1581 = vst.msk [vmem:[#allocation4 + $0x380] sm:$0xff] %vm869_vm6, %v8527_v43  ;;  %982 = vst.msk [vmem:[#allocation4 + $0x410] sm:$0xff] %vm869_vm6, %v8539_v37  ;;  %v1320_v21 = vrot.slane %v946_v17, 2  ;;  %v8595_v36 = vsel %vm1036_vm8, %v1103_v33, %v1105_v46  ;;  %1429 = vrot.lane.b32.xlu0 %v8375_v18, %s7473_s14 }
 0x16c   : > { %1746 = vst.msk [vmem:[#allocation4 + $0x388] sm:$0xff] %vm869_vm6, %v8539_v37  ;;  %983 = vst.msk [vmem:[#allocation4 + $0x438] sm:$0xff] %vm869_vm6, %v8543_v23  ;;  %v8587_v38 = vld [vmem:[#allocation2 + $0x150] sm:$0xff]  ;;  %v8592_v41 = vld [vmem:[#allocation2 + $0x158] sm:$0xff] }
 0x16d   : > { %1747 = vst.msk [vmem:[#allocation4 + $0x3b0] sm:$0xff] %vm869_vm6, %v8543_v23  ;;  %1582 = vst.msk [vmem:[#allocation4 + $0x3a8] sm:$0xff] %vm869_vm6, %v8546_v2  ;;  %v1317_v39 = vrot.slane %v8587_v38, 2  ;;  %v1318_v57 = vrot.slane %v8592_v41, 2  ;;  %v1107_v46 = vrot.slane %v8587_v38, 1  ;;  %v1108_v63 = vrot.slane %v8592_v41, 1  ;;  %1153 = vrot.lane.b32.xlu1 %v8378_v31, %s7473_s14 }
 0x16e   : > { %901 = vst.msk [vmem:[#allocation2 + $0x189] sm:$0xff] %vm869_vm6, %v867_v40  ;;  %10540 = vst [vmem:[#allocation14_spill] sm:$0xff] %v8570_v49  ;;  %v1110_v40 = vrot.slane %v946_v17, 1  ;;  %v949_v42 = vld [vmem:[#allocation2 + $0x178] sm:$0x3] }
 0x16f   : > { %10541 = vst [vmem:[#allocation15_spill] sm:$0xff] %v8573_v14  ;;  %1839 = vst.msk [vmem:[#allocation4 + $0x390] sm:$0xff] %vm869_vm6, %v8570_v49  ;;  %v8612_v33 = vld [vmem:[#allocation2 + $0x168] sm:$0xff]  ;;  %v8614_v59 = vld [vmem:[#allocation2 + $0x170] sm:$0xff]  ;;  %v1325_v12 = vrot.slane %v949_v42, 2  ;;  %v8624_v55 = vsel %vm1246_vm7, %v1318_v57, %v1320_v21  ;;  %v8632_v8 = vsel %vm1036_vm8, %v1107_v46, %v1108_v63  ;;  %1431 = vrot.lane.b32.xlu0 %v8380_v7, %s7473_s14 }
 0x170   : > { %1840 = vst.msk [vmem:[#allocation4 + $0x3b8] sm:$0xff] %vm869_vm6, %v8573_v14  ;;  %1385 = vst.msk [vmem:[#allocation4 + $0x418] sm:$0xff] %vm869_vm6, %v8570_v49  ;;  %v1953_v17 = vld [vmem:[#allocation4 + $0x340] sm:$0xff]  ;;  %v8621_v49 = vsel %vm1246_vm7, %v1317_v39, %v1318_v57  ;;  %v1322_v16 = vrot.slane %v8612_v33, 2  ;;  %v1323_v11 = vrot.slane %v8614_v59, 2  ;;  %v8651_v21 = vsel %vm1036_vm8, %v1108_v63, %v1110_v40  ;;  %v953_v31 = vld [vmem:[#allocation2 + $0x198] sm:$0xff] }
 0x171   : > { %1386 = vst.msk [vmem:[#allocation4 + $0x440] sm:$0xff] %vm869_vm6, %v8573_v14  ;;  %1583 = vst.msk [vmem:[#allocation4 + $0x3d0] sm:$0xff] %vm869_vm6, %v8576_v53  ;;  %v1958_v14 = vld [vmem:[#allocation4 + $0x368] sm:$0xff]  ;;  %6941 = vmatprep.mubr.msk.f32.mxu0 %vm869_vm6, %v1953_v17  ;;  %v1112_v39 = vrot.slane %v8612_v33, 1  ;;  %v1113_v57 = vrot.slane %v8614_v59, 1  ;;  %1155 = vrot.lane.b32.xlu1 %v8406_v56, %s7473_s14  ;;  %v2041_v7 = vld [vmem:[%s10500_s3 + $0x100] sm:$0xff] }
 0x172   : > { %900 = vst.msk [vmem:[#allocation2 + $0x181] sm:$0xff] %vm869_vm6, %v866_v13  ;;  %984 = vst.msk [vmem:[#allocation4 + $0x460] sm:$0xff] %vm869_vm6, %v8587_v38  ;;  %v1115_v13 = vrot.slane %v949_v42, 1  ;;  %6942 = vmatmul.mubr.msk.f32.gmra.mrb[52].mxu0 %vm869_vm6, %v1958_v14  ;;  %v8659_v42 = vsel %vm1246_vm7, %v1322_v16, %v1323_v11  ;;  %v8662_v17 = vsel %vm1246_vm7, %v1323_v11, %v1325_v12  ;;  %v2042_v56 = vld [vmem:[%s10500_s3 + $0x108] sm:$0xff] }
 0x173   : > { %1748 = vst.msk [vmem:[#allocation4 + $0x3d8] sm:$0xff] %vm869_vm6, %v8587_v38  ;;  %985 = vst.msk [vmem:[#allocation4 + $0x488] sm:$0xff] %vm869_vm6, %v8592_v41  ;;  %1433 = vrot.lane.b32.xlu0 %v8433_v22, %s7473_s14  ;;  %v954_v22 = vld [vmem:[#allocation2 + $0x1a0] sm:$0xff] }
 0x174   : > { %1749 = vst.msk [vmem:[#allocation4 + $0x400] sm:$0xff] %vm869_vm6, %v8592_v41  ;;  %1584 = vst.msk [vmem:[#allocation4 + $0x3f8] sm:$0xff] %vm869_vm6, %v8595_v36  ;;  %v8684_v15 = vsel %vm1036_vm8, %v1113_v57, %v1115_v13 }
 0x175   : > { %10542 = vst [vmem:[#allocation16_spill] sm:$0xff] %v8624_v55  ;;  %986 = vst.msk [vmem:[#allocation4 + $0x4b0] sm:$0xff] %vm869_vm6, %v8612_v33  ;;  %v952_v46 = vld [vmem:[#allocation2 + $0x190] sm:$0x3]  ;;  %1157 = vrot.lane.b32.xlu1 %v8436_v24, %s7473_s14  ;;  %v1759_v24 = vrot.slane %v953_v31, 1 }
 0x176   : > { %1750 = vst.msk [vmem:[#allocation4 + $0x428] sm:$0xff] %vm869_vm6, %v8612_v33  ;;  %987 = vst.msk [vmem:[#allocation4 + $0x4d8] sm:$0xff] %vm869_vm6, %v8614_v59  ;;  %v1963_v14 = vld [vmem:[#allocation4 + $0x390] sm:$0xff]  ;;  %v1594_v9 = vrot.slane %v952_v46, 2 }
 0x177   : > { %1751 = vst.msk [vmem:[#allocation4 + $0x450] sm:$0xff] %vm869_vm6, %v8614_v59  ;;  %1841 = vst.msk [vmem:[#allocation4 + $0x3e0] sm:$0xff] %vm869_vm6, %v8621_v49  ;;  %v1968_v40 = vld [vmem:[#allocation4 + $0x3b8] sm:$0xff]  ;;  %6944 = vmatprep.mubr.msk.f32.mxu0 %vm869_vm6, %v1963_v14  ;;  %1435 = vrot.lane.b32.xlu0 %v8439_v10, %s7473_s14 }
 0x178   : > { %1842 = vst.msk [vmem:[#allocation4 + $0x408] sm:$0xff] %vm869_vm6, %v8624_v55  ;;  %1387 = vst.msk [vmem:[#allocation4 + $0x468] sm:$0xff] %vm869_vm6, %v8621_v49  ;;  %6945 = vmatmul.mubr.msk.f32.gmra.mrb[54].mxu0 %vm869_vm6, %v1968_v40 }
 0x179   : > { %1388 = vst.msk [vmem:[#allocation4 + $0x490] sm:$0xff] %vm869_vm6, %v8624_v55  ;;  %1585 = vst.msk [vmem:[#allocation4 + $0x420] sm:$0xff] %vm869_vm6, %v8632_v8  ;;  %v8665_v55 = vsel %vm1036_vm8, %v1112_v39, %v1113_v57  ;;  %v8679_v16 = vld [vmem:[#allocation2 + $0x180] sm:$0xff]  ;;  %v8690_v12 = vld [vmem:[#allocation2 + $0x188] sm:$0xff]  ;;  %v1525_v39 = vrot.slane %v952_v46, 1  ;;  %1159 = vrot.lane.b32.xlu1 %v8442_v54, %s7473_s14 }
 0x17a   : > { %1586 = vst.msk [vmem:[#allocation4 + $0x448] sm:$0xff] %vm869_vm6, %v8651_v21  ;;  %10543 = vst [vmem:[#allocation17_spill] sm:$0xff] %v8659_v42  ;;  %v1591_v63 = vrot.slane %v8679_v16, 2  ;;  %v1522_v11 = vrot.slane %v8679_v16, 1  ;;  %v1592_v13 = vrot.slane %v8690_v12, 2  ;;  %v1523_v57 = vrot.slane %v8690_v12, 1 }
 0x17b   : > { %10544 = vst [vmem:[#allocation18_spill] sm:$0xff] %v8662_v17  ;;  %1843 = vst.msk [vmem:[#allocation4 + $0x430] sm:$0xff] %vm869_vm6, %v8659_v42  ;;  %1437 = vrot.lane.b32.xlu0 %v8486_v19, %s7473_s14  ;;  %v1760_v19 = vrot.slane %v954_v22, 1 }
 0x17c   : > { %1844 = vst.msk [vmem:[#allocation4 + $0x458] sm:$0xff] %vm869_vm6, %v8662_v17  ;;  %1389 = vst.msk [vmem:[#allocation4 + $0x4b8] sm:$0xff] %vm869_vm6, %v8659_v42  ;;  %v8705_v42 = vsel %vm1246_vm7, %v1591_v63, %v1592_v13  ;;  %v8708_v46 = vsel %vm1246_vm7, %v1592_v13, %v1594_v9  ;;  %v8711_v40 = vsel %vm1036_vm8, %v1522_v11, %v1523_v57  ;;  %v2045_v11 = vld [vmem:[%s10500_s3 + $0x120] sm:$0xff] }
 0x17d   : > { %1390 = vst.msk [vmem:[#allocation4 + $0x4e0] sm:$0xff] %vm869_vm6, %v8662_v17  ;;  %1587 = vst.msk [vmem:[#allocation4 + $0x470] sm:$0xff] %vm869_vm6, %v8665_v55  ;;  %v8721_v50 = vsel %vm1036_vm8, %v1523_v57, %v1525_v39  ;;  %1161 = vrot.lane.b32.xlu1 %v8471_v52, %s7473_s14  ;;  %v2046_v39 = vld [vmem:[%s10500_s3 + $0x128] sm:$0xff] }
 0x17e   : > { %1752 = vst.msk [vmem:[#allocation4 + $0x478] sm:$0xff] %vm869_vm6, %v8679_v16  ;;  %1588 = vst.msk [vmem:[#allocation4 + $0x498] sm:$0xff] %vm869_vm6, %v8684_v15  ;;  %v1973_v14 = vld [vmem:[#allocation4 + $0x3e0] sm:$0xff] }
 0x17f   : > { %1753 = vst.msk [vmem:[#allocation4 + $0x4a0] sm:$0xff] %vm869_vm6, %v8690_v12  ;;  %v1978_v17 = vld [vmem:[#allocation4 + $0x408] sm:$0xff]  ;;  %6947 = vmatprep.mubr.msk.f32.mxu0 %vm869_vm6, %v1973_v14  ;;  %1845 = vst.msk [vmem:[#allocation4 + $0x480] sm:$0xff] %vm869_vm6, %v8705_v42  ;;  %1439 = vrot.lane.b32.xlu0 %v8501_v51, %s7473_s14  ;;  %v1808_v51 = vrot.slane %v953_v31, 2 }
 0x180   : > { %1846 = vst.msk [vmem:[#allocation4 + $0x4a8] sm:$0xff] %vm869_vm6, %v8708_v46  ;;  %1589 = vst.msk [vmem:[#allocation4 + $0x4c0] sm:$0xff] %vm869_vm6, %v8711_v40  ;;  %6948 = vmatmul.mubr.msk.f32.gmra.mrb[56].mxu0 %vm869_vm6, %v1978_v17 }
 0x181   : > { %1590 = vst.msk [vmem:[#allocation4 + $0x4e8] sm:$0xff] %vm869_vm6, %v8721_v50  ;;  %1163 = vrot.lane.b32.xlu1 %v8492_v58, %s7473_s14  ;;  %1754 = vst.msk [vmem:[#allocation4 + $0x4c8] sm:$0xff] %vm869_vm6, %v953_v31  ;;  %v8805_v58 = vsel %vm1036_vm8, %v1759_v24, %v1760_v19  ;;  %v2052_v24 = vld [vmem:[%s10500_s3 + $0x158] sm:$0xff] }
 0x182   : > { %v1983_v60 = vld [vmem:[#allocation4 + $0x430] sm:$0xff]  ;;  %1755 = vst.msk [vmem:[#allocation4 + $0x4f0] sm:$0xff] %vm869_vm6, %v954_v22 }
 0x183   : > { %v1988_v9 = vld [vmem:[#allocation4 + $0x458] sm:$0xff]  ;;  %6950 = vmatprep.mubr.msk.f32.mxu0 %vm869_vm6, %v1983_v60  ;;  %1441 = vrot.lane.b32.xlu0 %v8539_v37, %s7473_s14  ;;  %v1809_v37 = vrot.slane %v954_v22, 2  ;;  %v10545_v60 = vmov 0.0|0.0  }
 0x184   : > { %6951 = vmatmul.mubr.msk.f32.gmra.mrb[58].mxu0 %vm869_vm6, %v1988_v9 }
 0x185   : > { %1165 = vrot.lane.b32.xlu1 %v8527_v43, %s7473_s14 }
 0x186   : > { %v1993_v17 = vld [vmem:[#allocation4 + $0x480] sm:$0xff] }
 0x187   : > { %v1998_v63 = vld [vmem:[#allocation4 + $0x4a8] sm:$0xff]  ;;  %6953 = vmatprep.mubr.msk.f32.mxu0 %vm869_vm6, %v1993_v17  ;;  %1443 = vrot.lane.b32.xlu0 %v8543_v23, %s7473_s14  ;;  %v955_v23 = vld [vmem:[#allocation2 + $0x1a8] sm:$0x3] }
 0x188   : > { %6954 = vmatmul.mubr.msk.f32.gmra.mrb[60].mxu0 %vm869_vm6, %v1998_v63  ;;  %v2048_v17 = vld [vmem:[%s10500_s3 + $0x138] sm:$0xff] }
 0x189   : > { %1167 = vrot.lane.b32.xlu1 %v8546_v2, %s7473_s14  ;;  %v2043_v2 = vld [vmem:[%s10500_s3 + $0x110] sm:$0xff] }
 0x18b   : > { %1445 = vrot.lane.b32.xlu0 %v8587_v38, %s7473_s14  ;;  %v1762_v38 = vrot.slane %v955_v23, 1 }
 0x18d   : > { %1169 = vrot.lane.b32.xlu1 %v8576_v53, %s7473_s14  ;;  %v2044_v53 = vld [vmem:[%s10500_s3 + $0x118] sm:$0xff] }
 0x18f   : > { %1447 = vrot.lane.b32.xlu0 %v8592_v41, %s7473_s14 }
 0x191   : > { %1171 = vrot.lane.b32.xlu1 %v8595_v36, %s7473_s14 }
 0x193   : > { %1449 = vrot.lane.b32.xlu0 %v8612_v33, %s7473_s14  ;;  %v1396_v52 = vpop.permute.xlu1 %1395  ;;  %v1394_v35 = vpop.permute.xlu0 %1393 }
 0x194   : > { %1490 = vst.msk [vmem:[#allocation4 + $0x30] sm:$0xff] %vm1213_vm9, %v1396_v52  ;;  %1489 = vst.msk [vmem:[#allocation4 + $0x8] sm:$0xff] %vm1213_vm9, %v1394_v35 }
 0x195   : > { %1173 = vrot.lane.b32.xlu1 %v8632_v8, %s7473_s14 }
 0x197   : > { %1451 = vrot.lane.b32.xlu0 %v8614_v59, %s7473_s14  ;;  %v1120_v61 = vpop.permute.xlu1 %1119  ;;  %v1118_v18 = vpop.permute.xlu0 %1117  ;;  %v1810_v59 = vsel %vm1246_vm7, %v1808_v51, %v1809_v37 }
 0x198   : > { %1215 = vst.msk [vmem:[#allocation4 + $0x28] sm:$0xff] %vm1213_vm9, %v1120_v61  ;;  %1214 = vst.msk [vmem:[#allocation4] sm:$0xff] %vm1213_vm9, %v1118_v18  ;;  %v2050_v18 = vld [vmem:[%s10500_s3 + $0x148] sm:$0xff] }
 0x199   : > { %1175 = vrot.lane.b32.xlu1 %v8651_v21, %s7473_s14  ;;  %1847 = vst.msk [vmem:[#allocation4 + $0x4d0] sm:$0xff] %vm869_vm6, %v1810_v59  ;;  %v8818_v21 = vsel %vm1036_vm8, %v1760_v19, %v1762_v38  ;;  %v2058_v59 = vld [vmem:[%s10500_s3 + $0x188] sm:$0xff] }
 0x19b   : > { %1453 = vrot.lane.b32.xlu0 %v8679_v16, %s7473_s14  ;;  %v1398_v10 = vpop.permute.xlu0 %1397  ;;  %v1122_v54 = vpop.permute.xlu1 %1121  ;;  %v1850_v43 = vld [vmem:[#allocation4 + $0x8] sm:$0xff]  ;;  %v1855_v8 = vld [vmem:[#allocation4 + $0x30] sm:$0xff] }
 0x19c   : > { %1491 = vst.msk [vmem:[#allocation4 + $0x58] sm:$0xff] %vm1213_vm9, %v1398_v10  ;;  %1216 = vst.msk [vmem:[#allocation4 + $0x50] sm:$0xff] %vm1213_vm9, %v1122_v54  ;;  %2248 = vmatprep.mubr.f32.mxu1 %v1850_v43 }
 0x19d   : > { %1177 = vrot.lane.b32.xlu1 %v8665_v55, %s7473_s14  ;;  %v7102_v55 = vpack.c.bf16 %v2042_v56, %v2041_v7 }
 0x19f   : > { %1455 = vrot.lane.b32.xlu0 %v8690_v12, %s7473_s14  ;;  %v1400_v41 = vpop.permute.xlu0 %1399  ;;  %v1849_v33 = vld [vmem:[#allocation4] sm:$0xff]  ;;  %v1854_v16 = vld [vmem:[#allocation4 + $0x28] sm:$0xff]  ;;  %v1811_v12 = vrot.slane %v955_v23, 2 }
 0x1a0   : > { %v1124_v36 = vpop.permute.xlu1 %1123  ;;  %1492 = vst.msk [vmem:[#allocation4 + $0x80] sm:$0xff] %vm1213_vm9, %v1400_v41  ;;  %2249 = vmatmul.mubr.f32.vlgmr.msra.gmra.mrb[0].mxu1 %v1849_v33 }
 0x1a1   : > { %1179 = vrot.lane.b32.xlu1 %v8684_v15, %s7473_s14  ;;  %1217 = vst.msk [vmem:[#allocation4 + $0x78] sm:$0xff] %vm1213_vm9, %v1124_v36  ;;  %7103 = vmatpush1.bf16.msra.mxu1 %v7102_v55  ;;  %v7105_v15 = vpack.c.bf16 %v2044_v53, %v2043_v2  ;;  %v1812_v9 = vsel %vm1246_vm7, %v1809_v37, %v1811_v12  ;;  %v2054_v55 = vld [vmem:[%s10500_s3 + $0x168] sm:$0xff]  ;;  %v2056_v53 = vld [vmem:[%s10500_s3 + $0x178] sm:$0xff] }
 0x1a2   : > { %2253 = vmatprep.mubr.f32.mxu1 %v1855_v8  ;;  %7104 = vmatprep.subr.bf16.mxu1 %v10545_v60  ;;  %1848 = vst.msk [vmem:[#allocation4 + $0x4f8] sm:$0xff] %vm869_vm6, %v1812_v9  ;;  %v2062_v9 = vld [vmem:[%s10500_s3 + $0x1a8] sm:$0xff] }
 0x1a3   : > { %1596 = vrot.lane.b32.xlu0 %v7980_v27, %s7473_s14  ;;  %v1402_v13 = vpop.permute.xlu0 %1401  ;;  %v1860_v14 = vld [vmem:[#allocation4 + $0x58] sm:$0xff]  ;;  %v7108_v27 = vpack.c.bf16 %v2046_v39, %v2045_v11  ;;  %v1859_v35 = vld [vmem:[#allocation4 + $0x50] sm:$0xff]  ;;  %v2060_v11 = vld [vmem:[%s10500_s3 + $0x198] sm:$0xff] }
 0x1a4   : > { %1493 = vst.msk [vmem:[#allocation4 + $0xa8] sm:$0xff] %vm1213_vm9, %v1402_v13  ;;  %2254 = vmatmul.mubr.f32.gmra.mrb[2].mxu1 %v1854_v16 }
 0x1a5   : > { %1598 = vrot.lane.b32.xlu1 %v7983_v28, %s7473_s14  ;;  %v1126_v57 = vpop.permute.xlu1 %1125  ;;  %2258 = vmatprep.mubr.f32.mxu1 %v1860_v14  ;;  %v2047_v28 = vld [vmem:[%s10500_s3 + $0x130] sm:$0xff] }
 0x1a6   : > { %1218 = vst.msk [vmem:[#allocation4 + $0xa0] sm:$0xff] %vm1213_vm9, %v1126_v57  ;;  %1776 = vst.msk [vmem:[#allocation4 + $0x18] sm:$0xff] %vm1213_vm9, %v1126_v57  ;;  %7106 = vmatpush1.bf16.msra.mxu1 %v7105_v15 }
 0x1a7   : > { %1600 = vrot.lane.b32.xlu0 %v8009_v47, %s7473_s14  ;;  %v1404_v63 = vpop.permute.xlu0 %1403  ;;  %v1865_v61 = vld [vmem:[#allocation4 + $0x80] sm:$0xff]  ;;  %7107 = vmatprep.subr.bf16.mxu1 %v10545_v60  ;;  %v7111_v47 = vpack.c.bf16 %v2048_v17, %v2047_v28 }
 0x1a8   : > { %1494 = vst.msk [vmem:[#allocation4 + $0xd0] sm:$0xff] %vm1213_vm9, %v1404_v63  ;;  %2259 = vmatmul.mubr.f32.gmra.mrb[4].mxu1 %v1859_v35  ;;  %v1864_v56 = vld [vmem:[#allocation4 + $0x78] sm:$0xff] }
 0x1a9   : > { %1602 = vrot.lane.b32.xlu1 %v8012_v48, %s7473_s14  ;;  %v1128_v52 = vpop.permute.xlu1 %1127  ;;  %2263 = vmatprep.mubr.f32.mxu1 %v1865_v61  ;;  %v2049_v48 = vld [vmem:[%s10500_s3 + $0x140] sm:$0xff] }
 0x1aa   : > { %1219 = vst.msk [vmem:[#allocation4 + $0xc8] sm:$0xff] %vm1213_vm9, %v1128_v52  ;;  %1777 = vst.msk [vmem:[#allocation4 + $0x40] sm:$0xff] %vm1213_vm9, %v1128_v52  ;;  %7109 = vmatpush1.bf16.msra.mxu1 %v7108_v27  ;;  %v2064_v52 = vld [vmem:[%s10500_s3 + $0x1b8] sm:$0xff] }
 0x1ab   : > { %1604 = vrot.lane.b32.xlu0 %v8055_v5, %s7473_s14  ;;  %v1406_v31 = vpop.permute.xlu0 %1405  ;;  %v1870_v22 = vld [vmem:[#allocation4 + $0xa8] sm:$0xff]  ;;  %7110 = vmatprep.subr.bf16.mxu1 %v10545_v60  ;;  %v7114_v5 = vpack.c.bf16 %v2050_v18, %v2049_v48 }
 0x1ac   : > { %1495 = vst.msk [vmem:[#allocation4 + $0xf8] sm:$0xff] %vm1213_vm9, %v1406_v31  ;;  %2264 = vmatmul.mubr.f32.gmra.mrb[6].mxu1 %v1864_v56  ;;  %v10547_v31 = vld [vmem:[#allocation10_spill] sm:$0xff]  ;;  %v2065_v56 = vld [vmem:[%s10500_s3 + $0x1c0] sm:$0xff] }
 0x1ad   : > { %1606 = vrot.lane.b32.xlu1 %v8058_v6, %s7473_s14  ;;  %v1130_v7 = vpop.permute.xlu1 %1129  ;;  %2268 = vmatprep.mubr.f32.mxu1 %v1870_v22  ;;  %v2051_v6 = vld [vmem:[%s10500_s3 + $0x150] sm:$0xff]  ;;  %v2066_v22 = vld [vmem:[%s10500_s3 + $0x1c8] sm:$0xff] }
 0x1ae   : > { %1220 = vst.msk [vmem:[#allocation4 + $0xf0] sm:$0xff] %vm1213_vm9, %v1130_v7  ;;  %1778 = vst.msk [vmem:[#allocation4 + $0x68] sm:$0xff] %vm1213_vm9, %v1130_v7  ;;  %7112 = vmatpush1.bf16.msra.mxu1 %v7111_v47  ;;  %v1869_v43 = vld [vmem:[#allocation4 + $0xa0] sm:$0xff]  ;;  %v10548_v7 = vld [vmem:[#allocation11_spill] sm:$0xff] }
 0x1af   : > { %1608 = vrot.lane.b32.xlu0 %v8110_v32, %s7473_s14  ;;  %v1408_v10 = vpop.permute.xlu0 %1407  ;;  %v1875_v19 = vld [vmem:[#allocation4 + $0xd0] sm:$0xff]  ;;  %7113 = vmatprep.subr.bf16.mxu1 %v10545_v60  ;;  %v7117_v32 = vpack.c.bf16 %v2052_v24, %v2051_v6 }
 0x1b0   : > { %1496 = vst.msk [vmem:[#allocation4 + $0x120] sm:$0xff] %vm1213_vm9, %v1408_v10  ;;  %2269 = vmatmul.mubr.f32.gmra.mrb[8].mxu1 %v1869_v43  ;;  %v10549_v43 = vld [vmem:[#allocation12_spill] sm:$0xff] }
 0x1b1   : > { %1610 = vrot.lane.b32.xlu1 %v8113_v34, %s7473_s14  ;;  %v1132_v54 = vpop.permute.xlu1 %1131  ;;  %2273 = vmatprep.mubr.f32.mxu1 %v1875_v19  ;;  %v2053_v34 = vld [vmem:[%s10500_s3 + $0x160] sm:$0xff]  ;;  %v1874_v23 = vld [vmem:[#allocation4 + $0xc8] sm:$0xff]  ;;  %v10550_v19 = vld [vmem:[#allocation13_spill] sm:$0xff] }
 0x1b2   : > { %1221 = vst.msk [vmem:[#allocation4 + $0x118] sm:$0xff] %vm1213_vm9, %v1132_v54  ;;  %1779 = vst.msk [vmem:[#allocation4 + $0x90] sm:$0xff] %vm1213_vm9, %v1132_v54  ;;  %7115 = vmatpush1.bf16.msra.mxu1 %v7114_v5  ;;  %v7138_v54 = vpack.c.bf16 %v2066_v22, %v2065_v56 }
 0x1b3   : > { %1612 = vrot.lane.b32.xlu0 %v8160_v1, %s7473_s14  ;;  %v1410_v51 = vpop.permute.xlu0 %1409  ;;  %v1880_v2 = vld [vmem:[#allocation4 + $0xf8] sm:$0xff]  ;;  %7116 = vmatprep.subr.bf16.mxu1 %v10545_v60  ;;  %v7120_v1 = vpack.c.bf16 %v2054_v55, %v2053_v34  ;;  %v2068_v34 = vld [vmem:[%s10500_s3 + $0x1d8] sm:$0xff] }
 0x1b4   : > { %1497 = vst.msk [vmem:[#allocation4 + $0x148] sm:$0xff] %vm1213_vm9, %v1410_v51  ;;  %2274 = vmatmul.mubr.f32.gmra.mrb[10].mxu1 %v1874_v23 }
 0x1b5   : > { %1614 = vrot.lane.b32.xlu1 %v8166_v3, %s7473_s14  ;;  %2278 = vmatprep.mubr.f32.mxu1 %v1880_v2  ;;  %v2055_v3 = vld [vmem:[%s10500_s3 + $0x170] sm:$0xff]  ;;  %v1879_v36 = vld [vmem:[#allocation4 + $0xf0] sm:$0xff] }
 0x1b6   : > { %v1134_v37 = vpop.permute.xlu1 %1133  ;;  %7118 = vmatpush1.bf16.msra.mxu1 %v7117_v32  ;;  %v2067_v32 = vld [vmem:[%s10500_s3 + $0x1d0] sm:$0xff] }
 0x1b7   : > { %1222 = vst.msk [vmem:[#allocation4 + $0x140] sm:$0xff] %vm1213_vm9, %v1134_v37  ;;  %1780 = vst.msk [vmem:[#allocation4 + $0xb8] sm:$0xff] %vm1213_vm9, %v1134_v37  ;;  %1616 = vrot.lane.b32.xlu0 %v8214_v29, %s7473_s14  ;;  %v1412_v38 = vpop.permute.xlu0 %1411  ;;  %v1885_v33 = vld [vmem:[#allocation4 + $0x120] sm:$0xff]  ;;  %7119 = vmatprep.subr.bf16.mxu1 %v10545_v60  ;;  %v7123_v29 = vpack.c.bf16 %v2056_v53, %v2055_v3  ;;  %v7141_v2 = vpack.c.bf16 %v2068_v34, %v2067_v32  ;;  %v10552_v3 = vld [vmem:[#allocation15_spill] sm:$0xff] }
 0x1b8   : > { %1498 = vst.msk [vmem:[#allocation4 + $0x170] sm:$0xff] %vm1213_vm9, %v1412_v38  ;;  %2279 = vmatmul.mubr.f32.gmra.mrb[12].mxu1 %v1879_v36  ;;  %v2069_v53 = vld [vmem:[%s10500_s3 + $0x1e0] sm:$0xff]  ;;  %v2070_v38 = vld [vmem:[%s10500_s3 + $0x1e8] sm:$0xff] }
 0x1b9   : > { %1618 = vrot.lane.b32.xlu1 %v8217_v30, %s7473_s14  ;;  %2283 = vmatprep.mubr.f32.mxu1 %v1885_v33  ;;  %v2057_v30 = vld [vmem:[%s10500_s3 + $0x180] sm:$0xff]  ;;  %v1884_v15 = vld [vmem:[#allocation4 + $0x118] sm:$0xff] }
 0x1ba   : > { %v1136_v41 = vpop.permute.xlu1 %1135  ;;  %7121 = vmatpush1.bf16.msra.mxu1 %v7120_v1  ;;  %v10551_v1 = vld [vmem:[#allocation14_spill] sm:$0xff] }
 0x1bb   : > { %1223 = vst.msk [vmem:[#allocation4 + $0x168] sm:$0xff] %vm1213_vm9, %v1136_v41  ;;  %1781 = vst.msk [vmem:[#allocation4 + $0xe0] sm:$0xff] %vm1213_vm9, %v1136_v41  ;;  %1620 = vrot.lane.b32.xlu0 %v8264_v0, %s7473_s14  ;;  %v1414_v8 = vpop.permute.xlu0 %1413  ;;  %v1890_v12 = vld [vmem:[#allocation4 + $0x148] sm:$0xff]  ;;  %7122 = vmatprep.subr.bf16.mxu1 %v10545_v60  ;;  %v7126_v0 = vpack.c.bf16 %v2058_v59, %v2057_v30  ;;  %v7144_v30 = vpack.c.bf16 %v2070_v38, %v2069_v53  ;;  %v10553_v59 = vld [vmem:[#allocation16_spill] sm:$0xff] }
 0x1bc   : > { %1499 = vst.msk [vmem:[#allocation4 + $0x198] sm:$0xff] %vm1213_vm9, %v1414_v8  ;;  %2284 = vmatmul.mubr.f32.gmra.mrb[14].mxu1 %v1884_v15  ;;  %v2071_v8 = vld [vmem:[%s10500_s3 + $0x1f0] sm:$0xff] }
 0x1bd   : > { %1622 = vrot.lane.b32.xlu1 %v8267_v4, %s7473_s14  ;;  %2288 = vmatprep.mubr.f32.mxu1 %v1890_v12  ;;  %v2059_v4 = vld [vmem:[%s10500_s3 + $0x190] sm:$0xff] }
 0x1be   : > { %v1138_v16 = vpop.permute.xlu1 %1137  ;;  %7124 = vmatpush1.bf16.msra.mxu1 %v7123_v29  ;;  %v1889_v57 = vld [vmem:[#allocation4 + $0x140] sm:$0xff] }
 0x1bf   : > { %1224 = vst.msk [vmem:[#allocation4 + $0x190] sm:$0xff] %vm1213_vm9, %v1138_v16  ;;  %1782 = vst.msk [vmem:[#allocation4 + $0x108] sm:$0xff] %vm1213_vm9, %v1138_v16  ;;  %1624 = vrot.lane.b32.xlu0 %v8315_v44, %s7473_s14  ;;  %v1416_v39 = vpop.permute.xlu0 %1415  ;;  %v1895_v14 = vld [vmem:[#allocation4 + $0x170] sm:$0xff]  ;;  %7125 = vmatprep.subr.bf16.mxu1 %v10545_v60  ;;  %v7129_v44 = vpack.c.bf16 %v2060_v11, %v2059_v4  ;;  %v2072_v16 = vld [vmem:[%s10500_s3 + $0x1f8] sm:$0xff] }
 0x1c0   : > { %1500 = vst.msk [vmem:[#allocation4 + $0x1c0] sm:$0xff] %vm1213_vm9, %v1416_v39  ;;  %2289 = vmatmul.mubr.f32.gmra.mrb[16].mxu1 %v1889_v57  ;;  %v10554_v11 = vld [vmem:[#allocation17_spill] sm:$0xff] }
 0x1c1   : > { %1626 = vrot.lane.b32.xlu1 %v8318_v45, %s7473_s14  ;;  %2293 = vmatprep.mubr.f32.mxu1 %v1895_v14  ;;  %v2061_v45 = vld [vmem:[%s10500_s3 + $0x1a0] sm:$0xff] }
 0x1c2   : > { %v1140_v13 = vpop.permute.xlu1 %1139  ;;  %7127 = vmatpush1.bf16.msra.mxu1 %v7126_v0  ;;  %v1894_v17 = vld [vmem:[#allocation4 + $0x168] sm:$0xff] }
 0x1c3   : > { %1225 = vst.msk [vmem:[#allocation4 + $0x1b8] sm:$0xff] %vm1213_vm9, %v1140_v13  ;;  %1783 = vst.msk [vmem:[#allocation4 + $0x130] sm:$0xff] %vm1213_vm9, %v1140_v13  ;;  %1628 = vrot.lane.b32.xlu0 %v8370_v25, %s7473_s14  ;;  %v1900_v63 = vld [vmem:[#allocation4 + $0x198] sm:$0xff]  ;;  %7128 = vmatprep.subr.bf16.mxu1 %v10545_v60  ;;  %v7132_v25 = vpack.c.bf16 %v2062_v9, %v2061_v45 }
 0x1c4   : > { %2294 = vmatmul.mubr.f32.gmra.mrb[18].mxu1 %v1894_v17 }
 0x1c5   : > { %1630 = vrot.lane.b32.xlu1 %v8373_v26, %s7473_s14  ;;  %v1418_v27 = vpop.permute.xlu0 %1417  ;;  %2298 = vmatprep.mubr.f32.mxu1 %v1900_v63  ;;  %v2063_v26 = vld [vmem:[%s10500_s3 + $0x1b0] sm:$0xff] }
 0x1c6   : > { %v1142_v28 = vpop.permute.xlu1 %1141  ;;  %1501 = vst.msk [vmem:[#allocation4 + $0x1e8] sm:$0xff] %vm1213_vm9, %v1418_v27  ;;  %7130 = vmatpush1.bf16.msra.mxu1 %v7129_v44  ;;  %v1899_v47 = vld [vmem:[#allocation4 + $0x190] sm:$0xff] }
 0x1c7   : > { %1226 = vst.msk [vmem:[#allocation4 + $0x1e0] sm:$0xff] %vm1213_vm9, %v1142_v28  ;;  %1784 = vst.msk [vmem:[#allocation4 + $0x158] sm:$0xff] %vm1213_vm9, %v1142_v28  ;;  %1632 = vrot.lane.b32.xlu0 %v8415_v20, %s7473_s14  ;;  %v1905_v48 = vld [vmem:[#allocation4 + $0x1c0] sm:$0xff]  ;;  %7131 = vmatprep.subr.bf16.mxu1 %v10545_v60 }
 0x1c8   : > { %2299 = vmatmul.mubr.f32.gmra.mrb[20].mxu1 %v1899_v47  ;;  %v10546_v20 = vld [vmem:[#allocation9_spill] sm:$0xff] }
 0x1c9   : > { %1634 = vrot.lane.b32.xlu1 %v8418_v62, %s7473_s14  ;;  %v1420_v35 = vpop.permute.xlu0 %1419  ;;  %2303 = vmatprep.mubr.f32.mxu1 %v1905_v48  ;;  %v7135_v62 = vpack.c.bf16 %v2064_v52, %v2063_v26 }
 0x1ca   : > { %v1144_v61 = vpop.permute.xlu1 %1143  ;;  %v8959_v18 = vld [vmem:[#allocation4 + $0x130] sm:$0xff]  ;;  %1502 = vst.msk [vmem:[#allocation4 + $0x210] sm:$0xff] %vm1213_vm9, %v1420_v35  ;;  %7133 = vmatpush1.bf16.msra.mxu1 %v7132_v25  ;;  %v1904_v24 = vld [vmem:[#allocation4 + $0x1b8] sm:$0xff] }
 0x1cb   : > { %1227 = vst.msk [vmem:[#allocation4 + $0x208] sm:$0xff] %vm1213_vm9, %v1144_v61  ;;  %1785 = vst.msk [vmem:[#allocation4 + $0x180] sm:$0xff] %vm1213_vm9, %v1144_v61  ;;  %1636 = vrot.lane.b32.xlu0 %v10547_v31, %s7473_s14  ;;  %7134 = vmatprep.subr.bf16.mxu1 %v10545_v60 }
 0x1cc   : > { %4806 = vst.msk [vmem:[#allocation4 + $0x130] sm:$0xff] %vm869_vm6, %v10546_v20  ;;  %2304 = vmatmul.mubr.f32.gmra.mrb[22].mxu1 %v1904_v24 }
 0x1cd   : > { %1638 = vrot.lane.b32.xlu1 %v10548_v7, %s7473_s14  ;;  %v1422_v5 = vpop.permute.xlu0 %1421  ;;  %v1910_v10 = vld [vmem:[#allocation4 + $0x1e8] sm:$0xff] }
 0x1ce   : > { %1503 = vst.msk [vmem:[#allocation4 + $0x238] sm:$0xff] %vm1213_vm9, %v1422_v5  ;;  %2308 = vmatprep.mubr.f32.mxu1 %v1910_v10  ;;  %7136 = vmatpush1.bf16.msra.mxu1 %v7135_v62  ;;  %v1909_v37 = vld [vmem:[#allocation4 + $0x1e0] sm:$0xff] }
 0x1cf   : > { %v1146_v6 = vpop.permute.xlu1 %1145  ;;  %1640 = vrot.lane.b32.xlu0 %v10549_v43, %s7473_s14  ;;  %7137 = vmatprep.subr.bf16.mxu1 %v10545_v60 }
 0x1d0   : > { %1228 = vst.msk [vmem:[#allocation4 + $0x230] sm:$0xff] %vm1213_vm9, %v1146_v6  ;;  %1786 = vst.msk [vmem:[#allocation4 + $0x1a8] sm:$0xff] %vm1213_vm9, %v1146_v6  ;;  %2309 = vmatmul.mubr.f32.gmra.mrb[24].mxu1 %v1909_v37 }
 0x1d1   : > { %1642 = vrot.lane.b32.xlu1 %v10550_v19, %s7473_s14  ;;  %v1424_v55 = vpop.permute.xlu0 %1423  ;;  %v1915_v23 = vld [vmem:[#allocation4 + $0x210] sm:$0xff] }
 0x1d2   : > { %1504 = vst.msk [vmem:[#allocation4 + $0x260] sm:$0xff] %vm1213_vm9, %v1424_v55  ;;  %2313 = vmatprep.mubr.f32.mxu1 %v1915_v23  ;;  %7139 = vmatpush1.bf16.msra.mxu1 %v7138_v54  ;;  %v1914_v33 = vld [vmem:[#allocation4 + $0x208] sm:$0xff] }
 0x1d3   : > { %v1148_v51 = vpop.permute.xlu1 %1147  ;;  %1644 = vrot.lane.b32.xlu0 %v10551_v1, %s7473_s14  ;;  %7140 = vmatprep.subr.bf16.mxu1 %v10545_v60 }
 0x1d4   : > { %1229 = vst.msk [vmem:[#allocation4 + $0x258] sm:$0xff] %vm1213_vm9, %v1148_v51  ;;  %1787 = vst.msk [vmem:[#allocation4 + $0x1d0] sm:$0xff] %vm1213_vm9, %v1148_v51  ;;  %2314 = vmatmul.mubr.f32.gmra.mrb[26].mxu1 %v1914_v33 }
 0x1d5   : > { %1646 = vrot.lane.b32.xlu1 %v10552_v3, %s7473_s14  ;;  %v1426_v41 = vpop.permute.xlu0 %1425  ;;  %v1920_v29 = vld [vmem:[#allocation4 + $0x238] sm:$0xff] }
 0x1d6   : > { %1505 = vst.msk [vmem:[#allocation4 + $0x288] sm:$0xff] %vm1213_vm9, %v1426_v41  ;;  %2318 = vmatprep.mubr.f32.mxu1 %v1920_v29  ;;  %7142 = vmatpush1.bf16.msra.mxu1 %v7141_v2 }
 0x1d7   : > { %v1150_v36 = vpop.permute.xlu1 %1149  ;;  %1648 = vrot.lane.b32.xlu0 %v8621_v49, %s7473_s14  ;;  %v1919_v0 = vld [vmem:[#allocation4 + $0x230] sm:$0xff]  ;;  %7143 = vmatprep.subr.bf16.mxu1 %v10545_v60  ;;  %v7147_v49 = vpack.c.bf16 %v2072_v16, %v2071_v8 }
 0x1d8   : > { %1230 = vst.msk [vmem:[#allocation4 + $0x280] sm:$0xff] %vm1213_vm9, %v1150_v36  ;;  %1788 = vst.msk [vmem:[#allocation4 + $0x1f8] sm:$0xff] %vm1213_vm9, %v1150_v36  ;;  %2319 = vmatmul.mubr.f32.gmra.mrb[28].mxu1 %v1919_v0 }
 0x1d9   : > { %1650 = vrot.lane.b32.xlu1 %v10553_v59, %s7473_s14  ;;  %v1428_v15 = vpop.permute.xlu0 %1427  ;;  %v1925_v4 = vld [vmem:[#allocation4 + $0x260] sm:$0xff] }
 0x1da   : > { %1506 = vst.msk [vmem:[#allocation4 + $0x2b0] sm:$0xff] %vm1213_vm9, %v1428_v15  ;;  %2323 = vmatprep.mubr.f32.mxu1 %v1925_v4  ;;  %7145 = vmatpush1.bf16.msra.mxu1 %v7144_v30 }
 0x1db   : > { %v1152_v12 = vpop.permute.xlu1 %1151  ;;  %1764 = vrot.lane.b32.xlu0 %v8711_v40, %s7473_s14  ;;  %v1924_v57 = vld [vmem:[#allocation4 + $0x258] sm:$0xff]  ;;  %7146 = vmatprep.subr.bf16.mxu1 %v10545_v60  ;;  %v10555_v40 = vld [vmem:[#allocation18_spill] sm:$0xff]  ;;  %v10556_v60 = vld [vmem:[#allocation5_spill] sm:$0xff] }
 0x1dc   : > { %1231 = vst.msk [vmem:[#allocation4 + $0x2a8] sm:$0xff] %vm1213_vm9, %v1152_v12  ;;  %1789 = vst.msk [vmem:[#allocation4 + $0x220] sm:$0xff] %vm1213_vm9, %v1152_v12  ;;  %2324 = vmatmul.mubr.f32.gmra.mrb[30].mxu1 %v1924_v57 }
 0x1dd   : > { %1652 = vrot.lane.b32.xlu1 %v10554_v11, %s7473_s14  ;;  %v1430_v39 = vpop.permute.xlu0 %1429  ;;  %v1930_v14 = vld [vmem:[#allocation4 + $0x288] sm:$0xff] }
 0x1de   : > { %1507 = vst.msk [vmem:[#allocation4 + $0x2d8] sm:$0xff] %vm1213_vm9, %v1430_v39  ;;  %2328 = vmatprep.mubr.f32.mxu1 %v1930_v14  ;;  %7148 = vmatpush1.bf16.msra.mxu1 %v7147_v49 }
 0x1df   : > { %v1154_v13 = vpop.permute.xlu1 %1153  ;;  %1766 = vrot.lane.b32.xlu0 %v8721_v50, %s7473_s14  ;;  %v1929_v9 = vld [vmem:[#allocation4 + $0x280] sm:$0xff]  ;;  %7341 = vmatprep.subr.bf16.mxu1 %v10556_v60 }
 0x1e0   : > { %1232 = vst.msk [vmem:[#allocation4 + $0x2d0] sm:$0xff] %vm1213_vm9, %v1154_v13  ;;  %1790 = vst.msk [vmem:[#allocation4 + $0x248] sm:$0xff] %vm1213_vm9, %v1154_v13  ;;  %2329 = vmatmul.mubr.f32.gmra.mrb[32].mxu1 %v1929_v9 }
 0x1e1   : > { %1654 = vrot.lane.b32.xlu1 %v10555_v40, %s7473_s14  ;;  %v1432_v44 = vpop.permute.xlu0 %1431  ;;  %v1935_v27 = vld [vmem:[#allocation4 + $0x2b0] sm:$0xff] }
 0x1e2   : > { %1508 = vst.msk [vmem:[#allocation4 + $0x300] sm:$0xff] %vm1213_vm9, %v1432_v44  ;;  %2333 = vmatprep.mubr.f32.mxu1 %v1935_v27 }
 0x1e3   : > { %v1156_v45 = vpop.permute.xlu1 %1155  ;;  %1768 = vrot.lane.b32.xlu0 %v8805_v58, %s7473_s14  ;;  %v1934_v17 = vld [vmem:[#allocation4 + $0x2a8] sm:$0xff] }
 0x1e4   : > { %1233 = vst.msk [vmem:[#allocation4 + $0x2f8] sm:$0xff] %vm1213_vm9, %v1156_v45  ;;  %1791 = vst.msk [vmem:[#allocation4 + $0x270] sm:$0xff] %vm1213_vm9, %v1156_v45  ;;  %2334 = vmatmul.mubr.f32.gmra.mrb[34].mxu1 %v1934_v17 }
 0x1e5   : > { %1656 = vrot.lane.b32.xlu1 %v8705_v42, %s7473_s14  ;;  %v1434_v50 = vpop.permute.xlu0 %1433  ;;  %v1940_v63 = vld [vmem:[#allocation4 + $0x2d8] sm:$0xff] }
 0x1e6   : > { %1509 = vst.msk [vmem:[#allocation4 + $0x328] sm:$0xff] %vm1213_vm9, %v1434_v50  ;;  %2338 = vmatprep.mubr.f32.mxu1 %v1940_v63 }
 0x1e7   : > { %v1158_v28 = vpop.permute.xlu1 %1157  ;;  %1770 = vrot.lane.b32.xlu0 %v8818_v21, %s7473_s14  ;;  %v1939_v25 = vld [vmem:[#allocation4 + $0x2d0] sm:$0xff] }
 0x1e8   : > { %1234 = vst.msk [vmem:[#allocation4 + $0x320] sm:$0xff] %vm1213_vm9, %v1158_v28  ;;  %1792 = vst.msk [vmem:[#allocation4 + $0x298] sm:$0xff] %vm1213_vm9, %v1158_v28  ;;  %2339 = vmatmul.mubr.f32.gmra.mrb[36].mxu1 %v1939_v25 }
 0x1e9   : > { %1658 = vrot.lane.b32.xlu1 %v8708_v46, %s7473_s14  ;;  %v1436_v42 = vpop.permute.xlu0 %1435  ;;  %v1945_v26 = vld [vmem:[#allocation4 + $0x300] sm:$0xff] }
 0x1ea   : > { %1510 = vst.msk [vmem:[#allocation4 + $0x350] sm:$0xff] %vm1213_vm9, %v1436_v42  ;;  %2343 = vmatprep.mubr.f32.mxu1 %v1945_v26 }
 0x1eb   : > { %v1160_v58 = vpop.permute.xlu1 %1159  ;;  %v1944_v61 = vld [vmem:[#allocation4 + $0x2f8] sm:$0xff] }
 0x1ec   : > { %1235 = vst.msk [vmem:[#allocation4 + $0x348] sm:$0xff] %vm1213_vm9, %v1160_v58  ;;  %1793 = vst.msk [vmem:[#allocation4 + $0x2c0] sm:$0xff] %vm1213_vm9, %v1160_v58  ;;  %2344 = vmatmul.mubr.f32.gmra.mrb[38].mxu1 %v1944_v61  ;;  %v1852_v61 = vld [vmem:[#allocation4 + $0x18] sm:$0xff] }
 0x1ed   : > { %v1438_v52 = vpop.permute.xlu0 %1437  ;;  %v1950_v47 = vld [vmem:[#allocation4 + $0x328] sm:$0xff] }
 0x1ee   : > { %1511 = vst.msk [vmem:[#allocation4 + $0x378] sm:$0xff] %vm1213_vm9, %v1438_v52  ;;  %2348 = vmatprep.mubr.f32.mxu1 %v1950_v47 }
 0x1ef   : > { %v1162_v35 = vpop.permute.xlu1 %1161  ;;  %v1949_v48 = vld [vmem:[#allocation4 + $0x320] sm:$0xff] }
 0x1f0   : > { %1236 = vst.msk [vmem:[#allocation4 + $0x370] sm:$0xff] %vm1213_vm9, %v1162_v35  ;;  %1794 = vst.msk [vmem:[#allocation4 + $0x2e8] sm:$0xff] %vm1213_vm9, %v1162_v35  ;;  %2349 = vmatmul.mubr.f32.gmra.mrb[40].mxu1 %v1949_v48 }
 0x1f1   : > { %v1440_v46 = vpop.permute.xlu0 %1439  ;;  %v1955_v62 = vld [vmem:[#allocation4 + $0x350] sm:$0xff] }
 0x1f2   : > { %1512 = vst.msk [vmem:[#allocation4 + $0x3a0] sm:$0xff] %vm1213_vm9, %v1440_v46  ;;  %2353 = vmatprep.mubr.f32.mxu1 %v1955_v62 }
 0x1f3   : > { %v1164_v21 = vpop.permute.xlu1 %1163  ;;  %v1954_v56 = vld [vmem:[#allocation4 + $0x348] sm:$0xff] }
 0x1f4   : > { %1237 = vst.msk [vmem:[#allocation4 + $0x398] sm:$0xff] %vm1213_vm9, %v1164_v21  ;;  %1795 = vst.msk [vmem:[#allocation4 + $0x310] sm:$0xff] %vm1213_vm9, %v1164_v21  ;;  %2354 = vmatmul.mubr.f32.gmra.mrb[42].mxu1 %v1954_v56 }
 0x1f5   : > { %v1442_v31 = vpop.permute.xlu0 %1441  ;;  %v1960_v22 = vld [vmem:[#allocation4 + $0x378] sm:$0xff] }
 0x1f6   : > { %1513 = vst.msk [vmem:[#allocation4 + $0x3c8] sm:$0xff] %vm1213_vm9, %v1442_v31  ;;  %2358 = vmatprep.mubr.f32.mxu1 %v1960_v22  ;;  %v1857_v31 = vld [vmem:[#allocation4 + $0x40] sm:$0xff] }
 0x1f7   : > { %v1166_v7 = vpop.permute.xlu1 %1165  ;;  %v1959_v24 = vld [vmem:[#allocation4 + $0x370] sm:$0xff] }
 0x1f8   : > { %1238 = vst.msk [vmem:[#allocation4 + $0x3c0] sm:$0xff] %vm1213_vm9, %v1166_v7  ;;  %1796 = vst.msk [vmem:[#allocation4 + $0x338] sm:$0xff] %vm1213_vm9, %v1166_v7  ;;  %2359 = vmatmul.mubr.f32.gmra.mrb[44].mxu1 %v1959_v24  ;;  %v10557_v7 = vld [vmem:[#allocation6_spill] sm:$0xff] }
 0x1f9   : > { %v1444_v5 = vpop.permute.xlu0 %1443  ;;  %v1965_v10 = vld [vmem:[#allocation4 + $0x3a0] sm:$0xff] }
 0x1fa   : > { %1514 = vst.msk [vmem:[#allocation4 + $0x3f0] sm:$0xff] %vm1213_vm9, %v1444_v5  ;;  %2363 = vmatprep.mubr.f32.mxu1 %v1965_v10  ;;  %v1862_v10 = vld [vmem:[#allocation4 + $0x68] sm:$0xff] }
 0x1fb   : > { %v1168_v6 = vpop.permute.xlu1 %1167  ;;  %v1964_v19 = vld [vmem:[#allocation4 + $0x398] sm:$0xff] }
 0x1fc   : > { %1239 = vst.msk [vmem:[#allocation4 + $0x3e8] sm:$0xff] %vm1213_vm9, %v1168_v6  ;;  %1797 = vst.msk [vmem:[#allocation4 + $0x360] sm:$0xff] %vm1213_vm9, %v1168_v6  ;;  %2364 = vmatmul.mubr.f32.gmra.mrb[46].mxu1 %v1964_v19 }
 0x1fd   : > { %v1446_v54 = vpop.permute.xlu0 %1445  ;;  %v1970_v32 = vld [vmem:[#allocation4 + $0x3c8] sm:$0xff] }
 0x1fe   : > { %1515 = vst.msk [vmem:[#allocation4 + $0x418] sm:$0xff] %vm1213_vm9, %v1446_v54  ;;  %2368 = vmatprep.mubr.f32.mxu1 %v1970_v32  ;;  %v10558_v54 = vld [vmem:[#allocation7_spill] sm:$0xff] }
 0x1ff   : > { %v1170_v43 = vpop.permute.xlu1 %1169  ;;  %v1969_v51 = vld [vmem:[#allocation4 + $0x3c0] sm:$0xff] }
 0x200   : > { %1240 = vst.msk [vmem:[#allocation4 + $0x410] sm:$0xff] %vm1213_vm9, %v1170_v43  ;;  %1798 = vst.msk [vmem:[#allocation4 + $0x388] sm:$0xff] %vm1213_vm9, %v1170_v43  ;;  %2369 = vmatmul.mubr.f32.gmra.mrb[48].mxu1 %v1969_v51 }
 0x201   : > { %v1448_v34 = vpop.permute.xlu0 %1447  ;;  %v1975_v37 = vld [vmem:[#allocation4 + $0x3f0] sm:$0xff] }
 0x202   : > { %1516 = vst.msk [vmem:[#allocation4 + $0x440] sm:$0xff] %vm1213_vm9, %v1448_v34  ;;  %2373 = vmatprep.mubr.f32.mxu1 %v1975_v37  ;;  %v10559_v37 = vld [vmem:[#allocation8_spill] sm:$0xff] }
 0x203   : > { %v1172_v55 = vpop.permute.xlu1 %1171  ;;  %v1974_v1 = vld [vmem:[#allocation4 + $0x3e8] sm:$0xff] }
 0x204   : > { %1241 = vst.msk [vmem:[#allocation4 + $0x438] sm:$0xff] %vm1213_vm9, %v1172_v55  ;;  %1799 = vst.msk [vmem:[#allocation4 + $0x3b0] sm:$0xff] %vm1213_vm9, %v1172_v55  ;;  %2374 = vmatmul.mubr.f32.gmra.mrb[50].mxu1 %v1974_v1  ;;  %v1867_v55 = vld [vmem:[#allocation4 + $0x90] sm:$0xff] }
 0x205   : > { %v1450_v23 = vpop.permute.xlu0 %1449  ;;  %v1980_v3 = vld [vmem:[#allocation4 + $0x418] sm:$0xff] }
 0x206   : > { %1517 = vst.msk [vmem:[#allocation4 + $0x468] sm:$0xff] %vm1213_vm9, %v1450_v23  ;;  %2378 = vmatprep.mubr.f32.mxu1 %v1980_v3 }
 0x207   : > { %v1174_v2 = vpop.permute.xlu1 %1173  ;;  %v9073_v53 = vpop.f32.mrb[32].mxu0  ;;  %v1979_v33 = vld [vmem:[#allocation4 + $0x410] sm:$0xff] }
 0x208   : > { %1242 = vst.msk [vmem:[#allocation4 + $0x460] sm:$0xff] %vm1213_vm9, %v1174_v2  ;;  %1800 = vst.msk [vmem:[#allocation4 + $0x3d8] sm:$0xff] %vm1213_vm9, %v1174_v2  ;;  %v9075_v38 = vpop.f32.mrb[33].mxu0  ;;  %2379 = vmatmul.mubr.f32.gmra.mrb[52].mxu1 %v1979_v33 }
 0x209   : > { %v1452_v41 = vpop.permute.xlu0 %1451  ;;  %v1985_v29 = vld [vmem:[#allocation4 + $0x440] sm:$0xff] }
 0x20a   : > { %1518 = vst.msk [vmem:[#allocation4 + $0x490] sm:$0xff] %vm1213_vm9, %v1452_v41  ;;  %2383 = vmatprep.mubr.f32.mxu1 %v1985_v29  ;;  %v1872_v41 = vld [vmem:[#allocation4 + $0xb8] sm:$0xff] }
 0x20b   : > { %v1176_v36 = vpop.permute.xlu1 %1175  ;;  %v1984_v15 = vld [vmem:[#allocation4 + $0x438] sm:$0xff] }
 0x20c   : > { %1243 = vst.msk [vmem:[#allocation4 + $0x488] sm:$0xff] %vm1213_vm9, %v1176_v36  ;;  %1801 = vst.msk [vmem:[#allocation4 + $0x400] sm:$0xff] %vm1213_vm9, %v1176_v36  ;;  %v9080_v30 = vpop.f32.mrb[34].mxu0  ;;  %2384 = vmatmul.mubr.f32.gmra.mrb[54].mxu1 %v1984_v15  ;;  %v1877_v15 = vld [vmem:[#allocation4 + $0xe0] sm:$0xff] }
 0x20d   : > { %v9082_v59 = vpop.f32.mrb[35].mxu0  ;;  %v1454_v8 = vpop.permute.xlu0 %1453  ;;  %v1990_v12 = vld [vmem:[#allocation4 + $0x468] sm:$0xff] }
 0x20e   : > { %1519 = vst.msk [vmem:[#allocation4 + $0x4b8] sm:$0xff] %vm1213_vm9, %v1454_v8  ;;  %2388 = vmatprep.mubr.f32.mxu1 %v1990_v12 }
 0x20f   : > { %v1178_v16 = vpop.permute.xlu1 %1177  ;;  %v1989_v11 = vld [vmem:[#allocation4 + $0x460] sm:$0xff] }
 0x210   : > { %1244 = vst.msk [vmem:[#allocation4 + $0x4b0] sm:$0xff] %vm1213_vm9, %v1178_v16  ;;  %1802 = vst.msk [vmem:[#allocation4 + $0x428] sm:$0xff] %vm1213_vm9, %v1178_v16  ;;  %2389 = vmatmul.mubr.f32.gmra.mrb[56].mxu1 %v1989_v11 }
 0x211   : > { %v1456_v4 = vpop.permute.xlu0 %1455  ;;  %v1995_v39 = vld [vmem:[#allocation4 + $0x490] sm:$0xff] }
 0x212   : > { %v9087_v0 = vpop.f32.mrb[36].mxu0  ;;  %1520 = vst.msk [vmem:[#allocation4 + $0x4e0] sm:$0xff] %vm1213_vm9, %v1456_v4  ;;  %2393 = vmatprep.mubr.f32.mxu1 %v1995_v39 }
 0x213   : > { %v1180_v49 = vpop.permute.xlu1 %1179  ;;  %v9092_v13 = vpop.f32.mrb[37].mxu0  ;;  %v1994_v14 = vld [vmem:[#allocation4 + $0x488] sm:$0xff] }
 0x214   : > { %1245 = vst.msk [vmem:[#allocation4 + $0x4d8] sm:$0xff] %vm1213_vm9, %v1180_v49  ;;  %1803 = vst.msk [vmem:[#allocation4 + $0x450] sm:$0xff] %vm1213_vm9, %v1180_v49  ;;  %2394 = vmatmul.mubr.f32.gmra.mrb[58].mxu1 %v1994_v14  ;;  %v1882_v14 = vld [vmem:[#allocation4 + $0x108] sm:$0xff] }
 0x215   : > { %v2000_v40 = vld [vmem:[#allocation4 + $0x4b8] sm:$0xff]  ;;  %v1597_v45 = vpop.permute.xlu0 %1596 }
 0x216   : > { %1692 = vst.msk [vmem:[#allocation4 + $0x10] sm:$0xff] %vm1213_vm9, %v1597_v45  ;;  %2398 = vmatprep.mubr.f32.mxu1 %v2000_v40 }
 0x217   : > { %v1599_v9 = vpop.permute.xlu1 %1598  ;;  %v1999_v50 = vld [vmem:[#allocation4 + $0x4b0] sm:$0xff] }
 0x218   : > { %1693 = vst.msk [vmem:[#allocation4 + $0x38] sm:$0xff] %vm1213_vm9, %v1599_v9  ;;  %2399 = vmatmul.mubr.f32.gmra.mrb[60].mxu1 %v1999_v50 }
 0x219   : > { %v9094_v57 = vpop.f32.mrb[38].mxu0  ;;  %v2005_v28 = vld [vmem:[#allocation4 + $0x4e0] sm:$0xff]  ;;  %v1601_v63 = vpop.permute.xlu0 %1600 }
 0x21a   : > { %v9096_v44 = vpop.f32.mrb[39].mxu0  ;;  %1694 = vst.msk [vmem:[#allocation4 + $0x60] sm:$0xff] %vm1213_vm9, %v1601_v63  ;;  %2403 = vmatprep.mubr.f32.mxu1 %v2005_v28 }
 0x21b   : > { %v1603_v42 = vpop.permute.xlu1 %1602  ;;  %v2004_v25 = vld [vmem:[#allocation4 + $0x4d8] sm:$0xff] }
 0x21c   : > { %1695 = vst.msk [vmem:[#allocation4 + $0x88] sm:$0xff] %vm1213_vm9, %v1603_v42  ;;  %2404 = vmatmul.mubr.f32.gmra.mrb[62].mxu1 %v2004_v25 }
 0x21d   : > { %v9100_v27 = vpop.f32.mrb[40].mxu0  ;;  %v1605_v52 = vpop.permute.xlu0 %1604  ;;  %2473 = vmatprep.mubr.f32.mxu1 %v1852_v61  ;;  %v1851_v46 = vld [vmem:[#allocation4 + $0x10] sm:$0xff]  ;;  %v1892_v61 = vld [vmem:[#allocation4 + $0x158] sm:$0xff] }
 0x21e   : > { %v9102_v17 = vpop.f32.mrb[41].mxu0  ;;  %1696 = vst.msk [vmem:[#allocation4 + $0xb0] sm:$0xff] %vm1213_vm9, %v1605_v52 }
 0x21f   : > { %v1607_v35 = vpop.permute.xlu1 %1606  ;;  %v1856_v22 = vld [vmem:[#allocation4 + $0x38] sm:$0xff] }
 0x220   : > { %1697 = vst.msk [vmem:[#allocation4 + $0xd8] sm:$0xff] %vm1213_vm9, %v1607_v35  ;;  %2474 = vmatmul.mubr.f32.vlgmr.msra.gmra.mrb[0].mxu1 %v1851_v46 }
 0x221   : > { %v1609_v48 = vpop.permute.xlu0 %1608  ;;  %7345 = vmatpush3.bf16.msra.mxu1 %v10556_v60  ;;  %2478 = vmatprep.mubr.f32.mxu1 %v1857_v31  ;;  %v1861_v43 = vld [vmem:[#allocation4 + $0x60] sm:$0xff] }
 0x222   : > { %1698 = vst.msk [vmem:[#allocation4 + $0x100] sm:$0xff] %vm1213_vm9, %v1609_v48  ;;  %7342 = vmatprep.subr.bf16.mxu1 %v10557_v7 }
 0x223   : > { %v1611_v62 = vpop.permute.xlu1 %1610  ;;  %v1866_v23 = vld [vmem:[#allocation4 + $0x88] sm:$0xff] }
 0x224   : > { %1699 = vst.msk [vmem:[#allocation4 + $0x128] sm:$0xff] %vm1213_vm9, %v1611_v62  ;;  %2479 = vmatmul.mubr.f32.gmra.mrb[2].mxu1 %v1856_v22 }
 0x225   : > { %v9106_v58 = vpop.f32.mrb[42].mxu0  ;;  %v1613_v6 = vpop.permute.xlu0 %1612  ;;  %2483 = vmatprep.mubr.f32.mxu1 %v1862_v10  ;;  %7346 = vmatpush3.bf16.msra.mxu1 %v10557_v7  ;;  %v1871_v33 = vld [vmem:[#allocation4 + $0xb0] sm:$0xff]  ;;  %v1897_v7 = vld [vmem:[#allocation4 + $0x180] sm:$0xff]  ;;  %v1902_v10 = vld [vmem:[#allocation4 + $0x1a8] sm:$0xff] }
 0x226   : > { %v9108_v26 = vpop.f32.mrb[43].mxu0  ;;  %1700 = vst.msk [vmem:[#allocation4 + $0x150] sm:$0xff] %vm1213_vm9, %v1613_v6  ;;  %7343 = vmatprep.subr.bf16.mxu1 %v10558_v54 }
 0x227   : > { %v1615_v24 = vpop.permute.xlu1 %1614  ;;  %v1876_v4 = vld [vmem:[#allocation4 + $0xd8] sm:$0xff] }
 0x228   : > { %1701 = vst.msk [vmem:[#allocation4 + $0x178] sm:$0xff] %vm1213_vm9, %v1615_v24  ;;  %2484 = vmatmul.mubr.f32.gmra.mrb[4].mxu1 %v1861_v43 }
 0x229   : > { %v1617_v32 = vpop.permute.xlu0 %1616  ;;  %2488 = vmatprep.mubr.f32.mxu1 %v1867_v55  ;;  %7347 = vmatpush3.bf16.msra.mxu1 %v10558_v54  ;;  %v1881_v45 = vld [vmem:[#allocation4 + $0x100] sm:$0xff] }
 0x22a   : > { %v9112_v47 = vpop.f32.mrb[44].mxu0  ;;  %1702 = vst.msk [vmem:[#allocation4 + $0x1a0] sm:$0xff] %vm1213_vm9, %v1617_v32  ;;  %7344 = vmatprep.subr.bf16.mxu1 %v10559_v37 }
 0x22b   : > { %v9114_v21 = vpop.f32.mrb[45].mxu0  ;;  %v1619_v34 = vpop.permute.xlu1 %1618  ;;  %v1886_v42 = vld [vmem:[#allocation4 + $0x128] sm:$0xff] }
 0x22c   : > { %1703 = vst.msk [vmem:[#allocation4 + $0x1c8] sm:$0xff] %vm1213_vm9, %v1619_v34  ;;  %2489 = vmatmul.mubr.f32.gmra.mrb[6].mxu1 %v1866_v23  ;;  %v1907_v34 = vld [vmem:[#allocation4 + $0x1d0] sm:$0xff] }
 0x22d   : > { %v1621_v1 = vpop.permute.xlu0 %1620  ;;  %2493 = vmatprep.mubr.f32.mxu1 %v1872_v41  ;;  %7348 = vmatpush3.bf16.msra.mxu1 %v10559_v37  ;;  %v1891_v48 = vld [vmem:[#allocation4 + $0x150] sm:$0xff] }
 0x22e   : > { %1704 = vst.msk [vmem:[#allocation4 + $0x1f0] sm:$0xff] %vm1213_vm9, %v1621_v1  ;;  %v1912_v1 = vld [vmem:[#allocation4 + $0x1f8] sm:$0xff] }
 0x22f   : > { %v1623_v3 = vpop.permute.xlu1 %1622  ;;  %v1896_v22 = vld [vmem:[#allocation4 + $0x178] sm:$0xff] }
 0x230   : > { %v9120_v56 = vpop.f32.mrb[46].mxu0  ;;  %1705 = vst.msk [vmem:[#allocation4 + $0x218] sm:$0xff] %vm1213_vm9, %v1623_v3  ;;  %2494 = vmatmul.mubr.f32.gmra.mrb[8].mxu1 %v1871_v33 }
 0x231   : > { %v9122_v5 = vpop.f32.mrb[47].mxu0  ;;  %v1625_v8 = vpop.permute.xlu0 %1624  ;;  %2498 = vmatprep.mubr.f32.mxu1 %v1877_v15  ;;  %v1901_v54 = vld [vmem:[#allocation4 + $0x1a0] sm:$0xff] }
 0x232   : > { %1706 = vst.msk [vmem:[#allocation4 + $0x240] sm:$0xff] %vm1213_vm9, %v1625_v8  ;;  %v1917_v8 = vld [vmem:[#allocation4 + $0x220] sm:$0xff] }
 0x233   : > { %v1627_v16 = vpop.permute.xlu1 %1626  ;;  %v1906_v55 = vld [vmem:[#allocation4 + $0x1c8] sm:$0xff] }
 0x234   : > { %1707 = vst.msk [vmem:[#allocation4 + $0x268] sm:$0xff] %vm1213_vm9, %v1627_v16  ;;  %2499 = vmatmul.mubr.f32.gmra.mrb[10].mxu1 %v1876_v4  ;;  %v1922_v4 = vld [vmem:[#allocation4 + $0x248] sm:$0xff] }
 0x235   : > { %v1629_v11 = vpop.permute.xlu0 %1628  ;;  %2503 = vmatprep.mubr.f32.mxu1 %v1882_v14  ;;  %v1911_v3 = vld [vmem:[#allocation4 + $0x1f0] sm:$0xff] }
 0x236   : > { %v9127_v60 = vpop.f32.mrb[48].mxu0  ;;  %1708 = vst.msk [vmem:[#allocation4 + $0x290] sm:$0xff] %vm1213_vm9, %v1629_v11 }
 0x237   : > { %v9130_v19 = vpop.f32.mrb[49].mxu0  ;;  %v1631_v39 = vpop.permute.xlu1 %1630  ;;  %v1916_v16 = vld [vmem:[#allocation4 + $0x218] sm:$0xff] }
 0x238   : > { %1709 = vst.msk [vmem:[#allocation4 + $0x2b8] sm:$0xff] %vm1213_vm9, %v1631_v39  ;;  %2504 = vmatmul.mubr.f32.gmra.mrb[12].mxu1 %v1881_v45  ;;  %v1927_v45 = vld [vmem:[#allocation4 + $0x270] sm:$0xff] }
 0x239   : > { %v1633_v50 = vpop.permute.xlu0 %1632  ;;  %2508 = vmatprep.mubr.f32.mxu1 %v8959_v18  ;;  %v1921_v39 = vld [vmem:[#allocation4 + $0x240] sm:$0xff] }
 0x23a   : > { %1710 = vst.msk [vmem:[#allocation4 + $0x2e0] sm:$0xff] %vm1213_vm9, %v1633_v50 }
 0x23b   : > { %v1635_v28 = vpop.permute.xlu1 %1634 }
 0x23c   : > { %1711 = vst.msk [vmem:[#allocation4 + $0x308] sm:$0xff] %vm1213_vm9, %v1635_v28  ;;  %2509 = vmatmul.mubr.f32.gmra.mrb[14].mxu1 %v1886_v42  ;;  %v1926_v28 = vld [vmem:[#allocation4 + $0x268] sm:$0xff]  ;;  %v1932_v42 = vld [vmem:[#allocation4 + $0x298] sm:$0xff] }
 0x23d   : > { %v9135_v51 = vpop.f32.mrb[50].mxu0  ;;  %v1637_v52 = vpop.permute.xlu0 %1636  ;;  %2513 = vmatprep.mubr.f32.mxu1 %v1892_v61 }
 0x23e   : > { %v9138_v2 = vpop.f32.mrb[51].mxu0  ;;  %1712 = vst.msk [vmem:[#allocation4 + $0x330] sm:$0xff] %vm1213_vm9, %v1637_v52  ;;  %v1931_v52 = vld [vmem:[#allocation4 + $0x290] sm:$0xff] }
 0x23f   : > { %v1639_v35 = vpop.permute.xlu1 %1638  ;;  %v1936_v61 = vld [vmem:[#allocation4 + $0x2b8] sm:$0xff] }
 0x240   : > { %1713 = vst.msk [vmem:[#allocation4 + $0x358] sm:$0xff] %vm1213_vm9, %v1639_v35  ;;  %2514 = vmatmul.mubr.f32.gmra.mrb[16].mxu1 %v1891_v48  ;;  %v1937_v35 = vld [vmem:[#allocation4 + $0x2c0] sm:$0xff]  ;;  %v1942_v48 = vld [vmem:[#allocation4 + $0x2e8] sm:$0xff] }
 0x241   : > { %v1641_v18 = vpop.permute.xlu0 %1640  ;;  %2518 = vmatprep.mubr.f32.mxu1 %v1897_v7 }
 0x242   : > { %1714 = vst.msk [vmem:[#allocation4 + $0x380] sm:$0xff] %vm1213_vm9, %v1641_v18  ;;  %v1941_v18 = vld [vmem:[#allocation4 + $0x2e0] sm:$0xff] }
 0x243   : > { %v1643_v31 = vpop.permute.xlu1 %1642  ;;  %v1946_v7 = vld [vmem:[#allocation4 + $0x308] sm:$0xff] }
 0x244   : > { %1715 = vst.msk [vmem:[#allocation4 + $0x3a8] sm:$0xff] %vm1213_vm9, %v1643_v31  ;;  %2519 = vmatmul.mubr.f32.gmra.mrb[18].mxu1 %v1896_v22  ;;  %v1947_v31 = vld [vmem:[#allocation4 + $0x310] sm:$0xff]  ;;  %v1952_v22 = vld [vmem:[#allocation4 + $0x338] sm:$0xff] }
 0x245   : > { %v9143_v36 = vpop.f32.mrb[52].mxu0  ;;  %v1645_v6 = vpop.permute.xlu0 %1644  ;;  %2523 = vmatprep.mubr.f32.mxu1 %v1902_v10 }
 0x246   : > { %v9145_v29 = vpop.f32.mrb[53].mxu0  ;;  %1716 = vst.msk [vmem:[#allocation4 + $0x3d0] sm:$0xff] %vm1213_vm9, %v1645_v6  ;;  %v1951_v6 = vld [vmem:[#allocation4 + $0x330] sm:$0xff] }
 0x247   : > { %v1647_v24 = vpop.permute.xlu1 %1646  ;;  %v1956_v10 = vld [vmem:[#allocation4 + $0x358] sm:$0xff] }
 0x248   : > { %1717 = vst.msk [vmem:[#allocation4 + $0x3f8] sm:$0xff] %vm1213_vm9, %v1647_v24  ;;  %2524 = vmatmul.mubr.f32.gmra.mrb[20].mxu1 %v1901_v54  ;;  %v1957_v24 = vld [vmem:[#allocation4 + $0x360] sm:$0xff]  ;;  %v1962_v54 = vld [vmem:[#allocation4 + $0x388] sm:$0xff] }
 0x249   : > { %v1649_v43 = vpop.permute.xlu0 %1648  ;;  %2528 = vmatprep.mubr.f32.mxu1 %v1907_v34 }
 0x24a   : > { %1718 = vst.msk [vmem:[#allocation4 + $0x420] sm:$0xff] %vm1213_vm9, %v1649_v43  ;;  %v1961_v43 = vld [vmem:[#allocation4 + $0x380] sm:$0xff] }
 0x24b   : > { %v9149_v12 = vpop.f32.mrb[54].mxu0  ;;  %v1651_v32 = vpop.permute.xlu1 %1650  ;;  %v1966_v34 = vld [vmem:[#allocation4 + $0x3a8] sm:$0xff] }
 0x24c   : > { %v9151_v49 = vpop.f32.mrb[55].mxu0  ;;  %1719 = vst.msk [vmem:[#allocation4 + $0x448] sm:$0xff] %vm1213_vm9, %v1651_v32  ;;  %2529 = vmatmul.mubr.f32.gmra.mrb[22].mxu1 %v1906_v55  ;;  %v1967_v32 = vld [vmem:[#allocation4 + $0x3b0] sm:$0xff]  ;;  %v1972_v55 = vld [vmem:[#allocation4 + $0x3d8] sm:$0xff] }
 0x24d   : > { %v1765_v37 = vpop.permute.xlu0 %1764  ;;  %2533 = vmatprep.mubr.f32.mxu1 %v1912_v1 }
 0x24e   : > { %1804 = vst.msk [vmem:[#allocation4 + $0x478] sm:$0xff] %vm1213_vm9, %v1765_v37  ;;  %v1971_v37 = vld [vmem:[#allocation4 + $0x3d0] sm:$0xff] }
 0x24f   : > { %v1653_v23 = vpop.permute.xlu1 %1652  ;;  %v1976_v1 = vld [vmem:[#allocation4 + $0x3f8] sm:$0xff] }
 0x250   : > { %1720 = vst.msk [vmem:[#allocation4 + $0x470] sm:$0xff] %vm1213_vm9, %v1653_v23  ;;  %2534 = vmatmul.mubr.f32.gmra.mrb[24].mxu1 %v1911_v3  ;;  %v1977_v23 = vld [vmem:[#allocation4 + $0x400] sm:$0xff]  ;;  %v1982_v3 = vld [vmem:[#allocation4 + $0x428] sm:$0xff] }
 0x251   : > { %v1767_v41 = vpop.permute.xlu0 %1766  ;;  %2538 = vmatprep.mubr.f32.mxu1 %v1917_v8 }
 0x252   : > { %1805 = vst.msk [vmem:[#allocation4 + $0x4a0] sm:$0xff] %vm1213_vm9, %v1767_v41  ;;  %v1981_v41 = vld [vmem:[#allocation4 + $0x420] sm:$0xff] }
 0x253   : > { %v9155_v40 = vpop.f32.mrb[56].mxu0  ;;  %v1655_v33 = vpop.permute.xlu1 %1654  ;;  %v1986_v8 = vld [vmem:[#allocation4 + $0x448] sm:$0xff] }
 0x254   : > { %v9157_v9 = vpop.f32.mrb[57].mxu0  ;;  %1721 = vst.msk [vmem:[#allocation4 + $0x498] sm:$0xff] %vm1213_vm9, %v1655_v33  ;;  %2539 = vmatmul.mubr.f32.gmra.mrb[26].mxu1 %v1916_v16  ;;  %v1987_v33 = vld [vmem:[#allocation4 + $0x450] sm:$0xff] }
 0x255   : > { %v1769_v11 = vpop.permute.xlu0 %1768  ;;  %2543 = vmatprep.mubr.f32.mxu1 %v1922_v4  ;;  %v1992_v16 = vld [vmem:[#allocation4 + $0x478] sm:$0xff] }
 0x256   : > { %1806 = vst.msk [vmem:[#allocation4 + $0x4c8] sm:$0xff] %vm1213_vm9, %v1769_v11 }
 0x257   : > { %v9162_v63 = vpop.f32.mrb[58].mxu0  ;;  %v1657_v15 = vpop.permute.xlu1 %1656 }
 0x258   : > { %10560 = vst [vmem:[#allocation10_spill] sm:$0xff] %v9162_v63  ;;  %v9164_v25 = vpop.f32.mrb[59].mxu0  ;;  %1722 = vst.msk [vmem:[#allocation4 + $0x4c0] sm:$0xff] %vm1213_vm9, %v1657_v15  ;;  %2544 = vmatmul.mubr.f32.gmra.mrb[28].mxu1 %v1921_v39  ;;  %v1991_v15 = vld [vmem:[#allocation4 + $0x470] sm:$0xff] }
 0x259   : > { %v1771_v50 = vpop.permute.xlu0 %1770  ;;  %2548 = vmatprep.mubr.f32.mxu1 %v1927_v45  ;;  %v1997_v4 = vld [vmem:[#allocation4 + $0x4a0] sm:$0xff] }
 0x25a   : > { %1807 = vst.msk [vmem:[#allocation4 + $0x4f0] sm:$0xff] %vm1213_vm9, %v1771_v50  ;;  %v2003_v50 = vld [vmem:[#allocation4 + $0x4d0] sm:$0xff] }
 0x25b   : > { %v9168_v46 = vpop.f32.mrb[60].mxu0  ;;  %v1659_v14 = vpop.permute.xlu1 %1658  ;;  %v1996_v39 = vld [vmem:[#allocation4 + $0x498] sm:$0xff] }
 0x25c   : > { %10561 = vst [vmem:[#allocation11_spill] sm:$0xff] %v9168_v46  ;;  %v9170_v62 = vpop.f32.mrb[61].mxu0  ;;  %1723 = vst.msk [vmem:[#allocation4 + $0x4e8] sm:$0xff] %vm1213_vm9, %v1659_v14  ;;  %2549 = vmatmul.mubr.f32.gmra.mrb[30].mxu1 %v1926_v28 }
 0x25d   : > { %10562 = vst [vmem:[#allocation12_spill] sm:$0xff] %v9170_v62  ;;  %2553 = vmatprep.mubr.f32.mxu1 %v1932_v42  ;;  %v2002_v11 = vld [vmem:[#allocation4 + $0x4c8] sm:$0xff]  ;;  %v2008_v42 = vld [vmem:[#allocation4 + $0x4f8] sm:$0xff] }
 0x25f   : > { %v2001_v45 = vld [vmem:[#allocation4 + $0x4c0] sm:$0xff] }
 0x260   : > { %2554 = vmatmul.mubr.f32.gmra.mrb[32].mxu1 %v1931_v52  ;;  %v9188_v52 = vld [vmem:[#allocation3] sm:$0xff] }
 0x261   : > { %2558 = vmatprep.mubr.f32.mxu1 %v1937_v35  ;;  %v2007_v14 = vld [vmem:[#allocation4 + $0x4f0] sm:$0xff]  ;;  %10563 = vst [vmem:[#allocation13_spill] sm:$0xff] %v9188_v52  ;;  %v4572_v35 = vld [vmem:[#allocation3 + $0x8] sm:$0x3]  ;;  %4591 = vst.msk [vmem:[#allocation4] sm:$0xff] %vm869_vm6, %v9188_v52 }
 0x263   : > { %v2006_v28 = vld [vmem:[#allocation4 + $0x4e8] sm:$0xff] }
 0x264   : > { %2559 = vmatmul.mubr.f32.gmra.mrb[34].mxu1 %v1936_v61  ;;  %v4615_v61 = vrot.slane %v9188_v52, 1 }
 0x265   : > { %2563 = vmatprep.mubr.f32.mxu1 %v1942_v48  ;;  %v4616_v48 = vrot.slane %v4572_v35, 1 }
 0x268   : > { %2564 = vmatmul.mubr.f32.gmra.mrb[36].mxu1 %v1941_v18  ;;  %v4617_v18 = vsel %vm1036_vm8, %v4615_v61, %v4616_v48 }
 0x269   : > { %2568 = vmatprep.mubr.f32.mxu1 %v1947_v31  ;;  %4639 = vrot.lane.b32.xlu1 %v4617_v18, %s7473_s14  ;;  %v7474_v31 = vmov 1983009808  }
 0x26c   : > { %2569 = vmatmul.mubr.f32.gmra.mrb[38].mxu1 %v1946_v7  ;;  %v2925_v7 = vunpack.c.l.s4 %v7474_v31 }
 0x26d   : > { %2573 = vmatprep.mubr.f32.mxu1 %v1952_v22  ;;  %v2927_v22 = vlaneseq }
 0x270   : > { %2574 = vmatmul.mubr.f32.gmra.mrb[40].mxu1 %v1951_v6  ;;  %v9198_v6 = vld [vmem:[%s10501_s4] ss:$0 sm:$0xff] }
 0x271   : > { %2578 = vmatprep.mubr.f32.mxu1 %v1957_v24  ;;  %v2926_v24 = vunpack.c.0.s8 %v2925_v7 }
 0x274   : > { %2579 = vmatmul.mubr.f32.gmra.mrb[42].mxu1 %v1956_v10  ;;  %v2928_v10 = vshrl.u32 %v2927_v22, 7 }
 0x275   : > { %2583 = vmatprep.mubr.f32.mxu1 %v1962_v54 }
 0x278   : > { %2584 = vmatmul.mubr.f32.gmra.mrb[44].mxu1 %v1961_v43 }
 0x279   : > { %2588 = vmatprep.mubr.f32.mxu1 %v1967_v32 }
 0x27c   : > { %2589 = vmatmul.mubr.f32.gmra.mrb[46].mxu1 %v1966_v34 }
 0x27d   : > { %2593 = vmatprep.mubr.f32.mxu1 %v1972_v55  ;;  %v9202_v55 = vsub.s32 %v2926_v24, %v2928_v10 }
 0x280   : > { %2594 = vmatmul.mubr.f32.gmra.mrb[48].mxu1 %v1971_v37 }
 0x281   : > { %2598 = vmatprep.mubr.f32.mxu1 %v1977_v23 }
 0x284   : > { %2599 = vmatmul.mubr.f32.gmra.mrb[50].mxu1 %v1976_v1 }
 0x285   : > { %2603 = vmatprep.mubr.f32.mxu1 %v1982_v3 }
 0x288   : > { %2604 = vmatmul.mubr.f32.gmra.mrb[52].mxu1 %v1981_v41 }
 0x289   : > { %2608 = vmatprep.mubr.f32.mxu1 %v1987_v33 }
 0x28c   : > { %2609 = vmatmul.mubr.f32.gmra.mrb[54].mxu1 %v1986_v8 }
 0x28d   : > { %2613 = vmatprep.mubr.f32.mxu1 %v1992_v16 }
 0x290   : > { %2614 = vmatmul.mubr.f32.gmra.mrb[56].mxu1 %v1991_v15 }
 0x291   : > { %2618 = vmatprep.mubr.f32.mxu1 %v1997_v4 }
 0x294   : > { %2619 = vmatmul.mubr.f32.gmra.mrb[58].mxu1 %v1996_v39 }
 0x295   : > { %2623 = vmatprep.mubr.f32.mxu1 %v2002_v11 }
 0x298   : > { %2624 = vmatmul.mubr.f32.gmra.mrb[60].mxu1 %v2001_v45 }
 0x299   : > { %2628 = vmatprep.mubr.f32.mxu1 %v2007_v14 }
 0x29c   : > { %2629 = vmatmul.mubr.f32.gmra.mrb[62].mxu1 %v2006_v28 }
 0x29d   : > { %6956 = vmatprep.mubr.msk.f32.mxu1 %vm869_vm6, %v2003_v50 }
 0x2a0   : > { %6957 = vmatmul.mubr.msk.f32.vlgmr.msra.gmra.mrb[64].mxu1 %vm869_vm6, %v2008_v42 }
 0x2f3   : > { %v2475_v54 = vpop.f32.mrb[0].mxu1 }
 0x2f4   : > { %v7349_v43 = vadd.f32 %v9198_v6, %v2475_v54  ;;  %v2477_v32 = vpop.f32.mrb[1].mxu1 }
 0x2f6   : > { %v2701_v34 = vadd.f32 %v7349_v43, %v9075_v38 }
 0x2f7   : > { %v2480_v37 = vpop.f32.mrb[2].mxu1 }
 0x2f8   : > { %v2859_v23 = vmax.f32 %v2701_v34, 0.0  ;;  %v7350_v1 = vadd.f32 %v9198_v6, %v2480_v37  ;;  %v2482_v3 = vpop.f32.mrb[3].mxu1  ;;  %v9213_v34 = vsub.s32 0, %v2928_v10 }
 0x2fa   : > { %v2923_v41 = vcombine.high %v2859_v23, %v2859_v23  ;;  %v2930_v33 = vrot.slane %v2859_v23, %v9202_v55  ;;  %v2706_v8 = vadd.f32 %v7350_v1, %v9073_v53 }
 0x2fb   : > { %v2485_v16 = vpop.f32.mrb[4].mxu1 }
 0x2fc   : > { %v2937_v15 = vrot.slane %v2923_v41, %v9202_v55  ;;  %v2938_v4 = vcombine.high %v2930_v33, %v2930_v33  ;;  %v2860_v11 = vmax.f32 %v2706_v8, 0.0  ;;  %v2487_v39 = vpop.f32.mrb[5].mxu1  ;;  %v7351_v38 = vadd.f32 %v9198_v6, %v2485_v16 }
 0x2fd   : > { %v6332_v45 = vrot.slane %v2930_v33, 9 }
 0x2fe   : > { %v2939_v14 = vcombine.high %v2937_v15, %v2937_v15  ;;  %v6333_v50 = vrot.slane %v2938_v4, 9  ;;  %v6334_v28 = vrot.slane %v2937_v15, 9  ;;  %v2940_v42 = vcombine.high %v2860_v11, %v2860_v11 }
 0x2ff   : > { %v2947_v35 = vrot.slane %v2860_v11, %v9202_v55  ;;  %v2711_v61 = vadd.f32 %v7351_v38, %v9082_v59  ;;  %v2490_v48 = vpop.f32.mrb[6].mxu1  ;;  %v3979_v43 = vmax.f32 %v2930_v33, %v6332_v45 }
 0x300   : > { %v6335_v18 = vrot.slane %v2939_v14, 9  ;;  %v7352_v53 = vadd.f32 %v9198_v6, %v2490_v48  ;;  %v2492_v31 = vpop.f32.mrb[7].mxu1  ;;  %v2954_v7 = vrot.slane %v2940_v42, %v9202_v55  ;;  %v3980_v32 = vmax.f32 %v2938_v4, %v6333_v50 }
 0x301   : > { %v2955_v22 = vcombine.high %v2947_v35, %v2947_v35  ;;  %v6336_v24 = vrot.slane %v2947_v35, 9  ;;  %v2861_v54 = vmax.f32 %v2711_v61, 0.0  ;;  %v3981_v23 = vmax.f32 %v2937_v15, %v6334_v28 }
 0x302   : > { %v2716_v37 = vadd.f32 %v7352_v53, %v9080_v30  ;;  %v2956_v1 = vcombine.high %v2954_v7, %v2954_v7  ;;  %v6338_v59 = vrot.slane %v2954_v7, 9  ;;  %v3982_v42 = vmax.f32 %v2939_v14, %v6335_v18 }
 0x303   : > { %v6337_v3 = vrot.slane %v2955_v22, 9  ;;  %v2495_v41 = vpop.f32.mrb[8].mxu1  ;;  %v2957_v8 = vcombine.high %v2861_v54, %v2861_v54  ;;  %v2964_v16 = vrot.slane %v2861_v54, %v9202_v55  ;;  %v3983_v33 = vmax.f32 %v2947_v35, %v6336_v24 }
 0x304   : > { %v2862_v11 = vmax.f32 %v2716_v37, 0.0  ;;  %v7353_v39 = vadd.f32 %v9198_v6, %v2495_v41  ;;  %v2497_v38 = vpop.f32.mrb[9].mxu1  ;;  %v6339_v61 = vrot.slane %v2956_v1, 9  ;;  %v3985_v50 = vmax.f32 %v2954_v7, %v6338_v59 }
 0x305   : > { %v3984_v4 = vmax.f32 %v2955_v22, %v6337_v3  ;;  %v2971_v10 = vrot.slane %v2957_v8, %v9202_v55  ;;  %v2972_v30 = vcombine.high %v2964_v16, %v2964_v16  ;;  %v6340_v15 = vrot.slane %v2964_v16, 9 }
 0x306   : > { %v2974_v45 = vcombine.high %v2862_v11, %v2862_v11  ;;  %v3986_v28 = vmax.f32 %v2956_v1, %v6339_v61  ;;  %v2981_v48 = vrot.slane %v2862_v11, %v9202_v55  ;;  %v2721_v53 = vadd.f32 %v7353_v39, %v9092_v13 }
 0x307   : > { %v2500_v31 = vpop.f32.mrb[10].mxu1  ;;  %v2973_v54 = vcombine.high %v2971_v10, %v2971_v10  ;;  %v6341_v14 = vrot.slane %v2972_v30, 9  ;;  %v6342_v18 = vrot.slane %v2971_v10, 9  ;;  %v3987_v35 = vmax.f32 %v2964_v16, %v6340_v15 }
 0x308   : > { %v2502_v22 = vpop.f32.mrb[11].mxu1  ;;  %v2988_v24 = vrot.slane %v2974_v45, %v9202_v55  ;;  %v2989_v37 = vcombine.high %v2981_v48, %v2981_v48  ;;  %v6344_v3 = vrot.slane %v2981_v48, 9  ;;  %v2863_v41 = vmax.f32 %v2721_v53, 0.0 }
 0x309   : > { %v6343_v7 = vrot.slane %v2973_v54, 9  ;;  %v3988_v1 = vmax.f32 %v2972_v30, %v6341_v14  ;;  %v3989_v59 = vmax.f32 %v2971_v10, %v6342_v18  ;;  %v4107_v8 = vmax.f32 %v3979_v43, %v3987_v35 }
 0x30a   : > { %v2990_v11 = vcombine.high %v2988_v24, %v2988_v24  ;;  %v6345_v38 = vrot.slane %v2989_v37, 9  ;;  %v6346_v13 = vrot.slane %v2988_v24, 9  ;;  %v3991_v39 = vmax.f32 %v2981_v48, %v6344_v3 }
 0x30b   : > { %v2505_v61 = vpop.f32.mrb[12].mxu1  ;;  %v3990_v20 = vmax.f32 %v2973_v54, %v6343_v7  ;;  %v4108_v52 = vmax.f32 %v3980_v32, %v3988_v1  ;;  %v4109_v16 = vmax.f32 %v3981_v23, %v3989_v59  ;;  %v4238_v15 = vrot.slane %v4107_v8, %v9213_v34 }
 0x30c   : > { %v2507_v22 = vpop.f32.mrb[13].mxu1  ;;  %v6347_v45 = vrot.slane %v2990_v11, 9  ;;  %v3992_v46 = vmax.f32 %v2989_v37, %v6345_v38  ;;  %v3993_v62 = vmax.f32 %v2988_v24, %v6346_v13  ;;  %v4111_v63 = vmax.f32 %v3983_v33, %v3991_v39 }
 0x30d   : > { %v4110_v53 = vmax.f32 %v3982_v42, %v3990_v20  ;;  %v4242_v30 = vrot.slane %v4108_v52, %v9213_v34  ;;  %v4246_v43 = vrot.slane %v4109_v16, %v9213_v34  ;;  %v2991_v10 = vcombine.high %v2863_v41, %v2863_v41 }
 0x30e   : > { %v3994_v14 = vmax.f32 %v2990_v11, %v6347_v45  ;;  %v4112_v18 = vmax.f32 %v3984_v4, %v3992_v46  ;;  %v4113_v48 = vmax.f32 %v3985_v50, %v3993_v62  ;;  %v4254_v54 = vrot.slane %v4111_v63, %v9213_v34 }
 0x30f   : > { %v2510_v32 = vpop.f32.mrb[14].mxu1  ;;  %v4250_v23 = vrot.slane %v4110_v53, %v9213_v34  ;;  %v4492_v35 = vsel %vm4491_vm10, %v4242_v30, %v4238_v15  ;;  %v2998_v37 = vrot.slane %v2863_v41, %v9202_v55  ;;  %v3005_v33 = vrot.slane %v2991_v10, %v9202_v55 }
 0x310   : > { %v2512_v20 = vpop.f32.mrb[15].mxu1  ;;  %v4494_v52 = vsel %vm4493_vm11, %v4246_v43, %v4492_v35  ;;  %v4114_v42 = vmax.f32 %v3986_v28, %v3994_v14  ;;  %v4258_v24 = vrot.slane %v4112_v18, %v9213_v34  ;;  %v4262_v46 = vrot.slane %v4113_v48, %v9213_v34 }
 0x311   : > { %v4496_v62 = vsel %vm4495_vm12, %v4250_v23, %v4494_v52  ;;  %v3006_v63 = vcombine.high %v2998_v37, %v2998_v37  ;;  %v3007_v4 = vcombine.high %v3005_v33, %v3005_v33  ;;  %v7354_v41 = vadd.f32 %v9198_v6, %v2500_v31 }
 0x312   : > { %v4266_v50 = vrot.slane %v4114_v42, %v9213_v34  ;;  %v4498_v3 = vsel %vm4497_vm13, %v4254_v54, %v4496_v62  ;;  %v6348_v28 = vrot.slane %v2998_v37, 9  ;;  %v6350_v59 = vrot.slane %v3005_v33, 9 }
 0x313   : > { %v2515_v7 = vpop.f32.mrb[16].mxu1  ;;  %v4500_v1 = vsel %vm4499_vm14, %v4258_v24, %v4498_v3  ;;  %v2726_v38 = vadd.f32 %v7354_v41, %v9087_v0  ;;  %v7355_v13 = vadd.f32 %v9198_v6, %v2505_v61  ;;  %v6349_v16 = vrot.slane %v3006_v63, 9 }
 0x314   : > { %v2517_v8 = vpop.f32.mrb[17].mxu1  ;;  %v4502_v11 = vsel %vm4501_vm15, %v4262_v46, %v4500_v1  ;;  %v6351_v15 = vrot.slane %v3007_v4, 9  ;;  %v7356_v22 = vadd.f32 %v9198_v6, %v2510_v32  ;;  %v7357_v53 = vadd.f32 %v9198_v6, %v2515_v7 }
 0x315   : > { %v4504_v39 = vsel %vm4503_vm0, %v4266_v50, %v4502_v11  ;;  %v2864_v31 = vmax.f32 %v2726_v38, 0.0  ;;  %v2731_v45 = vadd.f32 %v7355_v13, %v9096_v44  ;;  %v3995_v43 = vmax.f32 %v2998_v37, %v6348_v28 }
 0x316   : > { %4563 = vst.msk [vmem:[#allocation3 + $0x11] sm:$0xff] %vm869_vm6, %v4504_v39  ;;  %v9246_v10 = vmax.f32 %v3005_v33, %v6350_v59  ;;  %v2736_v0 = vadd.f32 %v7356_v22, %v9094_v57  ;;  %v2741_v32 = vadd.f32 %v7357_v53, %v9102_v17  ;;  %v3996_v23 = vmax.f32 %v3006_v63, %v6349_v16 }
 0x317   : > { %v2520_v30 = vpop.f32.mrb[18].mxu1  ;;  %v3008_v18 = vcombine.high %v2864_v31, %v2864_v31  ;;  %v3015_v48 = vrot.slane %v2864_v31, %v9202_v55  ;;  %v2865_v54 = vmax.f32 %v2731_v45, 0.0  ;;  %v9252_v35 = vmax.f32 %v3007_v4, %v6351_v15 }
 0x318   : > { %v7358_v61 = vadd.f32 %v9198_v6, %v2520_v30  ;;  %v2522_v14 = vpop.f32.mrb[19].mxu1  ;;  %v2866_v44 = vmax.f32 %v2736_v0, 0.0  ;;  %v2867_v17 = vmax.f32 %v2741_v32, 0.0 }
 0x319   : > { %v3022_v37 = vrot.slane %v3008_v18, %v9202_v55  ;;  %v3023_v33 = vcombine.high %v3015_v48, %v3015_v48  ;;  %v6352_v57 = vrot.slane %v3015_v48, 9  ;;  %v3025_v52 = vcombine.high %v2865_v54, %v2865_v54 }
 0x31a   : > { %v9255_v20 = vadd.f32 %v7358_v61, %v9100_v27  ;;  %v3032_v24 = vrot.slane %v2865_v54, %v9202_v55  ;;  %v3042_v46 = vcombine.high %v2866_v44, %v2866_v44  ;;  %v3049_v62 = vrot.slane %v2866_v44, %v9202_v55 }
 0x31b   : > { %v9258_v42 = vpop.f32.mrb[20].mxu1  ;;  %v3024_v4 = vcombine.high %v3022_v37, %v3022_v37  ;;  %v6353_v50 = vrot.slane %v3023_v33, 9  ;;  %v6354_v3 = vrot.slane %v3022_v37, 9  ;;  %v3999_v41 = vmax.f32 %v3015_v48, %v6352_v57 }
 0x31c   : > { %v2527_v63 = vpop.f32.mrb[21].mxu1  ;;  %v3039_v27 = vrot.slane %v3025_v52, %v9202_v55  ;;  %v3040_v7 = vcombine.high %v3032_v24, %v3032_v24  ;;  %v6356_v1 = vrot.slane %v3032_v24, 9  ;;  %v3056_v28 = vrot.slane %v3042_v46, %v9202_v55 }
 0x31d   : > { %v9264_v59 = vld [vmem:[#allocation3 + $0x10] sm:$0xff]  ;;  %v6355_v8 = vrot.slane %v3024_v4, 9  ;;  %v4000_v11 = vmax.f32 %v3023_v33, %v6353_v50  ;;  %v4001_v38 = vmax.f32 %v3022_v37, %v6354_v3  ;;  %v3057_v13 = vcombine.high %v3049_v62, %v3049_v62 }
 0x31e   : > { %4712 = vrot.lane.b32.xlu0 %v9264_v59, %s7473_s14  ;;  %4592 = vst.msk [vmem:[#allocation4 + $0x28] sm:$0xff] %vm869_vm6, %v9264_v59  ;;  %v3041_v16 = vcombine.high %v3039_v27, %v3039_v27  ;;  %v6357_v15 = vrot.slane %v3040_v7, 9  ;;  %v6358_v22 = vrot.slane %v3039_v27, 9  ;;  %v4003_v31 = vmax.f32 %v3032_v24, %v6356_v1 }
 0x31f   : > { %v9270_v39 = vpop.f32.mrb[22].mxu1  ;;  %v4002_v53 = vmax.f32 %v3024_v4, %v6355_v8  ;;  %v3058_v30 = vcombine.high %v3056_v28, %v3056_v28  ;;  %v6360_v0 = vrot.slane %v3049_v62, 9  ;;  %v6361_v61 = vrot.slane %v3057_v13, 9 }
 0x320   : > { %v2532_v45 = vpop.f32.mrb[23].mxu1  ;;  %v6359_v14 = vrot.slane %v3041_v16, 9  ;;  %v4004_v18 = vmax.f32 %v3040_v7, %v6357_v15  ;;  %v4005_v48 = vmax.f32 %v3039_v27, %v6358_v22  ;;  %v4115_v54 = vmax.f32 %v3995_v43, %v4003_v31 }
 0x321   : > { %v6362_v32 = vrot.slane %v3056_v28, 9  ;;  %v6363_v44 = vrot.slane %v3058_v30, 9  ;;  %v4007_v37 = vmax.f32 %v3049_v62, %v6360_v0  ;;  %v4008_v33 = vmax.f32 %v3057_v13, %v6361_v61 }
 0x322   : > { %v4006_v52 = vmax.f32 %v3041_v16, %v6359_v14  ;;  %v4116_v46 = vmax.f32 %v3996_v23, %v4004_v18  ;;  %v4117_v63 = vmax.f32 %v9246_v10, %v4005_v48  ;;  %v4270_v24 = vrot.slane %v4115_v54, %v9213_v34 }
 0x323   : > { %v9272_v57 = vpop.f32.mrb[24].mxu1  ;;  %v4009_v50 = vmax.f32 %v3056_v28, %v6362_v32  ;;  %v4010_v3 = vmax.f32 %v3058_v30, %v6363_v44  ;;  %v4119_v1 = vmax.f32 %v3999_v41, %v4007_v37  ;;  %v4120_v8 = vmax.f32 %v4000_v11, %v4008_v33 }
 0x324   : > { %v2537_v4 = vpop.f32.mrb[25].mxu1  ;;  %v4118_v27 = vmax.f32 %v9252_v35, %v4006_v52  ;;  %v4274_v43 = vrot.slane %v4116_v46, %v9213_v34  ;;  %v4278_v62 = vrot.slane %v4117_v63, %v9213_v34  ;;  %v3059_v7 = vcombine.high %v2867_v17, %v2867_v17 }
 0x325   : > { %v4121_v13 = vmax.f32 %v4001_v38, %v4009_v50  ;;  %v4122_v15 = vmax.f32 %v4002_v53, %v4010_v3  ;;  %v4286_v23 = vrot.slane %v4119_v1, %v9213_v34  ;;  %v4290_v10 = vrot.slane %v4120_v8, %v9213_v34  ;;  %v4574_v50 = vld [vmem:[#allocation3 + $0x18] sm:$0x3] }
 0x326   : > { %v4282_v22 = vrot.slane %v4118_v27, %v9213_v34  ;;  %v4505_v28 = vsel %vm4491_vm10, %v4274_v43, %v4270_v24  ;;  %v3066_v41 = vrot.slane %v2867_v17, %v9202_v55  ;;  %v3073_v35 = vrot.slane %v3059_v7, %v9202_v55 }
 0x327   : > { %v2540_v16 = vpop.f32.mrb[26].mxu1  ;;  %v4506_v31 = vsel %vm4493_vm11, %v4278_v62, %v4505_v28  ;;  %v4294_v45 = vrot.slane %v4121_v13, %v9213_v34  ;;  %v4298_v38 = vrot.slane %v4122_v15, %v9213_v34  ;;  %v2868_v53 = vmax.f32 %v9255_v20, 0.0 }
 0x328   : > { %v2542_v11 = vpop.f32.mrb[27].mxu1  ;;  %v4507_v30 = vsel %vm4495_vm12, %v4282_v22, %v4506_v31  ;;  %v3074_v0 = vcombine.high %v3066_v41, %v3066_v41  ;;  %v3075_v61 = vcombine.high %v3073_v35, %v3073_v35  ;;  %v6364_v14 = vrot.slane %v3066_v41, 9 }
 0x329   : > { %v4508_v18 = vsel %vm4497_vm13, %v4286_v23, %v4507_v30  ;;  %v6366_v48 = vrot.slane %v3073_v35, 9  ;;  %v3076_v17 = vcombine.high %v2868_v53, %v2868_v53  ;;  %v3083_v54 = vrot.slane %v2868_v53, %v9202_v55 }
 0x32a   : > { %v4509_v44 = vsel %vm4499_vm14, %v4290_v10, %v4508_v18  ;;  %v6365_v37 = vrot.slane %v3074_v0, 9  ;;  %v6367_v33 = vrot.slane %v3075_v61, 9  ;;  %v9293_v52 = vmax.f32 %v3066_v41, %v6364_v14 }
 0x32b   : > { %v2545_v32 = vpop.f32.mrb[28].mxu1  ;;  %v4510_v20 = vsel %vm4501_vm15, %v4294_v45, %v4509_v44  ;;  %v9296_v63 = vmax.f32 %v3073_v35, %v6366_v48  ;;  %v3090_v24 = vrot.slane %v3076_v17, %v9202_v55  ;;  %v3091_v4 = vcombine.high %v3083_v54, %v3083_v54 }
 0x32c   : > { %v2547_v46 = vpop.f32.mrb[29].mxu1  ;;  %v4511_v3 = vsel %vm4503_vm0, %v4298_v38, %v4510_v20  ;;  %v9300_v1 = vmax.f32 %v3074_v0, %v6365_v37  ;;  %v9302_v8 = vmax.f32 %v3075_v61, %v6367_v33  ;;  %v6368_v27 = vrot.slane %v3083_v54, 9 }
 0x32d   : > { %4564 = vst.msk [vmem:[#allocation3 + $0x21] sm:$0xff] %vm869_vm6, %v4511_v3  ;;  %v3092_v43 = vcombine.high %v3090_v24, %v3090_v24  ;;  %v6369_v62 = vrot.slane %v3091_v4, 9  ;;  %v6370_v7 = vrot.slane %v3090_v24, 9  ;;  %v7359_v13 = vadd.f32 %v9198_v6, %v9258_v42 }
 0x32e   : > { %v9307_v23 = vmax.f32 %v3083_v54, %v6368_v27  ;;  %v7360_v10 = vadd.f32 %v9198_v6, %v9270_v39  ;;  %v4618_v22 = vrot.slane %v9264_v59, 1  ;;  %v4619_v28 = vrot.slane %v4574_v50, 1 }
 0x32f   : > { %v2550_v15 = vpop.f32.mrb[30].mxu1  ;;  %v6371_v35 = vrot.slane %v3092_v43, 9  ;;  %v9312_v11 = vmax.f32 %v3091_v4, %v6369_v62  ;;  %v9314_v31 = vmax.f32 %v3090_v24, %v6370_v7  ;;  %v2751_v45 = vadd.f32 %v7359_v13, %v9108_v26 }
 0x330   : > { %v2552_v41 = vpop.f32.mrb[31].mxu1  ;;  %v2756_v38 = vadd.f32 %v7360_v10, %v9106_v58  ;;  %v4620_v42 = vsel %vm1036_vm8, %v4618_v22, %v4619_v28  ;;  %v7361_v53 = vadd.f32 %v9198_v6, %v9272_v57  ;;  %v7362_v39 = vadd.f32 %v9198_v6, %v2540_v16 }
 0x331   : > { %v9322_v30 = vmax.f32 %v3092_v43, %v6371_v35  ;;  %v2869_v0 = vmax.f32 %v2751_v45, 0.0  ;;  %4641 = vrot.lane.b32.xlu1 %v4620_v42, %s7473_s14  ;;  %4756 = vst.msk [vmem:[#allocation4 + $0x10] sm:$0xff] %vm869_vm6, %v4620_v42  ;;  %v7363_v61 = vadd.f32 %v9198_v6, %v2545_v32  ;;  %v7364_v26 = vadd.f32 %v9198_v6, %v2550_v15 }
 0x332   : > { %v2870_v58 = vmax.f32 %v2756_v38, 0.0  ;;  %v2761_v18 = vadd.f32 %v7361_v53, %v9114_v21  ;;  %v2766_v48 = vadd.f32 %v7362_v39, %v9112_v47 }
 0x333   : > { %v2555_v14 = vpop.f32.mrb[32].mxu1  ;;  %v3093_v17 = vcombine.high %v2869_v0, %v2869_v0  ;;  %v3100_v54 = vrot.slane %v2869_v0, %v9202_v55  ;;  %v2771_v44 = vadd.f32 %v7363_v61, %v9122_v5  ;;  %v9336_v37 = vadd.f32 %v7364_v26, %v9120_v56 }
 0x334   : > { %v9331_v57 = vadd.f32 %v9198_v6, %v2555_v14  ;;  %v2557_v16 = vpop.f32.mrb[33].mxu1  ;;  %v3110_v32 = vcombine.high %v2870_v58, %v2870_v58  ;;  %v3117_v33 = vrot.slane %v2870_v58, %v9202_v55  ;;  %v2871_v46 = vmax.f32 %v2761_v18, 0.0  ;;  %v9341_v21 = vld [vmem:[#allocation3 + $0x20] sm:$0xff] }
 0x335   : > { %v9339_v20 = vmax.f32 %v2766_v48, 0.0  ;;  %v3107_v47 = vrot.slane %v3093_v17, %v9202_v55  ;;  %v3108_v24 = vcombine.high %v3100_v54, %v3100_v54  ;;  %v6372_v4 = vrot.slane %v3100_v54, 9  ;;  %4714 = vrot.lane.b32.xlu0 %v9341_v21, %s7473_s14  ;;  %4593 = vst.msk [vmem:[#allocation4 + $0x50] sm:$0xff] %vm869_vm6, %v9341_v21  ;;  %4799 = vst.msk [vmem:[#allocation4 + $0x18] sm:$0xff] %vm869_vm6, %v9341_v21 }
 0x336   : > { %v9344_v50 = vmax.f32 %v2771_v44, 0.0  ;;  %v3124_v5 = vrot.slane %v3110_v32, %v9202_v55  ;;  %v3125_v3 = vcombine.high %v3117_v33, %v3117_v33  ;;  %v6376_v27 = vrot.slane %v3117_v33, 9 }
 0x337   : > { %v9352_v56 = vpop.f32.mrb[34].mxu1  ;;  %v3127_v43 = vcombine.high %v2871_v46, %v2871_v46  ;;  %v3109_v7 = vcombine.high %v3107_v47, %v3107_v47  ;;  %v6373_v13 = vrot.slane %v3108_v24, 9  ;;  %v6374_v15 = vrot.slane %v3107_v47, 9 }
 0x338   : > { %v2562_v62 = vpop.f32.mrb[35].mxu1  ;;  %v4019_v10 = vmax.f32 %v3100_v54, %v6372_v4  ;;  %v3126_v22 = vcombine.high %v3124_v5, %v3124_v5  ;;  %v6377_v28 = vrot.slane %v3125_v3, 9  ;;  %v6378_v41 = vrot.slane %v3124_v5, 9  ;;  %v4640_v54 = vpop.permute.xlu1 %4639 }
 0x339   : > { %v4023_v35 = vmax.f32 %v3117_v33, %v6376_v27  ;;  %v6375_v45 = vrot.slane %v3109_v7, 9  ;;  %v4020_v38 = vmax.f32 %v3108_v24, %v6373_v13  ;;  %v4021_v42 = vmax.f32 %v3107_v47, %v6374_v15  ;;  %4663 = vst.msk [vmem:[#allocation4] sm:$0xff] %vm1213_vm9, %v4640_v54 }
 0x33a   : > { %v4123_v53 = vmax.f32 %v9293_v52, %v4019_v10  ;;  %v6379_v0 = vrot.slane %v3126_v22, 9  ;;  %v4024_v61 = vmax.f32 %v3125_v3, %v6377_v28  ;;  %v4025_v26 = vmax.f32 %v3124_v5, %v6378_v41 }
 0x33b   : > { %v9356_v39 = vpop.f32.mrb[36].mxu1  ;;  %v4127_v14 = vmax.f32 %v9307_v23, %v4023_v35  ;;  %v4022_v18 = vmax.f32 %v3109_v7, %v6375_v45  ;;  %v4124_v48 = vmax.f32 %v9300_v1, %v4020_v38  ;;  %v4125_v16 = vmax.f32 %v9296_v63, %v4021_v42 }
 0x33c   : > { %v2567_v58 = vpop.f32.mrb[37].mxu1  ;;  %v4302_v17 = vrot.slane %v4123_v53, %v9213_v34  ;;  %v4026_v44 = vmax.f32 %v3126_v22, %v6379_v0  ;;  %v4128_v32 = vmax.f32 %v9312_v11, %v4024_v61  ;;  %v4129_v52 = vmax.f32 %v9314_v31, %v4025_v26 }
 0x33d   : > { %v4318_v33 = vrot.slane %v4127_v14, %v9213_v34  ;;  %v4126_v23 = vmax.f32 %v9302_v8, %v4022_v18  ;;  %v4306_v47 = vrot.slane %v4124_v48, %v9213_v34  ;;  %v4310_v1 = vrot.slane %v4125_v16, %v9213_v34 }
 0x33e   : > { %v3134_v63 = vrot.slane %v2871_v46, %v9202_v55  ;;  %v4130_v4 = vmax.f32 %v9322_v30, %v4026_v44  ;;  %v4322_v11 = vrot.slane %v4128_v32, %v9213_v34  ;;  %v4326_v31 = vrot.slane %v4129_v52, %v9213_v34 }
 0x33f   : > { %v9370_v24 = vpop.f32.mrb[38].mxu1  ;;  %v3141_v5 = vrot.slane %v3127_v43, %v9202_v55  ;;  %v4314_v27 = vrot.slane %v4126_v23, %v9213_v34  ;;  %v4512_v8 = vsel %vm4491_vm10, %v4306_v47, %v4302_v17  ;;  %v3144_v43 = vcombine.high %v9339_v20, %v9339_v20 }
 0x340   : > { %v2572_v3 = vpop.f32.mrb[39].mxu1  ;;  %v3142_v62 = vcombine.high %v3134_v63, %v3134_v63  ;;  %v6380_v7 = vrot.slane %v3134_v63, 9  ;;  %v4513_v13 = vsel %vm4493_vm11, %v4310_v1, %v4512_v8  ;;  %v4330_v46 = vrot.slane %v4130_v4, %v9213_v34 }
 0x341   : > { %v3143_v15 = vcombine.high %v3141_v5, %v3141_v5  ;;  %v6382_v10 = vrot.slane %v3141_v5, 9  ;;  %v4514_v30 = vsel %vm4495_vm12, %v4314_v27, %v4513_v13  ;;  %v3151_v42 = vrot.slane %v9339_v20, %v9202_v55 }
 0x342   : > { %v6381_v22 = vrot.slane %v3142_v62, 9  ;;  %v4027_v28 = vmax.f32 %v3134_v63, %v6380_v7  ;;  %v4515_v35 = vsel %vm4497_vm13, %v4318_v33, %v4514_v30  ;;  %v3158_v26 = vrot.slane %v3144_v43, %v9202_v55 }
 0x343   : > { %v9383_v41 = vpop.f32.mrb[40].mxu1  ;;  %v6383_v45 = vrot.slane %v3143_v15, 9  ;;  %v4029_v38 = vmax.f32 %v3141_v5, %v6382_v10  ;;  %v4516_v0 = vsel %vm4499_vm14, %v4322_v11, %v4515_v35  ;;  %v3161_v14 = vcombine.high %v9344_v50, %v9344_v50 }
 0x344   : > { %v2577_v53 = vpop.f32.mrb[41].mxu1  ;;  %v4028_v61 = vmax.f32 %v3142_v62, %v6381_v22  ;;  %v4517_v58 = vsel %vm4501_vm15, %v4326_v31, %v4516_v0  ;;  %v3159_v48 = vcombine.high %v3151_v42, %v3151_v42  ;;  %v6384_v16 = vrot.slane %v3151_v42, 9 }
 0x345   : > { %v4030_v18 = vmax.f32 %v3143_v15, %v6383_v45  ;;  %v4518_v17 = vsel %vm4503_vm0, %v4330_v46, %v4517_v58  ;;  %v3160_v54 = vcombine.high %v3158_v26, %v3158_v26  ;;  %v6386_v44 = vrot.slane %v3158_v26, 9  ;;  %v9406_v58 = vld [vmem:[#allocation3 + $0x28] sm:$0x3] }
 0x346   : > { %v3168_v20 = vrot.slane %v9344_v50, %v9202_v55  ;;  %4565 = vst.msk [vmem:[#allocation3 + $0x31] sm:$0xff] %vm869_vm6, %v4518_v17  ;;  %v6385_v52 = vrot.slane %v3159_v48, 9  ;;  %v4031_v33 = vmax.f32 %v3151_v42, %v6384_v16  ;;  %v3175_v23 = vrot.slane %v3161_v14, %v9202_v55 }
 0x347   : > { %v9396_v32 = vpop.f32.mrb[42].mxu1  ;;  %v2874_v47 = vmax.f32 %v9336_v37, 0.0  ;;  %v6387_v63 = vrot.slane %v3160_v54, 9  ;;  %v4033_v4 = vmax.f32 %v3158_v26, %v6386_v44  ;;  %v4621_v30 = vrot.slane %v9341_v21, 1 }
 0x348   : > { %v2582_v1 = vpop.f32.mrb[43].mxu1  ;;  %v3176_v11 = vcombine.high %v3168_v20, %v3168_v20  ;;  %v6388_v31 = vrot.slane %v3168_v20, 9  ;;  %v4032_v5 = vmax.f32 %v3159_v48, %v6385_v52  ;;  %v3177_v3 = vcombine.high %v3175_v23, %v3175_v23 }
 0x349   : > { %v6390_v27 = vrot.slane %v3175_v23, 9  ;;  %v3178_v8 = vcombine.high %v2874_v47, %v2874_v47  ;;  %v4034_v50 = vmax.f32 %v3160_v54, %v6387_v63  ;;  %v3185_v13 = vrot.slane %v2874_v47, %v9202_v55 }
 0x34a   : > { %v6389_v62 = vrot.slane %v3176_v11, 9  ;;  %v4035_v7 = vmax.f32 %v3168_v20, %v6388_v31  ;;  %v6391_v15 = vrot.slane %v3177_v3, 9 }
 0x34b   : > { %v9402_v46 = vpop.f32.mrb[44].mxu1  ;;  %v4037_v10 = vmax.f32 %v3175_v23, %v6390_v27  ;;  %v3192_v37 = vrot.slane %v3178_v8, %v9202_v55  ;;  %v3193_v45 = vcombine.high %v3185_v13, %v3185_v13  ;;  %v6392_v42 = vrot.slane %v3185_v13, 9 }
 0x34c   : > { %v2587_v22 = vpop.f32.mrb[45].mxu1  ;;  %v4036_v43 = vmax.f32 %v3176_v11, %v6389_v62  ;;  %v4131_v35 = vmax.f32 %v4027_v28, %v4035_v7  ;;  %v4038_v53 = vmax.f32 %v3177_v3, %v6391_v15  ;;  %v2781_v27 = vadd.f32 %v9331_v57, %v9130_v19 }
 0x34d   : > { %v4133_v0 = vmax.f32 %v4029_v38, %v4037_v10  ;;  %v3194_v26 = vcombine.high %v3192_v37, %v3192_v37  ;;  %v6394_v14 = vrot.slane %v3192_v37, 9  ;;  %v6393_v17 = vrot.slane %v3193_v45, 9  ;;  %v9409_v44 = vld [vmem:[#allocation3 + $0x30] sm:$0xff] }
 0x34e   : > { %v4132_v48 = vmax.f32 %v4028_v61, %v4036_v43  ;;  %v4334_v16 = vrot.slane %v4131_v35, %v9213_v34  ;;  %v4039_v54 = vmax.f32 %v3185_v13, %v6392_v42  ;;  %v4134_v52 = vmax.f32 %v4030_v18, %v4038_v53  ;;  %4716 = vrot.lane.b32.xlu0 %v9409_v44, %s7473_s14 }
 0x34f   : > { %v9411_v20 = vpop.f32.mrb[46].mxu1  ;;  %v4342_v28 = vrot.slane %v4133_v0, %v9213_v34  ;;  %v6395_v23 = vrot.slane %v3194_v26, 9  ;;  %v4041_v47 = vmax.f32 %v3192_v37, %v6394_v14  ;;  %4594 = vst.msk [vmem:[#allocation4 + $0x78] sm:$0xff] %vm869_vm6, %v9409_v44  ;;  %4800 = vst.msk [vmem:[#allocation4 + $0x40] sm:$0xff] %vm869_vm6, %v9409_v44  ;;  %v4040_v1 = vmax.f32 %v3193_v45, %v6393_v17 }
 0x350   : > { %v2592_v38 = vpop.f32.mrb[47].mxu1  ;;  %v4338_v61 = vrot.slane %v4132_v48, %v9213_v34  ;;  %v4135_v63 = vmax.f32 %v4031_v33, %v4039_v54  ;;  %v4622_v18 = vrot.slane %v9406_v58, 1  ;;  %v4346_v11 = vrot.slane %v4134_v52, %v9213_v34 }
 0x351   : > { %v4042_v31 = vmax.f32 %v3194_v26, %v6395_v23  ;;  %v4137_v3 = vmax.f32 %v4033_v4, %v4041_v47  ;;  %v4136_v62 = vmax.f32 %v4032_v5, %v4040_v1  ;;  %v2875_v4 = vmax.f32 %v2781_v27, 0.0 }
 0x352   : > { %v4519_v8 = vsel %vm4491_vm10, %v4338_v61, %v4334_v16  ;;  %v4350_v7 = vrot.slane %v4135_v63, %v9213_v34  ;;  %v4623_v13 = vsel %vm1036_vm8, %v4621_v30, %v4622_v18  ;;  %v7366_v30 = vadd.f32 %v9198_v6, %v9352_v56 }
 0x353   : > { %v9428_v15 = vpop.f32.mrb[48].mxu1  ;;  %v4520_v33 = vsel %vm4493_vm11, %v4342_v28, %v4519_v8  ;;  %v4138_v10 = vmax.f32 %v4034_v50, %v4042_v31  ;;  %v4358_v37 = vrot.slane %v4137_v3, %v9213_v34  ;;  %4643 = vrot.lane.b32.xlu1 %v4623_v13, %s7473_s14  ;;  %4757 = vst.msk [vmem:[#allocation4 + $0x38] sm:$0xff] %vm869_vm6, %v4623_v13 }
 0x354   : > { %v2597_v19 = vpop.f32.mrb[49].mxu1  ;;  %v4354_v57 = vrot.slane %v4136_v62, %v9213_v34  ;;  %v4521_v5 = vsel %vm4495_vm12, %v4346_v11, %v4520_v33  ;;  %v7367_v22 = vadd.f32 %v9198_v6, %v9356_v39  ;;  %v3195_v35 = vcombine.high %v2875_v4, %v2875_v4 }
 0x355   : > { %v4362_v50 = vrot.slane %v4138_v10, %v9213_v34  ;;  %v4522_v43 = vsel %vm4497_vm13, %v4350_v7, %v4521_v5  ;;  %v3202_v45 = vrot.slane %v2875_v4, %v9202_v55  ;;  %v2786_v53 = vadd.f32 %v7366_v30, %v9127_v60 }
 0x356   : > { %v4523_v42 = vsel %vm4499_vm14, %v4354_v57, %v4522_v43  ;;  %v2791_v0 = vadd.f32 %v7367_v22, %v9138_v2  ;;  %v7368_v26 = vadd.f32 %v9198_v6, %v9370_v24  ;;  %v3209_v14 = vrot.slane %v3195_v35, %v9202_v55 }
 0x357   : > { %v9448_v56 = vpop.f32.mrb[50].mxu1  ;;  %v4524_v39 = vsel %vm4501_vm15, %v4358_v37, %v4523_v42  ;;  %v3210_v48 = vcombine.high %v3202_v45, %v3202_v45  ;;  %v6396_v16 = vrot.slane %v3202_v45, 9  ;;  %v2876_v52 = vmax.f32 %v2786_v53, 0.0 }
 0x358   : > { %v2602_v17 = vpop.f32.mrb[51].mxu1  ;;  %v4525_v54 = vsel %vm4503_vm0, %v4362_v50, %v4524_v39  ;;  %v2877_v28 = vmax.f32 %v2791_v0, 0.0  ;;  %v2796_v60 = vadd.f32 %v7368_v26, %v9135_v51  ;;  %v3211_v2 = vcombine.high %v3209_v14, %v3209_v14 }
 0x359   : > { %4566 = vst.msk [vmem:[#allocation3 + $0x41] sm:$0xff] %vm869_vm6, %v4525_v54  ;;  %v6397_v23 = vrot.slane %v3210_v48, 9  ;;  %v6398_v6 = vrot.slane %v3209_v14, 9  ;;  %v4043_v24 = vmax.f32 %v3202_v45, %v6396_v16  ;;  %v3212_v47 = vcombine.high %v2876_v52, %v2876_v52 }
 0x35a   : > { %v3219_v38 = vrot.slane %v2876_v52, %v9202_v55  ;;  %v3229_v61 = vcombine.high %v2877_v28, %v2877_v28  ;;  %v3236_v1 = vrot.slane %v2877_v28, %v9202_v55  ;;  %v6399_v18 = vrot.slane %v3211_v2, 9 }
 0x35b   : > { %v9457_v63 = vpop.f32.mrb[52].mxu1  ;;  %v4044_v11 = vmax.f32 %v3210_v48, %v6397_v23  ;;  %v4045_v31 = vmax.f32 %v3209_v14, %v6398_v6  ;;  %v2878_v3 = vmax.f32 %v2796_v60, 0.0  ;;  %v3226_v51 = vrot.slane %v3212_v47, %v9202_v55 }
 0x35c   : > { %v2607_v27 = vpop.f32.mrb[53].mxu1  ;;  %v3227_v8 = vcombine.high %v3219_v38, %v3219_v38  ;;  %v6400_v62 = vrot.slane %v3219_v38, 9  ;;  %v3243_v7 = vrot.slane %v3229_v61, %v9202_v55  ;;  %v4046_v13 = vmax.f32 %v3211_v2, %v6399_v18 }
 0x35d   : > { %v3244_v33 = vcombine.high %v3236_v1, %v3236_v1  ;;  %v6404_v10 = vrot.slane %v3236_v1, 9  ;;  %v3246_v37 = vcombine.high %v2878_v3, %v2878_v3  ;;  %v3228_v4 = vcombine.high %v3226_v51, %v3226_v51  ;;  %v9476_v27 = vld [vmem:[#allocation3 + $0x38] sm:$0x3] }
 0x35e   : > { %v6401_v19 = vrot.slane %v3227_v8, 9  ;;  %v6402_v57 = vrot.slane %v3226_v51, 9  ;;  %v4047_v5 = vmax.f32 %v3219_v38, %v6400_v62  ;;  %v3245_v22 = vcombine.high %v3243_v7, %v3243_v7 }
 0x35f   : > { %v9461_v30 = vpop.f32.mrb[54].mxu1  ;;  %v6405_v50 = vrot.slane %v3244_v33, 9  ;;  %v6406_v43 = vrot.slane %v3243_v7, 9  ;;  %v4051_v35 = vmax.f32 %v3236_v1, %v6404_v10  ;;  %v6403_v42 = vrot.slane %v3228_v4, 9 }
 0x360   : > { %v2612_v45 = vpop.f32.mrb[55].mxu1  ;;  %v4048_v53 = vmax.f32 %v3227_v8, %v6401_v19  ;;  %v4049_v0 = vmax.f32 %v3226_v51, %v6402_v57  ;;  %v3253_v26 = vrot.slane %v2878_v3, %v9202_v55  ;;  %v9464_v39 = vld [vmem:[#allocation3 + $0x40] sm:$0xff]  ;;  %v6407_v14 = vrot.slane %v3245_v22, 9 }
 0x361   : > { %v4052_v48 = vmax.f32 %v3244_v33, %v6405_v50  ;;  %v4053_v16 = vmax.f32 %v3243_v7, %v6406_v43  ;;  %v4139_v17 = vmax.f32 %v4043_v24, %v4051_v35  ;;  %4718 = vrot.lane.b32.xlu0 %v9464_v39, %s7473_s14  ;;  %4595 = vst.msk [vmem:[#allocation4 + $0xa0] sm:$0xff] %vm869_vm6, %v9464_v39  ;;  %4801 = vst.msk [vmem:[#allocation4 + $0x68] sm:$0xff] %vm869_vm6, %v9464_v39 }
 0x362   : > { %v4050_v54 = vmax.f32 %v3228_v4, %v6403_v42  ;;  %v3260_v52 = vrot.slane %v3246_v37, %v9202_v55  ;;  %v3261_v28 = vcombine.high %v3253_v26, %v3253_v26  ;;  %v6408_v60 = vrot.slane %v3253_v26, 9 }
 0x363   : > { %v9473_v2 = vpop.f32.mrb[56].mxu1  ;;  %v4054_v23 = vmax.f32 %v3245_v22, %v6407_v14  ;;  %v4140_v6 = vmax.f32 %v4044_v11, %v4052_v48  ;;  %v4141_v47 = vmax.f32 %v4045_v31, %v4053_v16  ;;  %v4366_v24 = vrot.slane %v4139_v17, %v9213_v34 }
 0x364   : > { %v2617_v38 = vpop.f32.mrb[57].mxu1  ;;  %v3262_v61 = vcombine.high %v3260_v52, %v3260_v52  ;;  %v6409_v1 = vrot.slane %v3261_v28, 9  ;;  %v6410_v18 = vrot.slane %v3260_v52, 9  ;;  %v4055_v3 = vmax.f32 %v3253_v26, %v6408_v60  ;;  %v9511_v60 = vld [vmem:[#allocation3 + $0x48] sm:$0x3] }
 0x365   : > { %v4142_v51 = vmax.f32 %v4046_v13, %v4054_v23  ;;  %v4370_v8 = vrot.slane %v4140_v6, %v9213_v34  ;;  %v4374_v62 = vrot.slane %v4141_v47, %v9213_v34  ;;  %v4624_v7 = vrot.slane %v9409_v44, 1  ;;  %v9489_v13 = vld [vmem:[%s10501_s4] ss:$0 sm:$0xff] }
 0x366   : > { %v6411_v33 = vrot.slane %v3262_v61, 9  ;;  %v4056_v10 = vmax.f32 %v3261_v28, %v6409_v1  ;;  %v4057_v11 = vmax.f32 %v3260_v52, %v6410_v18  ;;  %v4143_v31 = vmax.f32 %v4047_v5, %v4055_v3 }
 0x367   : > { %v9481_v37 = vpop.f32.mrb[58].mxu1  ;;  %v4378_v4 = vrot.slane %v4142_v51, %v9213_v34  ;;  %v4526_v19 = vsel %vm4491_vm10, %v4370_v8, %v4366_v24  ;;  %v4625_v57 = vrot.slane %v9476_v27, 1  ;;  %v7369_v22 = vadd.f32 %v9489_v13, %v9383_v41 }
 0x368   : > { %v2622_v50 = vpop.f32.mrb[59].mxu1  ;;  %v4527_v43 = vsel %vm4493_vm11, %v4374_v62, %v4526_v19  ;;  %v4058_v5 = vmax.f32 %v3262_v61, %v6411_v33  ;;  %v4144_v35 = vmax.f32 %v4048_v53, %v4056_v10  ;;  %v4145_v45 = vmax.f32 %v4049_v0, %v4057_v11 }
 0x369   : > { %v4382_v42 = vrot.slane %v4143_v31, %v9213_v34  ;;  %v4528_v26 = vsel %vm4495_vm12, %v4378_v4, %v4527_v43  ;;  %v4626_v14 = vsel %vm1036_vm8, %v4624_v7, %v4625_v57  ;;  %v2801_v48 = vadd.f32 %v7369_v22, %v9145_v29 }
 0x36a   : > { %v4146_v16 = vmax.f32 %v4050_v54, %v4058_v5  ;;  %v4386_v17 = vrot.slane %v4144_v35, %v9213_v34  ;;  %v4390_v52 = vrot.slane %v4145_v45, %v9213_v34  ;;  %4645 = vrot.lane.b32.xlu1 %v4626_v14, %s7473_s14  ;;  %4758 = vst.msk [vmem:[#allocation4 + $0x60] sm:$0xff] %vm869_vm6, %v4626_v14  ;;  %v4627_v24 = vrot.slane %v9464_v39, 1 }
 0x36b   : > { %v7370_v41 = vadd.f32 %v9489_v13, %v9396_v32  ;;  %v9504_v53 = vpop.f32.mrb[60].mxu1  ;;  %v4529_v0 = vsel %vm4497_vm13, %v4382_v42, %v4528_v26  ;;  %v2879_v28 = vmax.f32 %v2801_v48, 0.0  ;;  %v7371_v29 = vadd.f32 %v9489_v13, %v9402_v46 }
 0x36c   : > { %v7372_v54 = vadd.f32 %v9489_v13, %v9411_v20  ;;  %v2627_v23 = vpop.f32.mrb[61].mxu1  ;;  %v4394_v6 = vrot.slane %v4146_v16, %v9213_v34  ;;  %v4530_v47 = vsel %vm4499_vm14, %v4386_v17, %v4529_v0  ;;  %v4628_v51 = vrot.slane %v9511_v60, 1 }
 0x36d   : > { %v2806_v32 = vadd.f32 %v7370_v41, %v9143_v36  ;;  %v4531_v38 = vsel %vm4501_vm15, %v4390_v52, %v4530_v47  ;;  %v3263_v61 = vcombine.high %v2879_v28, %v2879_v28  ;;  %v3270_v1 = vrot.slane %v2879_v28, %v9202_v55 }
 0x36e   : > { %v2811_v46 = vadd.f32 %v7371_v29, %v9151_v49  ;;  %v4532_v20 = vsel %vm4503_vm0, %v4394_v6, %v4531_v38  ;;  %v2816_v3 = vadd.f32 %v7372_v54, %v9149_v12  ;;  %v4629_v4 = vsel %vm1036_vm8, %v4627_v24, %v4628_v51 }
 0x36f   : > { %v2880_v18 = vmax.f32 %v2806_v32, 0.0  ;;  %v9523_v8 = vpop.f32.mrb[62].mxu1  ;;  %4567 = vst.msk [vmem:[#allocation3 + $0x51] sm:$0xff] %vm869_vm6, %v4532_v20  ;;  %v3277_v36 = vrot.slane %v3263_v61, %v9202_v55  ;;  %v3278_v62 = vcombine.high %v3270_v1, %v3270_v1  ;;  %v6412_v7 = vrot.slane %v3270_v1, 9  ;;  %4647 = vrot.lane.b32.xlu1 %v4629_v4, %s7473_s14  ;;  %4759 = vst.msk [vmem:[#allocation4 + $0x88] sm:$0xff] %vm869_vm6, %v4629_v4 }
 0x370   : > { %v2881_v33 = vmax.f32 %v2811_v46, 0.0  ;;  %v2632_v10 = vpop.f32.mrb[63].mxu1  ;;  %v2882_v31 = vmax.f32 %v2816_v3, 0.0 }
 0x371   : > { %v3280_v11 = vcombine.high %v2880_v18, %v2880_v18  ;;  %v3287_v49 = vrot.slane %v2880_v18, %v9202_v55  ;;  %v3279_v19 = vcombine.high %v3277_v36, %v3277_v36  ;;  %v6413_v12 = vrot.slane %v3278_v62, 9 }
 0x372   : > { %v6414_v57 = vrot.slane %v3277_v36, 9  ;;  %v4059_v22 = vmax.f32 %v3270_v1, %v6412_v7  ;;  %v3297_v35 = vcombine.high %v2881_v33, %v2881_v33  ;;  %v3304_v48 = vrot.slane %v2881_v33, %v9202_v55 }
 0x373   : > { %v3294_v50 = vrot.slane %v3280_v11, %v9202_v55  ;;  %v3295_v43 = vcombine.high %v3287_v49, %v3287_v49  ;;  %v6416_v5 = vrot.slane %v3287_v49, 9  ;;  %v9532_v45 = vpop.f32.mrb[64].mxu1  ;;  %v6415_v42 = vrot.slane %v3279_v19, 9 }
 0x374   : > { %v4060_v26 = vmax.f32 %v3278_v62, %v6413_v12  ;;  %v4061_v14 = vmax.f32 %v3277_v36, %v6414_v57  ;;  %v9535_v16 = vpop.f32.mrb[65].mxu1  ;;  %v3311_v29 = vrot.slane %v3297_v35, %v9202_v55  ;;  %v3312_v54 = vcombine.high %v3304_v48, %v3304_v48 }
 0x375   : > { %v3296_v17 = vcombine.high %v3294_v50, %v3294_v50  ;;  %v6417_v52 = vrot.slane %v3295_v43, 9  ;;  %v6418_v41 = vrot.slane %v3294_v50, 9  ;;  %v4063_v0 = vmax.f32 %v3287_v49, %v6416_v5 }
 0x376   : > { %v4062_v28 = vmax.f32 %v3279_v19, %v6415_v42  ;;  %v6420_v23 = vrot.slane %v3304_v48, 9  ;;  %v3314_v24 = vcombine.high %v2882_v31, %v2882_v31  ;;  %v9538_v38 = vld [vmem:[#allocation3 + $0x50] sm:$0xff]  ;;  %v3313_v61 = vcombine.high %v3311_v29, %v3311_v29 }
 0x377   : > { %v6419_v6 = vrot.slane %v3296_v17, 9  ;;  %v4064_v47 = vmax.f32 %v3295_v43, %v6417_v52  ;;  %v4065_v32 = vmax.f32 %v3294_v50, %v6418_v41  ;;  %v6421_v1 = vrot.slane %v3312_v54, 9  ;;  %4720 = vrot.lane.b32.xlu0 %v9538_v38, %s7473_s14  ;;  %4596 = vst.msk [vmem:[#allocation4 + $0xc8] sm:$0xff] %vm869_vm6, %v9538_v38  ;;  %4802 = vst.msk [vmem:[#allocation4 + $0x90] sm:$0xff] %vm869_vm6, %v9538_v38 }
 0x378   : > { %v6422_v46 = vrot.slane %v3311_v29, 9  ;;  %v4067_v20 = vmax.f32 %v3304_v48, %v6420_v23  ;;  %v3321_v3 = vrot.slane %v2882_v31, %v9202_v55  ;;  %v3328_v51 = vrot.slane %v3314_v24, %v9202_v55 }
 0x379   : > { %v4066_v18 = vmax.f32 %v3296_v17, %v6419_v6  ;;  %v7373_v36 = vadd.f32 %v9489_v13, %v9428_v15  ;;  %v6423_v62 = vrot.slane %v3313_v61, 9  ;;  %v4068_v7 = vmax.f32 %v3312_v54, %v6421_v1 }
 0x37a   : > { %v4069_v33 = vmax.f32 %v3311_v29, %v6422_v46  ;;  %v4147_v10 = vmax.f32 %v4059_v22, %v4067_v20  ;;  %v3329_v11 = vcombine.high %v3321_v3, %v3321_v3  ;;  %v3330_v49 = vcombine.high %v3328_v51, %v3328_v51 }
 0x37b   : > { %v6424_v4 = vrot.slane %v3321_v3, 9  ;;  %v6426_v19 = vrot.slane %v3328_v51, 9  ;;  %v4070_v12 = vmax.f32 %v3313_v61, %v6423_v62  ;;  %v4148_v57 = vmax.f32 %v4060_v26, %v4068_v7 }
 0x37c   : > { %v4149_v50 = vmax.f32 %v4061_v14, %v4069_v33  ;;  %v4398_v43 = vrot.slane %v4147_v10, %v9213_v34  ;;  %v6425_v5 = vrot.slane %v3329_v11, 9  ;;  %v6427_v31 = vrot.slane %v3330_v49, 9 }
 0x37d   : > { %v4071_v35 = vmax.f32 %v3321_v3, %v6424_v4  ;;  %v4073_v42 = vmax.f32 %v3328_v51, %v6426_v19  ;;  %v4150_v48 = vmax.f32 %v4062_v28, %v4070_v12  ;;  %v4402_v15 = vrot.slane %v4148_v57, %v9213_v34 }
 0x37e   : > { %v4406_v17 = vrot.slane %v4149_v50, %v9213_v34  ;;  %v2821_v22 = vadd.f32 %v7373_v36, %v9157_v9  ;;  %v4072_v52 = vmax.f32 %v3329_v11, %v6425_v5  ;;  %v4074_v41 = vmax.f32 %v3330_v49, %v6427_v31 }
 0x37f   : > { %v4151_v29 = vmax.f32 %v4063_v0, %v4071_v35  ;;  %v4153_v54 = vmax.f32 %v4065_v32, %v4073_v42  ;;  %v4410_v26 = vrot.slane %v4150_v48, %v9213_v34  ;;  %v4533_v14 = vsel %vm4491_vm10, %v4402_v15, %v4398_v43  ;;  %v9579_v43 = vld [vmem:[#allocation3 + $0x58] sm:$0x3] }
 0x380   : > { %v2883_v23 = vmax.f32 %v2821_v22, 0.0  ;;  %v7374_v6 = vadd.f32 %v9489_v13, %v9448_v56  ;;  %v4534_v28 = vsel %vm4493_vm11, %v4406_v17, %v4533_v14  ;;  %v4152_v24 = vmax.f32 %v4064_v47, %v4072_v52  ;;  %v10564_v17 = vld [vmem:[#allocation10_spill] sm:$0xff] }
 0x381   : > { %v4154_v61 = vmax.f32 %v4066_v18, %v4074_v41  ;;  %v4414_v1 = vrot.slane %v4151_v29, %v9213_v34  ;;  %v4422_v9 = vrot.slane %v4153_v54, %v9213_v34  ;;  %v4535_v46 = vsel %vm4495_vm12, %v4410_v26, %v4534_v28 }
 0x382   : > { %v3331_v0 = vcombine.high %v2883_v23, %v2883_v23  ;;  %v3338_v32 = vrot.slane %v2883_v23, %v9202_v55  ;;  %v4418_v20 = vrot.slane %v4152_v24, %v9213_v34  ;;  %v2826_v56 = vadd.f32 %v7374_v6, %v9155_v40 }
 0x383   : > { %v4426_v3 = vrot.slane %v4154_v61, %v9213_v34  ;;  %v4536_v51 = vsel %vm4497_vm13, %v4414_v1, %v4535_v46  ;;  %v7375_v62 = vadd.f32 %v9489_v13, %v9457_v63  ;;  %v7376_v10 = vadd.f32 %v9489_v13, %v9461_v30 }
 0x384   : > { %v3345_v47 = vrot.slane %v3331_v0, %v9202_v55  ;;  %v3346_v18 = vcombine.high %v3338_v32, %v3338_v32  ;;  %v6428_v36 = vrot.slane %v3338_v32, 9  ;;  %v4537_v7 = vsel %vm4499_vm14, %v4418_v20, %v4536_v51  ;;  %v10565_v0 = vld [vmem:[#allocation12_spill] sm:$0xff] }
 0x385   : > { %v2884_v33 = vmax.f32 %v2826_v56, 0.0  ;;  %v4630_v11 = vrot.slane %v9538_v38, 1  ;;  %v4538_v49 = vsel %vm4501_vm15, %v4422_v9, %v4537_v7  ;;  %v2831_v35 = vadd.f32 %v7375_v62, %v9164_v25 }
 0x386   : > { %v3347_v4 = vcombine.high %v3345_v47, %v3345_v47  ;;  %v6429_v19 = vrot.slane %v3346_v18, 9  ;;  %v6430_v40 = vrot.slane %v3345_v47, 9  ;;  %v4539_v12 = vsel %vm4503_vm0, %v4426_v3, %v4538_v49 }
 0x387   : > { %v9576_v57 = vmax.f32 %v3338_v32, %v6428_v36  ;;  %v3348_v50 = vcombine.high %v2884_v33, %v2884_v33  ;;  %v3355_v63 = vrot.slane %v2884_v33, %v9202_v55  ;;  %4568 = vst.msk [vmem:[#allocation3 + $0x61] sm:$0xff] %vm869_vm6, %v4539_v12  ;;  %v2836_v22 = vadd.f32 %v7376_v10, %v10564_v17 }
 0x388   : > { %v6431_v5 = vrot.slane %v3347_v4, 9  ;;  %v9582_v30 = vmax.f32 %v3346_v18, %v6429_v19  ;;  %v9584_v31 = vmax.f32 %v3345_v47, %v6430_v40  ;;  %v2885_v41 = vmax.f32 %v2831_v35, 0.0 }
 0x389   : > { %v3362_v42 = vrot.slane %v3348_v50, %v9202_v55  ;;  %v3363_v48 = vcombine.high %v3355_v63, %v3355_v63  ;;  %v6432_v15 = vrot.slane %v3355_v63, 9  ;;  %v4631_v29 = vrot.slane %v9579_v43, 1 }
 0x38a   : > { %v9589_v52 = vmax.f32 %v3347_v4, %v6431_v5  ;;  %v7377_v54 = vadd.f32 %v9489_v13, %v9473_v2  ;;  %v3365_v28 = vcombine.high %v2885_v41, %v2885_v41  ;;  %v3372_v25 = vrot.slane %v2885_v41, %v9202_v55 }
 0x38b   : > { %v3364_v26 = vcombine.high %v3362_v42, %v3362_v42  ;;  %v6433_v14 = vrot.slane %v3363_v48, 9  ;;  %v6434_v23 = vrot.slane %v3362_v42, 9  ;;  %v4079_v6 = vmax.f32 %v3355_v63, %v6432_v15 }
 0x38c   : > { %v2886_v24 = vmax.f32 %v2836_v22, 0.0  ;;  %v4632_v61 = vsel %vm1036_vm8, %v4630_v11, %v4631_v29  ;;  %v2841_v32 = vadd.f32 %v7377_v54, %v10565_v0  ;;  %v3379_v2 = vrot.slane %v3365_v28, %v9202_v55 }
 0x38d   : > { %v6435_v1 = vrot.slane %v3364_v26, 9  ;;  %v4080_v9 = vmax.f32 %v3363_v48, %v6433_v14  ;;  %v4081_v46 = vmax.f32 %v3362_v42, %v6434_v23  ;;  %4649 = vrot.lane.b32.xlu1 %v4632_v61, %s7473_s14  ;;  %4760 = vst.msk [vmem:[#allocation4 + $0xb0] sm:$0xff] %vm869_vm6, %v4632_v61  ;;  %v3380_v20 = vcombine.high %v3372_v25, %v3372_v25 }
 0x38e   : > { %v6436_v3 = vrot.slane %v3372_v25, 9  ;;  %v3382_v51 = vcombine.high %v2886_v24, %v2886_v24  ;;  %v3389_v47 = vrot.slane %v2886_v24, %v9202_v55  ;;  %v2887_v18 = vmax.f32 %v2841_v32, 0.0  ;;  %v9603_v62 = vld [vmem:[#allocation3 + $0x60] sm:$0xff] }
 0x38f   : > { %v4082_v56 = vmax.f32 %v3364_v26, %v6435_v1  ;;  %v7378_v36 = vadd.f32 %v9489_v13, %v9481_v37  ;;  %v3381_v7 = vcombine.high %v3379_v2, %v3379_v2  ;;  %v6437_v33 = vrot.slane %v3380_v20, 9  ;;  %4722 = vrot.lane.b32.xlu0 %v9603_v62, %s7473_s14  ;;  %4597 = vst.msk [vmem:[#allocation4 + $0xf0] sm:$0xff] %vm869_vm6, %v9603_v62 }
 0x390   : > { %v6438_v10 = vrot.slane %v3379_v2, 9  ;;  %v4083_v11 = vmax.f32 %v3372_v25, %v6436_v3  ;;  %4803 = vst.msk [vmem:[#allocation4 + $0xb8] sm:$0xff] %vm869_vm6, %v9603_v62  ;;  %v3396_v49 = vrot.slane %v3382_v51, %v9202_v55  ;;  %v3397_v4 = vcombine.high %v3389_v47, %v3389_v47 }
 0x391   : > { %v6440_v19 = vrot.slane %v3389_v47, 9  ;;  %v3399_v37 = vcombine.high %v2887_v18, %v2887_v18  ;;  %v6439_v40 = vrot.slane %v3381_v7, 9  ;;  %v4084_v12 = vmax.f32 %v3380_v20, %v6437_v33  ;;  %v10566_v33 = vld [vmem:[#allocation11_spill] sm:$0xff] }
 0x392   : > { %v4085_v50 = vmax.f32 %v3379_v2, %v6438_v10  ;;  %v4155_v63 = vmax.f32 %v9576_v57, %v4083_v11  ;;  %v3398_v5 = vcombine.high %v3396_v49, %v3396_v49  ;;  %v6441_v35 = vrot.slane %v3397_v4, 9  ;;  %v9631_v11 = vld [vmem:[#allocation3 + $0x8] sm:$0x3] }
 0x393   : > { %v6442_v42 = vrot.slane %v3396_v49, 9  ;;  %v4087_v48 = vmax.f32 %v3389_v47, %v6440_v19  ;;  %v4086_v15 = vmax.f32 %v3381_v7, %v6439_v40  ;;  %v4156_v17 = vmax.f32 %v9582_v30, %v4084_v12 }
 0x394   : > { %v4157_v22 = vmax.f32 %v9584_v31, %v4085_v50  ;;  %v4430_v41 = vrot.slane %v4155_v63, %v9213_v34  ;;  %v6443_v29 = vrot.slane %v3398_v5, 9  ;;  %v4088_v54 = vmax.f32 %v3397_v4, %v6441_v35 }
 0x395   : > { %v4089_v26 = vmax.f32 %v3396_v49, %v6442_v42  ;;  %v4159_v14 = vmax.f32 %v4079_v6, %v4087_v48  ;;  %v4158_v23 = vmax.f32 %v9589_v52, %v4086_v15  ;;  %v4434_v28 = vrot.slane %v4156_v17, %v9213_v34 }
 0x396   : > { %v4438_v57 = vrot.slane %v4157_v22, %v9213_v34  ;;  %v3406_v25 = vrot.slane %v2887_v18, %v9202_v55  ;;  %v4090_v24 = vmax.f32 %v3398_v5, %v6443_v29  ;;  %v4160_v61 = vmax.f32 %v4080_v9, %v4088_v54  ;;  %v4896_v5 = vld [vmem:[%s10502_s5 + $0x88] sm:$0xff]  ;;  %v4879_v29 = vld [vmem:[%s10502_s5] sm:$0xff] }
 0x397   : > { %v4161_v1 = vmax.f32 %v4081_v46, %v4089_v26  ;;  %v4446_v30 = vrot.slane %v4159_v14, %v9213_v34  ;;  %v4442_v31 = vrot.slane %v4158_v23, %v9213_v34  ;;  %v4540_v0 = vsel %vm4491_vm10, %v4434_v28, %v4430_v41  ;;  %v4880_v54 = vld [vmem:[%s10502_s5 + $0x8] sm:$0xff] }
 0x398   : > { %v3413_v32 = vrot.slane %v3399_v37, %v9202_v55  ;;  %v3414_v6 = vcombine.high %v3406_v25, %v3406_v25  ;;  %v4541_v52 = vsel %vm4493_vm11, %v4438_v57, %v4540_v0  ;;  %v4162_v2 = vmax.f32 %v4082_v56, %v4090_v24  ;;  %v9635_v37 = vld [vmem:[#allocation3 + $0x68] sm:$0x3] }
 0x399   : > { %v4450_v20 = vrot.slane %v4160_v61, %v9213_v34  ;;  %v4454_v3 = vrot.slane %v4161_v1, %v9213_v34  ;;  %v4542_v51 = vsel %vm4495_vm12, %v4442_v31, %v4541_v52  ;;  %v6444_v46 = vrot.slane %v3406_v25, 9 }
 0x39a   : > { %v3415_v9 = vcombine.high %v3413_v32, %v3413_v32  ;;  %v6445_v47 = vrot.slane %v3414_v6, 9  ;;  %v4458_v18 = vrot.slane %v4162_v2, %v9213_v34  ;;  %v4543_v7 = vsel %vm4497_vm13, %v4446_v30, %v4542_v51 }
 0x39b   : > { %v2846_v10 = vadd.f32 %v7378_v36, %v10566_v33  ;;  %v4672_v49 = vrot.slane %v9631_v11, 2  ;;  %v4544_v56 = vsel %vm4499_vm14, %v4450_v20, %v4543_v7  ;;  %v6446_v4 = vrot.slane %v3413_v32, 9  ;;  %v4895_v36 = vld [vmem:[%s10502_s5 + $0x80] sm:$0xff] }
 0x39c   : > { %v6447_v19 = vrot.slane %v3415_v9, 9  ;;  %v4545_v40 = vsel %vm4501_vm15, %v4454_v3, %v4544_v56  ;;  %v9638_v12 = vmax.f32 %v3406_v25, %v6444_v46  ;;  %v7379_v63 = vadd.f32 %v9489_v13, %v9504_v53 }
 0x39d   : > { %v2888_v50 = vmax.f32 %v2846_v10, 0.0  ;;  %v4546_v35 = vsel %vm4503_vm0, %v4458_v18, %v4545_v40  ;;  %v9649_v42 = vmax.f32 %v3414_v6, %v6445_v47  ;;  %v7380_v48 = vadd.f32 %v9489_v13, %v9523_v8 }
 0x39e   : > { %v4633_v15 = vrot.slane %v9603_v62, 1  ;;  %4569 = vst.msk [vmem:[#allocation3 + $0x71] sm:$0xff] %vm869_vm6, %v4546_v35  ;;  %v4634_v22 = vrot.slane %v9635_v37, 1  ;;  %v2851_v41 = vadd.f32 %v7379_v63, %v9535_v16  ;;  %v4677_v8 = vrot.slane %v9341_v21, 2 }
 0x39f   : > { %v3416_v53 = vcombine.high %v2888_v50, %v2888_v50  ;;  %v3423_v17 = vrot.slane %v2888_v50, %v9202_v55  ;;  %v2856_v13 = vadd.f32 %v7380_v48, %v9532_v45  ;;  %v4678_v26 = vrot.slane %v9406_v58, 2 }
 0x3a0   : > { %v7165_v14 = vpack.c.bf16 %v4896_v5, %v4895_v36  ;;  %v4635_v16 = vsel %vm1036_vm8, %v4633_v15, %v4634_v22  ;;  %v2889_v24 = vmax.f32 %v2851_v41, 0.0  ;;  %v7167_v21 = vpack.c.bf16 %v4880_v54, %v4879_v29 }
 0x3a1   : > { %v3430_v23 = vrot.slane %v3416_v53, %v9202_v55  ;;  %v3431_v28 = vcombine.high %v3423_v17, %v3423_v17  ;;  %v6448_v57 = vrot.slane %v3423_v17, 9  ;;  %4651 = vrot.lane.b32.xlu1 %v4635_v16, %s7473_s14  ;;  %4761 = vst.msk [vmem:[#allocation4 + $0xd8] sm:$0xff] %vm869_vm6, %v4635_v16  ;;  %v2890_v25 = vmax.f32 %v2856_v13, 0.0 }
 0x3a2   : > { %v9672_v61 = vsel %vm1246_vm7, %v4677_v8, %v4678_v26  ;;  %7166 = vmatprep.subr.bf16.mxu0 %v7165_v14  ;;  %v9674_v45 = vmax.f32 %v3413_v32, %v6446_v4  ;;  %v3433_v6 = vcombine.high %v2889_v24, %v2889_v24  ;;  %v3440_v52 = vrot.slane %v2889_v24, %v9202_v55 }
 0x3a3   : > { %v3432_v58 = vcombine.high %v3430_v23, %v3430_v23  ;;  %v6449_v1 = vrot.slane %v3431_v28, 9  ;;  %v6450_v30 = vrot.slane %v3430_v23, 9  ;;  %4831 = vst.msk [vmem:[#allocation4 + $0x20] sm:$0xff] %vm869_vm6, %v9672_v61  ;;  %4705 = vst.msk [vmem:[#allocation4 + $0x58] sm:$0xff] %vm869_vm6, %v9672_v61  ;;  %v3450_v31 = vcombine.high %v2890_v25, %v2890_v25  ;;  %7168 = vmatpush3.bf16.msra.mxu0 %v7167_v21  ;;  %v4642_v51 = vpop.permute.xlu1 %4641  ;;  %v4881_v21 = vld [vmem:[%s10502_s5 + $0x10] sm:$0xff] }
 0x3a4   : > { %v3457_v0 = vrot.slane %v2890_v25, %v9202_v55  ;;  %v9682_v2 = vmax.f32 %v3415_v9, %v6447_v19  ;;  %v4095_v20 = vmax.f32 %v3423_v17, %v6448_v57  ;;  %v3447_v7 = vrot.slane %v3433_v6, %v9202_v55  ;;  %4664 = vst.msk [vmem:[#allocation4 + $0x28] sm:$0xff] %vm1213_vm9, %v4642_v51 }
 0x3a5   : > { %v6451_v32 = vrot.slane %v3432_v58, 9  ;;  %v4096_v3 = vmax.f32 %v3431_v28, %v6449_v1  ;;  %v3464_v46 = vrot.slane %v3450_v31, %v9202_v55  ;;  %v9686_v33 = vld [vmem:[#allocation3 + $0x70] sm:$0xff]  ;;  %v9689_v10 = vmax.f32 %v3430_v23, %v6450_v30  ;;  %v9700_v13 = vld [vmem:[#allocation3 + $0x78] sm:$0x3]  ;;  %v4897_v28 = vld [vmem:[%s10502_s5 + $0x90] sm:$0xff] }
 0x3a6   : > { %v3465_v47 = vcombine.high %v3457_v0, %v3457_v0  ;;  %v6456_v18 = vrot.slane %v3457_v0, 9  ;;  %v3448_v9 = vcombine.high %v3440_v52, %v3440_v52  ;;  %v6452_v4 = vrot.slane %v3440_v52, 9  ;;  %4724 = vrot.lane.b32.xlu0 %v9686_v33, %s7473_s14  ;;  %4598 = vst.msk [vmem:[#allocation4 + $0x118] sm:$0xff] %vm869_vm6, %v9686_v33  ;;  %4804 = vst.msk [vmem:[#allocation4 + $0xe0] sm:$0xff] %vm869_vm6, %v9686_v33  ;;  %v4899_v30 = vld [vmem:[%s10502_s5 + $0xa0] sm:$0xff] }
 0x3a7   : > { %v9691_v56 = vmax.f32 %v3432_v58, %v6451_v32  ;;  %v3466_v55 = vcombine.high %v3464_v46, %v3464_v46  ;;  %v6458_v40 = vrot.slane %v3464_v46, 9  ;;  %v3449_v63 = vcombine.high %v3447_v7, %v3447_v7  ;;  %v4882_v58 = vld [vmem:[%s10502_s5 + $0x18] sm:$0xff]  ;;  %v4900_v32 = vld [vmem:[%s10502_s5 + $0xa8] sm:$0xff] }
 0x3a8   : > { %v6457_v19 = vrot.slane %v3465_v47, 9  ;;  %v4103_v50 = vmax.f32 %v3457_v0, %v6456_v18  ;;  %v6453_v36 = vrot.slane %v3448_v9, 9  ;;  %v6454_v5 = vrot.slane %v3447_v7, 9 }
 0x3a9   : > { %v4099_v35 = vmax.f32 %v3440_v52, %v6452_v4  ;;  %v6459_v48 = vrot.slane %v3466_v55, 9  ;;  %v4105_v53 = vmax.f32 %v3464_v46, %v6458_v40  ;;  %v6455_v22 = vrot.slane %v3449_v63, 9 }
 0x3aa   : > { %v4104_v15 = vmax.f32 %v3465_v47, %v6457_v19  ;;  %v4167_v17 = vmax.f32 %v4095_v20, %v4103_v50  ;;  %v4100_v41 = vmax.f32 %v3448_v9, %v6453_v36  ;;  %v4101_v29 = vmax.f32 %v3447_v7, %v6454_v5  ;;  %v4883_v20 = vld [vmem:[%s10502_s5 + $0x20] sm:$0xff]  ;;  %v4902_v9 = vld [vmem:[%s10502_s5 + $0xb8] sm:$0xff]  ;;  %v10567_v50 = vld [vmem:[#allocation13_spill] sm:$0xff]  ;;  %v4713_v36 = vpop.permute.xlu0 %4712 }
 0x3ab   : > { %v4163_v54 = vmax.f32 %v9638_v12, %v4099_v35  ;;  %v4106_v8 = vmax.f32 %v3466_v55, %v6459_v48  ;;  %v4169_v14 = vmax.f32 %v9689_v10, %v4105_v53  ;;  %v4636_v23 = vrot.slane %v9686_v33, 1  ;;  %v4898_v12 = vld [vmem:[%s10502_s5 + $0x98] sm:$0xff] }
 0x3ac   : > { %v4168_v26 = vmax.f32 %v4096_v3, %v4104_v15  ;;  %v4102_v57 = vmax.f32 %v3449_v63, %v6455_v22  ;;  %v4164_v16 = vmax.f32 %v9649_v42, %v4100_v41  ;;  %v4165_v25 = vmax.f32 %v9674_v45, %v4101_v29  ;;  %v4884_v3 = vld [vmem:[%s10502_s5 + $0x28] sm:$0xff]  ;;  %v4886_v22 = vld [vmem:[%s10502_s5 + $0x38] sm:$0xff] }
 0x3ad   : > { %v4683_v24 = vrot.slane %v9464_v39, 2  ;;  %v4170_v1 = vmax.f32 %v9691_v56, %v4106_v8  ;;  %v4478_v42 = vrot.slane %v4167_v17, %v9213_v34  ;;  %v4462_v45 = vrot.slane %v4163_v54, %v9213_v34  ;;  %v4901_v56 = vld [vmem:[%s10502_s5 + $0xb0] sm:$0xff] }
 0x3ae   : > { %v4637_v39 = vrot.slane %v9700_v13, 1  ;;  %v4166_v31 = vmax.f32 %v9682_v2, %v4102_v57  ;;  %v4466_v0 = vrot.slane %v4164_v16, %v9213_v34  ;;  %v4470_v6 = vrot.slane %v4165_v25, %v9213_v34  ;;  %v4885_v17 = vld [vmem:[%s10502_s5 + $0x30] sm:$0xff]  ;;  %v4887_v16 = vld [vmem:[%s10502_s5 + $0x40] sm:$0xff] }
 0x3af   : > { %v4684_v52 = vrot.slane %v9511_v60, 2  ;;  %v4482_v2 = vrot.slane %v4168_v26, %v9213_v34  ;;  %v7169_v46 = vpack.c.bf16 %v4898_v12, %v4897_v28  ;;  %v7171_v47 = vpack.c.bf16 %v4882_v58, %v4881_v21  ;;  %v4715_v28 = vpop.permute.xlu0 %4714  ;;  %v4906_v12 = vld [vmem:[%s10502_s5 + $0xd8] sm:$0xff] }
 0x3b0   : > { %v4638_v51 = vsel %vm1036_vm8, %v4636_v23, %v4637_v39  ;;  %v4474_v60 = vrot.slane %v4166_v31, %v9213_v34  ;;  %v4547_v18 = vsel %vm4491_vm10, %v4466_v0, %v4462_v45  ;;  %v4689_v10 = vrot.slane %v9603_v62, 2  ;;  %v4907_v39 = vld [vmem:[%s10502_s5 + $0xe0] sm:$0xff] }
 0x3b1   : > { %4653 = vrot.lane.b32.xlu1 %v4638_v51, %s7473_s14  ;;  %4762 = vst.msk [vmem:[#allocation4 + $0x100] sm:$0xff] %vm869_vm6, %v4638_v51  ;;  %v4685_v7 = vsel %vm1246_vm7, %v4683_v24, %v4684_v52  ;;  %v4548_v4 = vsel %vm4493_vm11, %v4470_v6, %v4547_v18  ;;  %7170 = vmatprep.subr.bf16.mxu0 %v7169_v46  ;;  %v4690_v55 = vrot.slane %v9635_v37, 2  ;;  %v4671_v63 = vrot.slane %v10567_v50, 2  ;;  %v4892_v51 = vld [vmem:[%s10502_s5 + $0x68] sm:$0xff]  ;;  %v4910_v18 = vld [vmem:[%s10502_s5 + $0xf8] sm:$0xff] }
 0x3b2   : > { %4833 = vst.msk [vmem:[#allocation4 + $0x70] sm:$0xff] %vm869_vm6, %v4685_v7  ;;  %4707 = vst.msk [vmem:[#allocation4 + $0xa8] sm:$0xff] %vm869_vm6, %v4685_v7  ;;  %v7173_v19 = vpack.c.bf16 %v4900_v32, %v4899_v30  ;;  %v7175_v40 = vpack.c.bf16 %v4884_v3, %v4883_v20  ;;  %v4549_v62 = vsel %vm4495_vm12, %v4474_v60, %v4548_v4  ;;  %7172 = vmatpush3.bf16.msra.mxu0 %v7171_v47  ;;  %v4908_v30 = vld [vmem:[%s10502_s5 + $0xe8] sm:$0xff]  ;;  %v4909_v60 = vld [vmem:[%s10502_s5 + $0xf0] sm:$0xff] }
 0x3b3   : > { %v4692_v5 = vrot.slane %v9686_v33, 2  ;;  %v4693_v35 = vrot.slane %v9700_v13, 2  ;;  %v4486_v48 = vrot.slane %v4169_v14, %v9213_v34  ;;  %v4550_v15 = vsel %vm4497_vm13, %v4478_v42, %v4549_v62  ;;  %v4903_v13 = vld [vmem:[%s10502_s5 + $0xc0] sm:$0xff]  ;;  %v4889_v42 = vld [vmem:[%s10502_s5 + $0x50] sm:$0xff]  ;;  %v4928_v62 = vld [vmem:[%s10502_s5 + $0x188] sm:$0xff] }
 0x3b4   : > { %v4691_v53 = vsel %vm1246_vm7, %v4689_v10, %v4690_v55  ;;  %7174 = vmatprep.subr.bf16.mxu0 %v7173_v19  ;;  %v7177_v37 = vpack.c.bf16 %v4902_v9, %v4901_v56  ;;  %v4490_v33 = vrot.slane %v4170_v1, %v9213_v34  ;;  %v4551_v41 = vsel %vm4499_vm14, %v4482_v2, %v4550_v15  ;;  %v4904_v34 = vld [vmem:[%s10502_s5 + $0xc8] sm:$0xff]  ;;  %v4891_v2 = vld [vmem:[%s10502_s5 + $0x60] sm:$0xff]  ;;  %v4893_v55 = vld [vmem:[%s10502_s5 + $0x70] sm:$0xff] }
 0x3b5   : > { %4769 = vrot.lane.b32.xlu1 %v9672_v61, %s7473_s14  ;;  %4835 = vst.msk [vmem:[#allocation4 + $0xc0] sm:$0xff] %vm869_vm6, %v4691_v53  ;;  %4709 = vst.msk [vmem:[#allocation4 + $0xf8] sm:$0xff] %vm869_vm6, %v4691_v53  ;;  %v4673_v29 = vsel %vm1246_vm7, %v4671_v63, %v4672_v49  ;;  %v4694_v54 = vsel %vm1246_vm7, %v4692_v5, %v4693_v35  ;;  %v4552_v61 = vsel %vm4501_vm15, %v4486_v48, %v4551_v41  ;;  %v7460_v49 = vld [vmem:[#allocation3 + $0x18] sm:$0x3]  ;;  %v4894_v19 = vld [vmem:[%s10502_s5 + $0x78] sm:$0xff] }
 0x3b6   : > { %4703 = vst.msk [vmem:[#allocation4 + $0x8] sm:$0xff] %vm869_vm6, %v4673_v29  ;;  %4836 = vst.msk [vmem:[#allocation4 + $0xe8] sm:$0xff] %vm869_vm6, %v4694_v54  ;;  %v4674_v11 = vrot.slane %v9264_v59, 2  ;;  %v4675_v8 = vrot.slane %v7460_v49, 2  ;;  %v4553_v26 = vsel %vm4503_vm0, %v4490_v33, %v4552_v61  ;;  %7176 = vmatpush3.bf16.msra.mxu0 %v7175_v40  ;;  %v7179_v14 = vpack.c.bf16 %v4886_v22, %v4885_v17  ;;  %v4888_v59 = vld [vmem:[%s10502_s5 + $0x48] sm:$0xff]  ;;  %v4927_v40 = vld [vmem:[%s10502_s5 + $0x180] sm:$0xff] }
 0x3b7   : > { %4710 = vst.msk [vmem:[#allocation4 + $0x120] sm:$0xff] %vm869_vm6, %v4694_v54  ;;  %v4680_v23 = vrot.slane %v9409_v44, 2  ;;  %4570 = vst.msk [vmem:[#allocation3 + $0x81] sm:$0xff] %vm869_vm6, %v4553_v26  ;;  %7178 = vmatprep.subr.bf16.mxu0 %v7177_v37  ;;  %v7181_v57 = vpack.c.bf16 %v4904_v34, %v4903_v13  ;;  %v4681_v24 = vrot.slane %v9476_v27, 2  ;;  %v4905_v44 = vld [vmem:[%s10502_s5 + $0xd0] sm:$0xff]  ;;  %v4686_v21 = vrot.slane %v9538_v38, 2 }
 0x3b8   : > { %4736 = vst.msk [vmem:[#allocation4 + $0x8] sm:$0xff] %vm1213_vm9, %v4713_v36  ;;  %v4676_v25 = vsel %vm1246_vm7, %v4674_v11, %v4675_v8  ;;  %v4687_v58 = vrot.slane %v9579_v43, 2  ;;  %v7183_v27 = vpack.c.bf16 %v4888_v59, %v4887_v16  ;;  %v7185_v38 = vpack.c.bf16 %v4906_v12, %v4905_v44  ;;  %v4890_v43 = vld [vmem:[%s10502_s5 + $0x58] sm:$0xff]  ;;  %v4911_v5 = vld [vmem:[%s10502_s5 + $0x100] sm:$0xff]  ;;  %v4912_v35 = vld [vmem:[%s10502_s5 + $0x108] sm:$0xff] }
 0x3b9   : > { %4773 = vrot.lane.b32.xlu1 %v4685_v7, %s7473_s14  ;;  %4704 = vst.msk [vmem:[#allocation4 + $0x30] sm:$0xff] %vm869_vm6, %v4676_v25  ;;  %v4682_v1 = vsel %vm1246_vm7, %v4680_v23, %v4681_v24  ;;  %v7187_v52 = vpack.c.bf16 %v4890_v43, %v4889_v42  ;;  %v7189_v32 = vpack.c.bf16 %v4908_v30, %v4907_v39  ;;  %v4929_v48 = vld [vmem:[%s10502_s5 + $0x190] sm:$0xff]  ;;  %v4930_v15 = vld [vmem:[%s10502_s5 + $0x198] sm:$0xff]  ;;  %v7461_v13 = vld [vmem:[#allocation3 + $0x98] sm:$0x3] }
 0x3ba   : > { %4737 = vst.msk [vmem:[#allocation4 + $0x30] sm:$0xff] %vm1213_vm9, %v4715_v28  ;;  %7180 = vmatpush3.bf16.msra.mxu0 %v7179_v14  ;;  %v4688_v45 = vsel %vm1246_vm7, %v4686_v21, %v4687_v58  ;;  %v7191_v9 = vpack.c.bf16 %v4892_v51, %v4891_v2  ;;  %v7193_v4 = vpack.c.bf16 %v4910_v18, %v4909_v60  ;;  %v4913_v33 = vld [vmem:[%s10502_s5 + $0x110] sm:$0xff]  ;;  %v4914_v41 = vld [vmem:[%s10502_s5 + $0x118] sm:$0xff]  ;;  %v4810_v34 = vrot.slane %v7461_v13, 1  ;;  %v4931_v61 = vld [vmem:[%s10502_s5 + $0x1a0] sm:$0xff] }
 0x3bb   : > { %4832 = vst.msk [vmem:[#allocation4 + $0x48] sm:$0xff] %vm869_vm6, %v4682_v1  ;;  %4706 = vst.msk [vmem:[#allocation4 + $0x80] sm:$0xff] %vm869_vm6, %v4682_v1  ;;  %7182 = vmatprep.subr.bf16.mxu0 %v7181_v57  ;;  %v7195_v63 = vpack.c.bf16 %v4894_v19, %v4893_v55  ;;  %v7197_v36 = vpack.c.bf16 %v4928_v62, %v4927_v40  ;;  %v7199_v37 = vpack.c.bf16 %v4912_v35, %v4911_v5  ;;  %v10568_v29 = vld [vmem:[#allocation9_spill] sm:$0xff]  ;;  %v4932_v11 = vld [vmem:[%s10502_s5 + $0x1a8] sm:$0xff] }
 0x3bc   : > { %4834 = vst.msk [vmem:[#allocation4 + $0x98] sm:$0xff] %vm869_vm6, %v4688_v45  ;;  %4708 = vst.msk [vmem:[#allocation4 + $0xd0] sm:$0xff] %vm869_vm6, %v4688_v45  ;;  %v7201_v22 = vpack.c.bf16 %v4930_v15, %v4929_v48  ;;  %v7203_v49 = vpack.c.bf16 %v4914_v41, %v4913_v33  ;;  %v7205_v26 = vpack.c.bf16 %v4932_v11, %v4931_v61  ;;  %v4915_v14 = vld [vmem:[%s10502_s5 + $0x120] sm:$0xff]  ;;  %v4916_v23 = vld [vmem:[%s10502_s5 + $0x128] sm:$0xff] }
 0x3bd   : > { %4777 = vrot.lane.b32.xlu1 %v4691_v53, %s7473_s14  ;;  %v4839_v53 = vld [vmem:[#allocation4] sm:$0xff]  ;;  %v4844_v28 = vld [vmem:[#allocation4 + $0x28] sm:$0xff]  ;;  %v4920_v43 = vld [vmem:[%s10502_s5 + $0x148] sm:$0xff] }
 0x3be   : > { %v4587_v0 = vld [vmem:[#allocation3 + $0x80] sm:$0xff]  ;;  %7184 = vmatpush3.bf16.msra.mxu0 %v7183_v27  ;;  %v4588_v6 = vld [vmem:[#allocation3 + $0x88] sm:$0x3]  ;;  %v4936_v27 = vld [vmem:[%s10502_s5 + $0x1c8] sm:$0xff] }
 0x3bf   : > { %v4840_v31 = vld [vmem:[#allocation4 + $0x8] sm:$0xff]  ;;  %4726 = vrot.lane.b32.xlu0 %v4587_v0, %s7473_s14  ;;  %4805 = vst.msk [vmem:[#allocation4 + $0x108] sm:$0xff] %vm869_vm6, %v4587_v0  ;;  %v4764_v20 = vrot.slane %v4587_v0, 2  ;;  %v4765_v3 = vrot.slane %v4588_v6, 2  ;;  %7186 = vmatprep.subr.bf16.mxu0 %v7185_v38  ;;  %v4745_v46 = vrot.slane %v4587_v0, 1  ;;  %v4746_v47 = vrot.slane %v4588_v6, 1 }
 0x3c0   : > { %5046 = vmatprep.mubr.f32.mxu0 %v4840_v31  ;;  %v4717_v56 = vpop.permute.xlu0 %4716  ;;  %v4933_v16 = vld [vmem:[%s10502_s5 + $0x1b0] sm:$0xff]  ;;  %v4934_v59 = vld [vmem:[%s10502_s5 + $0x1b8] sm:$0xff]  ;;  %v4919_v38 = vld [vmem:[%s10502_s5 + $0x140] sm:$0xff] }
 0x3c1   : > { %4779 = vrot.lane.b32.xlu1 %v4694_v54, %s7473_s14  ;;  %v4766_v7 = vsel %vm1246_vm7, %v4764_v20, %v4765_v3  ;;  %v4747_v10 = vsel %vm1036_vm8, %v4745_v46, %v4746_v47  ;;  %4738 = vst.msk [vmem:[#allocation4 + $0x58] sm:$0xff] %vm1213_vm9, %v4717_v56  ;;  %v4845_v17 = vld [vmem:[#allocation4 + $0x30] sm:$0xff]  ;;  %v4809_v54 = vrot.slane %v10568_v29, 1  ;;  %v7209_v44 = vpack.c.bf16 %v4934_v59, %v4933_v16  ;;  %v4917_v12 = vld [vmem:[%s10502_s5 + $0x130] sm:$0xff]  ;;  %v4918_v21 = vld [vmem:[%s10502_s5 + $0x138] sm:$0xff] }
 0x3c2   : > { %4837 = vst.msk [vmem:[#allocation4 + $0x110] sm:$0xff] %vm869_vm6, %v4766_v7  ;;  %7188 = vmatpush3.bf16.msra.mxu0 %v7187_v52  ;;  %4763 = vst.msk [vmem:[#allocation4 + $0x128] sm:$0xff] %vm869_vm6, %v4747_v10  ;;  %v7211_v42 = vpack.c.bf16 %v4918_v21, %v4917_v12  ;;  %v4937_v39 = vld [vmem:[%s10502_s5 + $0x1d0] sm:$0xff]  ;;  %v4938_v30 = vld [vmem:[%s10502_s5 + $0x1d8] sm:$0xff]  ;;  %v7215_v31 = vpack.c.bf16 %v4920_v43, %v4919_v38 }
 0x3c3   : > { %4767 = vrot.lane.b32.xlu0 %v4676_v25, %s7473_s14  ;;  %7190 = vmatprep.subr.bf16.mxu0 %v7189_v32  ;;  %v4811_v57 = vsel %vm1036_vm8, %v4809_v54, %v4810_v34  ;;  %v7207_v25 = vpack.c.bf16 %v4916_v23, %v4915_v14  ;;  %v7217_v6 = vpack.c.bf16 %v4938_v30, %v4937_v39  ;;  %v4921_v52 = vld [vmem:[%s10502_s5 + $0x150] sm:$0xff]  ;;  %v4922_v32 = vld [vmem:[%s10502_s5 + $0x158] sm:$0xff]  ;;  %v4939_v3 = vld [vmem:[%s10502_s5 + $0x1e0] sm:$0xff] }
 0x3c4   : > { %v4940_v2 = vld [vmem:[%s10502_s5 + $0x1e8] sm:$0xff]  ;;  %v7219_v51 = vpack.c.bf16 %v4922_v32, %v4921_v52  ;;  %v4923_v47 = vld [vmem:[%s10502_s5 + $0x160] sm:$0xff]  ;;  %v4941_v18 = vld [vmem:[%s10502_s5 + $0x1f0] sm:$0xff] }
 0x3c5   : > { %4781 = vrot.lane.b32.xlu1 %v4766_v7, %s7473_s14  ;;  %v4644_v50 = vpop.permute.xlu1 %4643  ;;  %v7221_v46 = vpack.c.bf16 %v4940_v2, %v4939_v3  ;;  %v4924_v60 = vld [vmem:[%s10502_s5 + $0x168] sm:$0xff]  ;;  %v4942_v7 = vld [vmem:[%s10502_s5 + $0x1f8] sm:$0xff]  ;;  %v4943_v40 = vld [vmem:[%s10502_s5 + $0x200] sm:$0xff] }
 0x3c6   : > { %7192 = vmatpush3.bf16.msra.mxu0 %v7191_v9  ;;  %4665 = vst.msk [vmem:[#allocation4 + $0x50] sm:$0xff] %vm1213_vm9, %v4644_v50  ;;  %4818 = vst.msk [vmem:[#allocation4 + $0x18] sm:$0xff] %vm1213_vm9, %v4644_v50  ;;  %v7225_v9 = vpack.c.bf16 %v4942_v7, %v4941_v18  ;;  %v4926_v55 = vld [vmem:[%s10502_s5 + $0x178] sm:$0xff]  ;;  %v4944_v62 = vld [vmem:[%s10502_s5 + $0x208] sm:$0xff] }
 0x3c7   : > { %4771 = vrot.lane.b32.xlu0 %v4682_v1, %s7473_s14  ;;  %7194 = vmatprep.subr.bf16.mxu0 %v7193_v4  ;;  %v4935_v1 = vld [vmem:[%s10502_s5 + $0x1c0] sm:$0xff]  ;;  %v4925_v4 = vld [vmem:[%s10502_s5 + $0x170] sm:$0xff]  ;;  %v9982_v35 = vld [vmem:[#allocation3 + $0x98] sm:$0x3] }
 0x3c8   : > { %v4850_v8 = vld [vmem:[#allocation4 + $0x58] sm:$0xff]  ;;  %v7227_v50 = vpack.c.bf16 %v4926_v55, %v4925_v4  ;;  %v9980_v5 = vld [vmem:[#allocation3 + $0x90] sm:$0xff]  ;;  %v5569_v15 = vrot.slane %v9982_v35, 2  ;;  %v4946_v12 = vld [vmem:[%s10502_s5 + $0x218] sm:$0xff] }
 0x3c9   : > { %v5568_v48 = vrot.slane %v9980_v5, 2  ;;  %v4848_v4 = vld [vmem:[#allocation4 + $0x48] sm:$0xff]  ;;  %v4853_v55 = vld [vmem:[#allocation4 + $0x70] sm:$0xff] }
 0x3ca   : > { %7196 = vmatpush3.bf16.msra.mxu0 %v7195_v63  ;;  %v9976_v63 = vpack.c.bf16 %v4944_v62, %v4943_v40  ;;  %v4863_v40 = vld [vmem:[#allocation4 + $0xc0] sm:$0xff]  ;;  %v4868_v62 = vld [vmem:[#allocation4 + $0xe8] sm:$0xff] }
 0x3cb   : > { %4775 = vrot.lane.b32.xlu0 %v4688_v45, %s7473_s14  ;;  %7198 = vmatprep.subr.bf16.mxu0 %v7197_v36  ;;  %v7213_v45 = vpack.c.bf16 %v4936_v27, %v4935_v1 }
 0x3cd   : > { %5047 = vmatmul.mubr.f32.vlgmr.msra.gmra.mrb[62].mxu0 %v4839_v53  ;;  %v4849_v58 = vld [vmem:[#allocation4 + $0x50] sm:$0xff]  ;;  %v9986_v53 = vld [vmem:[#allocation4 + $0x138] sm:$0xff] }
 0x3ce   : > { %5051 = vmatprep.mubr.f32.mxu0 %v4845_v17  ;;  %7200 = vmatpush3.bf16.msra.mxu0 %v7199_v37  ;;  %v5570_v37 = vsel %vm1246_vm7, %v5568_v48, %v5569_v15  ;;  %v4842_v21 = vld [vmem:[#allocation4 + $0x18] sm:$0xff] }
 0x3cf   : > { %4812 = vrot.lane.b32.xlu0 %v4747_v10, %s7473_s14  ;;  %7202 = vmatprep.subr.bf16.mxu0 %v7201_v22  ;;  %v7223_v10 = vpack.c.bf16 %v4924_v60, %v4923_v47  ;;  %5580 = vst.msk [vmem:[#allocation4 + $0x138] sm:$0xff] %vm869_vm6, %v5570_v37 }
 0x3d1   : > { %5052 = vmatmul.mubr.f32.gmra.mrb[64].mxu0 %v4844_v28 }
 0x3d2   : > { %5056 = vmatprep.mubr.f32.mxu0 %v4850_v8  ;;  %7204 = vmatpush3.bf16.msra.mxu0 %v7203_v49 }
 0x3d3   : > { %4814 = vrot.lane.b32.xlu0 %v4811_v57, %s7473_s14  ;;  %v4719_v24 = vpop.permute.xlu0 %4718  ;;  %7206 = vmatprep.subr.bf16.mxu0 %v7205_v26 }
 0x3d4   : > { %4739 = vst.msk [vmem:[#allocation4 + $0x80] sm:$0xff] %vm1213_vm9, %v4719_v24 }
 0x3d5   : > { %5057 = vmatmul.mubr.f32.gmra.mrb[66].mxu0 %v4849_v58 }
 0x3d6   : > { %7208 = vmatpush3.bf16.msra.mxu0 %v7207_v25 }
 0x3d7   : > { %7210 = vmatprep.subr.bf16.mxu0 %v7209_v44  ;;  %v4945_v44 = vld [vmem:[%s10502_s5 + $0x210] sm:$0xff] }
 0x3d8   : > { %v7233_v27 = vpack.c.bf16 %v4946_v12, %v4945_v44 }
 0x3da   : > { %7212 = vmatpush3.bf16.msra.mxu0 %v7211_v42  ;;  %v4947_v42 = vld [vmem:[%s10502_s5 + $0x220] sm:$0xff] }
 0x3db   : > { %v4855_v0 = vld [vmem:[#allocation4 + $0x80] sm:$0xff]  ;;  %7214 = vmatprep.subr.bf16.mxu0 %v7213_v45  ;;  %v4948_v45 = vld [vmem:[%s10502_s5 + $0x228] sm:$0xff] }
 0x3dc   : > { %v4646_v20 = vpop.permute.xlu1 %4645  ;;  %5061 = vmatprep.mubr.f32.mxu0 %v4855_v0  ;;  %v7237_v39 = vpack.c.bf16 %v4948_v45, %v4947_v42  ;;  %v4950_v0 = vld [vmem:[%s10502_s5 + $0x238] sm:$0xff]  ;;  %v5623_v45 = vld [vmem:[%s10504_s7 + $0x10] sm:$0xff] }
 0x3dd   : > { %4666 = vst.msk [vmem:[#allocation4 + $0x78] sm:$0xff] %vm1213_vm9, %v4646_v20  ;;  %4819 = vst.msk [vmem:[#allocation4 + $0x40] sm:$0xff] %vm1213_vm9, %v4646_v20 }
 0x3de   : > { %7216 = vmatpush3.bf16.msra.mxu0 %v7215_v31  ;;  %v4949_v31 = vld [vmem:[%s10502_s5 + $0x230] sm:$0xff] }
 0x3df   : > { %7218 = vmatprep.subr.bf16.mxu0 %v7217_v6  ;;  %v7241_v32 = vpack.c.bf16 %v4950_v0, %v4949_v31 }
 0x3e1   : > { %v4648_v56 = vpop.permute.xlu1 %4647 }
 0x3e2   : > { %7220 = vmatpush3.bf16.msra.mxu0 %v7219_v51  ;;  %4667 = vst.msk [vmem:[#allocation4 + $0xa0] sm:$0xff] %vm1213_vm9, %v4648_v56  ;;  %4820 = vst.msk [vmem:[#allocation4 + $0x68] sm:$0xff] %vm1213_vm9, %v4648_v56 }
 0x3e3   : > { %7222 = vmatprep.subr.bf16.mxu0 %v7221_v46 }
 0x3e4   : > { %v4854_v19 = vld [vmem:[#allocation4 + $0x78] sm:$0xff]  ;;  %v4847_v38 = vld [vmem:[#allocation4 + $0x40] sm:$0xff] }
 0x3e5   : > { %5062 = vmatmul.mubr.f32.gmra.mrb[68].mxu0 %v4854_v19  ;;  %v4858_v19 = vld [vmem:[#allocation4 + $0x98] sm:$0xff] }
 0x3e6   : > { %7224 = vmatpush3.bf16.msra.mxu0 %v7223_v10 }
 0x3e7   : > { %7226 = vmatprep.subr.bf16.mxu0 %v7225_v9  ;;  %v4843_v9 = vld [vmem:[#allocation4 + $0x20] sm:$0xff] }
 0x3e9   : > { %v4721_v36 = vpop.permute.xlu0 %4720  ;;  %v4859_v22 = vld [vmem:[#allocation4 + $0xa0] sm:$0xff]  ;;  %v4852_v6 = vld [vmem:[#allocation4 + $0x68] sm:$0xff] }
 0x3ea   : > { %4740 = vst.msk [vmem:[#allocation4 + $0xa8] sm:$0xff] %vm1213_vm9, %v4721_v36  ;;  %7228 = vmatpush3.bf16.msra.mxu0 %v7227_v50  ;;  %v4873_v50 = vld [vmem:[#allocation4 + $0x110] sm:$0xff] }
 0x3eb   : > { %7230 = vmatprep.subr.bf16.mxu0 %v9976_v63 }
 0x3f1   : > { %v4860_v17 = vld [vmem:[#allocation4 + $0xa8] sm:$0xff] }
 0x3f2   : > { %5066 = vmatprep.mubr.f32.mxu0 %v4860_v17 }
 0x3f3   : > { %5067 = vmatmul.mubr.f32.gmra.mrb[70].mxu0 %v4859_v22 }
 0x3ff   : > { %v4650_v33 = vpop.permute.xlu1 %4649 }
 0x400   : > { %4668 = vst.msk [vmem:[#allocation4 + $0xc8] sm:$0xff] %vm1213_vm9, %v4650_v33  ;;  %4821 = vst.msk [vmem:[#allocation4 + $0x90] sm:$0xff] %vm1213_vm9, %v4650_v33 }
 0x401   : > { %v4723_v41 = vpop.permute.xlu0 %4722 }
 0x402   : > { %4741 = vst.msk [vmem:[#allocation4 + $0xd0] sm:$0xff] %vm1213_vm9, %v4723_v41 }
 0x407   : > { %v4864_v54 = vld [vmem:[#allocation4 + $0xc8] sm:$0xff]  ;;  %v4857_v3 = vld [vmem:[#allocation4 + $0x90] sm:$0xff] }
 0x409   : > { %v4865_v29 = vld [vmem:[#allocation4 + $0xd0] sm:$0xff] }
 0x40a   : > { %5071 = vmatprep.mubr.f32.mxu0 %v4865_v29 }
 0x40b   : > { %5072 = vmatmul.mubr.f32.gmra.mrb[72].mxu0 %v4864_v54 }
 0x413   : > { %v4652_v13 = vpop.permute.xlu1 %4651 }
 0x414   : > { %4669 = vst.msk [vmem:[#allocation4 + $0xf0] sm:$0xff] %vm1213_vm9, %v4652_v13  ;;  %4822 = vst.msk [vmem:[#allocation4 + $0xb8] sm:$0xff] %vm1213_vm9, %v4652_v13 }
 0x418   : > { %v4725_v34 = vpop.permute.xlu0 %4724 }
 0x419   : > { %4742 = vst.msk [vmem:[#allocation4 + $0xf8] sm:$0xff] %vm1213_vm9, %v4725_v34  ;;  %v5313_v34 = vld [vmem:[#allocation3] sm:$0xff] }
 0x41a   : > { %5333 = vst.msk [vmem:[#allocation4] sm:$0xff] %vm869_vm6, %v5313_v34  ;;  %v5413_v44 = vrot.slane %v5313_v34, 2 }
 0x41b   : > { %v4869_v11 = vld [vmem:[#allocation4 + $0xf0] sm:$0xff]  ;;  %v4862_v51 = vld [vmem:[#allocation4 + $0xb8] sm:$0xff] }
 0x420   : > { %v4870_v61 = vld [vmem:[#allocation4 + $0xf8] sm:$0xff] }
 0x421   : > { %5076 = vmatprep.mubr.f32.mxu0 %v4870_v61  ;;  %v5314_v61 = vld [vmem:[#allocation3 + $0x8] sm:$0x3] }
 0x422   : > { %5077 = vmatmul.mubr.f32.gmra.mrb[74].mxu0 %v4869_v11  ;;  %v5357_v11 = vrot.slane %v5313_v34, 1 }
 0x423   : > { %v4654_v49 = vpop.permute.xlu1 %4653 }
 0x424   : > { %4670 = vst.msk [vmem:[#allocation4 + $0x118] sm:$0xff] %vm1213_vm9, %v4654_v49  ;;  %4823 = vst.msk [vmem:[#allocation4 + $0xe0] sm:$0xff] %vm1213_vm9, %v4654_v49 }
 0x427   : > { %v4770_v8 = vpop.permute.xlu1 %4769 }
 0x428   : > { %4792 = vst.msk [vmem:[#allocation4 + $0x38] sm:$0xff] %vm1213_vm9, %v4770_v8 }
 0x42b   : > { %v4774_v26 = vpop.permute.xlu1 %4773  ;;  %v4874_v24 = vld [vmem:[#allocation4 + $0x118] sm:$0xff]  ;;  %v4867_v60 = vld [vmem:[#allocation4 + $0xe0] sm:$0xff] }
 0x42c   : > { %4794 = vst.msk [vmem:[#allocation4 + $0x88] sm:$0xff] %vm1213_vm9, %v4774_v26 }
 0x42f   : > { %v4778_v14 = vpop.permute.xlu1 %4777  ;;  %v4846_v30 = vld [vmem:[#allocation4 + $0x38] sm:$0xff] }
 0x430   : > { %4796 = vst.msk [vmem:[#allocation4 + $0xd8] sm:$0xff] %vm1213_vm9, %v4778_v14 }
 0x431   : > { %v4727_v23 = vpop.permute.xlu0 %4726 }
 0x432   : > { %4743 = vst.msk [vmem:[#allocation4 + $0x120] sm:$0xff] %vm1213_vm9, %v4727_v23 }
 0x433   : > { %v4780_v28 = vpop.permute.xlu1 %4779  ;;  %v4856_v2 = vld [vmem:[#allocation4 + $0x88] sm:$0xff] }
 0x434   : > { %4797 = vst.msk [vmem:[#allocation4 + $0x100] sm:$0xff] %vm1213_vm9, %v4780_v28 }
 0x435   : > { %v4768_v57 = vpop.permute.xlu0 %4767 }
 0x436   : > { %4791 = vst.msk [vmem:[#allocation4 + $0x10] sm:$0xff] %vm1213_vm9, %v4768_v57 }
 0x437   : > { %v4782_v16 = vpop.permute.xlu1 %4781  ;;  %v4866_v18 = vld [vmem:[#allocation4 + $0xd8] sm:$0xff] }
 0x438   : > { %4798 = vst.msk [vmem:[#allocation4 + $0x128] sm:$0xff] %vm1213_vm9, %v4782_v16  ;;  %v5414_v16 = vrot.slane %v5314_v61, 2 }
 0x439   : > { %v4772_v59 = vpop.permute.xlu0 %4771  ;;  %v4875_v25 = vld [vmem:[#allocation4 + $0x120] sm:$0xff] }
 0x43a   : > { %4793 = vst.msk [vmem:[#allocation4 + $0x60] sm:$0xff] %vm1213_vm9, %v4772_v59  ;;  %5081 = vmatprep.mubr.f32.mxu0 %v4875_v25  ;;  %v5637_v59 = vld [vmem:[%s10504_s7 + $0x80] sm:$0xff]  ;;  %v5638_v25 = vld [vmem:[%s10504_s7 + $0x88] sm:$0xff] }
 0x43b   : > { %5082 = vmatmul.mubr.f32.gmra.mrb[76].mxu0 %v4874_v24  ;;  %v4871_v10 = vld [vmem:[#allocation4 + $0x100] sm:$0xff]  ;;  %v5621_v24 = vld [vmem:[%s10504_s7] sm:$0xff]  ;;  %v7245_v12 = vpack.c.bf16 %v5638_v25, %v5637_v59 }
 0x43c   : > { %5151 = vmatprep.mubr.f32.mxu0 %v4842_v21  ;;  %v5622_v21 = vld [vmem:[%s10504_s7 + $0x8] sm:$0xff] }
 0x43d   : > { %v4776_v58 = vpop.permute.xlu0 %4775  ;;  %v4841_v1 = vld [vmem:[#allocation4 + $0x10] sm:$0xff] }
 0x43e   : > { %4795 = vst.msk [vmem:[#allocation4 + $0xb0] sm:$0xff] %vm1213_vm9, %v4776_v58  ;;  %v5639_v58 = vld [vmem:[%s10504_s7 + $0x90] sm:$0xff] }
 0x43f   : > { %5152 = vmatmul.mubr.f32.vlgmr.msra.gmra.mrb[78].mxu0 %v4841_v1  ;;  %v4876_v56 = vld [vmem:[#allocation4 + $0x128] sm:$0xff] }
 0x440   : > { %7232 = vmatpush3.bf16.msra.mxu0 %v9976_v63  ;;  %5156 = vmatprep.mubr.f32.mxu0 %v4847_v38  ;;  %v5640_v1 = vld [vmem:[%s10504_s7 + $0x98] sm:$0xff] }
 0x441   : > { %v4813_v43 = vpop.permute.xlu0 %4812  ;;  %7234 = vmatprep.subr.bf16.mxu0 %v7233_v27  ;;  %v4851_v20 = vld [vmem:[#allocation4 + $0x60] sm:$0xff]  ;;  %v7249_v42 = vpack.c.bf16 %v5640_v1, %v5639_v58  ;;  %v5624_v38 = vld [vmem:[%s10504_s7 + $0x18] sm:$0xff] }
 0x442   : > { %4824 = vst.msk [vmem:[#allocation4 + $0x108] sm:$0xff] %vm1213_vm9, %v4813_v43  ;;  %v5641_v43 = vld [vmem:[%s10504_s7 + $0xa0] sm:$0xff]  ;;  %v7251_v31 = vpack.c.bf16 %v5624_v38, %v5623_v45 }
 0x443   : > { %5157 = vmatmul.mubr.f32.gmra.mrb[80].mxu0 %v4846_v30  ;;  %v5642_v30 = vld [vmem:[%s10504_s7 + $0xa8] sm:$0xff] }
 0x444   : > { %5161 = vmatprep.mubr.f32.mxu0 %v4852_v6  ;;  %7236 = vmatpush3.bf16.msra.mxu0 %v7233_v27  ;;  %v7247_v27 = vpack.c.bf16 %v5622_v21, %v5621_v24  ;;  %v7253_v6 = vpack.c.bf16 %v5642_v30, %v5641_v43 }
 0x445   : > { %7238 = vmatprep.subr.bf16.mxu0 %v7237_v39  ;;  %v4815_v52 = vpop.permute.xlu0 %4814  ;;  %v4861_v47 = vld [vmem:[#allocation4 + $0xb0] sm:$0xff] }
 0x446   : > { %4825 = vst.msk [vmem:[#allocation4 + $0x130] sm:$0xff] %vm1213_vm9, %v4815_v52  ;;  %v5625_v52 = vld [vmem:[%s10504_s7 + $0x20] sm:$0xff] }
 0x447   : > { %5162 = vmatmul.mubr.f32.gmra.mrb[82].mxu0 %v4851_v20 }
 0x448   : > { %5166 = vmatprep.mubr.f32.mxu0 %v4857_v3  ;;  %7240 = vmatpush3.bf16.msra.mxu0 %v7237_v39  ;;  %v5415_v39 = vsel %vm1246_vm7, %v5413_v44, %v5414_v16  ;;  %v5643_v3 = vld [vmem:[%s10504_s7 + $0xb0] sm:$0xff] }
 0x449   : > { %7242 = vmatprep.subr.bf16.mxu0 %v7241_v32  ;;  %v4872_v7 = vld [vmem:[#allocation4 + $0x108] sm:$0xff]  ;;  %5445 = vst.msk [vmem:[#allocation4 + $0x8] sm:$0xff] %vm869_vm6, %v5415_v39 }
 0x44b   : > { %5167 = vmatmul.mubr.f32.gmra.mrb[84].mxu0 %v4856_v2  ;;  %v5644_v2 = vld [vmem:[%s10504_s7 + $0xb8] sm:$0xff] }
 0x44c   : > { %5171 = vmatprep.mubr.f32.mxu0 %v4862_v51  ;;  %7244 = vmatpush3.bf16.msra.mxu0 %v7241_v32  ;;  %v5626_v32 = vld [vmem:[%s10504_s7 + $0x28] sm:$0xff] }
 0x44d   : > { %v4877_v46 = vld [vmem:[#allocation4 + $0x130] sm:$0xff]  ;;  %7246 = vmatprep.subr.bf16.mxu0 %v7245_v12 }
 0x44e   : > { %5548 = vst.msk [vmem:[#allocation4 + $0x130] sm:$0xff] %vm869_vm6, %v9980_v5 }
 0x44f   : > { %5172 = vmatmul.mubr.f32.gmra.mrb[86].mxu0 %v4861_v47  ;;  %v7257_v47 = vpack.c.bf16 %v5644_v2, %v5643_v3 }
 0x450   : > { %5176 = vmatprep.mubr.f32.mxu0 %v4867_v60  ;;  %v5627_v60 = vld [vmem:[%s10504_s7 + $0x30] sm:$0xff] }
 0x453   : > { %5177 = vmatmul.mubr.f32.gmra.mrb[88].mxu0 %v4866_v18  ;;  %v5628_v18 = vld [vmem:[%s10504_s7 + $0x38] sm:$0xff] }
 0x454   : > { %5181 = vmatprep.mubr.f32.mxu0 %v4872_v7  ;;  %v5645_v7 = vld [vmem:[%s10504_s7 + $0xc0] sm:$0xff] }
 0x457   : > { %5182 = vmatmul.mubr.f32.gmra.mrb[90].mxu0 %v4871_v10  ;;  %v5646_v10 = vld [vmem:[%s10504_s7 + $0xc8] sm:$0xff] }
 0x458   : > { %5186 = vmatprep.mubr.f32.mxu0 %v4877_v46  ;;  %v7255_v46 = vpack.c.bf16 %v5626_v32, %v5625_v52 }
 0x45b   : > { %5187 = vmatmul.mubr.f32.gmra.mrb[92].mxu0 %v4876_v56  ;;  %v7259_v56 = vpack.c.bf16 %v5628_v18, %v5627_v60 }
 0x45c   : > { %6975 = vmatprep.mubr.msk.f32.mxu0 %vm869_vm6, %v4843_v9  ;;  %v7261_v9 = vpack.c.bf16 %v5646_v10, %v5645_v7  ;;  %v5650_v7 = vld [vmem:[%s10504_s7 + $0xe8] sm:$0xff] }
 0x45f   : > { %6976 = vmatmul.mubr.msk.f32.vlgmr.msra.gmra.mrb[94].mxu0 %vm869_vm6, %v4848_v4  ;;  %v5629_v4 = vld [vmem:[%s10504_s7 + $0x40] sm:$0xff] }
 0x460   : > { %6978 = vmatprep.mubr.msk.f32.mxu0 %vm869_vm6, %v4853_v55  ;;  %7248 = vmatpush3.bf16.msra.mxu0 %v7247_v27  ;;  %v5630_v55 = vld [vmem:[%s10504_s7 + $0x48] sm:$0xff] }
 0x461   : > { %7250 = vmatprep.subr.bf16.mxu0 %v7249_v42 }
 0x463   : > { %6979 = vmatmul.mubr.msk.f32.gmra.mrb[96].mxu0 %vm869_vm6, %v4858_v19  ;;  %v5647_v19 = vld [vmem:[%s10504_s7 + $0xd0] sm:$0xff] }
 0x464   : > { %6981 = vmatprep.mubr.msk.f32.mxu0 %vm869_vm6, %v4863_v40  ;;  %7252 = vmatpush3.bf16.msra.mxu0 %v7251_v31  ;;  %v5648_v40 = vld [vmem:[%s10504_s7 + $0xd8] sm:$0xff] }
 0x465   : > { %7254 = vmatprep.subr.bf16.mxu0 %v7253_v6 }
 0x467   : > { %6982 = vmatmul.mubr.msk.f32.gmra.mrb[98].mxu0 %vm869_vm6, %v4868_v62  ;;  %v7263_v62 = vpack.c.bf16 %v5630_v55, %v5629_v4 }
 0x468   : > { %6984 = vmatprep.mubr.msk.f32.mxu0 %vm869_vm6, %v4873_v50  ;;  %7256 = vmatpush3.bf16.msra.mxu0 %v7255_v46  ;;  %v7265_v50 = vpack.c.bf16 %v5648_v40, %v5647_v19 }
 0x469   : > { %7258 = vmatprep.subr.bf16.mxu0 %v7257_v47 }
 0x46b   : > { %6985 = vmatmul.mubr.msk.f32.gmra.mrb[100].mxu0 %vm869_vm6, %v9986_v53  ;;  %v5358_v53 = vrot.slane %v5314_v61, 1 }
 0x46c   : > { %7260 = vmatpush3.bf16.msra.mxu0 %v7259_v56 }
 0x46d   : > { %v5359_v8 = vsel %vm1036_vm8, %v5357_v11, %v5358_v53  ;;  %7262 = vmatprep.subr.bf16.mxu0 %v7261_v9  ;;  %v5634_v9 = vld [vmem:[%s10504_s7 + $0x68] sm:$0xff] }
 0x46e   : > { %5381 = vrot.lane.b32.xlu1 %v5359_v8, %s7473_s14 }
 0x470   : > { %7264 = vmatpush3.bf16.msra.mxu0 %v7263_v62 }
 0x471   : > { %7266 = vmatprep.subr.bf16.mxu0 %v7265_v50 }
 0x4a0   : > { %v6599_v63 = vpop.f32.mrb[62].mxu0 }
 0x4a1   : > { %v6600_v36 = vpop.f32.mrb[63].mxu0 }
 0x4a2   : > { %v10039_v48 = vadd.f32 %v6600_v36, %v6599_v63  ;;  %v5631_v63 = vld [vmem:[%s10504_s7 + $0x50] sm:$0xff]  ;;  %v5632_v36 = vld [vmem:[%s10504_s7 + $0x58] sm:$0xff] }
 0x4a4   : > { %v6602_v15 = vpop.f32.mrb[64].mxu0 }
 0x4a5   : > { %v6603_v37 = vpop.f32.mrb[65].mxu0 }
 0x4a6   : > { %v10041_v17 = vadd.f32 %v6603_v37, %v6602_v15  ;;  %v7267_v15 = vpack.c.bf16 %v5632_v36, %v5631_v63  ;;  %v5651_v63 = vld [vmem:[%s10504_s7 + $0xf0] sm:$0xff]  ;;  %v5652_v36 = vld [vmem:[%s10504_s7 + $0xf8] sm:$0xff] }
 0x4a8   : > { %v6605_v22 = vpop.f32.mrb[66].mxu0  ;;  %7268 = vmatpush3.bf16.msra.mxu0 %v7267_v15  ;;  %v5635_v15 = vld [vmem:[%s10504_s7 + $0x70] sm:$0xff] }
 0x4a9   : > { %v6606_v33 = vpop.f32.mrb[67].mxu0 }
 0x4aa   : > { %v10043_v41 = vadd.f32 %v6606_v33, %v6605_v22 }
 0x4b8   : > { %v6608_v29 = vpop.f32.mrb[68].mxu0 }
 0x4b9   : > { %v6609_v54 = vpop.f32.mrb[69].mxu0 }
 0x4ba   : > { %v10045_v13 = vadd.f32 %v6609_v54, %v6608_v29  ;;  %v6460_v54 = vld [vmem:[%s10503_s6] ss:$0 sm:$0xff] }
 0x4bb   : > { %v5049_v61 = vadd.f32 %v10039_v48, %v6460_v54  ;;  %v5059_v25 = vadd.f32 %v10043_v41, %v6460_v54 }
 0x4bc   : > { %v5064_v58 = vadd.f32 %v10045_v13, %v6460_v54 }
 0x4c6   : > { %v6611_v49 = vpop.f32.mrb[70].mxu0 }
 0x4c7   : > { %v6612_v26 = vpop.f32.mrb[71].mxu0 }
 0x4c8   : > { %v10050_v14 = vadd.f32 %v6612_v26, %v6611_v49  ;;  %v5054_v26 = vadd.f32 %v10041_v17, %v6460_v54 }
 0x4ca   : > { %v5069_v45 = vadd.f32 %v10050_v14, %v6460_v54 }
 0x4de   : > { %v6614_v23 = vpop.f32.mrb[72].mxu0 }
 0x4df   : > { %v6615_v28 = vpop.f32.mrb[73].mxu0 }
 0x4e0   : > { %v10052_v57 = vadd.f32 %v6615_v28, %v6614_v23 }
 0x4e2   : > { %v5074_v30 = vadd.f32 %v10052_v57, %v6460_v54  ;;  %v5649_v57 = vld [vmem:[%s10504_s7 + $0xe0] sm:$0xff] }
 0x4e3   : > { %v7269_v56 = vpack.c.bf16 %v5650_v7, %v5649_v57 }
 0x4e5   : > { %7270 = vmatprep.subr.bf16.mxu0 %v7269_v56 }
 0x4f5   : > { %v6617_v0 = vpop.f32.mrb[74].mxu0 }
 0x4f6   : > { %v6618_v20 = vpop.f32.mrb[75].mxu0 }
 0x4f7   : > { %v10098_v51 = vadd.f32 %v6618_v20, %v6617_v0 }
 0x4f9   : > { %v5079_v52 = vadd.f32 %v10098_v51, %v6460_v54  ;;  %v5633_v51 = vld [vmem:[%s10504_s7 + $0x60] sm:$0xff] }
 0x4fa   : > { %v7271_v55 = vpack.c.bf16 %v5634_v9, %v5633_v51 }
 0x4fc   : > { %7272 = vmatpush3.bf16.msra.mxu0 %v7271_v55 }
 0x50e   : > { %v6620_v37 = vpop.f32.mrb[76].mxu0 }
 0x50f   : > { %v6621_v22 = vpop.f32.mrb[77].mxu0 }
 0x510   : > { %v6622_v33 = vadd.f32 %v6621_v22, %v6620_v37  ;;  %v7273_v22 = vpack.c.bf16 %v5652_v36, %v5651_v63 }
 0x512   : > { %v6655_v29 = vpop.f32.mrb[78].mxu0  ;;  %v5084_v2 = vadd.f32 %v6622_v33, %v6460_v54  ;;  %v5636_v33 = vld [vmem:[%s10504_s7 + $0x78] sm:$0xff]  ;;  %v5382_v54 = vpop.permute.xlu1 %5381  ;;  %7274 = vmatprep.subr.bf16.mxu0 %v7273_v22 }
 0x513   : > { %v6656_v34 = vpop.f32.mrb[79].mxu0  ;;  %5405 = vst.msk [vmem:[#allocation4] sm:$0xff] %vm1213_vm9, %v5382_v54 }
 0x514   : > { %v6657_v11 = vadd.f32 %v6656_v34, %v6655_v29  ;;  %v7275_v34 = vpack.c.bf16 %v5636_v33, %v5635_v15 }
 0x516   : > { %v6658_v53 = vpop.f32.mrb[80].mxu0  ;;  %v5154_v49 = vadd.f32 %v6657_v11, %v5049_v61  ;;  %7276 = vmatpush3.bf16.msra.mxu0 %v7275_v34 }
 0x517   : > { %v6659_v8 = vpop.f32.mrb[81].mxu0 }
 0x518   : > { %v6660_v23 = vadd.f32 %v6659_v8, %v6658_v53  ;;  %v5669_v8 = vld [vmem:[%s10504_s7 + $0x180] sm:$0xff] }
 0x51a   : > { %v6661_v28 = vpop.f32.mrb[82].mxu0  ;;  %v5159_v16 = vadd.f32 %v6660_v23, %v5054_v26  ;;  %v5670_v26 = vld [vmem:[%s10504_s7 + $0x188] sm:$0xff] }
 0x51b   : > { %v6662_v59 = vpop.f32.mrb[83].mxu0 }
 0x51c   : > { %v6663_v24 = vadd.f32 %v6662_v59, %v6661_v28  ;;  %v7277_v28 = vpack.c.bf16 %v5670_v26, %v5669_v8 }
 0x51e   : > { %v6664_v44 = vpop.f32.mrb[84].mxu0  ;;  %v5164_v12 = vadd.f32 %v6663_v24, %v5059_v25  ;;  %7278 = vmatprep.subr.bf16.mxu0 %v7277_v28 }
 0x51f   : > { %v6665_v21 = vpop.f32.mrb[85].mxu0 }
 0x520   : > { %v6666_v1 = vadd.f32 %v6665_v21, %v6664_v44 }
 0x522   : > { %v6667_v48 = vpop.f32.mrb[86].mxu0  ;;  %v5169_v27 = vadd.f32 %v6666_v1, %v5064_v58 }
 0x523   : > { %v6668_v42 = vpop.f32.mrb[87].mxu0 }
 0x524   : > { %v6669_v38 = vadd.f32 %v6668_v42, %v6667_v48 }
 0x526   : > { %v6670_v17 = vpop.f32.mrb[88].mxu0  ;;  %v5174_v43 = vadd.f32 %v6669_v38, %v5069_v45 }
 0x527   : > { %v6671_v39 = vpop.f32.mrb[89].mxu0 }
 0x528   : > { %v6672_v31 = vadd.f32 %v6671_v39, %v6670_v17 }
 0x52a   : > { %v6673_v41 = vpop.f32.mrb[90].mxu0  ;;  %v5179_v0 = vadd.f32 %v6672_v31, %v5074_v30 }
 0x52b   : > { %v6674_v6 = vpop.f32.mrb[91].mxu0 }
 0x52c   : > { %v6675_v32 = vadd.f32 %v6674_v6, %v6673_v41 }
 0x52e   : > { %v6676_v13 = vpop.f32.mrb[92].mxu0  ;;  %v5184_v20 = vadd.f32 %v6675_v32, %v5079_v52 }
 0x52f   : > { %v6677_v3 = vpop.f32.mrb[93].mxu0 }
 0x530   : > { %v6678_v46 = vadd.f32 %v6677_v3, %v6676_v13 }
 0x532   : > { %v6977_v47 = vpop.f32.mrb[94].mxu0  ;;  %v5189_v14 = vadd.f32 %v6678_v46, %v5084_v2 }
 0x533   : > { %v5264_v60 = vadd.f32 %v6977_v47, %v5159_v16  ;;  %v5258_v18 = vpop.f32.mrb[95].mxu0 }
 0x534   : > { %v5259_v10 = vadd.f32 %v5258_v18, %v5154_v49 }
 0x535   : > { %v5298_v4 = vmax.f32 %v5264_v60, 0.0 }
 0x536   : > { %v5297_v19 = vmax.f32 %v5259_v10, 0.0  ;;  %v6980_v40 = vpop.f32.mrb[96].mxu0 }
 0x537   : > { %5306 = vst.msk [vmem:[#allocation3 + $0x21] sm:$0xff] %vm869_vm6, %v5298_v4  ;;  %v5274_v62 = vadd.f32 %v6980_v40, %v5169_v27  ;;  %v5268_v50 = vpop.f32.mrb[97].mxu0 }
 0x538   : > { %5305 = vst.msk [vmem:[#allocation3 + $0x11] sm:$0xff] %vm869_vm6, %v5297_v19  ;;  %v5269_v37 = vadd.f32 %v5268_v50, %v5164_v12 }
 0x539   : > { %v5300_v29 = vmax.f32 %v5274_v62, 0.0 }
 0x53a   : > { %v5299_v61 = vmax.f32 %v5269_v37, 0.0  ;;  %v6983_v11 = vpop.f32.mrb[98].mxu0 }
 0x53b   : > { %5308 = vst.msk [vmem:[#allocation3 + $0x41] sm:$0xff] %vm869_vm6, %v5300_v29  ;;  %v5284_v53 = vadd.f32 %v6983_v11, %v5179_v0  ;;  %v5278_v49 = vpop.f32.mrb[99].mxu0 }
 0x53c   : > { %5307 = vst.msk [vmem:[#allocation3 + $0x31] sm:$0xff] %vm869_vm6, %v5299_v61  ;;  %v5279_v23 = vadd.f32 %v5278_v49, %v5174_v43 }
 0x53d   : > { %v5302_v16 = vmax.f32 %v5284_v53, 0.0 }
 0x53e   : > { %v5301_v59 = vmax.f32 %v5279_v23, 0.0  ;;  %v6986_v25 = vpop.f32.mrb[100].mxu0  ;;  %v5317_v24 = vld [vmem:[#allocation3 + $0x20] sm:$0xff]  ;;  %v5318_v44 = vld [vmem:[#allocation3 + $0x28] sm:$0x3] }
 0x53f   : > { %5310 = vst.msk [vmem:[#allocation3 + $0x61] sm:$0xff] %vm869_vm6, %v5302_v16  ;;  %v5294_v12 = vadd.f32 %v6986_v25, %v5189_v14  ;;  %v5288_v21 = vpop.f32.mrb[101].mxu0  ;;  %v5315_v58 = vld [vmem:[#allocation3 + $0x10] sm:$0xff]  ;;  %v5316_v1 = vld [vmem:[#allocation3 + $0x18] sm:$0x3]  ;;  %5335 = vst.msk [vmem:[#allocation4 + $0x50] sm:$0xff] %vm869_vm6, %v5317_v24 }
 0x540   : > { %5541 = vst.msk [vmem:[#allocation4 + $0x18] sm:$0xff] %vm869_vm6, %v5317_v24  ;;  %v5363_v48 = vrot.slane %v5317_v24, 1  ;;  %v5364_v27 = vrot.slane %v5318_v44, 1  ;;  %5309 = vst.msk [vmem:[#allocation3 + $0x51] sm:$0xff] %vm869_vm6, %v5301_v59  ;;  %v5289_v42 = vadd.f32 %v5288_v21, %v5184_v20  ;;  %5454 = vrot.lane.b32.xlu0 %v5315_v58, %s7473_s14  ;;  %v5360_v45 = vrot.slane %v5315_v58, 1 }
 0x541   : > { %v5416_v38 = vrot.slane %v5315_v58, 2  ;;  %5334 = vst.msk [vmem:[#allocation4 + $0x28] sm:$0xff] %vm869_vm6, %v5315_v58  ;;  %v5361_v17 = vrot.slane %v5316_v1, 1  ;;  %v5304_v43 = vmax.f32 %v5294_v12, 0.0  ;;  %v5419_v30 = vrot.slane %v5317_v24, 2 }
 0x542   : > { %v5365_v39 = vsel %vm1036_vm8, %v5363_v48, %v5364_v27  ;;  %v5420_v31 = vrot.slane %v5318_v44, 2  ;;  %v5303_v41 = vmax.f32 %v5289_v42, 0.0  ;;  %v10184_v6 = vld [vmem:[#allocation3 + $0x40] sm:$0xff]  ;;  %v5322_v52 = vld [vmem:[#allocation3 + $0x48] sm:$0x3]  ;;  %v5417_v32 = vrot.slane %v5316_v1, 2 }
 0x543   : > { %v5362_v0 = vsel %vm1036_vm8, %v5360_v45, %v5361_v17  ;;  %5499 = vst.msk [vmem:[#allocation4 + $0x38] sm:$0xff] %vm869_vm6, %v5365_v39  ;;  %5312 = vst.msk [vmem:[#allocation3 + $0x81] sm:$0xff] %vm869_vm6, %v5304_v43  ;;  %v5319_v13 = vld [vmem:[#allocation3 + $0x30] sm:$0xff]  ;;  %v5320_v20 = vld [vmem:[#allocation3 + $0x38] sm:$0x3]  ;;  %v5369_v3 = vrot.slane %v10184_v6, 1 }
 0x544   : > { %5383 = vrot.lane.b32.xlu1 %v5362_v0, %s7473_s14  ;;  %5498 = vst.msk [vmem:[#allocation4 + $0x10] sm:$0xff] %vm869_vm6, %v5362_v0  ;;  %5337 = vst.msk [vmem:[#allocation4 + $0xa0] sm:$0xff] %vm869_vm6, %v10184_v6  ;;  %v5370_v2 = vrot.slane %v5322_v52, 1  ;;  %v10195_v46 = vsel %vm1246_vm7, %v5419_v30, %v5420_v31  ;;  %v5425_v47 = vrot.slane %v10184_v6, 2  ;;  %5456 = vrot.lane.b32.xlu0 %v5317_v24, %s7473_s14  ;;  %v5366_v14 = vrot.slane %v5319_v13, 1  ;;  %v5672_v30 = vld [vmem:[%s10504_s7 + $0x198] sm:$0xff] }
 0x545   : > { %5543 = vst.msk [vmem:[#allocation4 + $0x68] sm:$0xff] %vm869_vm6, %v10184_v6  ;;  %5311 = vst.msk [vmem:[#allocation3 + $0x71] sm:$0xff] %vm869_vm6, %v5303_v41  ;;  %v5367_v60 = vrot.slane %v5320_v20, 1  ;;  %v10207_v18 = vsel %vm1246_vm7, %v5416_v38, %v5417_v32  ;;  %v5426_v57 = vrot.slane %v5322_v52, 2  ;;  %v5422_v51 = vrot.slane %v5319_v13, 2  ;;  %v5581_v41 = vld [vmem:[#allocation4] sm:$0xff] }
 0x546   : > { %5336 = vst.msk [vmem:[#allocation4 + $0x78] sm:$0xff] %vm869_vm6, %v5319_v13  ;;  %5542 = vst.msk [vmem:[#allocation4 + $0x40] sm:$0xff] %vm869_vm6, %v5319_v13  ;;  %v5371_v7 = vsel %vm1036_vm8, %v5369_v3, %v5370_v2  ;;  %v5423_v10 = vrot.slane %v5320_v20, 2  ;;  %v10214_v9 = vld [vmem:[#allocation3 + $0x60] sm:$0xff]  ;;  %v5326_v4 = vld [vmem:[#allocation3 + $0x68] sm:$0x3] }
 0x547   : > { %5573 = vst.msk [vmem:[#allocation4 + $0x20] sm:$0xff] %vm869_vm6, %v10195_v46  ;;  %5447 = vst.msk [vmem:[#allocation4 + $0x58] sm:$0xff] %vm869_vm6, %v10195_v46  ;;  %v5368_v56 = vsel %vm1036_vm8, %v5366_v14, %v5367_v60  ;;  %v10217_v55 = vsel %vm1246_vm7, %v5425_v47, %v5426_v57  ;;  %v5323_v19 = vld [vmem:[#allocation3 + $0x50] sm:$0xff]  ;;  %v5324_v40 = vld [vmem:[#allocation3 + $0x58] sm:$0x3]  ;;  %v5375_v62 = vrot.slane %v10214_v9, 1 }
 0x548   : > { %5446 = vst.msk [vmem:[#allocation4 + $0x30] sm:$0xff] %vm869_vm6, %v10207_v18  ;;  %5501 = vst.msk [vmem:[#allocation4 + $0x88] sm:$0xff] %vm869_vm6, %v5371_v7  ;;  %5385 = vrot.lane.b32.xlu1 %v5365_v39, %s7473_s14  ;;  %v5376_v50 = vrot.slane %v5326_v4, 1  ;;  %v5424_v63 = vsel %vm1246_vm7, %v5422_v51, %v5423_v10  ;;  %v5431_v36 = vrot.slane %v10214_v9, 2  ;;  %5458 = vrot.lane.b32.xlu0 %v5319_v13, %s7473_s14  ;;  %v5372_v15 = vrot.slane %v5323_v19, 1  ;;  %v5671_v39 = vld [vmem:[%s10504_s7 + $0x190] sm:$0xff] }
 0x549   : > { %5500 = vst.msk [vmem:[#allocation4 + $0x60] sm:$0xff] %vm869_vm6, %v5368_v56  ;;  %5339 = vst.msk [vmem:[#allocation4 + $0xf0] sm:$0xff] %vm869_vm6, %v10214_v9  ;;  %v5373_v37 = vrot.slane %v5324_v40, 1  ;;  %v5432_v22 = vrot.slane %v5326_v4, 2  ;;  %v5428_v33 = vrot.slane %v5323_v19, 2  ;;  %v5429_v54 = vrot.slane %v5324_v40, 2 }
 0x54a   : > { %5545 = vst.msk [vmem:[#allocation4 + $0xb8] sm:$0xff] %vm869_vm6, %v10214_v9  ;;  %5575 = vst.msk [vmem:[#allocation4 + $0x70] sm:$0xff] %vm869_vm6, %v10217_v55  ;;  %v5377_v29 = vsel %vm1036_vm8, %v5375_v62, %v5376_v50  ;;  %v5329_v61 = vld [vmem:[#allocation3 + $0x80] sm:$0xff]  ;;  %v5330_v53 = vld [vmem:[#allocation3 + $0x88] sm:$0x3]  ;;  %v5551_v27 = vrot.slane %v9980_v5, 1  ;;  %v7281_v32 = vpack.c.bf16 %v5672_v30, %v5671_v39 }
 0x54b   : > { %5449 = vst.msk [vmem:[#allocation4 + $0xa8] sm:$0xff] %vm869_vm6, %v10217_v55  ;;  %5338 = vst.msk [vmem:[#allocation4 + $0xc8] sm:$0xff] %vm869_vm6, %v5323_v19  ;;  %v5374_v34 = vsel %vm1036_vm8, %v5372_v15, %v5373_v37  ;;  %v5433_v11 = vsel %vm1246_vm7, %v5431_v36, %v5432_v22  ;;  %v5487_v26 = vrot.slane %v5329_v61, 1  ;;  %v5506_v23 = vrot.slane %v5329_v61, 2  ;;  %v5653_v5 = vld [vmem:[%s10504_s7 + $0x100] sm:$0xff]  ;;  %v5655_v13 = vld [vmem:[%s10504_s7 + $0x110] sm:$0xff] }
 0x54c   : > { %5544 = vst.msk [vmem:[#allocation4 + $0x90] sm:$0xff] %vm869_vm6, %v5323_v19  ;;  %5574 = vst.msk [vmem:[#allocation4 + $0x48] sm:$0xff] %vm869_vm6, %v5424_v63  ;;  %5387 = vrot.lane.b32.xlu1 %v5368_v56, %s7473_s14  ;;  %v5327_v49 = vld [vmem:[#allocation3 + $0x70] sm:$0xff]  ;;  %v5328_v8 = vld [vmem:[#allocation3 + $0x78] sm:$0x3]  ;;  %v5430_v28 = vsel %vm1246_vm7, %v5428_v33, %v5429_v54  ;;  %v5488_v16 = vrot.slane %v5330_v53, 1  ;;  %5460 = vrot.lane.b32.xlu0 %v10184_v6, %s7473_s14 }
 0x54d   : > { %5448 = vst.msk [vmem:[#allocation4 + $0x80] sm:$0xff] %vm869_vm6, %v5424_v63  ;;  %5503 = vst.msk [vmem:[#allocation4 + $0xd8] sm:$0xff] %vm869_vm6, %v5377_v29  ;;  %v5378_v59 = vrot.slane %v5327_v49, 1  ;;  %v5379_v25 = vrot.slane %v5328_v8, 1  ;;  %v5434_v24 = vrot.slane %v5327_v49, 2  ;;  %v5435_v44 = vrot.slane %v5328_v8, 2 }
 0x54e   : > { %5502 = vst.msk [vmem:[#allocation4 + $0xb0] sm:$0xff] %vm869_vm6, %v5374_v34  ;;  %5547 = vst.msk [vmem:[#allocation4 + $0x108] sm:$0xff] %vm869_vm6, %v5329_v61  ;;  %v5489_v12 = vsel %vm1036_vm8, %v5487_v26, %v5488_v16  ;;  %v5507_v21 = vrot.slane %v5330_v53, 2  ;;  %v5552_v42 = vrot.slane %v9982_v35, 1  ;;  %v5654_v35 = vld [vmem:[%s10504_s7 + $0x108] sm:$0xff]  ;;  %v5656_v20 = vld [vmem:[%s10504_s7 + $0x118] sm:$0xff] }
 0x54f   : > { %5577 = vst.msk [vmem:[#allocation4 + $0xc0] sm:$0xff] %vm869_vm6, %v5433_v11  ;;  %5451 = vst.msk [vmem:[#allocation4 + $0xf8] sm:$0xff] %vm869_vm6, %v5433_v11  ;;  %v5380_v58 = vsel %vm1036_vm8, %v5378_v59, %v5379_v25  ;;  %v5436_v1 = vsel %vm1246_vm7, %v5434_v24, %v5435_v44  ;;  %v7279_v0 = vpack.c.bf16 %v5654_v35, %v5653_v5  ;;  %v5673_v3 = vld [vmem:[%s10504_s7 + $0x1a0] sm:$0xff]  ;;  %v5674_v2 = vld [vmem:[%s10504_s7 + $0x1a8] sm:$0xff] }
 0x550   : > { %5340 = vst.msk [vmem:[#allocation4 + $0x118] sm:$0xff] %vm869_vm6, %v5327_v49  ;;  %5546 = vst.msk [vmem:[#allocation4 + $0xe0] sm:$0xff] %vm869_vm6, %v5327_v49  ;;  %5389 = vrot.lane.b32.xlu1 %v5371_v7, %s7473_s14  ;;  %v5508_v48 = vsel %vm1246_vm7, %v5506_v23, %v5507_v21  ;;  %5462 = vrot.lane.b32.xlu0 %v5323_v19, %s7473_s14  ;;  %v5553_v45 = vsel %vm1036_vm8, %v5551_v27, %v5552_v42  ;;  %v5657_v57 = vld [vmem:[%s10504_s7 + $0x120] sm:$0xff]  ;;  %v5658_v7 = vld [vmem:[%s10504_s7 + $0x128] sm:$0xff] }
 0x551   : > { %5576 = vst.msk [vmem:[#allocation4 + $0x98] sm:$0xff] %vm869_vm6, %v5430_v28  ;;  %5450 = vst.msk [vmem:[#allocation4 + $0xd0] sm:$0xff] %vm869_vm6, %v5430_v28  ;;  %v7283_v47 = vpack.c.bf16 %v5656_v20, %v5655_v13  ;;  %v5675_v10 = vld [vmem:[%s10504_s7 + $0x1b0] sm:$0xff]  ;;  %v5676_v56 = vld [vmem:[%s10504_s7 + $0x1b8] sm:$0xff]  ;;  %v7287_v4 = vpack.c.bf16 %v5658_v7, %v5657_v57 }
 0x552   : > { %5505 = vst.msk [vmem:[#allocation4 + $0x128] sm:$0xff] %vm869_vm6, %v5489_v12  ;;  %5504 = vst.msk [vmem:[#allocation4 + $0x100] sm:$0xff] %vm869_vm6, %v5380_v58  ;;  %v7289_v40 = vpack.c.bf16 %v5676_v56, %v5675_v10  ;;  %v5659_v62 = vld [vmem:[%s10504_s7 + $0x130] sm:$0xff]  ;;  %v5660_v50 = vld [vmem:[%s10504_s7 + $0x138] sm:$0xff] }
 0x553   : > { %5578 = vst.msk [vmem:[#allocation4 + $0xe8] sm:$0xff] %vm869_vm6, %v5436_v1  ;;  %5452 = vst.msk [vmem:[#allocation4 + $0x120] sm:$0xff] %vm869_vm6, %v5436_v1  ;;  %v5677_v36 = vld [vmem:[%s10504_s7 + $0x1c0] sm:$0xff]  ;;  %v5678_v15 = vld [vmem:[%s10504_s7 + $0x1c8] sm:$0xff]  ;;  %v7291_v22 = vpack.c.bf16 %v5660_v50, %v5659_v62 }
 0x554   : > { %5579 = vst.msk [vmem:[#allocation4 + $0x110] sm:$0xff] %vm869_vm6, %v5508_v48  ;;  %5391 = vrot.lane.b32.xlu1 %v5374_v34, %s7473_s14  ;;  %5464 = vrot.lane.b32.xlu0 %v10214_v9, %s7473_s14  ;;  %v7293_v54 = vpack.c.bf16 %v5678_v15, %v5677_v36  ;;  %v5661_v34 = vld [vmem:[%s10504_s7 + $0x140] sm:$0xff]  ;;  %v5679_v53 = vld [vmem:[%s10504_s7 + $0x1d0] sm:$0xff] }
 0x555   : > { %v5663_v59 = vld [vmem:[%s10504_s7 + $0x150] sm:$0xff]  ;;  %v5664_v25 = vld [vmem:[%s10504_s7 + $0x158] sm:$0xff]  ;;  %v5681_v44 = vld [vmem:[%s10504_s7 + $0x1e0] sm:$0xff] }
 0x556   : > { %v5665_v42 = vld [vmem:[%s10504_s7 + $0x160] sm:$0xff]  ;;  %v5691_v50 = vld [vmem:[%s10504_s7 + $0x230] sm:$0xff] }
 0x557   : > { %v5689_v56 = vld [vmem:[%s10504_s7 + $0x220] sm:$0xff] }
 0x558   : > { %5393 = vrot.lane.b32.xlu1 %v5377_v29, %s7473_s14  ;;  %5466 = vrot.lane.b32.xlu0 %v5327_v49, %s7473_s14  ;;  %v5680_v49 = vld [vmem:[%s10504_s7 + $0x1d8] sm:$0xff] }
 0x559   : > { %v7297_v16 = vpack.c.bf16 %v5680_v49, %v5679_v53 }
 0x55c   : > { %5395 = vrot.lane.b32.xlu1 %v5380_v58, %s7473_s14  ;;  %5468 = vrot.lane.b32.xlu0 %v5329_v61, %s7473_s14  ;;  %v5662_v61 = vld [vmem:[%s10504_s7 + $0x148] sm:$0xff]  ;;  %v7299_v58 = vpack.c.bf16 %v5664_v25, %v5663_v59  ;;  %v5595_v59 = vld [vmem:[#allocation4 + $0x70] sm:$0xff] }
 0x55d   : > { %v7295_v26 = vpack.c.bf16 %v5662_v61, %v5661_v34  ;;  %v5600_v25 = vld [vmem:[#allocation4 + $0x98] sm:$0xff] }
 0x560   : > { %5511 = vrot.lane.b32.xlu1 %v10195_v46, %s7473_s14  ;;  %5509 = vrot.lane.b32.xlu0 %v10207_v18, %s7473_s14  ;;  %v7285_v18 = vpack.c.bf16 %v5674_v2, %v5673_v3 }
 0x564   : > { %5515 = vrot.lane.b32.xlu1 %v10217_v55, %s7473_s14  ;;  %5513 = vrot.lane.b32.xlu0 %v5424_v63, %s7473_s14 }
 0x568   : > { %5519 = vrot.lane.b32.xlu1 %v5433_v11, %s7473_s14  ;;  %5517 = vrot.lane.b32.xlu0 %v5430_v28, %s7473_s14 }
 0x56c   : > { %5521 = vrot.lane.b32.xlu1 %v5436_v1, %s7473_s14  ;;  %5554 = vrot.lane.b32.xlu0 %v5489_v12, %s7473_s14  ;;  %v5682_v12 = vld [vmem:[%s10504_s7 + $0x1e8] sm:$0xff] }
 0x56d   : > { %v7301_v27 = vpack.c.bf16 %v5682_v12, %v5681_v44  ;;  %v5610_v44 = vld [vmem:[#allocation4 + $0xe8] sm:$0xff]  ;;  %v5615_v12 = vld [vmem:[#allocation4 + $0x110] sm:$0xff] }
 0x570   : > { %5523 = vrot.lane.b32.xlu1 %v5508_v48, %s7473_s14  ;;  %5556 = vrot.lane.b32.xlu0 %v5553_v45, %s7473_s14  ;;  %v5666_v45 = vld [vmem:[%s10504_s7 + $0x168] sm:$0xff] }
 0x571   : > { %v7303_v35 = vpack.c.bf16 %v5666_v45, %v5665_v42  ;;  %v6050_v42 = vld [vmem:[%s10506_s9 + $0x18] sm:$0xff] }
 0x5b2   : > { %v5455_v38 = vpop.permute.xlu0 %5454 }
 0x5b3   : > { %5478 = vst.msk [vmem:[#allocation4 + $0x8] sm:$0xff] %vm1213_vm9, %v5455_v38 }
 0x5b6   : > { %v5384_v17 = vpop.permute.xlu1 %5383  ;;  %v5457_v43 = vpop.permute.xlu0 %5456 }
 0x5b7   : > { %5406 = vst.msk [vmem:[#allocation4 + $0x28] sm:$0xff] %vm1213_vm9, %v5384_v17  ;;  %5479 = vst.msk [vmem:[#allocation4 + $0x30] sm:$0xff] %vm1213_vm9, %v5457_v43  ;;  %v5683_v17 = vld [vmem:[%s10504_s7 + $0x1f0] sm:$0xff]  ;;  %v5684_v43 = vld [vmem:[%s10504_s7 + $0x1f8] sm:$0xff] }
 0x5ba   : > { %v5386_v31 = vpop.permute.xlu1 %5385  ;;  %v5459_v6 = vpop.permute.xlu0 %5458  ;;  %v5582_v52 = vld [vmem:[#allocation4 + $0x8] sm:$0xff] }
 0x5bb   : > { %5407 = vst.msk [vmem:[#allocation4 + $0x50] sm:$0xff] %vm1213_vm9, %v5386_v31  ;;  %5560 = vst.msk [vmem:[#allocation4 + $0x18] sm:$0xff] %vm1213_vm9, %v5386_v31  ;;  %5788 = vmatprep.mubr.f32.mxu0 %v5582_v52  ;;  %v7305_v31 = vpack.c.bf16 %v5684_v43, %v5683_v17  ;;  %v5685_v52 = vld [vmem:[%s10504_s7 + $0x200] sm:$0xff]  ;;  %v6052_v17 = vld [vmem:[%s10506_s9 + $0x28] sm:$0xff] }
 0x5bc   : > { %5480 = vst.msk [vmem:[#allocation4 + $0x58] sm:$0xff] %vm1213_vm9, %v5459_v6  ;;  %5789 = vmatmul.mubr.f32.vlgmr.msra.gmra.mrb[102].mxu0 %v5581_v41  ;;  %v5667_v41 = vld [vmem:[%s10504_s7 + $0x170] sm:$0xff] }
 0x5bd   : > { %7280 = vmatpush3.bf16.msra.mxu0 %v7279_v0  ;;  %v5668_v0 = vld [vmem:[%s10504_s7 + $0x178] sm:$0xff] }
 0x5be   : > { %v5388_v46 = vpop.permute.xlu1 %5387  ;;  %v5461_v14 = vpop.permute.xlu0 %5460  ;;  %v5587_v60 = vld [vmem:[#allocation4 + $0x30] sm:$0xff]  ;;  %7282 = vmatprep.subr.bf16.mxu0 %v7281_v32  ;;  %v5586_v51 = vld [vmem:[#allocation4 + $0x28] sm:$0xff]  ;;  %v5686_v32 = vld [vmem:[%s10504_s7 + $0x208] sm:$0xff]  ;;  %v7307_v20 = vpack.c.bf16 %v5668_v0, %v5667_v41 }
 0x5bf   : > { %5408 = vst.msk [vmem:[#allocation4 + $0x78] sm:$0xff] %vm1213_vm9, %v5388_v46  ;;  %5561 = vst.msk [vmem:[#allocation4 + $0x40] sm:$0xff] %vm1213_vm9, %v5388_v46  ;;  %5793 = vmatprep.mubr.f32.mxu0 %v5587_v60  ;;  %v7309_v46 = vpack.c.bf16 %v5686_v32, %v5685_v52  ;;  %v5688_v60 = vld [vmem:[%s10504_s7 + $0x218] sm:$0xff] }
 0x5c0   : > { %5481 = vst.msk [vmem:[#allocation4 + $0x80] sm:$0xff] %vm1213_vm9, %v5461_v14  ;;  %5794 = vmatmul.mubr.f32.gmra.mrb[104].mxu0 %v5586_v51  ;;  %v5687_v14 = vld [vmem:[%s10504_s7 + $0x210] sm:$0xff] }
 0x5c1   : > { %7284 = vmatpush3.bf16.msra.mxu0 %v7283_v47  ;;  %v7313_v10 = vpack.c.bf16 %v5688_v60, %v5687_v14 }
 0x5c2   : > { %v5390_v9 = vpop.permute.xlu1 %5389  ;;  %v5463_v55 = vpop.permute.xlu0 %5462  ;;  %7286 = vmatprep.subr.bf16.mxu0 %v7285_v18  ;;  %v5591_v63 = vld [vmem:[#allocation4 + $0x50] sm:$0xff]  ;;  %v5584_v18 = vld [vmem:[#allocation4 + $0x18] sm:$0xff] }
 0x5c3   : > { %5409 = vst.msk [vmem:[#allocation4 + $0xa0] sm:$0xff] %vm1213_vm9, %v5390_v9  ;;  %5562 = vst.msk [vmem:[#allocation4 + $0x68] sm:$0xff] %vm1213_vm9, %v5390_v9  ;;  %v5592_v19 = vld [vmem:[#allocation4 + $0x58] sm:$0xff] }
 0x5c4   : > { %5482 = vst.msk [vmem:[#allocation4 + $0xa8] sm:$0xff] %vm1213_vm9, %v5463_v55  ;;  %5798 = vmatprep.mubr.f32.mxu0 %v5592_v19  ;;  %v5690_v9 = vld [vmem:[%s10504_s7 + $0x228] sm:$0xff] }
 0x5c5   : > { %5799 = vmatmul.mubr.f32.gmra.mrb[106].mxu0 %v5591_v63  ;;  %v5692_v63 = vld [vmem:[%s10504_s7 + $0x238] sm:$0xff] }
 0x5c6   : > { %7288 = vmatpush3.bf16.msra.mxu0 %v7287_v4  ;;  %v5392_v37 = vpop.permute.xlu1 %5391  ;;  %v5465_v33 = vpop.permute.xlu0 %5464  ;;  %v5596_v11 = vld [vmem:[#allocation4 + $0x78] sm:$0xff]  ;;  %v5589_v4 = vld [vmem:[#allocation4 + $0x40] sm:$0xff] }
 0x5c7   : > { %5410 = vst.msk [vmem:[#allocation4 + $0xc8] sm:$0xff] %vm1213_vm9, %v5392_v37  ;;  %5563 = vst.msk [vmem:[#allocation4 + $0x90] sm:$0xff] %vm1213_vm9, %v5392_v37  ;;  %v5597_v29 = vld [vmem:[#allocation4 + $0x80] sm:$0xff]  ;;  %7290 = vmatprep.subr.bf16.mxu0 %v7289_v40  ;;  %v7317_v40 = vpack.c.bf16 %v5690_v9, %v5689_v56 }
 0x5c8   : > { %5483 = vst.msk [vmem:[#allocation4 + $0xd0] sm:$0xff] %vm1213_vm9, %v5465_v33  ;;  %5803 = vmatprep.mubr.f32.mxu0 %v5597_v29 }
 0x5c9   : > { %5804 = vmatmul.mubr.f32.gmra.mrb[108].mxu0 %v5596_v11 }
 0x5ca   : > { %7292 = vmatpush3.bf16.msra.mxu0 %v7291_v22  ;;  %v5394_v8 = vpop.permute.xlu1 %5393  ;;  %v5467_v23 = vpop.permute.xlu0 %5466  ;;  %v5601_v24 = vld [vmem:[#allocation4 + $0xa0] sm:$0xff]  ;;  %v5594_v36 = vld [vmem:[#allocation4 + $0x68] sm:$0xff]  ;;  %v7321_v22 = vpack.c.bf16 %v5692_v63, %v5691_v50 }
 0x5cb   : > { %5411 = vst.msk [vmem:[#allocation4 + $0xf0] sm:$0xff] %vm1213_vm9, %v5394_v8  ;;  %5564 = vst.msk [vmem:[#allocation4 + $0xb8] sm:$0xff] %vm1213_vm9, %v5394_v8  ;;  %v5602_v28 = vld [vmem:[#allocation4 + $0xa8] sm:$0xff]  ;;  %7294 = vmatprep.subr.bf16.mxu0 %v7293_v54 }
 0x5cc   : > { %5484 = vst.msk [vmem:[#allocation4 + $0xf8] sm:$0xff] %vm1213_vm9, %v5467_v23  ;;  %5808 = vmatprep.mubr.f32.mxu0 %v5602_v28  ;;  %v5585_v28 = vld [vmem:[#allocation4 + $0x20] sm:$0xff] }
 0x5cd   : > { %5809 = vmatmul.mubr.f32.gmra.mrb[110].mxu0 %v5601_v24  ;;  %v5605_v24 = vld [vmem:[#allocation4 + $0xc0] sm:$0xff] }
 0x5ce   : > { %7296 = vmatpush3.bf16.msra.mxu0 %v7295_v26  ;;  %v5396_v21 = vpop.permute.xlu1 %5395  ;;  %v5469_v1 = vpop.permute.xlu0 %5468  ;;  %v5606_v38 = vld [vmem:[#allocation4 + $0xc8] sm:$0xff]  ;;  %v5599_v29 = vld [vmem:[#allocation4 + $0x90] sm:$0xff] }
 0x5cf   : > { %5412 = vst.msk [vmem:[#allocation4 + $0x118] sm:$0xff] %vm1213_vm9, %v5396_v21  ;;  %5565 = vst.msk [vmem:[#allocation4 + $0xe0] sm:$0xff] %vm1213_vm9, %v5396_v21  ;;  %v5607_v48 = vld [vmem:[#allocation4 + $0xd0] sm:$0xff]  ;;  %7298 = vmatprep.subr.bf16.mxu0 %v7297_v16  ;;  %v5590_v16 = vld [vmem:[#allocation4 + $0x48] sm:$0xff] }
 0x5d0   : > { %5485 = vst.msk [vmem:[#allocation4 + $0x120] sm:$0xff] %vm1213_vm9, %v5469_v1  ;;  %5813 = vmatprep.mubr.f32.mxu0 %v5607_v48  ;;  %v5620_v21 = vld [vmem:[#allocation4 + $0x138] sm:$0xff] }
 0x5d1   : > { %5814 = vmatmul.mubr.f32.gmra.mrb[112].mxu0 %v5606_v38  ;;  %v6048_v1 = vld [vmem:[%s10506_s9 + $0x8] sm:$0xff]  ;;  %v6051_v38 = vld [vmem:[%s10506_s9 + $0x20] sm:$0xff] }
 0x5d2   : > { %7300 = vmatpush3.bf16.msra.mxu0 %v7299_v58  ;;  %v5512_v5 = vpop.permute.xlu1 %5511  ;;  %v5510_v39 = vpop.permute.xlu0 %5509  ;;  %v5611_v6 = vld [vmem:[#allocation4 + $0xf0] sm:$0xff]  ;;  %v5604_v34 = vld [vmem:[#allocation4 + $0xb8] sm:$0xff]  ;;  %v7333_v43 = vpack.c.bf16 %v6052_v17, %v6051_v38 }
 0x5d3   : > { %5534 = vst.msk [vmem:[#allocation4 + $0x38] sm:$0xff] %vm1213_vm9, %v5512_v5  ;;  %v5612_v30 = vld [vmem:[#allocation4 + $0xf8] sm:$0xff]  ;;  %7302 = vmatprep.subr.bf16.mxu0 %v7301_v27  ;;  %5533 = vst.msk [vmem:[#allocation4 + $0x10] sm:$0xff] %vm1213_vm9, %v5510_v39  ;;  %v6047_v58 = vld [vmem:[%s10506_s9] sm:$0xff] }
 0x5d4   : > { %5818 = vmatprep.mubr.f32.mxu0 %v5612_v30  ;;  %v7325_v48 = vpack.c.bf16 %v6048_v1, %v6047_v58  ;;  %v6049_v27 = vld [vmem:[%s10506_s9 + $0x10] sm:$0xff] }
 0x5d5   : > { %5819 = vmatmul.mubr.f32.gmra.mrb[114].mxu0 %v5611_v6  ;;  %v7329_v45 = vpack.c.bf16 %v6050_v42, %v6049_v27  ;;  %v6053_v5 = vld [vmem:[%s10506_s9 + $0x30] sm:$0xff] }
 0x5d6   : > { %7304 = vmatpush3.bf16.msra.mxu0 %v7303_v35  ;;  %v5516_v13 = vpop.permute.xlu1 %5515  ;;  %v5514_v3 = vpop.permute.xlu0 %5513  ;;  %v5616_v47 = vld [vmem:[#allocation4 + $0x118] sm:$0xff]  ;;  %v5609_v11 = vld [vmem:[#allocation4 + $0xe0] sm:$0xff]  ;;  %v6054_v35 = vld [vmem:[%s10506_s9 + $0x38] sm:$0xff] }
 0x5d7   : > { %5536 = vst.msk [vmem:[#allocation4 + $0x88] sm:$0xff] %vm1213_vm9, %v5516_v13  ;;  %v5617_v2 = vld [vmem:[#allocation4 + $0x120] sm:$0xff]  ;;  %7306 = vmatprep.subr.bf16.mxu0 %v7305_v31  ;;  %5535 = vst.msk [vmem:[#allocation4 + $0x60] sm:$0xff] %vm1213_vm9, %v5514_v3  ;;  %v7337_v39 = vpack.c.bf16 %v6054_v35, %v6053_v5 }
 0x5d8   : > { %5823 = vmatprep.mubr.f32.mxu0 %v5617_v2 }
 0x5d9   : > { %5824 = vmatmul.mubr.f32.gmra.mrb[116].mxu0 %v5616_v47 }
 0x5da   : > { %7308 = vmatpush3.bf16.msra.mxu0 %v7307_v20  ;;  %v5520_v57 = vpop.permute.xlu1 %5519  ;;  %5893 = vmatprep.mubr.f32.mxu0 %v5584_v18  ;;  %v5518_v7 = vpop.permute.xlu0 %5517  ;;  %v5583_v51 = vld [vmem:[#allocation4 + $0x10] sm:$0xff]  ;;  %v5588_v62 = vld [vmem:[#allocation4 + $0x38] sm:$0xff] }
 0x5db   : > { %5538 = vst.msk [vmem:[#allocation4 + $0xd8] sm:$0xff] %vm1213_vm9, %v5520_v57  ;;  %7310 = vmatprep.subr.bf16.mxu0 %v7309_v46  ;;  %5537 = vst.msk [vmem:[#allocation4 + $0xb0] sm:$0xff] %vm1213_vm9, %v5518_v7 }
 0x5dd   : > { %5894 = vmatmul.mubr.f32.vlgmr.msra.gmra.mrb[118].mxu0 %v5583_v51 }
 0x5de   : > { %7312 = vmatpush3.bf16.msra.mxu0 %v7309_v46  ;;  %v5522_v55 = vpop.permute.xlu1 %5521  ;;  %5898 = vmatprep.mubr.f32.mxu0 %v5589_v4  ;;  %v5555_v19 = vpop.permute.xlu0 %5554  ;;  %v5593_v33 = vld [vmem:[#allocation4 + $0x60] sm:$0xff]  ;;  %v5598_v54 = vld [vmem:[#allocation4 + $0x88] sm:$0xff] }
 0x5df   : > { %5539 = vst.msk [vmem:[#allocation4 + $0x100] sm:$0xff] %vm1213_vm9, %v5522_v55  ;;  %7314 = vmatprep.subr.bf16.mxu0 %v7313_v10  ;;  %5566 = vst.msk [vmem:[#allocation4 + $0x108] sm:$0xff] %vm1213_vm9, %v5555_v19  ;;  %v6469_v19 = vld [vmem:[%s10505_s8] ss:$0 sm:$0xff] }
 0x5e1   : > { %5899 = vmatmul.mubr.f32.gmra.mrb[120].mxu0 %v5588_v62 }
 0x5e2   : > { %v5524_v15 = vpop.permute.xlu1 %5523  ;;  %5903 = vmatprep.mubr.f32.mxu0 %v5594_v36  ;;  %7316 = vmatpush3.bf16.msra.mxu0 %v7313_v10  ;;  %v5557_v37 = vpop.permute.xlu0 %5556  ;;  %v5603_v61 = vld [vmem:[#allocation4 + $0xb0] sm:$0xff]  ;;  %v5608_v53 = vld [vmem:[#allocation4 + $0xd8] sm:$0xff] }
 0x5e3   : > { %5540 = vst.msk [vmem:[#allocation4 + $0x128] sm:$0xff] %vm1213_vm9, %v5524_v15  ;;  %7318 = vmatprep.subr.bf16.mxu0 %v7317_v40  ;;  %5567 = vst.msk [vmem:[#allocation4 + $0x130] sm:$0xff] %vm1213_vm9, %v5557_v37 }
 0x5e5   : > { %5904 = vmatmul.mubr.f32.gmra.mrb[122].mxu0 %v5593_v33 }
 0x5e6   : > { %5908 = vmatprep.mubr.f32.mxu0 %v5599_v29  ;;  %7320 = vmatpush3.bf16.msra.mxu0 %v7317_v40  ;;  %v5614_v49 = vld [vmem:[#allocation4 + $0x108] sm:$0xff]  ;;  %v5613_v26 = vld [vmem:[#allocation4 + $0x100] sm:$0xff] }
 0x5e7   : > { %7322 = vmatprep.subr.bf16.mxu0 %v7321_v22 }
 0x5e9   : > { %5909 = vmatmul.mubr.f32.gmra.mrb[124].mxu0 %v5598_v54 }
 0x5ea   : > { %5913 = vmatprep.mubr.f32.mxu0 %v5604_v34  ;;  %7324 = vmatpush3.bf16.msra.mxu0 %v7321_v22  ;;  %v5619_v8 = vld [vmem:[#allocation4 + $0x130] sm:$0xff]  ;;  %v5618_v23 = vld [vmem:[#allocation4 + $0x128] sm:$0xff] }
 0x5eb   : > { %7326 = vmatprep.subr.bf16.mxu0 %v7325_v48 }
 0x5ed   : > { %5914 = vmatmul.mubr.f32.gmra.mrb[126].mxu0 %v5603_v61 }
 0x5ee   : > { %5918 = vmatprep.mubr.f32.mxu0 %v5609_v11 }
 0x5f1   : > { %5919 = vmatmul.mubr.f32.gmra.mrb[128].mxu0 %v5608_v53 }
 0x5f2   : > { %5923 = vmatprep.mubr.f32.mxu0 %v5614_v49 }
 0x5f5   : > { %5924 = vmatmul.mubr.f32.gmra.mrb[130].mxu0 %v5613_v26 }
 0x5f6   : > { %5928 = vmatprep.mubr.f32.mxu0 %v5619_v8 }
 0x5f9   : > { %5929 = vmatmul.mubr.f32.gmra.mrb[132].mxu0 %v5618_v23 }
 0x5fa   : > { %7003 = vmatprep.mubr.msk.f32.mxu0 %vm869_vm6, %v5585_v28 }
 0x5fd   : > { %7004 = vmatmul.mubr.msk.f32.vlgmr.msra.gmra.mrb[134].mxu0 %vm869_vm6, %v5590_v16 }
 0x5fe   : > { %7006 = vmatprep.mubr.msk.f32.mxu0 %vm869_vm6, %v5595_v59  ;;  %7328 = vmatpush3.bf16.msra.mxu0 %v7325_v48 }
 0x5ff   : > { %7330 = vmatprep.subr.bf16.mxu0 %v7329_v45 }
 0x601   : > { %7007 = vmatmul.mubr.msk.f32.gmra.mrb[136].mxu0 %vm869_vm6, %v5600_v25 }
 0x602   : > { %7009 = vmatprep.mubr.msk.f32.mxu0 %vm869_vm6, %v5605_v24  ;;  %7332 = vmatpush3.bf16.msra.mxu0 %v7329_v45 }
 0x603   : > { %7334 = vmatprep.subr.bf16.mxu0 %v7333_v43 }
 0x605   : > { %7010 = vmatmul.mubr.msk.f32.gmra.mrb[138].mxu0 %vm869_vm6, %v5610_v44 }
 0x606   : > { %7012 = vmatprep.mubr.msk.f32.mxu0 %vm869_vm6, %v5615_v12  ;;  %7336 = vmatpush3.bf16.msra.mxu0 %v7333_v43 }
 0x607   : > { %7338 = vmatprep.subr.bf16.mxu0 %v7337_v39 }
 0x609   : > { %7013 = vmatmul.mubr.msk.f32.gmra.mrb[140].mxu0 %vm869_vm6, %v5620_v21 }
 0x60a   : > { %7340 = vmatpush3.bf16.msra.mxu0 %v7337_v39 }
 0x68f   : > { %v6727_v30 = vpop.f32.mrb[102].mxu0 }
 0x690   : > { %v6728_v31 = vpop.f32.mrb[103].mxu0 }
 0x691   : > { %v6729_v41 = vadd.f32 %v6728_v31, %v6727_v30 }
 0x693   : > { %v6730_v0 = vpop.f32.mrb[104].mxu0  ;;  %v5791_v50 = vadd.f32 %v6729_v41, %v6469_v19 }
 0x694   : > { %v6731_v6 = vpop.f32.mrb[105].mxu0 }
 0x695   : > { %v6732_v52 = vadd.f32 %v6731_v6, %v6730_v0 }
 0x697   : > { %v5796_v22 = vadd.f32 %v6732_v52, %v6469_v19 }
 0x698   : > { %v6733_v32 = vpop.f32.mrb[106].mxu0 }
 0x699   : > { %v6734_v13 = vpop.f32.mrb[107].mxu0 }
 0x69a   : > { %v6735_v20 = vadd.f32 %v6734_v13, %v6733_v32 }
 0x69c   : > { %v6736_v3 = vpop.f32.mrb[108].mxu0  ;;  %v5801_v61 = vadd.f32 %v6735_v20, %v6469_v19 }
 0x69d   : > { %v6737_v2 = vpop.f32.mrb[109].mxu0 }
 0x69e   : > { %v6738_v46 = vadd.f32 %v6737_v2, %v6736_v3 }
 0x6a0   : > { %v6739_v47 = vpop.f32.mrb[110].mxu0  ;;  %v5806_v26 = vadd.f32 %v6738_v46, %v6469_v19 }
 0x6a1   : > { %v6740_v14 = vpop.f32.mrb[111].mxu0 }
 0x6a2   : > { %v6741_v60 = vadd.f32 %v6740_v14, %v6739_v47 }
 0x6a4   : > { %v6742_v18 = vpop.f32.mrb[112].mxu0  ;;  %v5811_v25 = vadd.f32 %v6741_v60, %v6469_v19 }
 0x6a5   : > { %v6743_v57 = vpop.f32.mrb[113].mxu0 }
 0x6a6   : > { %v6744_v7 = vadd.f32 %v6743_v57, %v6742_v18 }
 0x6a8   : > { %v6745_v51 = vpop.f32.mrb[114].mxu0  ;;  %v5816_v58 = vadd.f32 %v6744_v7, %v6469_v19 }
 0x6a9   : > { %v6746_v10 = vpop.f32.mrb[115].mxu0 }
 0x6aa   : > { %v6747_v56 = vadd.f32 %v6746_v10, %v6745_v51 }
 0x6ac   : > { %v6748_v9 = vpop.f32.mrb[116].mxu0  ;;  %v5821_v45 = vadd.f32 %v6747_v56, %v6469_v19 }
 0x6ad   : > { %v6749_v4 = vpop.f32.mrb[117].mxu0 }
 0x6ae   : > { %v6750_v55 = vadd.f32 %v6749_v4, %v6748_v9 }
 0x6b0   : > { %v6783_v40 = vpop.f32.mrb[118].mxu0  ;;  %v5826_v35 = vadd.f32 %v6750_v55, %v6469_v19 }
 0x6b1   : > { %v6784_v62 = vpop.f32.mrb[119].mxu0 }
 0x6b2   : > { %v6785_v63 = vadd.f32 %v6784_v62, %v6783_v40  ;;  %v6478_v40 = vld [vmem:[%s10507_s10] ss:$0 sm:$0xff] }
 0x6b4   : > { %v6786_v36 = vpop.f32.mrb[120].mxu0  ;;  %v5896_v15 = vadd.f32 %v6785_v63, %v5791_v50 }
 0x6b5   : > { %v6787_v37 = vpop.f32.mrb[121].mxu0 }
 0x6b6   : > { %v6788_v33 = vadd.f32 %v6787_v37, %v6786_v36 }
 0x6b8   : > { %v6789_v29 = vpop.f32.mrb[122].mxu0  ;;  %v5901_v54 = vadd.f32 %v6788_v33, %v5796_v22 }
 0x6b9   : > { %v6790_v34 = vpop.f32.mrb[123].mxu0 }
 0x6ba   : > { %v6791_v11 = vadd.f32 %v6790_v34, %v6789_v29 }
 0x6bc   : > { %v6792_v53 = vpop.f32.mrb[124].mxu0  ;;  %v5906_v49 = vadd.f32 %v6791_v11, %v5801_v61 }
 0x6bd   : > { %v6793_v8 = vpop.f32.mrb[125].mxu0 }
 0x6be   : > { %v6794_v23 = vadd.f32 %v6793_v8, %v6792_v53 }
 0x6c0   : > { %v6795_v28 = vpop.f32.mrb[126].mxu0  ;;  %v5911_v16 = vadd.f32 %v6794_v23, %v5806_v26 }
 0x6c1   : > { %v6796_v59 = vpop.f32.mrb[127].mxu0 }
 0x6c2   : > { %v6797_v24 = vadd.f32 %v6796_v59, %v6795_v28 }
 0x6c4   : > { %v6798_v44 = vpop.f32.mrb[128].mxu0  ;;  %v5916_v12 = vadd.f32 %v6797_v24, %v5811_v25 }
 0x6c5   : > { %v6799_v21 = vpop.f32.mrb[129].mxu0 }
 0x6c6   : > { %v6800_v1 = vadd.f32 %v6799_v21, %v6798_v44 }
 0x6c8   : > { %v6801_v48 = vpop.f32.mrb[130].mxu0  ;;  %v5921_v27 = vadd.f32 %v6800_v1, %v5816_v58 }
 0x6c9   : > { %v6802_v42 = vpop.f32.mrb[131].mxu0 }
 0x6ca   : > { %v6803_v38 = vadd.f32 %v6802_v42, %v6801_v48 }
 0x6cc   : > { %v6804_v17 = vpop.f32.mrb[132].mxu0  ;;  %v5926_v43 = vadd.f32 %v6803_v38, %v5821_v45 }
 0x6cd   : > { %v6805_v5 = vpop.f32.mrb[133].mxu0 }
 0x6ce   : > { %v6806_v39 = vadd.f32 %v6805_v5, %v6804_v17 }
 0x6d0   : > { %v7005_v30 = vpop.f32.mrb[134].mxu0  ;;  %v5931_v31 = vadd.f32 %v6806_v39, %v5826_v35 }
 0x6d1   : > { %v6006_v41 = vadd.f32 %v7005_v30, %v5901_v54  ;;  %v6000_v0 = vpop.f32.mrb[135].mxu0 }
 0x6d2   : > { %v6001_v6 = vadd.f32 %v6000_v0, %v5896_v15 }
 0x6d3   : > { %v6040_v13 = vmax.f32 %v6006_v41, 0.0 }
 0x6d4   : > { %v6039_v52 = vmax.f32 %v6001_v6, 0.0  ;;  %v7008_v32 = vpop.f32.mrb[136].mxu0 }
 0x6d5   : > { %v6016_v20 = vadd.f32 %v7008_v32, %v5911_v16  ;;  %v6010_v3 = vpop.f32.mrb[137].mxu0 }
 0x6d6   : > { %v6011_v2 = vadd.f32 %v6010_v3, %v5906_v49  ;;  %7031 = vmatprep.mubr.msk.f32.mxu0 %vm869_vm6, %v6039_v52 }
 0x6d7   : > { %7032 = vmatmul.mubr.msk.f32.vlgmr.msra.gmra.mrb[142].mxu0 %vm869_vm6, %v6040_v13  ;;  %v6042_v14 = vmax.f32 %v6016_v20, 0.0 }
 0x6d8   : > { %v6041_v46 = vmax.f32 %v6011_v2, 0.0  ;;  %v7011_v47 = vpop.f32.mrb[138].mxu0 }
 0x6d9   : > { %v6026_v60 = vadd.f32 %v7011_v47, %v5921_v27  ;;  %v6020_v18 = vpop.f32.mrb[139].mxu0 }
 0x6da   : > { %v6021_v57 = vadd.f32 %v6020_v18, %v5916_v12  ;;  %7034 = vmatprep.mubr.msk.f32.mxu0 %vm869_vm6, %v6041_v46 }
 0x6db   : > { %7035 = vmatmul.mubr.msk.f32.gmra.mrb[144].mxu0 %vm869_vm6, %v6042_v14  ;;  %v6044_v10 = vmax.f32 %v6026_v60, 0.0 }
 0x6dc   : > { %v6043_v7 = vmax.f32 %v6021_v57, 0.0  ;;  %v7014_v51 = vpop.f32.mrb[140].mxu0 }
 0x6dd   : > { %v6036_v56 = vadd.f32 %v7014_v51, %v5931_v31  ;;  %v6030_v9 = vpop.f32.mrb[141].mxu0 }
 0x6de   : > { %v6031_v4 = vadd.f32 %v6030_v9, %v5926_v43  ;;  %7037 = vmatprep.mubr.msk.f32.mxu0 %vm869_vm6, %v6043_v7 }
 0x6df   : > { %7038 = vmatmul.mubr.msk.f32.gmra.mrb[146].mxu0 %vm869_vm6, %v6044_v10  ;;  %v6046_v19 = vmax.f32 %v6036_v56, 0.0 }
 0x6e0   : > { %v6045_v55 = vmax.f32 %v6031_v4, 0.0 }
 0x6e2   : > { %7040 = vmatprep.mubr.msk.f32.mxu0 %vm869_vm6, %v6045_v55 }
 0x6e3   : > { %7041 = vmatmul.mubr.msk.f32.gmra.mrb[148].mxu0 %vm869_vm6, %v6046_v19 }
 0x7aa   : > { %v7033_v62 = vpop.f32.mrb[142].mxu0 }
 0x7ab   : > { %v6158_v50 = vadd.f32 %v7033_v62, %v6478_v40  ;;  %v6152_v63 = vpop.f32.mrb[143].mxu0 }
 0x7ac   : > { %v6153_v36 = vadd.f32 %v6478_v40, %v6152_v63 }
 0x7ad   : > { %6193 = vst.msk [vmem:[%s7551_s27 + $0x8] sm:$0xff] %vm6191_vm1, %v6158_v50 }
 0x7ae   : > { %6192 = vst.msk [vmem:[%s7551_s27] sm:$0xff] %vm6191_vm1, %v6153_v36  ;;  %v7036_v15 = vpop.f32.mrb[144].mxu0 }
 0x7af   : > { %v6168_v37 = vadd.f32 %v7036_v15, %v6478_v40  ;;  %v6162_v22 = vpop.f32.mrb[145].mxu0 }
 0x7b0   : > { %v6163_v33 = vadd.f32 %v6478_v40, %v6162_v22 }
 0x7b1   : > { %6195 = vst.msk [vmem:[%s7551_s27 + $0x18] sm:$0xff] %vm6191_vm1, %v6168_v37 }
 0x7b2   : > { %6194 = vst.msk [vmem:[%s7551_s27 + $0x10] sm:$0xff] %vm6191_vm1, %v6163_v33  ;;  %v7039_v29 = vpop.f32.mrb[146].mxu0 }
 0x7b3   : > { %v6178_v54 = vadd.f32 %v7039_v29, %v6478_v40  ;;  %v6172_v34 = vpop.f32.mrb[147].mxu0 }
 0x7b4   : > { %v6173_v61 = vadd.f32 %v6478_v40, %v6172_v34 }
 0x7b5   : > { %6197 = vst.msk [vmem:[%s7551_s27 + $0x28] sm:$0xff] %vm6191_vm1, %v6178_v54 }
 0x7b6   : > { %6196 = vst.msk [vmem:[%s7551_s27 + $0x20] sm:$0xff] %vm6191_vm1, %v6173_v61  ;;  %v7042_v11 = vpop.f32.mrb[148].mxu0 }
 0x7b7   : > { %v6188_v53 = vadd.f32 %v7042_v11, %v6478_v40  ;;  %v6182_v49 = vpop.f32.mrb[149].mxu0 }
 0x7b8   : > { %v6183_v8 = vadd.f32 %v6478_v40, %v6182_v49 }
 0x7b9   : > { %6199 = vst.msk [vmem:[%s7551_s27 + $0x38] sm:$0xff] %vm6191_vm1, %v6188_v53 }
 0x7ba   : > { %6198 = vst.msk [vmem:[%s7551_s27 + $0x30] sm:$0xff] %vm6191_vm1, %v6183_v8 }
 0x7bb PF: > { %s21_s17 = sadd.s32 1, %s7468_s17  }
 0x7bc   : > { %p18_p5 = scmp.ge.s32.totalorder %s21_s17, 4  }
 0x7be   :  { %20 = sbr.rel (!%p18_p5) target bundleno = 1 (0x1), region = 100 }

</bundles_post_ra>
